<compile_context>
chip_gen: v7x
topology: tpu7x:2x2x1
jax: 0.10.0
libtpu: 0.0.40
codegen_flags: <defaults>
</compile_context>

<pallas_src>
import functools
import math

import jax
import jax.numpy as jnp
from jax.experimental import pallas as pl
from jax.experimental.pallas import tpu as pltpu

BN_EPS = 1e-5
_VMEM = pl.BlockSpec(memory_space=pltpu.MemorySpace.VMEM)


# ---------------------------------------------------------------------------
# Fused basic-block kernel
# ---------------------------------------------------------------------------
def _basicblock_kernel(*refs, n, h, w, cin, planes, stride, downsample, last):
    """Fused ResNetBasicblock forward.

    refs layout:
      stride == 1 : (x,                      wa, wb, ga, ba, gb, bb, o, xpad, ypad, slab)
      stride == 2 : (x_ee, x_eo, x_oe, x_oo, wa, wb, ga, ba, gb, bb, o,       ypad, slab)
    """
    n_x = 1 if stride == 1 else 4
    x_refs = refs[:n_x]
    wa_ref, wb_ref, ga_ref, ba_ref, gb_ref, bb_ref, o_ref = refs[n_x:n_x + 7]
    if stride == 1:
        xpad_ref, ypad_ref, slab_ref = refs[n_x + 7:]
    else:
        ypad_ref, slab_ref = refs[n_x + 7:]

    ho, wo = h // stride, w // stride
    m = n * ho * wo
    ka = 9 * cin                       # contraction depth of conv_a

    def fill_pad(pad_ref, interior, hh, ww, c):
        # Halo-only zeroing: four thin strips instead of zero-filling the whole
        # buffer and overwriting the interior (cuts ~80% of the zero-store traffic).
        zrow = jnp.zeros((n, 1, ww + 2, c), pad_ref.dtype)
        zcol = jnp.zeros((n, hh + 2, 1, c), pad_ref.dtype)
        pad_ref[:, 0:1, :, :] = zrow
        pad_ref[:, hh + 1:hh + 2, :, :] = zrow
        pad_ref[:, :, 0:1, :] = zcol
        pad_ref[:, :, ww + 1:ww + 2, :] = zcol
        pad_ref[:, 1:hh + 1, 1:ww + 1, :] = interior

    def fill_slab(tap, c):
        # im2col: 9 shifted windows written as lane-column blocks of the bf16 slab.
        # The f32->bf16 cast happens exactly once per slab element, fused into the
        # copy we need anyway; the conv then becomes a single MXU matmul.
        for dh in range(3):
            for dw in range(3):
                t = dh * 3 + dw
                win = tap(dh, dw).reshape(m, c)
                slab_ref[:, t * c:(t + 1) * c] = win.astype(slab_ref.dtype)

    def batchnorm(y, g_ref, b_ref):
        # Training-mode batch statistics over the N*Ho*Wo rows, two-pass (centered
        # variance) in f32, biased variance, eps = 1e-5.
        mean = jnp.sum(y, axis=0, keepdims=True) * (1.0 / m)
        yc = y - mean
        var = jnp.sum(yc * yc, axis=0, keepdims=True) * (1.0 / m)
        return yc * (jax.lax.rsqrt(var + BN_EPS) * g_ref[...]) + b_ref[...]

    # ---- conv_a (3x3, stride=s, pad=1) + bn_a + ReLU -------------------------
    if stride == 1:
        # Zero-pad the activation once into VMEM; x is read from HBM exactly once.
        fill_pad(xpad_ref, x_refs[0][...], h, w, cin)

        def tap_a(dh, dw):
            return xpad_ref[:, dh:dh + ho, dw:dw + wo, :]
    else:
        # Parity-split padded input (built in the wrapper): every tap is a
        # unit-stride window of one of the 4 even/odd views.
        def tap_a(dh, dw):
            r = x_refs[(dh % 2) * 2 + (dw % 2)]
            return r[:, dh // 2:dh // 2 + ho, dw // 2:dw // 2 + wo, :]

    fill_slab(tap_a, cin)
    ya = jnp.dot(slab_ref[:, :ka], wa_ref[...], preferred_element_type=jnp.float32)
    ya = jnp.maximum(batchnorm(ya, ga_ref, ba_ref), 0.0)

    # ---- conv_b (3x3, stride=1, pad=1) + bn_b --------------------------------
    # Stage the zero-padded intermediate activation in VMEM (never hits HBM).
    fill_pad(ypad_ref, ya.reshape(n, ho, wo, planes), ho, wo, planes)

    def tap_b(dh, dw):
        return ypad_ref[:, dh:dh + ho, dw:dw + wo, :]

    fill_slab(tap_b, planes)
    yb = jnp.dot(slab_ref[...], wb_ref[...], preferred_element_type=jnp.float32)
    yb = batchnorm(yb, gb_ref, bb_ref)

    # ---- residual + optional trailing ReLU -----------------------------------
    if downsample:
        # DownsampleA: x[:, ::2, ::2, :] is exactly the odd/odd parity view (f32).
        # Slice-add to the first Cin output channels; no zero-concat temporary.
        res = x_refs[3][:, 0:ho, 0:wo, :].reshape(m, cin)
        y_lo = yb[:, :cin] + res
        y_hi = yb[:, cin:]
        if not last:
            y_lo = jnp.maximum(y_lo, 0.0)
            y_hi = jnp.maximum(y_hi, 0.0)
        o_ref[:, :, :, 0:cin] = y_lo.reshape(n, ho, wo, cin)
        o_ref[:, :, :, cin:planes] = y_hi.reshape(n, ho, wo, planes - cin)
    else:
        yb = yb + x_refs[0][...].reshape(m, cin)     # identity residual, f32
        if not last:
            yb = jnp.maximum(yb, 0.0)
        o_ref[...] = yb.reshape(n, ho, wo, planes)


# ---------------------------------------------------------------------------
# pallas_call wrapper
# ---------------------------------------------------------------------------
def _vmem_limit_bytes():
    """Generation-aware VMEM request: ~75% of per-core capacity (headroom for
    compiler temporaries), floor 32 MiB, never the full 64 MiB of a v7x core."""
    cap = 64 * 1024 * 1024            # conservative default (v7x physical per-TC)
    try:
        info = pltpu.get_tpu_info()
        cap = int(getattr(info, "vmem_capacity_bytes", cap))
    except Exception:
        pass
    return max(32 * 1024 * 1024, (cap * 3) // 4)


def _block_pallas_call(inputs, *, n, h, w, cin, planes, stride, downsample, last):
    ho, wo = h // stride, w // stride
    kernel = functools.partial(
        _basicblock_kernel, n=n, h=h, w=w, cin=cin, planes=planes,
        stride=stride, downsample=downsample, last=last)
    scratch_shapes = []
    if stride == 1:
        scratch_shapes.append(pltpu.VMEM((n, h + 2, w + 2, cin), jnp.float32))
    scratch_shapes.append(pltpu.VMEM((n, ho + 2, wo + 2, planes), jnp.float32))
    # One bf16 im2col slab reused by both convs (conv_a uses the first 9*cin lanes).
    scratch_shapes.append(pltpu.VMEM((n * ho * wo, 9 * planes), jnp.bfloat16))
    return pl.pallas_call(
        kernel,
        out_shape=jax.ShapeDtypeStruct((n, ho, wo, planes), jnp.float32),
        in_specs=[_VMEM] * len(inputs),
        out_specs=_VMEM,
        scratch_shapes=scratch_shapes,
        compiler_params=pltpu.CompilerParams(vmem_limit_bytes=_vmem_limit_bytes()),
    )(*inputs)


@functools.partial(jax.jit, static_argnames=("stride", "downsample", "last"))
def resnet_basicblock_forward(x_nchw, params, *, stride=1, downsample=False, last=False):
    """ResNetBasicblock.forward (gamma_beta=None path). x: [N, Cin, H, W] (torch NCHW)."""
    # TODO(synk): conv2d_fw.Conv2d_fw / FeatureWiseTransformation2d_fw (mtl/ft branch)
    # and the per-sample gamma_beta FiLM path are not provided in the reference; bn_b
    # uses standard BatchNorm2d training-mode batch statistics here (no eval mode).
    x = jnp.transpose(x_nchw, (0, 2, 3, 1)).astype(jnp.float32)  # NCHW -> NHWC
    n, h, w, cin = x.shape
    planes = params["wa"].shape[0]
    assert stride in (1, 2)
    assert h % stride == 0 and w % stride == 0
    assert (w // stride) % 8 == 0, "W/stride must be a multiple of 8 (sublane tiling)"
    if downsample:
        assert stride == 2 and planes == 2 * cin, "DownsampleA: planes == 2*inplanes"
    else:
        assert stride == 1 and planes == cin, "identity residual needs matching shapes"

    # torch OIHW conv weights -> lane-dense (9*K, Cout) im2col matrices, bf16 for MXU.
    wa = jnp.transpose(params["wa"], (2, 3, 1, 0)).reshape(9 * cin, planes)
    wb = jnp.transpose(params["wb"], (2, 3, 1, 0)).reshape(9 * planes, planes)
    wa = wa.astype(jnp.bfloat16)
    wb = wb.astype(jnp.bfloat16)
    ga = params["ga"].reshape(1, planes).astype(jnp.float32)
    ba = params["ba"].reshape(1, planes).astype(jnp.float32)
    gb = params["gb"].reshape(1, planes).astype(jnp.float32)
    bb = params["bb"].reshape(1, planes).astype(jnp.float32)

    if stride == 1:
        xin = (x,)
    else:
        # Even/odd parity split of the zero-padded input: every 3x3 tap becomes a
        # unit-stride window inside the kernel; views stay f32 so the DownsampleA
        # residual add is full precision.
        xp = jnp.pad(x, ((0, 0), (1, 1), (1, 1), (0, 0)))
        xin = (xp[:, 0::2, 0::2, :], xp[:, 0::2, 1::2, :],
               xp[:, 1::2, 0::2, :], xp[:, 1::2, 1::2, :])

    y = _block_pallas_call(
        xin + (wa, wb, ga, ba, gb, bb),
        n=n, h=h, w=w, cin=cin, planes=planes,
        stride=stride, downsample=downsample, last=last)
    return jnp.transpose(y, (0, 3, 1, 2))  # NHWC -> NCHW


# ---------------------------------------------------------------------------
# Pure-JAX f32 reference (same training-mode BN semantics) for a numerical check
# ---------------------------------------------------------------------------
def _reference_block(x_nchw, params, *, stride, downsample, last):
    x = jnp.transpose(x_nchw, (0, 2, 3, 1)).astype(jnp.float32)

    def conv3x3(inp, wt, s):
        return jax.lax.conv_general_dilated(
            inp, jnp.transpose(wt, (2, 3, 1, 0)), (s, s), ((1, 1), (1, 1)),
            dimension_numbers=("NHWC", "HWIO", "NHWC"))

    def bn(y, g, b):
        mean = jnp.mean(y, axis=(0, 1, 2), keepdims=True)
        var = jnp.mean((y - mean) ** 2, axis=(0, 1, 2), keepdims=True)
        return (y - mean) * jax.lax.rsqrt(var + BN_EPS) * g + b

    y = jnp.maximum(bn(conv3x3(x, params["wa"], stride), params["ga"], params["ba"]), 0.0)
    y = bn(conv3x3(y, params["wb"], 1), params["gb"], params["bb"])
    if downsample:
        r = x[:, ::2, ::2, :]
        r = jnp.concatenate([r, jnp.zeros_like(r)], axis=-1)
    else:
        r = x
    y = y + r
    if not last:
        y = jnp.maximum(y, 0.0)
    return jnp.transpose(y, (0, 3, 1, 2))


# ---------------------------------------------------------------------------
if __name__ == "__main__":
    key = jax.random.PRNGKey(0)
    kx, ka1, kb1, ka2, kb2 = jax.random.split(key, 5)

    def kaiming(k, cout, cin_):
        # kaiming_normal_(mode='fan_out', nonlinearity='relu') for a 3x3 conv.
        std = math.sqrt(2.0 / (cout * 9))
        return std * jax.random.normal(k, (cout, cin_, 3, 3), dtype=jnp.float32)

    def bn_params(p):
        return jnp.ones((p,), jnp.float32), jnp.zeros((p,), jnp.float32)

    N, H, W, inplanes = 2, 16, 16, 16
    x = jax.random.normal(kx, (N, inplanes, H, W), dtype=jnp.float32)

    # Block 1: stride=1, identity residual, trailing ReLU.
    p1 = {"wa": kaiming(ka1, inplanes, inplanes), "wb": kaiming(kb1, inplanes, inplanes)}
    p1["ga"], p1["ba"] = bn_params(inplanes)
    p1["gb"], p1["bb"] = bn_params(inplanes)
    y1 = jax.block_until_ready(
        resnet_basicblock_forward(x, p1, stride=1, downsample=False, last=False))
    assert y1.shape == (N, inplanes, H, W), y1.shape
    err1 = float(jnp.max(jnp.abs(
        y1 - _reference_block(x, p1, stride=1, downsample=False, last=False))))
    assert err1 < 0.1, err1

    # Block 2: stride=2 + DownsampleA residual, last=True (no trailing ReLU).
    planes = 2 * inplanes
    p2 = {"wa": kaiming(ka2, planes, inplanes), "wb": kaiming(kb2, planes, planes)}
    p2["ga"], p2["ba"] = bn_params(planes)
    p2["gb"], p2["bb"] = bn_params(planes)
    y2 = jax.block_until_ready(
        resnet_basicblock_forward(y1, p2, stride=2, downsample=True, last=True))
    assert y2.shape == (N, planes, H // 2, W // 2), y2.shape
    err2 = float(jnp.max(jnp.abs(
        y2 - _reference_block(y1, p2, stride=2, downsample=True, last=True))))
    assert err2 < 0.1, err2

    assert bool(jnp.all(jnp.isfinite(y1))) and bool(jnp.all(jnp.isfinite(y2)))
    print("KERNEL_OK")
</pallas_src>

<mosaic_0001>
module attributes {stable_mosaic.version = 11 : i64} {
  func.func @_basicblock_kernel(%arg0: memref<2x16x16x16xf32, #tpu.memory_space<vmem>>, %arg1: memref<144x16xbf16, #tpu.memory_space<vmem>>, %arg2: memref<144x16xbf16, #tpu.memory_space<vmem>>, %arg3: memref<1x16xf32, #tpu.memory_space<vmem>>, %arg4: memref<1x16xf32, #tpu.memory_space<vmem>>, %arg5: memref<1x16xf32, #tpu.memory_space<vmem>>, %arg6: memref<1x16xf32, #tpu.memory_space<vmem>>, %arg7: memref<2x16x16x16xf32, #tpu.memory_space<vmem>>, %arg8: memref<2x18x18x16xf32, #tpu.memory_space<vmem>>, %arg9: memref<2x18x18x16xf32, #tpu.memory_space<vmem>>, %arg10: memref<512x144xbf16, #tpu.memory_space<vmem>>) attributes {dimension_semantics = [], scalar_prefetch = 0 : i64, scratch_operands = 3 : i64, tpu.core_type = #tpu.core_type<tc>} {
    %c0 = arith.constant 0 : index
    %c0_0 = arith.constant 0 : index
    %c0_1 = arith.constant 0 : index
    %c0_2 = arith.constant 0 : index
    %0 = vector.load %arg0[%c0, %c0_0, %c0_1, %c0_2] : memref<2x16x16x16xf32, #tpu.memory_space<vmem>>, vector<2x16x16x16xf32>
    %cst = arith.constant 0.000000e+00 : f32
    %1 = vector.broadcast %cst : f32 to vector<2x1x18x16xf32>
    %cst_3 = arith.constant 0.000000e+00 : f32
    %2 = vector.broadcast %cst_3 : f32 to vector<2x18x1x16xf32>
    %c0_4 = arith.constant 0 : index
    %c0_5 = arith.constant 0 : index
    %c0_6 = arith.constant 0 : index
    %c0_7 = arith.constant 0 : index
    %3 = vector.load %arg8[%c0_4, %c0_5, %c0_6, %c0_7] : memref<2x18x18x16xf32, #tpu.memory_space<vmem>>, vector<2x1x18x16xf32>
    tpu.vector_store %arg8[%c0_4, %c0_5, %c0_6, %c0_7], %1 {strides = array<i32>} : memref<2x18x18x16xf32, #tpu.memory_space<vmem>>, vector<2x1x18x16xf32>,
    %c0_8 = arith.constant 0 : index
    %c17 = arith.constant 17 : index
    %c0_9 = arith.constant 0 : index
    %c0_10 = arith.constant 0 : index
    %4 = vector.load %arg8[%c0_8, %c17, %c0_9, %c0_10] : memref<2x18x18x16xf32, #tpu.memory_space<vmem>>, vector<2x1x18x16xf32>
    tpu.vector_store %arg8[%c0_8, %c17, %c0_9, %c0_10], %1 {strides = array<i32>} : memref<2x18x18x16xf32, #tpu.memory_space<vmem>>, vector<2x1x18x16xf32>,
    %c0_11 = arith.constant 0 : index
    %c0_12 = arith.constant 0 : index
    %c0_13 = arith.constant 0 : index
    %c0_14 = arith.constant 0 : index
    %5 = vector.load %arg8[%c0_11, %c0_12, %c0_13, %c0_14] : memref<2x18x18x16xf32, #tpu.memory_space<vmem>>, vector<2x18x1x16xf32>
    tpu.vector_store %arg8[%c0_11, %c0_12, %c0_13, %c0_14], %2 {strides = array<i32>} : memref<2x18x18x16xf32, #tpu.memory_space<vmem>>, vector<2x18x1x16xf32>,
    %c0_15 = arith.constant 0 : index
    %c0_16 = arith.constant 0 : index
    %c17_17 = arith.constant 17 : index
    %c0_18 = arith.constant 0 : index
    %6 = vector.load %arg8[%c0_15, %c0_16, %c17_17, %c0_18] : memref<2x18x18x16xf32, #tpu.memory_space<vmem>>, vector<2x18x1x16xf32>
    tpu.vector_store %arg8[%c0_15, %c0_16, %c17_17, %c0_18], %2 {strides = array<i32>} : memref<2x18x18x16xf32, #tpu.memory_space<vmem>>, vector<2x18x1x16xf32>,
    %c0_19 = arith.constant 0 : index
    %c1 = arith.constant 1 : index
    %c1_20 = arith.constant 1 : index
    %c0_21 = arith.constant 0 : index
    %7 = vector.load %arg8[%c0_19, %c1, %c1_20, %c0_21] : memref<2x18x18x16xf32, #tpu.memory_space<vmem>>, vector<2x16x16x16xf32>
    tpu.vector_store %arg8[%c0_19, %c1, %c1_20, %c0_21], %0 {strides = array<i32>} : memref<2x18x18x16xf32, #tpu.memory_space<vmem>>, vector<2x16x16x16xf32>,
    %c0_22 = arith.constant 0 : index
    %c0_23 = arith.constant 0 : index
    %c0_24 = arith.constant 0 : index
    %c0_25 = arith.constant 0 : index
    %8 = vector.load %arg8[%c0_22, %c0_23, %c0_24, %c0_25] : memref<2x18x18x16xf32, #tpu.memory_space<vmem>>, vector<2x16x16x16xf32>
    %9 = vector.shape_cast %8 : vector<2x16x16x16xf32> to vector<512x16xf32>
    %10 = arith.truncf %9 : vector<512x16xf32> to vector<512x16xbf16>
    %c0_26 = arith.constant 0 : index
    %c0_27 = arith.constant 0 : index
    %11 = vector.load %arg10[%c0_26, %c0_27] : memref<512x144xbf16, #tpu.memory_space<vmem>>, vector<512x16xbf16>
    tpu.vector_store %arg10[%c0_26, %c0_27], %10 {strides = array<i32>} : memref<512x144xbf16, #tpu.memory_space<vmem>>, vector<512x16xbf16>,
    %c0_28 = arith.constant 0 : index
    %c0_29 = arith.constant 0 : index
    %c1_30 = arith.constant 1 : index
    %c0_31 = arith.constant 0 : index
    %12 = vector.load %arg8[%c0_28, %c0_29, %c1_30, %c0_31] : memref<2x18x18x16xf32, #tpu.memory_space<vmem>>, vector<2x16x16x16xf32>
    %13 = vector.shape_cast %12 : vector<2x16x16x16xf32> to vector<512x16xf32>
    %14 = arith.truncf %13 : vector<512x16xf32> to vector<512x16xbf16>
    %c0_32 = arith.constant 0 : index
    %c16 = arith.constant 16 : index
    %15 = vector.load %arg10[%c0_32, %c16] : memref<512x144xbf16, #tpu.memory_space<vmem>>, vector<512x16xbf16>
    tpu.vector_store %arg10[%c0_32, %c16], %14 {strides = array<i32>} : memref<512x144xbf16, #tpu.memory_space<vmem>>, vector<512x16xbf16>,
    %c0_33 = arith.constant 0 : index
    %c0_34 = arith.constant 0 : index
    %c2 = arith.constant 2 : index
    %c0_35 = arith.constant 0 : index
    %16 = vector.load %arg8[%c0_33, %c0_34, %c2, %c0_35] : memref<2x18x18x16xf32, #tpu.memory_space<vmem>>, vector<2x16x16x16xf32>
    %17 = vector.shape_cast %16 : vector<2x16x16x16xf32> to vector<512x16xf32>
    %18 = arith.truncf %17 : vector<512x16xf32> to vector<512x16xbf16>
    %c0_36 = arith.constant 0 : index
    %c32 = arith.constant 32 : index
    %19 = vector.load %arg10[%c0_36, %c32] : memref<512x144xbf16, #tpu.memory_space<vmem>>, vector<512x16xbf16>
    tpu.vector_store %arg10[%c0_36, %c32], %18 {strides = array<i32>} : memref<512x144xbf16, #tpu.memory_space<vmem>>, vector<512x16xbf16>,
    %c0_37 = arith.constant 0 : index
    %c1_38 = arith.constant 1 : index
    %c0_39 = arith.constant 0 : index
    %c0_40 = arith.constant 0 : index
    %20 = vector.load %arg8[%c0_37, %c1_38, %c0_39, %c0_40] : memref<2x18x18x16xf32, #tpu.memory_space<vmem>>, vector<2x16x16x16xf32>
    %21 = vector.shape_cast %20 : vector<2x16x16x16xf32> to vector<512x16xf32>
    %22 = arith.truncf %21 : vector<512x16xf32> to vector<512x16xbf16>
    %c0_41 = arith.constant 0 : index
    %c48 = arith.constant 48 : index
    %23 = vector.load %arg10[%c0_41, %c48] : memref<512x144xbf16, #tpu.memory_space<vmem>>, vector<512x16xbf16>
    tpu.vector_store %arg10[%c0_41, %c48], %22 {strides = array<i32>} : memref<512x144xbf16, #tpu.memory_space<vmem>>, vector<512x16xbf16>,
    %c0_42 = arith.constant 0 : index
    %c1_43 = arith.constant 1 : index
    %c1_44 = arith.constant 1 : index
    %c0_45 = arith.constant 0 : index
    %24 = vector.load %arg8[%c0_42, %c1_43, %c1_44, %c0_45] : memref<2x18x18x16xf32, #tpu.memory_space<vmem>>, vector<2x16x16x16xf32>
    %25 = vector.shape_cast %24 : vector<2x16x16x16xf32> to vector<512x16xf32>
    %26 = arith.truncf %25 : vector<512x16xf32> to vector<512x16xbf16>
    %c0_46 = arith.constant 0 : index
    %c64 = arith.constant 64 : index
    %27 = vector.load %arg10[%c0_46, %c64] : memref<512x144xbf16, #tpu.memory_space<vmem>>, vector<512x16xbf16>
    tpu.vector_store %arg10[%c0_46, %c64], %26 {strides = array<i32>} : memref<512x144xbf16, #tpu.memory_space<vmem>>, vector<512x16xbf16>,
    %c0_47 = arith.constant 0 : index
    %c1_48 = arith.constant 1 : index
    %c2_49 = arith.constant 2 : index
    %c0_50 = arith.constant 0 : index
    %28 = vector.load %arg8[%c0_47, %c1_48, %c2_49, %c0_50] : memref<2x18x18x16xf32, #tpu.memory_space<vmem>>, vector<2x16x16x16xf32>
    %29 = vector.shape_cast %28 : vector<2x16x16x16xf32> to vector<512x16xf32>
    %30 = arith.truncf %29 : vector<512x16xf32> to vector<512x16xbf16>
    %c0_51 = arith.constant 0 : index
    %c80 = arith.constant 80 : index
    %31 = vector.load %arg10[%c0_51, %c80] : memref<512x144xbf16, #tpu.memory_space<vmem>>, vector<512x16xbf16>
    tpu.vector_store %arg10[%c0_51, %c80], %30 {strides = array<i32>} : memref<512x144xbf16, #tpu.memory_space<vmem>>, vector<512x16xbf16>,
    %c0_52 = arith.constant 0 : index
    %c2_53 = arith.constant 2 : index
    %c0_54 = arith.constant 0 : index
    %c0_55 = arith.constant 0 : index
    %32 = vector.load %arg8[%c0_52, %c2_53, %c0_54, %c0_55] : memref<2x18x18x16xf32, #tpu.memory_space<vmem>>, vector<2x16x16x16xf32>
    %33 = vector.shape_cast %32 : vector<2x16x16x16xf32> to vector<512x16xf32>
    %34 = arith.truncf %33 : vector<512x16xf32> to vector<512x16xbf16>
    %c0_56 = arith.constant 0 : index
    %c96 = arith.constant 96 : index
    %35 = vector.load %arg10[%c0_56, %c96] : memref<512x144xbf16, #tpu.memory_space<vmem>>, vector<512x16xbf16>
    tpu.vector_store %arg10[%c0_56, %c96], %34 {strides = array<i32>} : memref<512x144xbf16, #tpu.memory_space<vmem>>, vector<512x16xbf16>,
    %c0_57 = arith.constant 0 : index
    %c2_58 = arith.constant 2 : index
    %c1_59 = arith.constant 1 : index
    %c0_60 = arith.constant 0 : index
    %36 = vector.load %arg8[%c0_57, %c2_58, %c1_59, %c0_60] : memref<2x18x18x16xf32, #tpu.memory_space<vmem>>, vector<2x16x16x16xf32>
    %37 = vector.shape_cast %36 : vector<2x16x16x16xf32> to vector<512x16xf32>
    %38 = arith.truncf %37 : vector<512x16xf32> to vector<512x16xbf16>
    %c0_61 = arith.constant 0 : index
    %c112 = arith.constant 112 : index
    %39 = vector.load %arg10[%c0_61, %c112] : memref<512x144xbf16, #tpu.memory_space<vmem>>, vector<512x16xbf16>
    tpu.vector_store %arg10[%c0_61, %c112], %38 {strides = array<i32>} : memref<512x144xbf16, #tpu.memory_space<vmem>>, vector<512x16xbf16>,
    %c0_62 = arith.constant 0 : index
    %c2_63 = arith.constant 2 : index
    %c2_64 = arith.constant 2 : index
    %c0_65 = arith.constant 0 : index
    %40 = vector.load %arg8[%c0_62, %c2_63, %c2_64, %c0_65] : memref<2x18x18x16xf32, #tpu.memory_space<vmem>>, vector<2x16x16x16xf32>
    %41 = vector.shape_cast %40 : vector<2x16x16x16xf32> to vector<512x16xf32>
    %42 = arith.truncf %41 : vector<512x16xf32> to vector<512x16xbf16>
    %c0_66 = arith.constant 0 : index
    %c128 = arith.constant 128 : index
    %43 = vector.load %arg10[%c0_66, %c128] : memref<512x144xbf16, #tpu.memory_space<vmem>>, vector<512x16xbf16>
    tpu.vector_store %arg10[%c0_66, %c128], %42 {strides = array<i32>} : memref<512x144xbf16, #tpu.memory_space<vmem>>, vector<512x16xbf16>,
    %c0_67 = arith.constant 0 : index
    %c0_68 = arith.constant 0 : index
    %44 = vector.load %arg10[%c0_67, %c0_68] : memref<512x144xbf16, #tpu.memory_space<vmem>>, vector<512x144xbf16>
    %c0_69 = arith.constant 0 : index
    %c0_70 = arith.constant 0 : index
    %45 = vector.load %arg1[%c0_69, %c0_70] : memref<144x16xbf16, #tpu.memory_space<vmem>>, vector<144x16xbf16>
    %cst_71 = arith.constant dense<0.000000e+00> : vector<512x16xf32>
    %46 = tpu.matmul %44, %45, %cst_71 {dimension_numbers = #tpu.dot_dimension_numbers<[1], [0], [0], [1], [0, 0, 1, 1], [], []>} : vector<512x144xbf16>, vector<144x16xbf16>, vector<512x16xf32> -> vector<512x16xf32>
    %cst_72 = arith.constant dense<0.000000e+00> : vector<16xf32>
    %47 = vector.multi_reduction <add>, %46, %cst_72 [0] : vector<512x16xf32> to vector<16xf32>
    %48 = vector.shape_cast %47 : vector<16xf32> to vector<1x16xf32>
    %cst_73 = arith.constant 0.001953125 : f32
    %49 = vector.broadcast %cst_73 : f32 to vector<1x16xf32>
    %50 = arith.mulf %48, %49 : vector<1x16xf32>
    %51 = vector.broadcast %50 : vector<1x16xf32> to vector<512x16xf32>
    %52 = arith.subf %46, %51 : vector<512x16xf32>
    %53 = arith.mulf %52, %52 : vector<512x16xf32>
    %cst_74 = arith.constant dense<0.000000e+00> : vector<16xf32>
    %54 = vector.multi_reduction <add>, %53, %cst_74 [0] : vector<512x16xf32> to vector<16xf32>
    %55 = vector.shape_cast %54 : vector<16xf32> to vector<1x16xf32>
    %cst_75 = arith.constant 0.001953125 : f32
    %56 = vector.broadcast %cst_75 : f32 to vector<1x16xf32>
    %57 = arith.mulf %55, %56 : vector<1x16xf32>
    %cst_76 = arith.constant 9.99999974E-6 : f32
    %58 = vector.broadcast %cst_76 : f32 to vector<1x16xf32>
    %59 = arith.addf %57, %58 : vector<1x16xf32>
    %60 = math.rsqrt %59 : vector<1x16xf32>
    %c0_77 = arith.constant 0 : index
    %c0_78 = arith.constant 0 : index
    %61 = vector.load %arg3[%c0_77, %c0_78] : memref<1x16xf32, #tpu.memory_space<vmem>>, vector<1x16xf32>
    %62 = arith.mulf %60, %61 : vector<1x16xf32>
    %63 = vector.broadcast %62 : vector<1x16xf32> to vector<512x16xf32>
    %64 = arith.mulf %52, %63 : vector<512x16xf32>
    %c0_79 = arith.constant 0 : index
    %c0_80 = arith.constant 0 : index
    %65 = vector.load %arg4[%c0_79, %c0_80] : memref<1x16xf32, #tpu.memory_space<vmem>>, vector<1x16xf32>
    %66 = vector.broadcast %65 : vector<1x16xf32> to vector<512x16xf32>
    %67 = arith.addf %64, %66 : vector<512x16xf32>
    %cst_81 = arith.constant 0.000000e+00 : f32
    %68 = vector.broadcast %cst_81 : f32 to vector<512x16xf32>
    %69 = arith.maximumf %67, %68 : vector<512x16xf32>
    %70 = vector.shape_cast %69 : vector<512x16xf32> to vector<2x16x16x16xf32>
    %cst_82 = arith.constant 0.000000e+00 : f32
    %71 = vector.broadcast %cst_82 : f32 to vector<2x1x18x16xf32>
    %cst_83 = arith.constant 0.000000e+00 : f32
    %72 = vector.broadcast %cst_83 : f32 to vector<2x18x1x16xf32>
    %c0_84 = arith.constant 0 : index
    %c0_85 = arith.constant 0 : index
    %c0_86 = arith.constant 0 : index
    %c0_87 = arith.constant 0 : index
    %73 = vector.load %arg9[%c0_84, %c0_85, %c0_86, %c0_87] : memref<2x18x18x16xf32, #tpu.memory_space<vmem>>, vector<2x1x18x16xf32>
    tpu.vector_store %arg9[%c0_84, %c0_85, %c0_86, %c0_87], %71 {strides = array<i32>} : memref<2x18x18x16xf32, #tpu.memory_space<vmem>>, vector<2x1x18x16xf32>,
    %c0_88 = arith.constant 0 : index
    %c17_89 = arith.constant 17 : index
    %c0_90 = arith.constant 0 : index
    %c0_91 = arith.constant 0 : index
    %74 = vector.load %arg9[%c0_88, %c17_89, %c0_90, %c0_91] : memref<2x18x18x16xf32, #tpu.memory_space<vmem>>, vector<2x1x18x16xf32>
    tpu.vector_store %arg9[%c0_88, %c17_89, %c0_90, %c0_91], %71 {strides = array<i32>} : memref<2x18x18x16xf32, #tpu.memory_space<vmem>>, vector<2x1x18x16xf32>,
    %c0_92 = arith.constant 0 : index
    %c0_93 = arith.constant 0 : index
    %c0_94 = arith.constant 0 : index
    %c0_95 = arith.constant 0 : index
    %75 = vector.load %arg9[%c0_92, %c0_93, %c0_94, %c0_95] : memref<2x18x18x16xf32, #tpu.memory_space<vmem>>, vector<2x18x1x16xf32>
    tpu.vector_store %arg9[%c0_92, %c0_93, %c0_94, %c0_95], %72 {strides = array<i32>} : memref<2x18x18x16xf32, #tpu.memory_space<vmem>>, vector<2x18x1x16xf32>,
    %c0_96 = arith.constant 0 : index
    %c0_97 = arith.constant 0 : index
    %c17_98 = arith.constant 17 : index
    %c0_99 = arith.constant 0 : index
    %76 = vector.load %arg9[%c0_96, %c0_97, %c17_98, %c0_99] : memref<2x18x18x16xf32, #tpu.memory_space<vmem>>, vector<2x18x1x16xf32>
    tpu.vector_store %arg9[%c0_96, %c0_97, %c17_98, %c0_99], %72 {strides = array<i32>} : memref<2x18x18x16xf32, #tpu.memory_space<vmem>>, vector<2x18x1x16xf32>,
    %c0_100 = arith.constant 0 : index
    %c1_101 = arith.constant 1 : index
    %c1_102 = arith.constant 1 : index
    %c0_103 = arith.constant 0 : index
    %77 = vector.load %arg9[%c0_100, %c1_101, %c1_102, %c0_103] : memref<2x18x18x16xf32, #tpu.memory_space<vmem>>, vector<2x16x16x16xf32>
    tpu.vector_store %arg9[%c0_100, %c1_101, %c1_102, %c0_103], %70 {strides = array<i32>} : memref<2x18x18x16xf32, #tpu.memory_space<vmem>>, vector<2x16x16x16xf32>,
    %c0_104 = arith.constant 0 : index
    %c0_105 = arith.constant 0 : index
    %c0_106 = arith.constant 0 : index
    %c0_107 = arith.constant 0 : index
    %78 = vector.load %arg9[%c0_104, %c0_105, %c0_106, %c0_107] : memref<2x18x18x16xf32, #tpu.memory_space<vmem>>, vector<2x16x16x16xf32>
    %79 = vector.shape_cast %78 : vector<2x16x16x16xf32> to vector<512x16xf32>
    %80 = arith.truncf %79 : vector<512x16xf32> to vector<512x16xbf16>
    %c0_108 = arith.constant 0 : index
    %c0_109 = arith.constant 0 : index
    %81 = vector.load %arg10[%c0_108, %c0_109] : memref<512x144xbf16, #tpu.memory_space<vmem>>, vector<512x16xbf16>
    tpu.vector_store %arg10[%c0_108, %c0_109], %80 {strides = array<i32>} : memref<512x144xbf16, #tpu.memory_space<vmem>>, vector<512x16xbf16>,
    %c0_110 = arith.constant 0 : index
    %c0_111 = arith.constant 0 : index
    %c1_112 = arith.constant 1 : index
    %c0_113 = arith.constant 0 : index
    %82 = vector.load %arg9[%c0_110, %c0_111, %c1_112, %c0_113] : memref<2x18x18x16xf32, #tpu.memory_space<vmem>>, vector<2x16x16x16xf32>
    %83 = vector.shape_cast %82 : vector<2x16x16x16xf32> to vector<512x16xf32>
    %84 = arith.truncf %83 : vector<512x16xf32> to vector<512x16xbf16>
    %c0_114 = arith.constant 0 : index
    %c16_115 = arith.constant 16 : index
    %85 = vector.load %arg10[%c0_114, %c16_115] : memref<512x144xbf16, #tpu.memory_space<vmem>>, vector<512x16xbf16>
    tpu.vector_store %arg10[%c0_114, %c16_115], %84 {strides = array<i32>} : memref<512x144xbf16, #tpu.memory_space<vmem>>, vector<512x16xbf16>,
    %c0_116 = arith.constant 0 : index
    %c0_117 = arith.constant 0 : index
    %c2_118 = arith.constant 2 : index
    %c0_119 = arith.constant 0 : index
    %86 = vector.load %arg9[%c0_116, %c0_117, %c2_118, %c0_119] : memref<2x18x18x16xf32, #tpu.memory_space<vmem>>, vector<2x16x16x16xf32>
    %87 = vector.shape_cast %86 : vector<2x16x16x16xf32> to vector<512x16xf32>
    %88 = arith.truncf %87 : vector<512x16xf32> to vector<512x16xbf16>
    %c0_120 = arith.constant 0 : index
    %c32_121 = arith.constant 32 : index
    %89 = vector.load %arg10[%c0_120, %c32_121] : memref<512x144xbf16, #tpu.memory_space<vmem>>, vector<512x16xbf16>
    tpu.vector_store %arg10[%c0_120, %c32_121], %88 {strides = array<i32>} : memref<512x144xbf16, #tpu.memory_space<vmem>>, vector<512x16xbf16>,
    %c0_122 = arith.constant 0 : index
    %c1_123 = arith.constant 1 : index
    %c0_124 = arith.constant 0 : index
    %c0_125 = arith.constant 0 : index
    %90 = vector.load %arg9[%c0_122, %c1_123, %c0_124, %c0_125] : memref<2x18x18x16xf32, #tpu.memory_space<vmem>>, vector<2x16x16x16xf32>
    %91 = vector.shape_cast %90 : vector<2x16x16x16xf32> to vector<512x16xf32>
    %92 = arith.truncf %91 : vector<512x16xf32> to vector<512x16xbf16>
    %c0_126 = arith.constant 0 : index
    %c48_127 = arith.constant 48 : index
    %93 = vector.load %arg10[%c0_126, %c48_127] : memref<512x144xbf16, #tpu.memory_space<vmem>>, vector<512x16xbf16>
    tpu.vector_store %arg10[%c0_126, %c48_127], %92 {strides = array<i32>} : memref<512x144xbf16, #tpu.memory_space<vmem>>, vector<512x16xbf16>,
    %c0_128 = arith.constant 0 : index
    %c1_129 = arith.constant 1 : index
    %c1_130 = arith.constant 1 : index
    %c0_131 = arith.constant 0 : index
    %94 = vector.load %arg9[%c0_128, %c1_129, %c1_130, %c0_131] : memref<2x18x18x16xf32, #tpu.memory_space<vmem>>, vector<2x16x16x16xf32>
    %95 = vector.shape_cast %94 : vector<2x16x16x16xf32> to vector<512x16xf32>
    %96 = arith.truncf %95 : vector<512x16xf32> to vector<512x16xbf16>
    %c0_132 = arith.constant 0 : index
    %c64_133 = arith.constant 64 : index
    %97 = vector.load %arg10[%c0_132, %c64_133] : memref<512x144xbf16, #tpu.memory_space<vmem>>, vector<512x16xbf16>
    tpu.vector_store %arg10[%c0_132, %c64_133], %96 {strides = array<i32>} : memref<512x144xbf16, #tpu.memory_space<vmem>>, vector<512x16xbf16>,
    %c0_134 = arith.constant 0 : index
    %c1_135 = arith.constant 1 : index
    %c2_136 = arith.constant 2 : index
    %c0_137 = arith.constant 0 : index
    %98 = vector.load %arg9[%c0_134, %c1_135, %c2_136, %c0_137] : memref<2x18x18x16xf32, #tpu.memory_space<vmem>>, vector<2x16x16x16xf32>
    %99 = vector.shape_cast %98 : vector<2x16x16x16xf32> to vector<512x16xf32>
    %100 = arith.truncf %99 : vector<512x16xf32> to vector<512x16xbf16>
    %c0_138 = arith.constant 0 : index
    %c80_139 = arith.constant 80 : index
    %101 = vector.load %arg10[%c0_138, %c80_139] : memref<512x144xbf16, #tpu.memory_space<vmem>>, vector<512x16xbf16>
    tpu.vector_store %arg10[%c0_138, %c80_139], %100 {strides = array<i32>} : memref<512x144xbf16, #tpu.memory_space<vmem>>, vector<512x16xbf16>,
    %c0_140 = arith.constant 0 : index
    %c2_141 = arith.constant 2 : index
    %c0_142 = arith.constant 0 : index
    %c0_143 = arith.constant 0 : index
    %102 = vector.load %arg9[%c0_140, %c2_141, %c0_142, %c0_143] : memref<2x18x18x16xf32, #tpu.memory_space<vmem>>, vector<2x16x16x16xf32>
    %103 = vector.shape_cast %102 : vector<2x16x16x16xf32> to vector<512x16xf32>
    %104 = arith.truncf %103 : vector<512x16xf32> to vector<512x16xbf16>
    %c0_144 = arith.constant 0 : index
    %c96_145 = arith.constant 96 : index
    %105 = vector.load %arg10[%c0_144, %c96_145] : memref<512x144xbf16, #tpu.memory_space<vmem>>, vector<512x16xbf16>
    tpu.vector_store %arg10[%c0_144, %c96_145], %104 {strides = array<i32>} : memref<512x144xbf16, #tpu.memory_space<vmem>>, vector<512x16xbf16>,
    %c0_146 = arith.constant 0 : index
    %c2_147 = arith.constant 2 : index
    %c1_148 = arith.constant 1 : index
    %c0_149 = arith.constant 0 : index
    %106 = vector.load %arg9[%c0_146, %c2_147, %c1_148, %c0_149] : memref<2x18x18x16xf32, #tpu.memory_space<vmem>>, vector<2x16x16x16xf32>
    %107 = vector.shape_cast %106 : vector<2x16x16x16xf32> to vector<512x16xf32>
    %108 = arith.truncf %107 : vector<512x16xf32> to vector<512x16xbf16>
    %c0_150 = arith.constant 0 : index
    %c112_151 = arith.constant 112 : index
    %109 = vector.load %arg10[%c0_150, %c112_151] : memref<512x144xbf16, #tpu.memory_space<vmem>>, vector<512x16xbf16>
    tpu.vector_store %arg10[%c0_150, %c112_151], %108 {strides = array<i32>} : memref<512x144xbf16, #tpu.memory_space<vmem>>, vector<512x16xbf16>,
    %c0_152 = arith.constant 0 : index
    %c2_153 = arith.constant 2 : index
    %c2_154 = arith.constant 2 : index
    %c0_155 = arith.constant 0 : index
    %110 = vector.load %arg9[%c0_152, %c2_153, %c2_154, %c0_155] : memref<2x18x18x16xf32, #tpu.memory_space<vmem>>, vector<2x16x16x16xf32>
    %111 = vector.shape_cast %110 : vector<2x16x16x16xf32> to vector<512x16xf32>
    %112 = arith.truncf %111 : vector<512x16xf32> to vector<512x16xbf16>
    %c0_156 = arith.constant 0 : index
    %c128_157 = arith.constant 128 : index
    %113 = vector.load %arg10[%c0_156, %c128_157] : memref<512x144xbf16, #tpu.memory_space<vmem>>, vector<512x16xbf16>
    tpu.vector_store %arg10[%c0_156, %c128_157], %112 {strides = array<i32>} : memref<512x144xbf16, #tpu.memory_space<vmem>>, vector<512x16xbf16>,
    %c0_158 = arith.constant 0 : index
    %c0_159 = arith.constant 0 : index
    %114 = vector.load %arg10[%c0_158, %c0_159] : memref<512x144xbf16, #tpu.memory_space<vmem>>, vector<512x144xbf16>
    %c0_160 = arith.constant 0 : index
    %c0_161 = arith.constant 0 : index
    %115 = vector.load %arg2[%c0_160, %c0_161] : memref<144x16xbf16, #tpu.memory_space<vmem>>, vector<144x16xbf16>
    %cst_162 = arith.constant dense<0.000000e+00> : vector<512x16xf32>
    %116 = tpu.matmul %114, %115, %cst_162 {dimension_numbers = #tpu.dot_dimension_numbers<[1], [0], [0], [1], [0, 0, 1, 1], [], []>} : vector<512x144xbf16>, vector<144x16xbf16>, vector<512x16xf32> -> vector<512x16xf32>
    %cst_163 = arith.constant dense<0.000000e+00> : vector<16xf32>
    %117 = vector.multi_reduction <add>, %116, %cst_163 [0] : vector<512x16xf32> to vector<16xf32>
    %118 = vector.shape_cast %117 : vector<16xf32> to vector<1x16xf32>
    %cst_164 = arith.constant 0.001953125 : f32
    %119 = vector.broadcast %cst_164 : f32 to vector<1x16xf32>
    %120 = arith.mulf %118, %119 : vector<1x16xf32>
    %121 = vector.broadcast %120 : vector<1x16xf32> to vector<512x16xf32>
    %122 = arith.subf %116, %121 : vector<512x16xf32>
    %123 = arith.mulf %122, %122 : vector<512x16xf32>
    %cst_165 = arith.constant dense<0.000000e+00> : vector<16xf32>
    %124 = vector.multi_reduction <add>, %123, %cst_165 [0] : vector<512x16xf32> to vector<16xf32>
    %125 = vector.shape_cast %124 : vector<16xf32> to vector<1x16xf32>
    %cst_166 = arith.constant 0.001953125 : f32
    %126 = vector.broadcast %cst_166 : f32 to vector<1x16xf32>
    %127 = arith.mulf %125, %126 : vector<1x16xf32>
    %cst_167 = arith.constant 9.99999974E-6 : f32
    %128 = vector.broadcast %cst_167 : f32 to vector<1x16xf32>
    %129 = arith.addf %127, %128 : vector<1x16xf32>
    %130 = math.rsqrt %129 : vector<1x16xf32>
    %c0_168 = arith.constant 0 : index
    %c0_169 = arith.constant 0 : index
    %131 = vector.load %arg5[%c0_168, %c0_169] : memref<1x16xf32, #tpu.memory_space<vmem>>, vector<1x16xf32>
    %132 = arith.mulf %130, %131 : vector<1x16xf32>
    %133 = vector.broadcast %132 : vector<1x16xf32> to vector<512x16xf32>
    %134 = arith.mulf %122, %133 : vector<512x16xf32>
    %c0_170 = arith.constant 0 : index
    %c0_171 = arith.constant 0 : index
    %135 = vector.load %arg6[%c0_170, %c0_171] : memref<1x16xf32, #tpu.memory_space<vmem>>, vector<1x16xf32>
    %136 = vector.broadcast %135 : vector<1x16xf32> to vector<512x16xf32>
    %137 = arith.addf %134, %136 : vector<512x16xf32>
    %c0_172 = arith.constant 0 : index
    %c0_173 = arith.constant 0 : index
    %c0_174 = arith.constant 0 : index
    %c0_175 = arith.constant 0 : index
    %138 = vector.load %arg0[%c0_172, %c0_173, %c0_174, %c0_175] : memref<2x16x16x16xf32, #tpu.memory_space<vmem>>, vector<2x16x16x16xf32>
    %139 = vector.shape_cast %138 : vector<2x16x16x16xf32> to vector<512x16xf32>
    %140 = arith.addf %137, %139 : vector<512x16xf32>
    %cst_176 = arith.constant 0.000000e+00 : f32
    %141 = vector.broadcast %cst_176 : f32 to vector<512x16xf32>
    %142 = arith.maximumf %140, %141 : vector<512x16xf32>
    %143 = vector.shape_cast %142 : vector<512x16xf32> to vector<2x16x16x16xf32>
    %c0_177 = arith.constant 0 : index
    %c0_178 = arith.constant 0 : index
    %c0_179 = arith.constant 0 : index
    %c0_180 = arith.constant 0 : index
    %144 = vector.load %arg7[%c0_177, %c0_178, %c0_179, %c0_180] : memref<2x16x16x16xf32, #tpu.memory_space<vmem>>, vector<2x16x16x16xf32>
    tpu.vector_store %arg7[%c0_177, %c0_178, %c0_179, %c0_180], %143 {strides = array<i32>} : memref<2x16x16x16xf32, #tpu.memory_space<vmem>>, vector<2x16x16x16xf32>,
    return
  }
}

</mosaic_0001>

<bundles_post_ra>
// kernel: resnet_basicblock_forward.1
= control target key start
LH: loop header
LB: loop body
LE: loop exit
PB: predicated region body
PF: predicated region fallthrough
CT: control target
= control target key end

     0   :  { %vm91_vm0 = vcmask 130048   ;;  %vm94_vm1 = vcmask 123904   ;;  %vm106_vm2 = vcmask 122880   ;;  %v7058_v0 = vmov 0.0   ;;  %s7060_s12 = smov 16   ;;  %s7061_s13 = smov 48   ;;  %s12576_s0 = inlined_call_operand.vmem [shape: f32[2,16,16,16], index: 0, kind: input, shape index: {}]   ;;  %s12577_s1 = inlined_call_operand.vmem [shape: bf16[144,16], index: 1, kind: input, shape index: {}]   ;;  %s12578_s3 = inlined_call_operand.vmem [shape: f32[1,16], index: 3, kind: input, shape index: {}]   ;;  %s12579_s4 = inlined_call_operand.vmem [shape: f32[1,16], index: 4, kind: input, shape index: {}]   ;;  %s12580_s2 = inlined_call_operand.vmem [shape: bf16[144,16], index: 2, kind: input, shape index: {}]   ;;  %s12581_s5 = inlined_call_operand.vmem [shape: f32[1,16], index: 5, kind: input, shape index: {}]   ;;  %s12582_s6 = inlined_call_operand.vmem [shape: f32[1,16], index: 6, kind: input, shape index: {}]   ;;  %s12583_s7 = inlined_call_operand.vmem [shape: f32[2,16,16,16], index: 7, kind: output, shape index: {}]  }
   0x1   :  { %92 = vst.msk [vmem:[#allocation2] sm:$0xff] %vm91_vm0, %v7058_v0  ;;  %93 = vst.msk [vmem:[#allocation2 + $0x8] sm:$0xff] %vm91_vm0, %v7058_v0  ;;  %v27_v1 = vld [vmem:[%s12576_s0] sm:$0xff]  ;;  %v28_v2 = vld [vmem:[%s12576_s0 + $0x8] sm:$0xff]  ;;  %v12584_v7 = vmov 0   ;;  %s7062_s14 = smov 32  }
   0x2   :  { %95 = vst.msk [vmem:[#allocation2 + $0x10] sm:$0x3] %vm94_vm1, %v7058_v0  ;;  %98 = vst.msk [vmem:[#allocation2 + $0x1c0] sm:$0x3] %vm94_vm1, %v7058_v0  ;;  %v29_v3 = vld [vmem:[%s12576_s0 + $0x10] sm:$0xff]  ;;  %v30_v4 = vld [vmem:[%s12576_s0 + $0x18] sm:$0xff]  ;;  %2532 = vmatprep.subr.bf16.mxu0 %v12584_v7  ;;  %5855 = vmatprep.subr.bf16.mxu1 %v12584_v7 }
   0x3   :  { %96 = vst.msk [vmem:[#allocation2 + $0x1b0] sm:$0xff] %vm91_vm0, %v7058_v0  ;;  %97 = vst.msk [vmem:[#allocation2 + $0x1b8] sm:$0xff] %vm91_vm0, %v7058_v0  ;;  %v31_v5 = vld [vmem:[%s12576_s0 + $0x20] sm:$0xff]  ;;  %v32_v6 = vld [vmem:[%s12576_s0 + $0x28] sm:$0xff]  ;;  %s7063_s15 = smov 64   ;;  %s7064_s16 = smov 80  }
   0x4   :  { %100 = vst.msk [vmem:[#allocation2 + $0x198] sm:$0xff] %vm91_vm0, %v7058_v0  ;;  %101 = vst.msk [vmem:[#allocation2 + $0x1a0] sm:$0xff] %vm91_vm0, %v7058_v0  ;;  %v33_v8 = vld [vmem:[%s12576_s0 + $0x30] sm:$0xff]  ;;  %v34_v9 = vld [vmem:[%s12576_s0 + $0x38] sm:$0xff]  ;;  %s7065_s17 = smov 96   ;;  %s7066_s18 = smov 112  }
   0x5   :  { %102 = vst.msk [vmem:[#allocation2 + $0x1a8] sm:$0x3] %vm94_vm1, %v7058_v0  ;;  %105 = vst.msk [vmem:[#allocation2 + $0x358] sm:$0x3] %vm94_vm1, %v7058_v0  ;;  %v35_v10 = vld [vmem:[%s12576_s0 + $0x40] sm:$0xff]  ;;  %v36_v11 = vld [vmem:[%s12576_s0 + $0x48] sm:$0xff] }
   0x6   :  { %103 = vst.msk [vmem:[#allocation2 + $0x348] sm:$0xff] %vm91_vm0, %v7058_v0  ;;  %104 = vst.msk [vmem:[#allocation2 + $0x350] sm:$0xff] %vm91_vm0, %v7058_v0  ;;  %v37_v12 = vld [vmem:[%s12576_s0 + $0x50] sm:$0xff]  ;;  %v38_v13 = vld [vmem:[%s12576_s0 + $0x58] sm:$0xff]  ;;  %vm596_vm3 = vcmask 261248   ;;  %vm853_vm4 = vcmask 392448  }
   0x7   :  { %108 = vst.msk [vmem:[#allocation2 + $0x18] sm:$0x1] %vm106_vm2, %v7058_v0  ;;  %109 = vst.msk [vmem:[#allocation2 + $0x30] sm:$0x1] %vm106_vm2, %v7058_v0  ;;  %v39_v14 = vld [vmem:[%s12576_s0 + $0x60] sm:$0xff]  ;;  %v40_v15 = vld [vmem:[%s12576_s0 + $0x68] sm:$0xff] }
   0x8   :  { %110 = vst.msk [vmem:[#allocation2 + $0x48] sm:$0x1] %vm106_vm2, %v7058_v0  ;;  %111 = vst.msk [vmem:[#allocation2 + $0x60] sm:$0x1] %vm106_vm2, %v7058_v0  ;;  %v41_v16 = vld [vmem:[%s12576_s0 + $0x70] sm:$0xff]  ;;  %v42_v17 = vld [vmem:[%s12576_s0 + $0x78] sm:$0xff] }
   0x9   :  { %112 = vst.msk [vmem:[#allocation2 + $0x78] sm:$0x1] %vm106_vm2, %v7058_v0  ;;  %113 = vst.msk [vmem:[#allocation2 + $0x90] sm:$0x1] %vm106_vm2, %v7058_v0  ;;  %v7036_v18 = vld [vmem:[%s12577_s1] sm:$0xff]   ;;  %v373_v20 = vld [vmem:[#allocation2 + $0x9] sm:$0xff] }
   0xa   :  { %114 = vst.msk [vmem:[#allocation2 + $0xa8] sm:$0x1] %vm106_vm2, %v7058_v0  ;;  %115 = vst.msk [vmem:[#allocation2 + $0xc0] sm:$0x1] %vm106_vm2, %v7058_v0  ;;  %v372_v19 = vld [vmem:[#allocation2 + $0x1] sm:$0xff]  ;;  %2533 = vmatpush1.bf16.msra.mxu0 %v7036_v18  ;;  %vm1110_vm5 = vcmask 523648  }
   0xb   :  { %116 = vst.msk [vmem:[#allocation2 + $0xd8] sm:$0x1] %vm106_vm2, %v7058_v0  ;;  %117 = vst.msk [vmem:[#allocation2 + $0xf0] sm:$0x1] %vm106_vm2, %v7058_v0  ;;  %v629_v21 = vld [vmem:[#allocation2 + $0x2] sm:$0xff]  ;;  %v436_v22 = vpack.c.bf16 %v373_v20, %v372_v19  ;;  %2534 = vmatprep.subr.bf16.mxu0 %v12584_v7  ;;  %v7039_v19 = vld [vmem:[%s12577_s1 + $0x18] sm:$0xff]  }
   0xc   :  { %118 = vst.msk [vmem:[#allocation2 + $0x108] sm:$0x1] %vm106_vm2, %v7058_v0  ;;  %119 = vst.msk [vmem:[#allocation2 + $0x120] sm:$0x1] %vm106_vm2, %v7058_v0  ;;  %v45_v20 = vld [vmem:[%s12576_s0 + $0x90] sm:$0xff]  ;;  %vm1367_vm6 = vcmask 654848  }
   0xd   :  { %120 = vst.msk [vmem:[#allocation2 + $0x138] sm:$0x1] %vm106_vm2, %v7058_v0  ;;  %121 = vst.msk [vmem:[#allocation2 + $0x150] sm:$0x1] %vm106_vm2, %v7058_v0  ;;  %500 = vrot.lane.b32.xlu0 %v436_v22, %s7060_s12  ;;  %vm1624_vm7 = vcmask 786048   ;;  %vm1882_vm8 = vcmask 917248  }
   0xe   :  { %122 = vst.msk [vmem:[#allocation2 + $0x168] sm:$0x1] %vm106_vm2, %v7058_v0  ;;  %123 = vst.msk [vmem:[#allocation2 + $0x180] sm:$0x1] %vm106_vm2, %v7058_v0  ;;  %vm2139_vm9 = vcmask 1048448  }
   0xf   :  { %126 = vst.msk [vmem:[#allocation2 + $0x1c8] sm:$0x1] %vm106_vm2, %v7058_v0  ;;  %127 = vst.msk [vmem:[#allocation2 + $0x1e0] sm:$0x1] %vm106_vm2, %v7058_v0 }
  0x10   :  { %128 = vst.msk [vmem:[#allocation2 + $0x1f8] sm:$0x1] %vm106_vm2, %v7058_v0  ;;  %129 = vst.msk [vmem:[#allocation2 + $0x210] sm:$0x1] %vm106_vm2, %v7058_v0 }
  0x11   :  { %130 = vst.msk [vmem:[#allocation2 + $0x228] sm:$0x1] %vm106_vm2, %v7058_v0  ;;  %131 = vst.msk [vmem:[#allocation2 + $0x240] sm:$0x1] %vm106_vm2, %v7058_v0 }
  0x12   :  { %132 = vst.msk [vmem:[#allocation2 + $0x258] sm:$0x1] %vm106_vm2, %v7058_v0  ;;  %133 = vst.msk [vmem:[#allocation2 + $0x270] sm:$0x1] %vm106_vm2, %v7058_v0 }
  0x13   :  { %134 = vst.msk [vmem:[#allocation2 + $0x288] sm:$0x1] %vm106_vm2, %v7058_v0  ;;  %135 = vst.msk [vmem:[#allocation2 + $0x2a0] sm:$0x1] %vm106_vm2, %v7058_v0 }
  0x14   :  { %136 = vst.msk [vmem:[#allocation2 + $0x2b8] sm:$0x1] %vm106_vm2, %v7058_v0  ;;  %137 = vst.msk [vmem:[#allocation2 + $0x2d0] sm:$0x1] %vm106_vm2, %v7058_v0 }
  0x15   :  { %138 = vst.msk [vmem:[#allocation2 + $0x2e8] sm:$0x1] %vm106_vm2, %v7058_v0  ;;  %139 = vst.msk [vmem:[#allocation2 + $0x300] sm:$0x1] %vm106_vm2, %v7058_v0 }
  0x16   :  { %140 = vst.msk [vmem:[#allocation2 + $0x318] sm:$0x1] %vm106_vm2, %v7058_v0  ;;  %141 = vst.msk [vmem:[#allocation2 + $0x330] sm:$0x1] %vm106_vm2, %v7058_v0 }
  0x17   :  { %144 = vst.msk [vmem:[#allocation2 + $0x29] sm:$0x1] %vm106_vm2, %v7058_v0  ;;  %145 = vst.msk [vmem:[#allocation2 + $0x41] sm:$0x1] %vm106_vm2, %v7058_v0 }
  0x18   :  { %146 = vst.msk [vmem:[#allocation2 + $0x59] sm:$0x1] %vm106_vm2, %v7058_v0  ;;  %147 = vst.msk [vmem:[#allocation2 + $0x71] sm:$0x1] %vm106_vm2, %v7058_v0 }
  0x19   :  { %148 = vst.msk [vmem:[#allocation2 + $0x89] sm:$0x1] %vm106_vm2, %v7058_v0  ;;  %149 = vst.msk [vmem:[#allocation2 + $0xa1] sm:$0x1] %vm106_vm2, %v7058_v0 }
  0x1a   :  { %150 = vst.msk [vmem:[#allocation2 + $0xb9] sm:$0x1] %vm106_vm2, %v7058_v0  ;;  %151 = vst.msk [vmem:[#allocation2 + $0xd1] sm:$0x1] %vm106_vm2, %v7058_v0 }
  0x1b   :  { %152 = vst.msk [vmem:[#allocation2 + $0xe9] sm:$0x1] %vm106_vm2, %v7058_v0  ;;  %153 = vst.msk [vmem:[#allocation2 + $0x101] sm:$0x1] %vm106_vm2, %v7058_v0 }
  0x1c   :  { %154 = vst.msk [vmem:[#allocation2 + $0x119] sm:$0x1] %vm106_vm2, %v7058_v0  ;;  %155 = vst.msk [vmem:[#allocation2 + $0x131] sm:$0x1] %vm106_vm2, %v7058_v0 }
  0x1d   :  { %156 = vst.msk [vmem:[#allocation2 + $0x149] sm:$0x1] %vm106_vm2, %v7058_v0  ;;  %157 = vst.msk [vmem:[#allocation2 + $0x161] sm:$0x1] %vm106_vm2, %v7058_v0 }
  0x1e   :  { %158 = vst.msk [vmem:[#allocation2 + $0x179] sm:$0x1] %vm106_vm2, %v7058_v0  ;;  %159 = vst.msk [vmem:[#allocation2 + $0x191] sm:$0x1] %vm106_vm2, %v7058_v0 }
  0x1f   :  { %162 = vst.msk [vmem:[#allocation2 + $0x1d9] sm:$0x1] %vm106_vm2, %v7058_v0  ;;  %163 = vst.msk [vmem:[#allocation2 + $0x1f1] sm:$0x1] %vm106_vm2, %v7058_v0 }
  0x20   :  { %164 = vst.msk [vmem:[#allocation2 + $0x209] sm:$0x1] %vm106_vm2, %v7058_v0  ;;  %165 = vst.msk [vmem:[#allocation2 + $0x221] sm:$0x1] %vm106_vm2, %v7058_v0 }
  0x21   :  { %166 = vst.msk [vmem:[#allocation2 + $0x239] sm:$0x1] %vm106_vm2, %v7058_v0  ;;  %167 = vst.msk [vmem:[#allocation2 + $0x251] sm:$0x1] %vm106_vm2, %v7058_v0 }
  0x22   :  { %168 = vst.msk [vmem:[#allocation2 + $0x269] sm:$0x1] %vm106_vm2, %v7058_v0  ;;  %169 = vst.msk [vmem:[#allocation2 + $0x281] sm:$0x1] %vm106_vm2, %v7058_v0 }
  0x23   :  { %170 = vst.msk [vmem:[#allocation2 + $0x299] sm:$0x1] %vm106_vm2, %v7058_v0  ;;  %171 = vst.msk [vmem:[#allocation2 + $0x2b1] sm:$0x1] %vm106_vm2, %v7058_v0 }
  0x24   :  { %172 = vst.msk [vmem:[#allocation2 + $0x2c9] sm:$0x1] %vm106_vm2, %v7058_v0  ;;  %173 = vst.msk [vmem:[#allocation2 + $0x2e1] sm:$0x1] %vm106_vm2, %v7058_v0 }
  0x25   :  { %174 = vst.msk [vmem:[#allocation2 + $0x2f9] sm:$0x1] %vm106_vm2, %v7058_v0  ;;  %175 = vst.msk [vmem:[#allocation2 + $0x311] sm:$0x1] %vm106_vm2, %v7058_v0 }
  0x26   :  { %176 = vst.msk [vmem:[#allocation2 + $0x329] sm:$0x1] %vm106_vm2, %v7058_v0  ;;  %177 = vst.msk [vmem:[#allocation2 + $0x341] sm:$0x1] %vm106_vm2, %v7058_v0 }
  0x27   :  { %3424 = vst.msk [vmem:[#allocation3] sm:$0xff] %vm91_vm0, %v7058_v0  ;;  %3425 = vst.msk [vmem:[#allocation3 + $0x8] sm:$0xff] %vm91_vm0, %v7058_v0 }
  0x28   :  { %3426 = vst.msk [vmem:[#allocation3 + $0x10] sm:$0x3] %vm94_vm1, %v7058_v0  ;;  %3429 = vst.msk [vmem:[#allocation3 + $0x1c0] sm:$0x3] %vm94_vm1, %v7058_v0 }
  0x29   :  { %3427 = vst.msk [vmem:[#allocation3 + $0x1b0] sm:$0xff] %vm91_vm0, %v7058_v0  ;;  %3428 = vst.msk [vmem:[#allocation3 + $0x1b8] sm:$0xff] %vm91_vm0, %v7058_v0 }
  0x2a   :  { %3431 = vst.msk [vmem:[#allocation3 + $0x198] sm:$0xff] %vm91_vm0, %v7058_v0  ;;  %3432 = vst.msk [vmem:[#allocation3 + $0x1a0] sm:$0xff] %vm91_vm0, %v7058_v0 }
  0x2b   :  { %3433 = vst.msk [vmem:[#allocation3 + $0x1a8] sm:$0x3] %vm94_vm1, %v7058_v0  ;;  %3436 = vst.msk [vmem:[#allocation3 + $0x358] sm:$0x3] %vm94_vm1, %v7058_v0 }
  0x2c   :  { %3434 = vst.msk [vmem:[#allocation3 + $0x348] sm:$0xff] %vm91_vm0, %v7058_v0  ;;  %3435 = vst.msk [vmem:[#allocation3 + $0x350] sm:$0xff] %vm91_vm0, %v7058_v0 }
  0x2d   :  { %3438 = vst.msk [vmem:[#allocation3 + $0x18] sm:$0x1] %vm106_vm2, %v7058_v0  ;;  %3439 = vst.msk [vmem:[#allocation3 + $0x30] sm:$0x1] %vm106_vm2, %v7058_v0 }
  0x2e   :  { %3440 = vst.msk [vmem:[#allocation3 + $0x48] sm:$0x1] %vm106_vm2, %v7058_v0  ;;  %3441 = vst.msk [vmem:[#allocation3 + $0x60] sm:$0x1] %vm106_vm2, %v7058_v0 }
  0x2f   :  { %3442 = vst.msk [vmem:[#allocation3 + $0x78] sm:$0x1] %vm106_vm2, %v7058_v0  ;;  %3443 = vst.msk [vmem:[#allocation3 + $0x90] sm:$0x1] %vm106_vm2, %v7058_v0 }
  0x30   :  { %3444 = vst.msk [vmem:[#allocation3 + $0xa8] sm:$0x1] %vm106_vm2, %v7058_v0  ;;  %3445 = vst.msk [vmem:[#allocation3 + $0xc0] sm:$0x1] %vm106_vm2, %v7058_v0 }
  0x31   :  { %3446 = vst.msk [vmem:[#allocation3 + $0xd8] sm:$0x1] %vm106_vm2, %v7058_v0  ;;  %3447 = vst.msk [vmem:[#allocation3 + $0xf0] sm:$0x1] %vm106_vm2, %v7058_v0 }
  0x32   :  { %3448 = vst.msk [vmem:[#allocation3 + $0x108] sm:$0x1] %vm106_vm2, %v7058_v0  ;;  %3449 = vst.msk [vmem:[#allocation3 + $0x120] sm:$0x1] %vm106_vm2, %v7058_v0 }
  0x33   :  { %3450 = vst.msk [vmem:[#allocation3 + $0x138] sm:$0x1] %vm106_vm2, %v7058_v0  ;;  %3451 = vst.msk [vmem:[#allocation3 + $0x150] sm:$0x1] %vm106_vm2, %v7058_v0 }
  0x34   :  { %3452 = vst.msk [vmem:[#allocation3 + $0x168] sm:$0x1] %vm106_vm2, %v7058_v0  ;;  %3453 = vst.msk [vmem:[#allocation3 + $0x180] sm:$0x1] %vm106_vm2, %v7058_v0 }
  0x35   :  { %3456 = vst.msk [vmem:[#allocation3 + $0x1c8] sm:$0x1] %vm106_vm2, %v7058_v0  ;;  %3457 = vst.msk [vmem:[#allocation3 + $0x1e0] sm:$0x1] %vm106_vm2, %v7058_v0 }
  0x36   :  { %3458 = vst.msk [vmem:[#allocation3 + $0x1f8] sm:$0x1] %vm106_vm2, %v7058_v0  ;;  %3459 = vst.msk [vmem:[#allocation3 + $0x210] sm:$0x1] %vm106_vm2, %v7058_v0 }
  0x37   :  { %3460 = vst.msk [vmem:[#allocation3 + $0x228] sm:$0x1] %vm106_vm2, %v7058_v0  ;;  %3461 = vst.msk [vmem:[#allocation3 + $0x240] sm:$0x1] %vm106_vm2, %v7058_v0 }
  0x38   :  { %3462 = vst.msk [vmem:[#allocation3 + $0x258] sm:$0x1] %vm106_vm2, %v7058_v0  ;;  %3463 = vst.msk [vmem:[#allocation3 + $0x270] sm:$0x1] %vm106_vm2, %v7058_v0 }
  0x39   :  { %3464 = vst.msk [vmem:[#allocation3 + $0x288] sm:$0x1] %vm106_vm2, %v7058_v0  ;;  %3465 = vst.msk [vmem:[#allocation3 + $0x2a0] sm:$0x1] %vm106_vm2, %v7058_v0 }
  0x3a   :  { %3466 = vst.msk [vmem:[#allocation3 + $0x2b8] sm:$0x1] %vm106_vm2, %v7058_v0  ;;  %3467 = vst.msk [vmem:[#allocation3 + $0x2d0] sm:$0x1] %vm106_vm2, %v7058_v0 }
  0x3b   :  { %3468 = vst.msk [vmem:[#allocation3 + $0x2e8] sm:$0x1] %vm106_vm2, %v7058_v0  ;;  %3469 = vst.msk [vmem:[#allocation3 + $0x300] sm:$0x1] %vm106_vm2, %v7058_v0 }
  0x3c   :  { %3470 = vst.msk [vmem:[#allocation3 + $0x318] sm:$0x1] %vm106_vm2, %v7058_v0  ;;  %3471 = vst.msk [vmem:[#allocation3 + $0x330] sm:$0x1] %vm106_vm2, %v7058_v0 }
  0x3d   :  { %3474 = vst.msk [vmem:[#allocation3 + $0x29] sm:$0x1] %vm106_vm2, %v7058_v0  ;;  %3475 = vst.msk [vmem:[#allocation3 + $0x41] sm:$0x1] %vm106_vm2, %v7058_v0 }
  0x3e   :  { %3476 = vst.msk [vmem:[#allocation3 + $0x59] sm:$0x1] %vm106_vm2, %v7058_v0  ;;  %3477 = vst.msk [vmem:[#allocation3 + $0x71] sm:$0x1] %vm106_vm2, %v7058_v0 }
  0x3f   :  { %3478 = vst.msk [vmem:[#allocation3 + $0x89] sm:$0x1] %vm106_vm2, %v7058_v0  ;;  %3479 = vst.msk [vmem:[#allocation3 + $0xa1] sm:$0x1] %vm106_vm2, %v7058_v0 }
  0x40   :  { %3480 = vst.msk [vmem:[#allocation3 + $0xb9] sm:$0x1] %vm106_vm2, %v7058_v0  ;;  %3481 = vst.msk [vmem:[#allocation3 + $0xd1] sm:$0x1] %vm106_vm2, %v7058_v0 }
  0x41   :  { %3482 = vst.msk [vmem:[#allocation3 + $0xe9] sm:$0x1] %vm106_vm2, %v7058_v0  ;;  %3483 = vst.msk [vmem:[#allocation3 + $0x101] sm:$0x1] %vm106_vm2, %v7058_v0 }
  0x42   :  { %3484 = vst.msk [vmem:[#allocation3 + $0x119] sm:$0x1] %vm106_vm2, %v7058_v0  ;;  %3485 = vst.msk [vmem:[#allocation3 + $0x131] sm:$0x1] %vm106_vm2, %v7058_v0 }
  0x43   :  { %3486 = vst.msk [vmem:[#allocation3 + $0x149] sm:$0x1] %vm106_vm2, %v7058_v0  ;;  %3487 = vst.msk [vmem:[#allocation3 + $0x161] sm:$0x1] %vm106_vm2, %v7058_v0 }
  0x44   :  { %3488 = vst.msk [vmem:[#allocation3 + $0x179] sm:$0x1] %vm106_vm2, %v7058_v0  ;;  %3489 = vst.msk [vmem:[#allocation3 + $0x191] sm:$0x1] %vm106_vm2, %v7058_v0 }
  0x45   :  { %3492 = vst.msk [vmem:[#allocation3 + $0x1d9] sm:$0x1] %vm106_vm2, %v7058_v0  ;;  %3493 = vst.msk [vmem:[#allocation3 + $0x1f1] sm:$0x1] %vm106_vm2, %v7058_v0 }
  0x46   :  { %3494 = vst.msk [vmem:[#allocation3 + $0x209] sm:$0x1] %vm106_vm2, %v7058_v0  ;;  %3495 = vst.msk [vmem:[#allocation3 + $0x221] sm:$0x1] %vm106_vm2, %v7058_v0 }
  0x47   :  { %3496 = vst.msk [vmem:[#allocation3 + $0x239] sm:$0x1] %vm106_vm2, %v7058_v0  ;;  %3497 = vst.msk [vmem:[#allocation3 + $0x251] sm:$0x1] %vm106_vm2, %v7058_v0 }
  0x48   :  { %3498 = vst.msk [vmem:[#allocation3 + $0x269] sm:$0x1] %vm106_vm2, %v7058_v0  ;;  %3499 = vst.msk [vmem:[#allocation3 + $0x281] sm:$0x1] %vm106_vm2, %v7058_v0 }
  0x49   :  { %3500 = vst.msk [vmem:[#allocation3 + $0x299] sm:$0x1] %vm106_vm2, %v7058_v0  ;;  %3501 = vst.msk [vmem:[#allocation3 + $0x2b1] sm:$0x1] %vm106_vm2, %v7058_v0 }
  0x4a   :  { %3502 = vst.msk [vmem:[#allocation3 + $0x2c9] sm:$0x1] %vm106_vm2, %v7058_v0  ;;  %3503 = vst.msk [vmem:[#allocation3 + $0x2e1] sm:$0x1] %vm106_vm2, %v7058_v0 }
  0x4b   :  { %3504 = vst.msk [vmem:[#allocation3 + $0x2f9] sm:$0x1] %vm106_vm2, %v7058_v0  ;;  %3505 = vst.msk [vmem:[#allocation3 + $0x311] sm:$0x1] %vm106_vm2, %v7058_v0 }
  0x4c   :  { %3506 = vst.msk [vmem:[#allocation3 + $0x329] sm:$0x1] %vm106_vm2, %v7058_v0  ;;  %3507 = vst.msk [vmem:[#allocation3 + $0x341] sm:$0x1] %vm106_vm2, %v7058_v0 }
  0x4d   :  { %143 = vst.msk [vmem:[#allocation2 + $0x11] sm:$0x1] %vm106_vm2, %v7058_v0  ;;  %107 = vst.msk [vmem:[#allocation2] sm:$0x1] %vm106_vm2, %v7058_v0 }
  0x4e   :  { %180 = vst.msk [vmem:[#allocation2 + $0x19] sm:$0xff] %vm91_vm0, %v27_v1  ;;  %181 = vst.msk [vmem:[#allocation2 + $0x21] sm:$0xff] %vm91_vm0, %v28_v2 }
  0x4f   :  { %124 = vst.msk [vmem:[#allocation2 + $0x198] sm:$0x1] %vm106_vm2, %v7058_v0  ;;  %125 = vst.msk [vmem:[#allocation2 + $0x1b0] sm:$0x1] %vm106_vm2, %v7058_v0 }
  0x50   :  { %142 = vst.msk [vmem:[#allocation2 + $0x348] sm:$0x1] %vm106_vm2, %v7058_v0  ;;  %160 = vst.msk [vmem:[#allocation2 + $0x1a9] sm:$0x1] %vm106_vm2, %v7058_v0 }
  0x51   :  { %161 = vst.msk [vmem:[#allocation2 + $0x1c1] sm:$0x1] %vm106_vm2, %v7058_v0  ;;  %178 = vst.msk [vmem:[#allocation2 + $0x359] sm:$0x1] %vm106_vm2, %v7058_v0 }
  0x52   :  { %3437 = vst.msk [vmem:[#allocation3] sm:$0x1] %vm106_vm2, %v7058_v0  ;;  %3454 = vst.msk [vmem:[#allocation3 + $0x198] sm:$0x1] %vm106_vm2, %v7058_v0 }
  0x53   :  { %3455 = vst.msk [vmem:[#allocation3 + $0x1b0] sm:$0x1] %vm106_vm2, %v7058_v0  ;;  %3472 = vst.msk [vmem:[#allocation3 + $0x348] sm:$0x1] %vm106_vm2, %v7058_v0 }
  0x54   :  { %3473 = vst.msk [vmem:[#allocation3 + $0x11] sm:$0x1] %vm106_vm2, %v7058_v0  ;;  %3490 = vst.msk [vmem:[#allocation3 + $0x1a9] sm:$0x1] %vm106_vm2, %v7058_v0  ;;  %v630_v25 = vld [vmem:[#allocation2 + $0xa] sm:$0xff] }
  0x55   :  { %3491 = vst.msk [vmem:[#allocation3 + $0x1c1] sm:$0x1] %vm106_vm2, %v7058_v0  ;;  %3508 = vst.msk [vmem:[#allocation3 + $0x359] sm:$0x1] %vm106_vm2, %v7058_v0  ;;  %v886_v23 = vld [vmem:[#allocation2 + $0x18] sm:$0xff]  ;;  %v887_v24 = vld [vmem:[#allocation2 + $0x20] sm:$0xff]  ;;  %v693_v29 = vpack.c.bf16 %v630_v25, %v629_v21 }
  0x56   :  { %182 = vst.msk [vmem:[#allocation2 + $0x31] sm:$0xff] %vm91_vm0, %v29_v3  ;;  %183 = vst.msk [vmem:[#allocation2 + $0x39] sm:$0xff] %vm91_vm0, %v30_v4  ;;  %v950_v26 = vpack.c.bf16 %v887_v24, %v886_v23  ;;  %v1143_v27 = vld [vmem:[#allocation2 + $0x19] sm:$0xff]  ;;  %v1144_v28 = vld [vmem:[#allocation2 + $0x21] sm:$0xff] }
  0x57   :  { %184 = vst.msk [vmem:[#allocation2 + $0x49] sm:$0xff] %vm91_vm0, %v31_v5  ;;  %185 = vst.msk [vmem:[#allocation2 + $0x51] sm:$0xff] %vm91_vm0, %v32_v6  ;;  %v1207_v32 = vpack.c.bf16 %v1144_v28, %v1143_v27  ;;  %v1400_v33 = vld [vmem:[#allocation2 + $0x1a] sm:$0xff]  ;;  %v1401_v34 = vld [vmem:[#allocation2 + $0x22] sm:$0xff]  ;;  %757 = vrot.lane.b32.xlu0 %v693_v29, %s7062_s14 }
  0x58   :  { %186 = vst.msk [vmem:[#allocation2 + $0x61] sm:$0xff] %vm91_vm0, %v33_v8  ;;  %187 = vst.msk [vmem:[#allocation2 + $0x69] sm:$0xff] %vm91_vm0, %v34_v9  ;;  %1014 = vrot.lane.b32.xlu1 %v950_v26, %s7061_s13  ;;  %v1464_v43 = vpack.c.bf16 %v1401_v34, %v1400_v33  ;;  %v7037_v6 = vld [vmem:[%s12577_s1 + $0x8] sm:$0xff]   ;;  %v46_v21 = vld [vmem:[%s12576_s0 + $0x98] sm:$0xff] }
  0x59   :  { %188 = vst.msk [vmem:[#allocation2 + $0x79] sm:$0xff] %vm91_vm0, %v35_v10  ;;  %189 = vst.msk [vmem:[#allocation2 + $0x81] sm:$0xff] %vm91_vm0, %v36_v11  ;;  %2535 = vmatpush1.bf16.msra.mxu0 %v7037_v6  ;;  %v7038_v11 = vld [vmem:[%s12577_s1 + $0x10] sm:$0xff]   ;;  %v7040_v23 = vld [vmem:[%s12577_s1 + $0x20] sm:$0xff]  }
  0x5a   :  { %190 = vst.msk [vmem:[#allocation2 + $0x91] sm:$0xff] %vm91_vm0, %v37_v12  ;;  %191 = vst.msk [vmem:[#allocation2 + $0x99] sm:$0xff] %vm91_vm0, %v38_v13  ;;  %v43_v12 = vld [vmem:[%s12576_s0 + $0x80] sm:$0xff]  ;;  %2536 = vmatprep.subr.bf16.mxu0 %v12584_v7  ;;  %v44_v13 = vld [vmem:[%s12576_s0 + $0x88] sm:$0xff] }
  0x5b   :  { %192 = vst.msk [vmem:[#allocation2 + $0xa9] sm:$0xff] %vm91_vm0, %v39_v14  ;;  %193 = vst.msk [vmem:[#allocation2 + $0xb1] sm:$0xff] %vm91_vm0, %v40_v15  ;;  %1528 = vrot.lane.b32.xlu0 %v1464_v43, %s7064_s16  ;;  %v245_v15 = vld [vmem:[#allocation2 + $0x8] sm:$0xff]  ;;  %v47_v29 = vld [vmem:[%s12576_s0 + $0xa0] sm:$0xff] }
  0x5c   :  { %194 = vst.msk [vmem:[#allocation2 + $0xc1] sm:$0xff] %vm91_vm0, %v41_v16  ;;  %195 = vst.msk [vmem:[#allocation2 + $0xc9] sm:$0xff] %vm91_vm0, %v42_v17  ;;  %1271 = vrot.lane.b32.xlu1 %v1207_v32, %s7063_s15  ;;  %v244_v16 = vld [vmem:[#allocation2] sm:$0xff]  ;;  %v7041_v27 = vld [vmem:[%s12577_s1 + $0x28] sm:$0xff]  }
  0x5d   :  { %v1658_v30 = vld [vmem:[#allocation2 + $0x30] sm:$0xff]  ;;  %v1659_v31 = vld [vmem:[#allocation2 + $0x38] sm:$0xff]  ;;  %341 = vst.msk [vmem:[#allocation4 + $0x10] sm:$0xff] %vm91_vm0, %v950_v26  ;;  %196 = vst.msk [vmem:[#allocation2 + $0xd9] sm:$0xff] %vm91_vm0, %v43_v12  ;;  %v308_v18 = vpack.c.bf16 %v245_v15, %v244_v16  ;;  %2537 = vmatpush1.bf16.msra.mxu0 %v7038_v11 }
  0x5e   :  { %v7515_v35 = vpack.c.bf16 %v1659_v31, %v1658_v30  ;;  %v1402_v36 = vld [vmem:[#allocation2 + $0x32] sm:$0xff]  ;;  %v1403_v37 = vld [vmem:[#allocation2 + $0x3a] sm:$0xff]  ;;  %v1660_v38 = vld [vmem:[#allocation2 + $0x48] sm:$0xff]  ;;  %197 = vst.msk [vmem:[#allocation2 + $0xe1] sm:$0xff] %vm91_vm0, %v44_v13  ;;  %2538 = vmatprep.subr.bf16.mxu0 %v12584_v7 }
  0x5f   :  { %v1661_v39 = vld [vmem:[#allocation2 + $0x50] sm:$0xff]  ;;  %v7518_v40 = vpack.c.bf16 %v1403_v37, %v1402_v36  ;;  %v1662_v45 = vld [vmem:[#allocation2 + $0x60] sm:$0xff]  ;;  %v1663_v46 = vld [vmem:[#allocation2 + $0x68] sm:$0xff]  ;;  %340 = vst.msk [vmem:[#allocation4] sm:$0xff] %vm91_vm0, %v308_v18 }
  0x60   :  { %v7520_v41 = vpack.c.bf16 %v1661_v39, %v1660_v38  ;;  %v1404_v42 = vld [vmem:[#allocation2 + $0x4a] sm:$0xff]  ;;  %342 = vst.msk [vmem:[#allocation4 + $0x20] sm:$0xff] %vm91_vm0, %v7515_v35  ;;  %v1405_v44 = vld [vmem:[#allocation2 + $0x52] sm:$0xff]  ;;  %v7528_v50 = vpack.c.bf16 %v1663_v46, %v1662_v45  ;;  %v1406_v51 = vld [vmem:[#allocation2 + $0x62] sm:$0xff]  ;;  %1786 = vrot.lane.b32.xlu1 %v7515_v35, %s7065_s17 }
  0x61   :  { %v1915_v47 = vld [vmem:[#allocation2 + $0x31] sm:$0xff]  ;;  %v1916_v48 = vld [vmem:[#allocation2 + $0x39] sm:$0xff]  ;;  %v7526_v49 = vpack.c.bf16 %v1405_v44, %v1404_v42  ;;  %2268 = vst.msk [vmem:[#allocation4 + $0x8] sm:$0xff] %vm91_vm0, %v7518_v40  ;;  %v1409_v59 = vld [vmem:[#allocation2 + $0x82] sm:$0xff]  ;;  %2539 = vmatpush1.bf16.msra.mxu0 %v7039_v19 }
  0x62   :  { %343 = vst.msk [vmem:[#allocation4 + $0x30] sm:$0xff] %vm91_vm0, %v7520_v41  ;;  %v1407_v52 = vld [vmem:[#allocation2 + $0x6a] sm:$0xff]  ;;  %v1664_v53 = vld [vmem:[#allocation2 + $0x78] sm:$0xff]  ;;  %v1665_v54 = vld [vmem:[#allocation2 + $0x80] sm:$0xff]  ;;  %v7543_v58 = vpack.c.bf16 %v1916_v48, %v1915_v47  ;;  %2540 = vmatprep.subr.bf16.mxu0 %v12584_v7 }
  0x63   :  { %v7534_v55 = vpack.c.bf16 %v1407_v52, %v1406_v51  ;;  %v7536_v56 = vpack.c.bf16 %v1665_v54, %v1664_v53  ;;  %v1408_v57 = vld [vmem:[#allocation2 + $0x7a] sm:$0xff]  ;;  %2269 = vst.msk [vmem:[#allocation4 + $0x18] sm:$0xff] %vm91_vm0, %v7526_v49  ;;  %344 = vst.msk [vmem:[#allocation4 + $0x40] sm:$0xff] %vm91_vm0, %v7528_v50  ;;  %v1666_v60 = vld [vmem:[#allocation2 + $0x90] sm:$0xff] }
  0x64   :  { %v1667_v61 = vld [vmem:[#allocation2 + $0x98] sm:$0xff]  ;;  %v7547_v62 = vpack.c.bf16 %v1409_v59, %v1408_v57  ;;  %v1412_v3 = vld [vmem:[#allocation2 + $0xaa] sm:$0xff]  ;;  %2043 = vrot.lane.b32.xlu0 %v7543_v58, %s7066_s18  ;;  %502 = vrot.lane.b32.xlu1 %v1207_v32, %s7060_s12  ;;  %v1414_v8 = vld [vmem:[#allocation2 + $0xc2] sm:$0xff]  ;;  %198 = vst.msk [vmem:[#allocation2 + $0xf1] sm:$0xff] %vm91_vm0, %v45_v20 }
  0x65   :  { %v7549_v63 = vpack.c.bf16 %v1667_v61, %v1666_v60  ;;  %v1410_v0 = vld [vmem:[#allocation2 + $0x92] sm:$0xff]  ;;  %2270 = vst.msk [vmem:[#allocation4 + $0x28] sm:$0xff] %vm91_vm0, %v7534_v55  ;;  %345 = vst.msk [vmem:[#allocation4 + $0x50] sm:$0xff] %vm91_vm0, %v7536_v56  ;;  %v1411_v1 = vld [vmem:[#allocation2 + $0x9a] sm:$0xff]  ;;  %2541 = vmatpush1.bf16.msra.mxu0 %v7040_v23 }
  0x66   :  { %v7555_v2 = vpack.c.bf16 %v1411_v1, %v1410_v0  ;;  %2271 = vst.msk [vmem:[#allocation4 + $0x38] sm:$0xff] %vm91_vm0, %v7547_v62  ;;  %v1413_v4 = vld [vmem:[#allocation2 + $0xb2] sm:$0xff]  ;;  %v1415_v9 = vld [vmem:[#allocation2 + $0xca] sm:$0xff]  ;;  %199 = vst.msk [vmem:[#allocation2 + $0xf9] sm:$0xff] %vm91_vm0, %v46_v21  ;;  %2542 = vmatprep.subr.bf16.mxu0 %v12584_v7 }
  0x67   :  { %346 = vst.msk [vmem:[#allocation4 + $0x60] sm:$0xff] %vm91_vm0, %v7549_v63  ;;  %v7564_v5 = vpack.c.bf16 %v1413_v4, %v1412_v3  ;;  %v7571_v10 = vpack.c.bf16 %v1415_v9, %v1414_v8  ;;  %v1917_v14 = vld [vmem:[#allocation2 + $0x49] sm:$0xff]  ;;  %v1918_v17 = vld [vmem:[#allocation2 + $0x51] sm:$0xff]  ;;  %v1416_v24 = vld [vmem:[#allocation2 + $0xda] sm:$0xff] }
  0x68   :  { %2272 = vst.msk [vmem:[#allocation4 + $0x48] sm:$0xff] %vm91_vm0, %v7555_v2  ;;  %759 = vrot.lane.b32.xlu0 %v1464_v43, %s7062_s14  ;;  %1016 = vrot.lane.b32.xlu1 %v7515_v35, %s7061_s13  ;;  %v7607_v22 = vpack.c.bf16 %v1918_v17, %v1917_v14  ;;  %v1417_v25 = vld [vmem:[#allocation2 + $0xe2] sm:$0xff]  ;;  %200 = vst.msk [vmem:[#allocation2 + $0x109] sm:$0xff] %vm91_vm0, %v47_v29  ;;  %v49_v31 = vld [vmem:[%s12576_s0 + $0xb0] sm:$0xff] }
  0x69   :  { %2273 = vst.msk [vmem:[#allocation4 + $0x58] sm:$0xff] %vm91_vm0, %v7564_v5  ;;  %2274 = vst.msk [vmem:[#allocation4 + $0x68] sm:$0xff] %vm91_vm0, %v7571_v10  ;;  %v2301_v26 = vld [vmem:[#allocation4 + $0x8] sm:$0xff]  ;;  %v7622_v28 = vpack.c.bf16 %v1417_v25, %v1416_v24  ;;  %v50_v32 = vld [vmem:[%s12576_s0 + $0xb8] sm:$0xff]  ;;  %2543 = vmatpush1.bf16.msra.mxu0 %v7041_v27 }
  0x6a   :  { %6952 = vmatprep.mubr.msk.bf16.mxu0 %vm91_vm0, %v2301_v26  ;;  %v48_v30 = vld [vmem:[%s12576_s0 + $0xa8] sm:$0xff]  ;;  %v51_v33 = vld [vmem:[%s12576_s0 + $0xc0] sm:$0xff]  ;;  %202 = vst.msk [vmem:[#allocation2 + $0x121] sm:$0xff] %vm91_vm0, %v49_v31  ;;  %203 = vst.msk [vmem:[#allocation2 + $0x129] sm:$0xff] %vm91_vm0, %v50_v32  ;;  %2544 = vmatprep.subr.bf16.mxu0 %v12584_v7 }
  0x6b   :  { %201 = vst.msk [vmem:[#allocation2 + $0x111] sm:$0xff] %vm91_vm0, %v48_v30  ;;  %204 = vst.msk [vmem:[#allocation2 + $0x139] sm:$0xff] %vm91_vm0, %v51_v33  ;;  %v52_v37 = vld [vmem:[%s12576_s0 + $0xc8] sm:$0xff]  ;;  %v7042_v38 = vld [vmem:[%s12577_s1 + $0x30] sm:$0xff]  }
  0x6c   :  { %1273 = vrot.lane.b32.xlu0 %v7543_v58, %s7063_s15  ;;  %1530 = vrot.lane.b32.xlu1 %v7518_v40, %s7064_s16  ;;  %2275 = vst.msk [vmem:[#allocation4 + $0x78] sm:$0xff] %vm91_vm0, %v7622_v28  ;;  %205 = vst.msk [vmem:[#allocation2 + $0x141] sm:$0xff] %vm91_vm0, %v52_v37  ;;  %v1919_v39 = vld [vmem:[#allocation2 + $0x61] sm:$0xff]  ;;  %v7043_v42 = vld [vmem:[%s12577_s1 + $0x38] sm:$0xff]  }
  0x6d   :  { %v1418_v34 = vld [vmem:[#allocation2 + $0xf2] sm:$0xff]  ;;  %v1419_v35 = vld [vmem:[#allocation2 + $0xfa] sm:$0xff]  ;;  %2545 = vmatpush1.bf16.msra.mxu0 %v7042_v38  ;;  %v1668_v9 = vld [vmem:[#allocation2 + $0xa8] sm:$0xff] }
  0x6e   :  { %v7652_v36 = vpack.c.bf16 %v1419_v35, %v1418_v34  ;;  %2546 = vmatprep.subr.bf16.mxu0 %v12584_v7  ;;  %v7044_v51 = vld [vmem:[%s12577_s1 + $0x40] sm:$0xff]   ;;  %v53_v52 = vld [vmem:[%s12576_s0 + $0xd0] sm:$0xff]  ;;  %v54_v53 = vld [vmem:[%s12576_s0 + $0xd8] sm:$0xff] }
  0x6f   :  { %206 = vst.msk [vmem:[#allocation2 + $0x151] sm:$0xff] %vm91_vm0, %v53_v52  ;;  %207 = vst.msk [vmem:[#allocation2 + $0x159] sm:$0xff] %vm91_vm0, %v54_v53  ;;  %v1922_v59 = vld [vmem:[#allocation2 + $0x81] sm:$0xff]  ;;  %v1923_v4 = vld [vmem:[#allocation2 + $0x91] sm:$0xff] }
  0x70   :  { %1788 = vrot.lane.b32.xlu0 %v7520_v41, %s7065_s17  ;;  %2045 = vrot.lane.b32.xlu1 %v7607_v22, %s7066_s18  ;;  %2276 = vst.msk [vmem:[#allocation4 + $0x88] sm:$0xff] %vm91_vm0, %v7652_v36  ;;  %v1924_v6 = vld [vmem:[#allocation2 + $0x99] sm:$0xff]  ;;  %v1669_v11 = vld [vmem:[#allocation2 + $0xb0] sm:$0xff]  ;;  %v1671_v21 = vld [vmem:[#allocation2 + $0xc8] sm:$0xff] }
  0x71   :  { %v1422_v46 = vld [vmem:[#allocation2 + $0x122] sm:$0xff]  ;;  %v1423_v47 = vld [vmem:[#allocation2 + $0x12a] sm:$0xff]  ;;  %2547 = vmatpush1.bf16.msra.mxu0 %v7043_v42  ;;  %v1983_v8 = vpack.c.bf16 %v1924_v6, %v1923_v4  ;;  %v1727_v17 = vpack.c.bf16 %v1669_v11, %v1668_v9  ;;  %v62_v34 = vld [vmem:[%s12576_s0 + $0x118] sm:$0xff] }
  0x72   :  { %v1420_v43 = vld [vmem:[#allocation2 + $0x10a] sm:$0xff]  ;;  %v1421_v44 = vld [vmem:[#allocation2 + $0x112] sm:$0xff]  ;;  %v7678_v48 = vpack.c.bf16 %v1423_v47, %v1422_v46  ;;  %2548 = vmatprep.subr.bf16.mxu0 %v12584_v7  ;;  %v1670_v20 = vld [vmem:[#allocation2 + $0xc0] sm:$0xff]  ;;  %215 = vst.msk [vmem:[#allocation2 + $0x1e9] sm:$0xff] %vm91_vm0, %v62_v34 }
  0x73   :  { %v7674_v45 = vpack.c.bf16 %v1421_v44, %v1420_v43  ;;  %v1424_v54 = vld [vmem:[#allocation2 + $0x13a] sm:$0xff]  ;;  %v1425_v57 = vld [vmem:[#allocation2 + $0x142] sm:$0xff]  ;;  %v1926_v15 = vld [vmem:[#allocation2 + $0xb1] sm:$0xff]  ;;  %v1728_v25 = vpack.c.bf16 %v1671_v21, %v1670_v20 }
  0x74   :  { %504 = vrot.lane.b32.xlu0 %v7543_v58, %s7060_s12  ;;  %761 = vrot.lane.b32.xlu1 %v7518_v40, %s7062_s14  ;;  %v1920_v40 = vld [vmem:[#allocation2 + $0x69] sm:$0xff]  ;;  %2278 = vst.msk [vmem:[#allocation4 + $0xa8] sm:$0xff] %vm91_vm0, %v7678_v48  ;;  %v1921_v58 = vld [vmem:[#allocation2 + $0x79] sm:$0xff]  ;;  %v7703_v60 = vpack.c.bf16 %v1425_v57, %v1424_v54  ;;  %v1927_v26 = vld [vmem:[#allocation2 + $0xc1] sm:$0xff] }
  0x75   :  { %2277 = vst.msk [vmem:[#allocation4 + $0x98] sm:$0xff] %vm91_vm0, %v7674_v45  ;;  %2549 = vmatpush1.bf16.msra.mxu0 %v7044_v51  ;;  %v1982_v61 = vpack.c.bf16 %v1922_v59, %v1921_v58  ;;  %v1925_v14 = vld [vmem:[#allocation2 + $0xa9] sm:$0xff]  ;;  %v260_v32 = vld [vmem:[#allocation2 + $0xc0] sm:$0xff]  ;;  %v1672_v37 = vld [vmem:[#allocation2 + $0xd8] sm:$0xff] }
  0x76   :  { %2279 = vst.msk [vmem:[#allocation4 + $0xb8] sm:$0xff] %vm91_vm0, %v7703_v60  ;;  %v1426_v0 = vld [vmem:[#allocation2 + $0x152] sm:$0xff]  ;;  %v1427_v1 = vld [vmem:[#allocation2 + $0x15a] sm:$0xff]  ;;  %v1928_v27 = vld [vmem:[#allocation2 + $0xc9] sm:$0xff] }
  0x77   :  { %v7724_v3 = vpack.c.bf16 %v1427_v1, %v1426_v0  ;;  %v259_v18 = vld [vmem:[#allocation2 + $0xb0] sm:$0xff]  ;;  %v60_v29 = vld [vmem:[%s12576_s0 + $0x108] sm:$0xff]  ;;  %v1985_v30 = vpack.c.bf16 %v1928_v27, %v1927_v26  ;;  %v1673_v38 = vld [vmem:[#allocation2 + $0xe0] sm:$0xff] }
  0x78   :  { %1018 = vrot.lane.b32.xlu0 %v7520_v41, %s7061_s13  ;;  %1275 = vrot.lane.b32.xlu1 %v7607_v22, %s7063_s15  ;;  %v1981_v41 = vpack.c.bf16 %v1920_v40, %v1919_v39  ;;  %213 = vst.msk [vmem:[#allocation2 + $0x1d1] sm:$0xff] %vm91_vm0, %v60_v29  ;;  %v61_v31 = vld [vmem:[%s12576_s0 + $0x110] sm:$0xff]  ;;  %v261_v33 = vld [vmem:[#allocation2 + $0xc8] sm:$0xff]  ;;  %v1929_v39 = vld [vmem:[#allocation2 + $0xd9] sm:$0xff]  ;;  %v1729_v42 = vpack.c.bf16 %v1673_v38, %v1672_v37 }
  0x79   :  { %2280 = vst.msk [vmem:[#allocation4 + $0xc8] sm:$0xff] %vm91_vm0, %v7724_v3  ;;  %214 = vst.msk [vmem:[#allocation2 + $0x1e1] sm:$0xff] %vm91_vm0, %v61_v31  ;;  %v316_v35 = vpack.c.bf16 %v261_v33, %v260_v32  ;;  %v1930_v40 = vld [vmem:[#allocation2 + $0xe1] sm:$0xff]  ;;  %v262_v44 = vld [vmem:[#allocation2 + $0xd8] sm:$0xff] }
  0x7a   :  { %v1986_v43 = vpack.c.bf16 %v1930_v40, %v1929_v39  ;;  %v63_v46 = vld [vmem:[%s12576_s0 + $0x120] sm:$0xff]  ;;  %v64_v47 = vld [vmem:[%s12576_s0 + $0x128] sm:$0xff]  ;;  %v1674_v51 = vld [vmem:[#allocation2 + $0xf0] sm:$0xff] }
  0x7b   :  { %348 = vst.msk [vmem:[#allocation4 + $0x80] sm:$0xff] %vm91_vm0, %v316_v35  ;;  %216 = vst.msk [vmem:[#allocation2 + $0x1f9] sm:$0xff] %vm91_vm0, %v63_v46  ;;  %v1675_v53 = vld [vmem:[#allocation2 + $0xf8] sm:$0xff]  ;;  %v1435_v57 = vld [vmem:[#allocation2 + $0x1ea] sm:$0xff] }
  0x7c   :  { %1532 = vrot.lane.b32.xlu0 %v7526_v49, %s7064_s16  ;;  %1790 = vrot.lane.b32.xlu1 %v7528_v50, %s7065_s17  ;;  %217 = vst.msk [vmem:[#allocation2 + $0x201] sm:$0xff] %vm91_vm0, %v64_v47  ;;  %v65_v6 = vld [vmem:[%s12576_s0 + $0x130] sm:$0xff]  ;;  %v265_v9 = vld [vmem:[#allocation2 + $0xf8] sm:$0xff]  ;;  %v67_v31 = vld [vmem:[%s12576_s0 + $0x140] sm:$0xff] }
  0x7d   :  { %218 = vst.msk [vmem:[#allocation2 + $0x211] sm:$0xff] %vm91_vm0, %v65_v6  ;;  %v267_v29 = vld [vmem:[#allocation2 + $0x110] sm:$0xff]  ;;  %v68_v32 = vld [vmem:[%s12576_s0 + $0x148] sm:$0xff]  ;;  %220 = vst.msk [vmem:[#allocation2 + $0x229] sm:$0xff] %vm91_vm0, %v67_v31 }
  0x7e   :  { %221 = vst.msk [vmem:[#allocation2 + $0x231] sm:$0xff] %vm91_vm0, %v68_v32  ;;  %v1678_v35 = vld [vmem:[#allocation2 + $0x120] sm:$0xff]  ;;  %v1679_v38 = vld [vmem:[#allocation2 + $0x128] sm:$0xff] }
  0x7f   :  { %v501_v52 = vpop.permute.xlu0 %500  ;;  %v2305_v46 = vld [vmem:[#allocation4 + $0x28] sm:$0xff]  ;;  %v1940_v31 = vld [vmem:[#allocation2 + $0x159] sm:$0xff] }
  0x80   :  { %2047 = vrot.lane.b32.xlu0 %v1981_v41, %s7066_s18  ;;  %506 = vrot.lane.b32.xlu1 %v7607_v22, %s7060_s12  ;;  %v1434_v54 = vld [vmem:[#allocation2 + $0x1e2] sm:$0xff]  ;;  %597 = vst.msk [vmem:[#allocation4] sm:$0xff] %vm596_vm3, %v501_v52 }
  0x81   :  { %v7811_v59 = vpack.c.bf16 %v1435_v57, %v1434_v54  ;;  %v69_v54 = vld [vmem:[%s12576_s0 + $0x150] sm:$0xff]  ;;  %v70_v57 = vld [vmem:[%s12576_s0 + $0x158] sm:$0xff] }
  0x82   :  { %222 = vst.msk [vmem:[#allocation2 + $0x241] sm:$0xff] %vm91_vm0, %v69_v54  ;;  %223 = vst.msk [vmem:[#allocation2 + $0x249] sm:$0xff] %vm91_vm0, %v70_v57 }
  0x83   :  { %2284 = vst.msk [vmem:[#allocation4 + $0x108] sm:$0xff] %vm91_vm0, %v7811_v59 }
  0x84   :  { %763 = vrot.lane.b32.xlu0 %v7526_v49, %s7062_s14  ;;  %1020 = vrot.lane.b32.xlu1 %v7528_v50, %s7061_s13  ;;  %v55_v49 = vld [vmem:[%s12576_s0 + $0xe0] sm:$0xff]  ;;  %v56_v50 = vld [vmem:[%s12576_s0 + $0xe8] sm:$0xff] }
  0x85   :  { %208 = vst.msk [vmem:[#allocation2 + $0x169] sm:$0xff] %vm91_vm0, %v55_v49  ;;  %209 = vst.msk [vmem:[#allocation2 + $0x171] sm:$0xff] %vm91_vm0, %v56_v50  ;;  %v1931_v49 = vld [vmem:[#allocation2 + $0xf1] sm:$0xff]  ;;  %v1932_v50 = vld [vmem:[#allocation2 + $0xf9] sm:$0xff] }
  0x86   :  { %v7821_v1 = vpack.c.bf16 %v1932_v50, %v1931_v49  ;;  %v269_v49 = vld [vmem:[#allocation2 + $0x128] sm:$0xff] }
  0x87   :  { %v1440_v6 = vld [vmem:[#allocation2 + $0x22a] sm:$0xff] }
  0x88   :  { %1277 = vrot.lane.b32.xlu0 %v1981_v41, %s7063_s15  ;;  %1534 = vrot.lane.b32.xlu1 %v7534_v55, %s7064_s16 }
  0x8c   :  { %1792 = vrot.lane.b32.xlu0 %v7536_v56, %s7065_s17  ;;  %2049 = vrot.lane.b32.xlu1 %v1982_v61, %s7066_s18  ;;  %v1428_v12 = vld [vmem:[#allocation2 + $0x16a] sm:$0xff]  ;;  %v1429_v13 = vld [vmem:[#allocation2 + $0x172] sm:$0xff] }
  0x8d   :  { %v7749_v16 = vpack.c.bf16 %v1429_v13, %v1428_v12  ;;  %v1941_v54 = vld [vmem:[#allocation2 + $0x169] sm:$0xff]  ;;  %v1942_v57 = vld [vmem:[#allocation2 + $0x171] sm:$0xff] }
  0x8f   :  { %2281 = vst.msk [vmem:[#allocation4 + $0xd8] sm:$0xff] %vm91_vm0, %v7749_v16 }
  0x90   :  { %508 = vrot.lane.b32.xlu0 %v1981_v41, %s7060_s12  ;;  %765 = vrot.lane.b32.xlu1 %v7534_v55, %s7062_s14  ;;  %v57_v55 = vld [vmem:[%s12576_s0 + $0xf0] sm:$0xff]  ;;  %v263_v41 = vld [vmem:[#allocation2 + $0xe0] sm:$0xff] }
  0x91   :  { %210 = vst.msk [vmem:[#allocation2 + $0x181] sm:$0xff] %vm91_vm0, %v57_v55 }
  0x94   :  { %1022 = vrot.lane.b32.xlu0 %v7536_v56, %s7061_s13  ;;  %1279 = vrot.lane.b32.xlu1 %v1982_v61, %s7063_s15  ;;  %v58_v56 = vld [vmem:[%s12576_s0 + $0xf8] sm:$0xff] }
  0x95   :  { %211 = vst.msk [vmem:[#allocation2 + $0x189] sm:$0xff] %vm91_vm0, %v58_v56  ;;  %v264_v56 = vld [vmem:[#allocation2 + $0xf0] sm:$0xff] }
  0x96   :  { %v318_v11 = vpack.c.bf16 %v265_v9, %v264_v56  ;;  %v1937_v56 = vld [vmem:[#allocation2 + $0x139] sm:$0xff]  ;;  %v1938_v9 = vld [vmem:[#allocation2 + $0x141] sm:$0xff] }
  0x98   :  { %1536 = vrot.lane.b32.xlu0 %v7547_v62, %s7064_s16  ;;  %1794 = vrot.lane.b32.xlu1 %v7549_v63, %s7065_s17  ;;  %350 = vst.msk [vmem:[#allocation4 + $0xa0] sm:$0xff] %vm91_vm0, %v318_v11 }
  0x9c   :  { %2051 = vrot.lane.b32.xlu0 %v1983_v8, %s7066_s18  ;;  %510 = vrot.lane.b32.xlu1 %v1982_v61, %s7060_s12  ;;  %v1430_v22 = vld [vmem:[#allocation2 + $0x182] sm:$0xff]  ;;  %v1431_v23 = vld [vmem:[#allocation2 + $0x18a] sm:$0xff]  ;;  %v1730_v61 = vpack.c.bf16 %v1675_v53, %v1674_v51 }
  0x9d   :  { %v7762_v24 = vpack.c.bf16 %v1431_v23, %v1430_v22  ;;  %v2303_v23 = vld [vmem:[#allocation4 + $0x18] sm:$0xff] }
  0x9f   :  { %2282 = vst.msk [vmem:[#allocation4 + $0xe8] sm:$0xff] %vm91_vm0, %v7762_v24 }
  0xa0   :  { %767 = vrot.lane.b32.xlu0 %v7547_v62, %s7062_s14  ;;  %1024 = vrot.lane.b32.xlu1 %v7549_v63, %s7061_s13  ;;  %v1984_v62 = vpack.c.bf16 %v1926_v15, %v1925_v14  ;;  %v258_v63 = vld [vmem:[#allocation2 + $0xa8] sm:$0xff]  ;;  %v1677_v15 = vld [vmem:[#allocation2 + $0x110] sm:$0xff] }
  0xa1   :  { %v315_v19 = vpack.c.bf16 %v259_v18, %v258_v63  ;;  %v1676_v14 = vld [vmem:[#allocation2 + $0x108] sm:$0xff] }
  0xa2   :  { %v1933_v18 = vld [vmem:[#allocation2 + $0x109] sm:$0xff] }
  0xa3   :  { %347 = vst.msk [vmem:[#allocation4 + $0x70] sm:$0xff] %vm91_vm0, %v315_v19  ;;  %v1934_v19 = vld [vmem:[#allocation2 + $0x111] sm:$0xff] }
  0xa4   :  { %1281 = vrot.lane.b32.xlu0 %v1983_v8, %s7063_s15  ;;  %1538 = vrot.lane.b32.xlu1 %v7555_v2, %s7064_s16  ;;  %v7854_v22 = vpack.c.bf16 %v1934_v19, %v1933_v18  ;;  %v271_v18 = vld [vmem:[#allocation2 + $0x140] sm:$0xff] }
  0xa8   :  { %1796 = vrot.lane.b32.xlu0 %v1727_v17, %s7065_s17  ;;  %2053 = vrot.lane.b32.xlu1 %v1984_v62, %s7066_s18 }
  0xac   :  { %512 = vrot.lane.b32.xlu0 %v1983_v8, %s7060_s12  ;;  %769 = vrot.lane.b32.xlu1 %v7555_v2, %s7062_s14  ;;  %v59_v2 = vld [vmem:[%s12576_s0 + $0x100] sm:$0xff]  ;;  %v66_v8 = vld [vmem:[%s12576_s0 + $0x138] sm:$0xff] }
  0xad   :  { %212 = vst.msk [vmem:[#allocation2 + $0x1c9] sm:$0xff] %vm91_vm0, %v59_v2  ;;  %219 = vst.msk [vmem:[#allocation2 + $0x219] sm:$0xff] %vm91_vm0, %v66_v8  ;;  %v266_v2 = vld [vmem:[#allocation2 + $0x108] sm:$0xff]  ;;  %v1441_v8 = vld [vmem:[#allocation2 + $0x232] sm:$0xff] }
  0xae   :  { %v7911_v11 = vpack.c.bf16 %v1441_v8, %v1440_v6  ;;  %v275_v6 = vld [vmem:[#allocation2 + $0x170] sm:$0xff] }
  0xb0   :  { %1026 = vrot.lane.b32.xlu0 %v1727_v17, %s7061_s13  ;;  %1283 = vrot.lane.b32.xlu1 %v1984_v62, %s7063_s15  ;;  %v1436_v17 = vld [vmem:[#allocation2 + $0x1fa] sm:$0xff]  ;;  %2287 = vst.msk [vmem:[#allocation4 + $0x138] sm:$0xff] %vm91_vm0, %v7911_v11 }
  0xb4   :  { %1540 = vrot.lane.b32.xlu0 %v7564_v5, %s7064_s16  ;;  %1798 = vrot.lane.b32.xlu1 %v1728_v25, %s7065_s17  ;;  %v1438_v39 = vld [vmem:[#allocation2 + $0x212] sm:$0xff]  ;;  %v1439_v40 = vld [vmem:[#allocation2 + $0x21a] sm:$0xff] }
  0xb8   :  { %2055 = vrot.lane.b32.xlu0 %v1985_v30, %s7066_s18  ;;  %514 = vrot.lane.b32.xlu1 %v1984_v62, %s7060_s12  ;;  %v1437_v62 = vld [vmem:[#allocation2 + $0x202] sm:$0xff] }
  0xb9   :  { %v7844_v20 = vpack.c.bf16 %v1437_v62, %v1436_v17 }
  0xbb   :  { %2285 = vst.msk [vmem:[#allocation4 + $0x118] sm:$0xff] %vm91_vm0, %v7844_v20 }
  0xbc   :  { %771 = vrot.lane.b32.xlu0 %v7564_v5, %s7062_s14  ;;  %1028 = vrot.lane.b32.xlu1 %v1728_v25, %s7061_s13  ;;  %v317_v5 = vpack.c.bf16 %v263_v41, %v262_v44  ;;  %v1732_v44 = vpack.c.bf16 %v1679_v38, %v1678_v35  ;;  %v1935_v41 = vld [vmem:[#allocation2 + $0x121] sm:$0xff]  ;;  %v73_v38 = vld [vmem:[%s12576_s0 + $0x170] sm:$0xff] }
  0xbd   :  { %226 = vst.msk [vmem:[#allocation2 + $0x271] sm:$0xff] %vm91_vm0, %v73_v38 }
  0xbe   :  { %349 = vst.msk [vmem:[#allocation4 + $0x90] sm:$0xff] %vm91_vm0, %v317_v5 }
  0xc0   :  { %1285 = vrot.lane.b32.xlu0 %v1985_v30, %s7063_s15  ;;  %1542 = vrot.lane.b32.xlu1 %v7571_v10, %s7064_s16 }
  0xc4   :  { %1800 = vrot.lane.b32.xlu0 %v1729_v42, %s7065_s17  ;;  %2057 = vrot.lane.b32.xlu1 %v1986_v43, %s7066_s18 }
  0xc8   :  { %516 = vrot.lane.b32.xlu0 %v1985_v30, %s7060_s12  ;;  %773 = vrot.lane.b32.xlu1 %v7571_v10, %s7062_s14  ;;  %v319_v30 = vpack.c.bf16 %v267_v29, %v266_v2 }
  0xc9   :  { %v758_v10 = vpop.permute.xlu0 %757 }
  0xca   :  { %v1015_v58 = vpop.permute.xlu1 %1014  ;;  %854 = vst.msk [vmem:[#allocation4] sm:$0xff] %vm853_vm4, %v758_v10 }
  0xcb   :  { %1111 = vst.msk [vmem:[#allocation4] sm:$0xff] %vm1110_vm5, %v1015_v58 }
  0xcc   :  { %1030 = vrot.lane.b32.xlu0 %v1729_v42, %s7061_s13  ;;  %1287 = vrot.lane.b32.xlu1 %v1986_v43, %s7063_s15  ;;  %351 = vst.msk [vmem:[#allocation4 + $0xb0] sm:$0xff] %vm91_vm0, %v319_v30  ;;  %v1939_v30 = vld [vmem:[#allocation2 + $0x151] sm:$0xff] }
  0xcd   :  { %v1529_v4 = vpop.permute.xlu0 %1528  ;;  %v1991_v35 = vpack.c.bf16 %v1940_v31, %v1939_v30  ;;  %v276_v30 = vld [vmem:[#allocation2 + $0x1b0] sm:$0xff]  ;;  %v277_v31 = vld [vmem:[#allocation2 + $0x1b8] sm:$0xff] }
  0xce   :  { %v1272_v0 = vpop.permute.xlu1 %1271 }
  0xcf   :  { %1368 = vst.msk [vmem:[#allocation4] sm:$0xff] %vm1367_vm6, %v1272_v0 }
  0xd0   :  { %1544 = vrot.lane.b32.xlu0 %v7622_v28, %s7064_s16  ;;  %1802 = vrot.lane.b32.xlu1 %v1730_v61, %s7065_s17  ;;  %1625 = vst.msk [vmem:[#allocation4] sm:$0xff] %vm1624_vm7, %v1529_v4  ;;  %v1681_v4 = vld [vmem:[#allocation2 + $0x140] sm:$0xff] }
  0xd2   :  { %v1787_v55 = vpop.permute.xlu1 %1786 }
  0xd3   :  { %1883 = vst.msk [vmem:[#allocation4] sm:$0xff] %vm1882_vm8, %v1787_v55 }
  0xd4   :  { %2059 = vrot.lane.b32.xlu0 %v7821_v1, %s7066_s18  ;;  %518 = vrot.lane.b32.xlu1 %v1986_v43, %s7060_s12  ;;  %v7878_v43 = vpack.c.bf16 %v1439_v40, %v1438_v39  ;;  %v74_v39 = vld [vmem:[%s12576_s0 + $0x178] sm:$0xff] }
  0xd5   :  { %227 = vst.msk [vmem:[#allocation2 + $0x279] sm:$0xff] %vm91_vm0, %v74_v39 }
  0xd6   :  { %v2044_v12 = vpop.permute.xlu0 %2043  ;;  %v503_v13 = vpop.permute.xlu1 %502  ;;  %2286 = vst.msk [vmem:[#allocation4 + $0x128] sm:$0xff] %vm91_vm0, %v7878_v43 }
  0xd7   :  { %2140 = vst.msk [vmem:[#allocation4] sm:$0xff] %vm2139_vm9, %v2044_v12 }
  0xd8   :  { %598 = vst.msk [vmem:[#allocation4 + $0x10] sm:$0xff] %vm596_vm3, %v503_v13  ;;  %775 = vrot.lane.b32.xlu0 %v7622_v28, %s7062_s14  ;;  %1032 = vrot.lane.b32.xlu1 %v1730_v61, %s7061_s13  ;;  %v1731_v28 = vpack.c.bf16 %v1677_v15, %v1676_v14  ;;  %v268_v61 = vld [vmem:[#allocation2 + $0x120] sm:$0xff]  ;;  %v2307_v14 = vld [vmem:[#allocation4 + $0x38] sm:$0xff] }
  0xd9   :  { %v320_v50 = vpack.c.bf16 %v269_v49, %v268_v61 }
  0xda   :  { %v760_v63 = vpop.permute.xlu0 %759  ;;  %v1017_v21 = vpop.permute.xlu1 %1016 }
  0xdb   :  { %855 = vst.msk [vmem:[#allocation4 + $0x10] sm:$0xff] %vm853_vm4, %v760_v63  ;;  %v270_v63 = vld [vmem:[#allocation2 + $0x138] sm:$0xff] }
  0xdc   :  { %1112 = vst.msk [vmem:[#allocation4 + $0x10] sm:$0xff] %vm1110_vm5, %v1017_v21  ;;  %1289 = vrot.lane.b32.xlu0 %v7821_v1, %s7063_s15  ;;  %1546 = vrot.lane.b32.xlu1 %v7652_v36, %s7064_s16  ;;  %v321_v19 = vpack.c.bf16 %v271_v18, %v270_v63  ;;  %v71_v21 = vld [vmem:[%s12576_s0 + $0x160] sm:$0xff]  ;;  %v1944_v63 = vld [vmem:[#allocation2 + $0x189] sm:$0xff] }
  0xdd   :  { %352 = vst.msk [vmem:[#allocation4 + $0xc0] sm:$0xff] %vm91_vm0, %v320_v50  ;;  %224 = vst.msk [vmem:[#allocation2 + $0x259] sm:$0xff] %vm91_vm0, %v71_v21  ;;  %v2311_v50 = vld [vmem:[#allocation4 + $0x58] sm:$0xff] }
  0xde   :  { %v1274_v25 = vpop.permute.xlu0 %1273  ;;  %v2300_v26 = vld [vmem:[#allocation4] sm:$0xff]  ;;  %v1531_v27 = vpop.permute.xlu1 %1530  ;;  %353 = vst.msk [vmem:[#allocation4 + $0xd0] sm:$0xff] %vm91_vm0, %v321_v19  ;;  %v2313_v19 = vld [vmem:[#allocation4 + $0x68] sm:$0xff] }
  0xdf   :  { %1369 = vst.msk [vmem:[#allocation4 + $0x10] sm:$0xff] %vm1367_vm6, %v1274_v25  ;;  %2565 = vmatmul.mubr.bf16.vlgmr.msra.gmra.mrb[0].mxu0 %v2300_v26  ;;  %v1682_v26 = vld [vmem:[#allocation2 + $0x150] sm:$0xff] }
  0xe0   :  { %1626 = vst.msk [vmem:[#allocation4 + $0x10] sm:$0xff] %vm1624_vm7, %v1531_v27  ;;  %1804 = vrot.lane.b32.xlu0 %v1731_v28, %s7065_s17  ;;  %6953 = vmatprep.mubr.msk.bf16.mxu0 %vm91_vm0, %v2303_v23  ;;  %v1683_v27 = vld [vmem:[#allocation2 + $0x158] sm:$0xff] }
  0xe1   :  { %2061 = vrot.lane.b32.xlu1 %v7854_v22, %s7066_s18  ;;  %v1734_v29 = vpack.c.bf16 %v1683_v27, %v1682_v26  ;;  %v77_v27 = vld [vmem:[%s12576_s0 + $0x190] sm:$0xff] }
  0xe2   :  { %v1789_v33 = vpop.permute.xlu0 %1788  ;;  %v2046_v34 = vpop.permute.xlu1 %2045  ;;  %230 = vst.msk [vmem:[#allocation2 + $0x2a1] sm:$0xff] %vm91_vm0, %v77_v27  ;;  %v1948_v27 = vld [vmem:[#allocation2 + $0x1e9] sm:$0xff] }
  0xe3   :  { %1884 = vst.msk [vmem:[#allocation4 + $0x10] sm:$0xff] %vm1882_vm8, %v1789_v33  ;;  %v2309_v33 = vld [vmem:[#allocation4 + $0x48] sm:$0xff] }
  0xe4   :  { %2141 = vst.msk [vmem:[#allocation4 + $0x10] sm:$0xff] %vm2139_vm9, %v2046_v34  ;;  %520 = vrot.lane.b32.xlu0 %v7821_v1, %s7060_s12  ;;  %v1680_v1 = vld [vmem:[#allocation2 + $0x138] sm:$0xff] }
  0xe5   :  { %777 = vrot.lane.b32.xlu1 %v7652_v36, %s7062_s14  ;;  %v1936_v36 = vld [vmem:[#allocation2 + $0x129] sm:$0xff]  ;;  %v1733_v13 = vpack.c.bf16 %v1681_v4, %v1680_v1 }
  0xe6   :  { %v505_v37 = vpop.permute.xlu0 %504  ;;  %v762_v42 = vpop.permute.xlu1 %761  ;;  %v1989_v52 = vpack.c.bf16 %v1936_v36, %v1935_v41  ;;  %v274_v4 = vld [vmem:[#allocation2 + $0x168] sm:$0xff] }
  0xe7   :  { %599 = vst.msk [vmem:[#allocation4 + $0x20] sm:$0xff] %vm596_vm3, %v505_v37  ;;  %v323_v8 = vpack.c.bf16 %v275_v6, %v274_v4  ;;  %v919_v6 = vld [vmem:[#allocation2 + $0x1d0] sm:$0xff] }
  0xe8   :  { %856 = vst.msk [vmem:[#allocation4 + $0x20] sm:$0xff] %vm853_vm4, %v762_v42  ;;  %1034 = vrot.lane.b32.xlu0 %v1731_v28, %s7061_s13  ;;  %v72_v28 = vld [vmem:[%s12576_s0 + $0x168] sm:$0xff]  ;;  %v272_v42 = vld [vmem:[#allocation2 + $0x150] sm:$0xff] }
  0xe9   :  { %1291 = vrot.lane.b32.xlu1 %v7854_v22, %s7063_s15  ;;  %225 = vst.msk [vmem:[#allocation2 + $0x261] sm:$0xff] %vm91_vm0, %v72_v28  ;;  %355 = vst.msk [vmem:[#allocation4 + $0xf0] sm:$0xff] %vm91_vm0, %v323_v8 }
  0xea   :  { %v1019_v5 = vpop.permute.xlu0 %1018  ;;  %v1276_v47 = vpop.permute.xlu1 %1275 }
  0xeb   :  { %1113 = vst.msk [vmem:[#allocation4 + $0x20] sm:$0xff] %vm1110_vm5, %v1019_v5  ;;  %v2302_v51 = vld [vmem:[#allocation4 + $0x10] sm:$0xff] }
  0xec   :  { %1370 = vst.msk [vmem:[#allocation4 + $0x20] sm:$0xff] %vm1367_vm6, %v1276_v47  ;;  %1548 = vrot.lane.b32.xlu0 %v7674_v45, %s7064_s16  ;;  %2573 = vmatmul.mubr.bf16.gmra.mrb[4].mxu0 %v2302_v51  ;;  %v1685_v47 = vld [vmem:[#allocation2 + $0x170] sm:$0xff] }
  0xed   :  { %1806 = vrot.lane.b32.xlu1 %v1732_v44, %s7065_s17  ;;  %6954 = vmatprep.mubr.msk.bf16.mxu0 %vm91_vm0, %v2305_v46  ;;  %v1684_v46 = vld [vmem:[#allocation2 + $0x168] sm:$0xff] }
  0xee   :  { %v1533_v53 = vpop.permute.xlu0 %1532  ;;  %v1791_v58 = vpop.permute.xlu1 %1790  ;;  %v1735_v49 = vpack.c.bf16 %v1685_v47, %v1684_v46  ;;  %v5526_v46 = vld [vmem:[#allocation3 + $0x1a2] sm:$0xff] }
  0xef   :  { %1627 = vst.msk [vmem:[#allocation4 + $0x20] sm:$0xff] %vm1624_vm7, %v1533_v53 }
  0xf0   :  { %1885 = vst.msk [vmem:[#allocation4 + $0x20] sm:$0xff] %vm1882_vm8, %v1791_v58  ;;  %2063 = vrot.lane.b32.xlu0 %v1989_v52, %s7066_s18  ;;  %v1444_v51 = vld [vmem:[#allocation2 + $0x25a] sm:$0xff] }
  0xf1   :  { %522 = vrot.lane.b32.xlu1 %v7854_v22, %s7060_s12 }
  0xf2   :  { %v2048_v10 = vpop.permute.xlu0 %2047  ;;  %v507_v0 = vpop.permute.xlu1 %506 }
  0xf3   :  { %2142 = vst.msk [vmem:[#allocation4 + $0x20] sm:$0xff] %vm2139_vm9, %v2048_v10 }
  0xf4   :  { %600 = vst.msk [vmem:[#allocation4 + $0x30] sm:$0xff] %vm596_vm3, %v507_v0  ;;  %779 = vrot.lane.b32.xlu0 %v7674_v45, %s7062_s14  ;;  %v1990_v45 = vpack.c.bf16 %v1938_v9, %v1937_v56  ;;  %v76_v56 = vld [vmem:[%s12576_s0 + $0x188] sm:$0xff] }
  0xf5   :  { %1036 = vrot.lane.b32.xlu1 %v1732_v44, %s7061_s13  ;;  %v273_v44 = vld [vmem:[#allocation2 + $0x158] sm:$0xff]  ;;  %229 = vst.msk [vmem:[#allocation2 + $0x291] sm:$0xff] %vm91_vm0, %v76_v56  ;;  %v80_v56 = vld [vmem:[%s12576_s0 + $0x1a8] sm:$0xff] }
  0xf6   :  { %v764_v55 = vpop.permute.xlu0 %763  ;;  %v1021_v12 = vpop.permute.xlu1 %1020  ;;  %v322_v41 = vpack.c.bf16 %v273_v44, %v272_v42  ;;  %v1946_v42 = vld [vmem:[#allocation2 + $0x1a1] sm:$0xff]  ;;  %233 = vst.msk [vmem:[#allocation2 + $0x2c1] sm:$0xff] %vm91_vm0, %v80_v56 }
  0xf7   :  { %857 = vst.msk [vmem:[#allocation4 + $0x30] sm:$0xff] %vm853_vm4, %v764_v55  ;;  %v75_v55 = vld [vmem:[%s12576_s0 + $0x180] sm:$0xff] }
  0xf8   :  { %1114 = vst.msk [vmem:[#allocation4 + $0x30] sm:$0xff] %vm1110_vm5, %v1021_v12  ;;  %1293 = vrot.lane.b32.xlu0 %v1989_v52, %s7063_s15  ;;  %v283_v56 = vld [vmem:[#allocation2 + $0x200] sm:$0xff] }
  0xf9   :  { %1550 = vrot.lane.b32.xlu1 %v7678_v48, %s7064_s16  ;;  %354 = vst.msk [vmem:[#allocation4 + $0xe0] sm:$0xff] %vm91_vm0, %v322_v41  ;;  %228 = vst.msk [vmem:[#allocation2 + $0x289] sm:$0xff] %vm91_vm0, %v75_v55  ;;  %v79_v55 = vld [vmem:[%s12576_s0 + $0x1a0] sm:$0xff] }
  0xfa   :  { %v1278_v15 = vpop.permute.xlu0 %1277  ;;  %v2304_v17 = vld [vmem:[#allocation4 + $0x20] sm:$0xff]  ;;  %v1535_v62 = vpop.permute.xlu1 %1534  ;;  %232 = vst.msk [vmem:[#allocation2 + $0x2b9] sm:$0xff] %vm91_vm0, %v79_v55  ;;  %v282_v55 = vld [vmem:[#allocation2 + $0x1f8] sm:$0xff] }
  0xfb   :  { %1371 = vst.msk [vmem:[#allocation4 + $0x30] sm:$0xff] %vm1367_vm6, %v1278_v15  ;;  %2581 = vmatmul.mubr.bf16.gmra.mrb[8].mxu0 %v2304_v17 }
  0xfc   :  { %1628 = vst.msk [vmem:[#allocation4 + $0x30] sm:$0xff] %vm1624_vm7, %v1535_v62  ;;  %1808 = vrot.lane.b32.xlu0 %v1733_v13, %s7065_s17  ;;  %6955 = vmatprep.mubr.msk.bf16.mxu0 %vm91_vm0, %v2307_v14  ;;  %v1687_v14 = vld [vmem:[#allocation2 + $0x188] sm:$0xff]  ;;  %v1449_v38 = vld [vmem:[#allocation2 + $0x292] sm:$0xff] }
  0xfd   :  { %2065 = vrot.lane.b32.xlu1 %v1990_v45, %s7066_s18  ;;  %v1943_v62 = vld [vmem:[#allocation2 + $0x181] sm:$0xff] }
  0xfe   :  { %v1793_v22 = vpop.permute.xlu0 %1792  ;;  %v2050_v23 = vpop.permute.xlu1 %2049  ;;  %v1993_v28 = vpack.c.bf16 %v1944_v63, %v1943_v62  ;;  %v1433_v62 = vld [vmem:[#allocation2 + $0x1d2] sm:$0xff]  ;;  %v1690_v63 = vld [vmem:[#allocation2 + $0x1e0] sm:$0xff] }
  0xff   :  { %1886 = vst.msk [vmem:[#allocation4 + $0x30] sm:$0xff] %vm1882_vm8, %v1793_v22  ;;  %v2202_v22 = vld [vmem:[#allocation2 + $0x19a] sm:$0xff] }
 0x100   :  { %2143 = vst.msk [vmem:[#allocation4 + $0x30] sm:$0xff] %vm2139_vm9, %v2050_v23  ;;  %524 = vrot.lane.b32.xlu0 %v1989_v52, %s7060_s12  ;;  %v1445_v52 = vld [vmem:[#allocation2 + $0x262] sm:$0xff] }
 0x101   :  { %781 = vrot.lane.b32.xlu1 %v7678_v48, %s7062_s14  ;;  %v7967_v58 = vpack.c.bf16 %v1445_v52, %v1444_v51  ;;  %v2203_v23 = vld [vmem:[#allocation2 + $0x1a2] sm:$0xff]  ;;  %v405_v51 = vld [vmem:[#allocation2 + $0x1b9] sm:$0xff] }
 0x102   :  { %v509_v25 = vpop.permute.xlu0 %508  ;;  %v766_v2 = vpop.permute.xlu1 %765  ;;  %v661_v52 = vld [vmem:[#allocation2 + $0x1b2] sm:$0xff] }
 0x103   :  { %601 = vst.msk [vmem:[#allocation4 + $0x40] sm:$0xff] %vm596_vm3, %v509_v25  ;;  %v2251_v25 = vpack.c.bf16 %v2203_v23, %v2202_v22 }
 0x104   :  { %858 = vst.msk [vmem:[#allocation4 + $0x40] sm:$0xff] %vm853_vm4, %v766_v2  ;;  %1038 = vrot.lane.b32.xlu0 %v1733_v13, %s7061_s13  ;;  %v78_v2 = vld [vmem:[%s12576_s0 + $0x198] sm:$0xff] }
 0x105   :  { %1295 = vrot.lane.b32.xlu1 %v1990_v45, %s7063_s15  ;;  %2289 = vst.msk [vmem:[#allocation4 + $0x158] sm:$0xff] %vm91_vm0, %v7967_v58  ;;  %2283 = vst.msk [vmem:[#allocation4 + $0xf8] sm:$0xff] %vm91_vm0, %v2251_v25  ;;  %v1947_v25 = vld [vmem:[#allocation2 + $0x1e1] sm:$0xff] }
 0x106   :  { %v1023_v32 = vpop.permute.xlu0 %1022  ;;  %v1280_v48 = vpop.permute.xlu1 %1279  ;;  %231 = vst.msk [vmem:[#allocation2 + $0x2a9] sm:$0xff] %vm91_vm0, %v78_v2  ;;  %v1708_v2 = vld [vmem:[#allocation2 + $0x2b8] sm:$0xff] }
 0x107   :  { %1115 = vst.msk [vmem:[#allocation4 + $0x40] sm:$0xff] %vm1110_vm5, %v1023_v32  ;;  %v2306_v34 = vld [vmem:[#allocation4 + $0x30] sm:$0xff]  ;;  %v324_v32 = vpack.c.bf16 %v277_v31, %v276_v30  ;;  %v2317_v31 = vld [vmem:[#allocation4 + $0x88] sm:$0xff] }
 0x108   :  { %1372 = vst.msk [vmem:[#allocation4 + $0x40] sm:$0xff] %vm1367_vm6, %v1280_v48  ;;  %1552 = vrot.lane.b32.xlu0 %v7703_v60, %s7064_s16  ;;  %2589 = vmatmul.mubr.bf16.gmra.mrb[12].mxu0 %v2306_v34  ;;  %v1688_v34 = vld [vmem:[#allocation2 + $0x198] sm:$0xff] }
 0x109   :  { %1810 = vrot.lane.b32.xlu1 %v1734_v29, %s7065_s17  ;;  %6956 = vmatprep.mubr.msk.bf16.mxu0 %vm91_vm0, %v2309_v33  ;;  %356 = vst.msk [vmem:[#allocation4 + $0x100] sm:$0xff] %vm91_vm0, %v324_v32 }
 0x10a   :  { %v1537_v37 = vpop.permute.xlu0 %1536  ;;  %v1795_v40 = vpop.permute.xlu1 %1794 }
 0x10b   :  { %1629 = vst.msk [vmem:[#allocation4 + $0x40] sm:$0xff] %vm1624_vm7, %v1537_v37  ;;  %v1448_v37 = vld [vmem:[#allocation2 + $0x28a] sm:$0xff] }
 0x10c   :  { %1887 = vst.msk [vmem:[#allocation4 + $0x40] sm:$0xff] %vm1882_vm8, %v1795_v40  ;;  %2067 = vrot.lane.b32.xlu0 %v1991_v35, %s7066_s18  ;;  %v1945_v40 = vld [vmem:[#allocation2 + $0x199] sm:$0xff]  ;;  %v8029_v44 = vpack.c.bf16 %v1449_v38, %v1448_v37  ;;  %v81_v37 = vld [vmem:[%s12576_s0 + $0x1b0] sm:$0xff] }
 0x10d   :  { %526 = vrot.lane.b32.xlu1 %v1990_v45, %s7060_s12  ;;  %v1686_v45 = vld [vmem:[#allocation2 + $0x180] sm:$0xff]  ;;  %v1994_v47 = vpack.c.bf16 %v1946_v42, %v1945_v40  ;;  %v82_v38 = vld [vmem:[%s12576_s0 + $0x1b8] sm:$0xff]  ;;  %v281_v42 = vld [vmem:[#allocation2 + $0x1e8] sm:$0xff]  ;;  %234 = vst.msk [vmem:[#allocation2 + $0x2d1] sm:$0xff] %vm91_vm0, %v81_v37 }
 0x10e   :  { %v2052_v36 = vpop.permute.xlu0 %2051  ;;  %v511_v5 = vpop.permute.xlu1 %510  ;;  %v1736_v17 = vpack.c.bf16 %v1687_v14, %v1686_v45  ;;  %2291 = vst.msk [vmem:[#allocation4 + $0x178] sm:$0xff] %vm91_vm0, %v8029_v44  ;;  %v280_v40 = vld [vmem:[#allocation2 + $0x1e0] sm:$0xff]  ;;  %235 = vst.msk [vmem:[#allocation2 + $0x2d9] sm:$0xff] %vm91_vm0, %v82_v38  ;;  %v284_v37 = vld [vmem:[#allocation2 + $0x210] sm:$0xff] }
 0x10f   :  { %2144 = vst.msk [vmem:[#allocation4 + $0x40] sm:$0xff] %vm2139_vm9, %v2052_v36  ;;  %v285_v38 = vld [vmem:[#allocation2 + $0x218] sm:$0xff] }
 0x110   :  { %602 = vst.msk [vmem:[#allocation4 + $0x50] sm:$0xff] %vm596_vm3, %v511_v5  ;;  %783 = vrot.lane.b32.xlu0 %v7703_v60, %s7062_s14  ;;  %v7976_v60 = vpack.c.bf16 %v1942_v57, %v1941_v54  ;;  %v5525_v5 = vld [vmem:[#allocation3 + $0x19a] sm:$0xff] }
 0x111   :  { %1040 = vrot.lane.b32.xlu1 %v1734_v29, %s7061_s13  ;;  %v5574_v54 = vpack.c.bf16 %v5526_v46, %v5525_v5  ;;  %v1692_v5 = vld [vmem:[#allocation2 + $0x1f8] sm:$0xff]  ;;  %v1693_v46 = vld [vmem:[#allocation2 + $0x200] sm:$0xff] }
 0x112   :  { %v768_v53 = vpop.permute.xlu0 %767  ;;  %v1025_v61 = vpop.permute.xlu1 %1024 }
 0x113   :  { %859 = vst.msk [vmem:[#allocation4 + $0x50] sm:$0xff] %vm853_vm4, %v768_v53  ;;  %v2315_v53 = vld [vmem:[#allocation4 + $0x78] sm:$0xff] }
 0x114   :  { %1116 = vst.msk [vmem:[#allocation4 + $0x50] sm:$0xff] %vm1110_vm5, %v1025_v61  ;;  %1297 = vrot.lane.b32.xlu0 %v1991_v35, %s7063_s15 }
 0x115   :  { %1554 = vrot.lane.b32.xlu1 %v7724_v3, %s7064_s16 }
 0x116   :  { %v1282_v10 = vpop.permute.xlu0 %1281  ;;  %v2308_v0 = vld [vmem:[#allocation4 + $0x40] sm:$0xff]  ;;  %v1539_v1 = vpop.permute.xlu1 %1538 }
 0x117   :  { %1373 = vst.msk [vmem:[#allocation4 + $0x50] sm:$0xff] %vm1367_vm6, %v1282_v10  ;;  %2597 = vmatmul.mubr.bf16.gmra.mrb[16].mxu0 %v2308_v0  ;;  %v918_v10 = vld [vmem:[#allocation2 + $0x1c8] sm:$0xff] }
 0x118   :  { %1630 = vst.msk [vmem:[#allocation4 + $0x50] sm:$0xff] %vm1624_vm7, %v1539_v1  ;;  %1812 = vrot.lane.b32.xlu0 %v1735_v49, %s7065_s17  ;;  %6957 = vmatprep.mubr.msk.bf16.mxu0 %vm91_vm0, %v2311_v50  ;;  %v278_v0 = vld [vmem:[#allocation2 + $0x1c8] sm:$0xff]  ;;  %v279_v1 = vld [vmem:[#allocation2 + $0x1d0] sm:$0xff]  ;;  %v966_v14 = vpack.c.bf16 %v919_v6, %v918_v10  ;;  %v1739_v10 = vpack.c.bf16 %v1693_v46, %v1692_v5 }
 0x119   :  { %2069 = vrot.lane.b32.xlu1 %v7976_v60, %s7066_s18  ;;  %v325_v8 = vpack.c.bf16 %v279_v1, %v278_v0  ;;  %v2319_v1 = vld [vmem:[#allocation4 + $0x98] sm:$0xff] }
 0x11a   :  { %v1797_v9 = vpop.permute.xlu0 %1796  ;;  %v2054_v12 = vpop.permute.xlu1 %2053 }
 0x11b   :  { %1888 = vst.msk [vmem:[#allocation4 + $0x50] sm:$0xff] %vm1882_vm8, %v1797_v9 }
 0x11c   :  { %2145 = vst.msk [vmem:[#allocation4 + $0x50] sm:$0xff] %vm2139_vm9, %v2054_v12  ;;  %528 = vrot.lane.b32.xlu0 %v1991_v35, %s7060_s12  ;;  %v1689_v35 = vld [vmem:[#allocation2 + $0x1a0] sm:$0xff]  ;;  %v1175_v12 = vld [vmem:[#allocation2 + $0x1c9] sm:$0xff] }
 0x11d   :  { %785 = vrot.lane.b32.xlu1 %v7724_v3, %s7062_s14  ;;  %v1737_v36 = vpack.c.bf16 %v1689_v35, %v1688_v34  ;;  %357 = vst.msk [vmem:[#allocation4 + $0x110] sm:$0xff] %vm91_vm0, %v325_v8  ;;  %v8072_v34 = vpack.c.bf16 %v1948_v27, %v1947_v25  ;;  %v2321_v27 = vld [vmem:[#allocation4 + $0xa8] sm:$0xff] }
 0x11e   :  { %v513_v13 = vpop.permute.xlu0 %512  ;;  %v770_v15 = vpop.permute.xlu1 %769 }
 0x11f   :  { %603 = vst.msk [vmem:[#allocation4 + $0x60] sm:$0xff] %vm596_vm3, %v513_v13  ;;  %v1176_v13 = vld [vmem:[#allocation2 + $0x1d1] sm:$0xff] }
 0x120   :  { %860 = vst.msk [vmem:[#allocation4 + $0x60] sm:$0xff] %vm853_vm4, %v770_v15  ;;  %1042 = vrot.lane.b32.xlu0 %v1735_v49, %s7061_s13  ;;  %v662_v49 = vld [vmem:[#allocation2 + $0x1ba] sm:$0xff]  ;;  %v1223_v15 = vpack.c.bf16 %v1176_v13, %v1175_v12  ;;  %v84_v13 = vld [vmem:[%s12576_s0 + $0x1c8] sm:$0xff] }
 0x121   :  { %1299 = vrot.lane.b32.xlu1 %v7976_v60, %s7063_s15  ;;  %v709_v4 = vpack.c.bf16 %v662_v49, %v661_v52  ;;  %v1453_v52 = vld [vmem:[#allocation2 + $0x2c2] sm:$0xff]  ;;  %v1711_v49 = vld [vmem:[#allocation2 + $0x2d8] sm:$0xff]  ;;  %237 = vst.msk [vmem:[#allocation2 + $0x2f1] sm:$0xff] %vm91_vm0, %v84_v13 }
 0x122   :  { %v1027_v18 = vpop.permute.xlu0 %1026  ;;  %v1284_v3 = vpop.permute.xlu1 %1283  ;;  %v83_v12 = vld [vmem:[%s12576_s0 + $0x1c0] sm:$0xff] }
 0x123   :  { %1117 = vst.msk [vmem:[#allocation4 + $0x60] sm:$0xff] %vm1110_vm5, %v1027_v18  ;;  %v2310_v21 = vld [vmem:[#allocation4 + $0x50] sm:$0xff]  ;;  %v87_v13 = vld [vmem:[%s12576_s0 + $0x1e0] sm:$0xff] }
 0x124   :  { %1374 = vst.msk [vmem:[#allocation4 + $0x60] sm:$0xff] %vm1367_vm6, %v1284_v3  ;;  %1556 = vrot.lane.b32.xlu0 %v7749_v16, %s7064_s16  ;;  %2605 = vmatmul.mubr.bf16.gmra.mrb[20].mxu0 %v2310_v21  ;;  %v1450_v3 = vld [vmem:[#allocation2 + $0x2a2] sm:$0xff]  ;;  %v1451_v21 = vld [vmem:[#allocation2 + $0x2aa] sm:$0xff] }
 0x125   :  { %1814 = vrot.lane.b32.xlu1 %v1736_v17, %s7065_s17  ;;  %6958 = vmatprep.mubr.msk.bf16.mxu0 %vm91_vm0, %v2313_v19  ;;  %v1691_v19 = vld [vmem:[#allocation2 + $0x1e8] sm:$0xff]  ;;  %v8060_v22 = vpack.c.bf16 %v1451_v21, %v1450_v3  ;;  %236 = vst.msk [vmem:[#allocation2 + $0x2e9] sm:$0xff] %vm91_vm0, %v83_v12  ;;  %v1951_v21 = vld [vmem:[#allocation2 + $0x211] sm:$0xff]  ;;  %240 = vst.msk [vmem:[#allocation2 + $0x319] sm:$0xff] %vm91_vm0, %v87_v13 }
 0x126   :  { %v1541_v26 = vpop.permute.xlu0 %1540  ;;  %v1799_v29 = vpop.permute.xlu1 %1798  ;;  %v291_v13 = vld [vmem:[#allocation2 + $0x260] sm:$0xff] }
 0x127   :  { %1631 = vst.msk [vmem:[#allocation4 + $0x60] sm:$0xff] %vm1624_vm7, %v1541_v26  ;;  %v1738_v26 = vpack.c.bf16 %v1691_v19, %v1690_v63  ;;  %v1454_v63 = vld [vmem:[#allocation2 + $0x2d2] sm:$0xff] }
 0x128   :  { %1889 = vst.msk [vmem:[#allocation4 + $0x60] sm:$0xff] %vm1882_vm8, %v1799_v29  ;;  %2071 = vrot.lane.b32.xlu0 %v1993_v28, %s7066_s18  ;;  %v1709_v29 = vld [vmem:[#allocation2 + $0x2c0] sm:$0xff]  ;;  %v1457_v46 = vld [vmem:[#allocation2 + $0x2f2] sm:$0xff] }
 0x129   :  { %530 = vrot.lane.b32.xlu1 %v7976_v60, %s7060_s12  ;;  %v8038_v60 = vld [vmem:[#allocation4 + $0xf8] sm:$0xff]  ;;  %2292 = vst.msk [vmem:[#allocation4 + $0x188] sm:$0xff] %vm91_vm0, %v8060_v22  ;;  %v8067_v32 = vpack.c.bf16 %v1709_v29, %v1708_v2 }
 0x12a   :  { %v2056_v33 = vpop.permute.xlu0 %2055  ;;  %v515_v48 = vpop.permute.xlu1 %514  ;;  %5606 = vst.msk [vmem:[#allocation4 + $0xf8] sm:$0xff] %vm91_vm0, %v5574_v54  ;;  %v1950_v54 = vld [vmem:[#allocation2 + $0x201] sm:$0xff] }
 0x12b   :  { %2146 = vst.msk [vmem:[#allocation4 + $0x60] sm:$0xff] %vm2139_vm9, %v2056_v33 }
 0x12c   :  { %604 = vst.msk [vmem:[#allocation4 + $0x70] sm:$0xff] %vm596_vm3, %v515_v48  ;;  %787 = vrot.lane.b32.xlu0 %v7749_v16, %s7062_s14  ;;  %v404_v16 = vld [vmem:[#allocation2 + $0x1b1] sm:$0xff] }
 0x12d   :  { %1044 = vrot.lane.b32.xlu1 %v1736_v17, %s7061_s13  ;;  %v1432_v17 = vld [vmem:[#allocation2 + $0x1ca] sm:$0xff]  ;;  %367 = vst.msk [vmem:[#allocation4 + $0x1b0] sm:$0xff] %vm91_vm0, %v8067_v32 }
 0x12e   :  { %v772_v39 = vpop.permute.xlu0 %771  ;;  %v1029_v41 = vpop.permute.xlu1 %1028  ;;  %v1480_v23 = vpack.c.bf16 %v1433_v62, %v1432_v17  ;;  %v1695_v62 = vld [vmem:[#allocation2 + $0x218] sm:$0xff]  ;;  %v1713_v25 = vld [vmem:[#allocation2 + $0x2f0] sm:$0xff] }
 0x12f   :  { %861 = vst.msk [vmem:[#allocation4 + $0x70] sm:$0xff] %vm853_vm4, %v772_v39  ;;  %v1456_v5 = vld [vmem:[#allocation2 + $0x2ea] sm:$0xff] }
 0x130   :  { %1118 = vst.msk [vmem:[#allocation4 + $0x70] sm:$0xff] %vm1110_vm5, %v1029_v41  ;;  %1301 = vrot.lane.b32.xlu0 %v1993_v28, %s7063_s15  ;;  %v326_v41 = vpack.c.bf16 %v281_v42, %v280_v40 }
 0x131   :  { %1558 = vrot.lane.b32.xlu1 %v7762_v24, %s7064_s16  ;;  %v452_v24 = vpack.c.bf16 %v405_v51, %v404_v16  ;;  %v1452_v51 = vld [vmem:[#allocation2 + $0x2ba] sm:$0xff] }
 0x132   :  { %v1286_v57 = vpop.permute.xlu0 %1285  ;;  %v2312_v61 = vld [vmem:[#allocation4 + $0x60] sm:$0xff]  ;;  %v1543_v50 = vpop.permute.xlu1 %1542  ;;  %358 = vst.msk [vmem:[#allocation4 + $0x120] sm:$0xff] %vm91_vm0, %v326_v41  ;;  %v1696_v41 = vld [vmem:[#allocation2 + $0x228] sm:$0xff] }
 0x133   :  { %1375 = vst.msk [vmem:[#allocation4 + $0x70] sm:$0xff] %vm1367_vm6, %v1286_v57  ;;  %2613 = vmatmul.mubr.bf16.gmra.mrb[24].mxu0 %v2312_v61  ;;  %v8096_v57 = vpack.c.bf16 %v1453_v52, %v1452_v51  ;;  %v1710_v61 = vld [vmem:[#allocation2 + $0x2d0] sm:$0xff]  ;;  %v8174_v52 = vpack.c.bf16 %v1457_v46, %v1456_v5  ;;  %v1700_v46 = vld [vmem:[#allocation2 + $0x258] sm:$0xff] }
 0x134   :  { %1632 = vst.msk [vmem:[#allocation4 + $0x70] sm:$0xff] %vm1624_vm7, %v1543_v50  ;;  %1816 = vrot.lane.b32.xlu0 %v1737_v36, %s7065_s17  ;;  %6959 = vmatprep.mubr.msk.bf16.mxu0 %vm91_vm0, %v2315_v53  ;;  %v1954_v51 = vld [vmem:[#allocation2 + $0x231] sm:$0xff] }
 0x135   :  { %2073 = vrot.lane.b32.xlu1 %v1994_v47, %s7066_s18  ;;  %v1949_v47 = vld [vmem:[#allocation2 + $0x1f9] sm:$0xff]  ;;  %2293 = vst.msk [vmem:[#allocation4 + $0x198] sm:$0xff] %vm91_vm0, %v8096_v57  ;;  %2295 = vst.msk [vmem:[#allocation4 + $0x1b8] sm:$0xff] %vm91_vm0, %v8174_v52 }
 0x136   :  { %v1801_v9 = vpop.permute.xlu0 %1800  ;;  %v2058_v45 = vpop.permute.xlu1 %2057  ;;  %v8108_v0 = vpack.c.bf16 %v1950_v54, %v1949_v47 }
 0x137   :  { %1890 = vst.msk [vmem:[#allocation4 + $0x70] sm:$0xff] %vm1882_vm8, %v1801_v9  ;;  %v327_v9 = vpack.c.bf16 %v283_v56, %v282_v55  ;;  %v286_v55 = vld [vmem:[#allocation2 + $0x228] sm:$0xff]  ;;  %v287_v56 = vld [vmem:[#allocation2 + $0x230] sm:$0xff] }
 0x138   :  { %2147 = vst.msk [vmem:[#allocation4 + $0x70] sm:$0xff] %vm2139_vm9, %v2058_v45  ;;  %532 = vrot.lane.b32.xlu0 %v452_v24, %s7060_s12  ;;  %v8099_v24 = vpack.c.bf16 %v1711_v49, %v1710_v61  ;;  %v329_v12 = vpack.c.bf16 %v287_v56, %v286_v55  ;;  %v2216_v56 = vld [vmem:[#allocation2 + $0x272] sm:$0xff] }
 0x139   :  { %789 = vrot.lane.b32.xlu1 %v709_v4, %s7062_s14  ;;  %359 = vst.msk [vmem:[#allocation4 + $0x130] sm:$0xff] %vm91_vm0, %v327_v9 }
 0x13a   :  { %v517_v18 = vpop.permute.xlu0 %516  ;;  %v774_v28 = vpop.permute.xlu1 %773  ;;  %368 = vst.msk [vmem:[#allocation4 + $0x1c0] sm:$0xff] %vm91_vm0, %v8099_v24  ;;  %361 = vst.msk [vmem:[#allocation4 + $0x150] sm:$0xff] %vm91_vm0, %v329_v12  ;;  %v290_v12 = vld [vmem:[#allocation2 + $0x258] sm:$0xff] }
 0x13b   :  { %605 = vst.msk [vmem:[#allocation4 + $0x80] sm:$0xff] %vm596_vm3, %v517_v18  ;;  %v1455_v18 = vld [vmem:[#allocation2 + $0x2da] sm:$0xff] }
 0x13c   :  { %862 = vst.msk [vmem:[#allocation4 + $0x80] sm:$0xff] %vm853_vm4, %v774_v28  ;;  %1046 = vrot.lane.b32.xlu0 %v966_v14, %s7061_s13  ;;  %v8134_v3 = vpack.c.bf16 %v1455_v18, %v1454_v63  ;;  %v1699_v63 = vld [vmem:[#allocation2 + $0x248] sm:$0xff] }
 0x13d   :  { %1303 = vrot.lane.b32.xlu1 %v1223_v15, %s7063_s15 }
 0x13e   :  { %v1031_v30 = vpop.permute.xlu0 %1030  ;;  %v1288_v33 = vpop.permute.xlu1 %1287  ;;  %2294 = vst.msk [vmem:[#allocation4 + $0x1a8] sm:$0xff] %vm91_vm0, %v8134_v3 }
 0x13f   :  { %1119 = vst.msk [vmem:[#allocation4 + $0x80] sm:$0xff] %vm1110_vm5, %v1031_v30  ;;  %v2314_v48 = vld [vmem:[#allocation4 + $0x70] sm:$0xff] }
 0x140   :  { %1376 = vst.msk [vmem:[#allocation4 + $0x80] sm:$0xff] %vm1367_vm6, %v1288_v33  ;;  %1560 = vrot.lane.b32.xlu0 %v1480_v23, %s7064_s16  ;;  %2621 = vmatmul.mubr.bf16.gmra.mrb[28].mxu0 %v2314_v48  ;;  %v85_v48 = vld [vmem:[%s12576_s0 + $0x1d0] sm:$0xff] }
 0x141   :  { %1818 = vrot.lane.b32.xlu1 %v1738_v26, %s7065_s17  ;;  %6960 = vmatprep.mubr.msk.bf16.mxu0 %vm91_vm0, %v2317_v31  ;;  %238 = vst.msk [vmem:[#allocation2 + $0x301] sm:$0xff] %vm91_vm0, %v85_v48 }
 0x142   :  { %v1545_v35 = vpop.permute.xlu0 %1544  ;;  %v1803_v39 = vpop.permute.xlu1 %1802 }
 0x143   :  { %1633 = vst.msk [vmem:[#allocation4 + $0x80] sm:$0xff] %vm1624_vm7, %v1545_v35 }
 0x144   :  { %1891 = vst.msk [vmem:[#allocation4 + $0x80] sm:$0xff] %vm1882_vm8, %v1803_v39  ;;  %2075 = vrot.lane.b32.xlu0 %v8072_v34, %s7066_s18  ;;  %v328_v39 = vpack.c.bf16 %v285_v38, %v284_v37  ;;  %v90_v37 = vld [vmem:[%s12576_s0 + $0x1f8] sm:$0xff] }
 0x145   :  { %534 = vrot.lane.b32.xlu1 %v1223_v15, %s7060_s12  ;;  %v1694_v15 = vld [vmem:[#allocation2 + $0x210] sm:$0xff]  ;;  %243 = vst.msk [vmem:[#allocation2 + $0x339] sm:$0xff] %vm91_vm0, %v90_v37 }
 0x146   :  { %v2060_v36 = vpop.permute.xlu0 %2059  ;;  %v519_v16 = vpop.permute.xlu1 %518  ;;  %v1740_v28 = vpack.c.bf16 %v1695_v62, %v1694_v15  ;;  %360 = vst.msk [vmem:[#allocation4 + $0x140] sm:$0xff] %vm91_vm0, %v328_v39  ;;  %v288_v39 = vld [vmem:[#allocation2 + $0x240] sm:$0xff]  ;;  %v292_v37 = vld [vmem:[#allocation2 + $0x270] sm:$0xff] }
 0x147   :  { %2148 = vst.msk [vmem:[#allocation4 + $0x80] sm:$0xff] %vm2139_vm9, %v2060_v36  ;;  %v1697_v36 = vld [vmem:[#allocation2 + $0x230] sm:$0xff] }
 0x148   :  { %606 = vst.msk [vmem:[#allocation4 + $0x90] sm:$0xff] %vm596_vm3, %v519_v16  ;;  %791 = vrot.lane.b32.xlu0 %v1480_v23, %s7062_s14  ;;  %v1712_v23 = vld [vmem:[#allocation2 + $0x2e8] sm:$0xff] }
 0x149   :  { %1048 = vrot.lane.b32.xlu1 %v1738_v26, %s7061_s13  ;;  %v8142_v2 = vpack.c.bf16 %v1713_v25, %v1712_v23  ;;  %v1953_v16 = vld [vmem:[#allocation2 + $0x229] sm:$0xff]  ;;  %v1716_v25 = vld [vmem:[#allocation2 + $0x318] sm:$0xff] }
 0x14a   :  { %v776_v53 = vpop.permute.xlu0 %775  ;;  %v1033_v50 = vpop.permute.xlu1 %1032 }
 0x14b   :  { %863 = vst.msk [vmem:[#allocation4 + $0x90] sm:$0xff] %vm853_vm4, %v776_v53  ;;  %v1714_v53 = vld [vmem:[#allocation2 + $0x300] sm:$0xff] }
 0x14c   :  { %1120 = vst.msk [vmem:[#allocation4 + $0x90] sm:$0xff] %vm1110_vm5, %v1033_v50  ;;  %1305 = vrot.lane.b32.xlu0 %v8072_v34, %s7063_s15  ;;  %v8186_v50 = vpack.c.bf16 %v1954_v51, %v1953_v16  ;;  %v1443_v16 = vld [vmem:[#allocation2 + $0x24a] sm:$0xff]  ;;  %v1701_v51 = vld [vmem:[#allocation2 + $0x260] sm:$0xff] }
 0x14d   :  { %1562 = vrot.lane.b32.xlu1 %v7811_v59, %s7064_s16  ;;  %369 = vst.msk [vmem:[#allocation4 + $0x1d0] sm:$0xff] %vm91_vm0, %v8142_v2 }
 0x14e   :  { %v1290_v4 = vpop.permute.xlu0 %1289  ;;  %v2316_v6 = vld [vmem:[#allocation4 + $0x80] sm:$0xff]  ;;  %v1547_v8 = vpop.permute.xlu1 %1546 }
 0x14f   :  { %1377 = vst.msk [vmem:[#allocation4 + $0x90] sm:$0xff] %vm1367_vm6, %v1290_v4  ;;  %2629 = vmatmul.mubr.bf16.gmra.mrb[32].mxu0 %v2316_v6  ;;  %v2212_v6 = vld [vmem:[#allocation2 + $0x242] sm:$0xff] }
 0x150   :  { %1634 = vst.msk [vmem:[#allocation4 + $0x90] sm:$0xff] %vm1624_vm7, %v1547_v8  ;;  %1820 = vrot.lane.b32.xlu0 %v1739_v10, %s7065_s17  ;;  %6961 = vmatprep.mubr.msk.bf16.mxu0 %vm91_vm0, %v2319_v1  ;;  %v2213_v8 = vld [vmem:[#allocation2 + $0x24a] sm:$0xff] }
 0x151   :  { %2077 = vrot.lane.b32.xlu1 %v8108_v0, %s7066_s18  ;;  %v2256_v9 = vpack.c.bf16 %v2213_v8, %v2212_v6 }
 0x152   :  { %v1805_v45 = vpop.permute.xlu0 %1804 }
 0x153   :  { %1892 = vst.msk [vmem:[#allocation4 + $0x90] sm:$0xff] %vm1882_vm8, %v1805_v45  ;;  %v2062_v14 = vpop.permute.xlu1 %2061  ;;  %v88_v45 = vld [vmem:[%s12576_s0 + $0x1e8] sm:$0xff] }
 0x154   :  { %2149 = vst.msk [vmem:[#allocation4 + $0x90] sm:$0xff] %vm2139_vm9, %v2062_v14  ;;  %536 = vrot.lane.b32.xlu0 %v8072_v34, %s7060_s12  ;;  %v86_v34 = vld [vmem:[%s12576_s0 + $0x1d8] sm:$0xff] }
 0x155   :  { %793 = vrot.lane.b32.xlu1 %v7811_v59, %s7062_s14  ;;  %v1952_v59 = vld [vmem:[#allocation2 + $0x219] sm:$0xff]  ;;  %239 = vst.msk [vmem:[#allocation2 + $0x309] sm:$0xff] %vm91_vm0, %v86_v34  ;;  %2288 = vst.msk [vmem:[#allocation4 + $0x148] sm:$0xff] %vm91_vm0, %v2256_v9 }
 0x156   :  { %v521_v17 = vpop.permute.xlu0 %520  ;;  %v8148_v31 = vpack.c.bf16 %v1952_v59, %v1951_v21  ;;  %241 = vst.msk [vmem:[#allocation2 + $0x321] sm:$0xff] %vm91_vm0, %v88_v45  ;;  %v1955_v59 = vld [vmem:[#allocation2 + $0x241] sm:$0xff] }
 0x157   :  { %607 = vst.msk [vmem:[#allocation4 + $0xa0] sm:$0xff] %vm596_vm3, %v521_v17  ;;  %v778_v19 = vpop.permute.xlu1 %777  ;;  %v1698_v17 = vld [vmem:[#allocation2 + $0x240] sm:$0xff] }
 0x158   :  { %864 = vst.msk [vmem:[#allocation4 + $0xa0] sm:$0xff] %vm853_vm4, %v778_v19  ;;  %1050 = vrot.lane.b32.xlu0 %v1739_v10, %s7061_s13  ;;  %v2323_v10 = vld [vmem:[#allocation4 + $0xb8] sm:$0xff]  ;;  %v1742_v23 = vpack.c.bf16 %v1699_v63, %v1698_v17 }
 0x159   :  { %1307 = vrot.lane.b32.xlu1 %v8108_v0, %s7063_s15  ;;  %v2217_v9 = vld [vmem:[#allocation2 + $0x27a] sm:$0xff] }
 0x15a   :  { %v1035_v26 = vpop.permute.xlu0 %1034  ;;  %v2258_v45 = vpack.c.bf16 %v2217_v9, %v2216_v56  ;;  %v1706_v56 = vld [vmem:[#allocation2 + $0x2a0] sm:$0xff] }
 0x15b   :  { %1121 = vst.msk [vmem:[#allocation4 + $0xa0] sm:$0xff] %vm1110_vm5, %v1035_v26  ;;  %v1292_v29 = vpop.permute.xlu1 %1291  ;;  %v2318_v30 = vld [vmem:[#allocation4 + $0x90] sm:$0xff] }
 0x15c   :  { %1378 = vst.msk [vmem:[#allocation4 + $0xa0] sm:$0xff] %vm1367_vm6, %v1292_v29  ;;  %1564 = vrot.lane.b32.xlu0 %v7844_v20, %s7064_s16  ;;  %2637 = vmatmul.mubr.bf16.gmra.mrb[36].mxu0 %v2318_v30  ;;  %v1715_v54 = vld [vmem:[#allocation2 + $0x308] sm:$0xff] }
 0x15d   :  { %1822 = vrot.lane.b32.xlu1 %v1740_v28, %s7065_s17  ;;  %6962 = vmatprep.mubr.msk.bf16.mxu0 %vm91_vm0, %v2321_v27  ;;  %v8177_v49 = vpack.c.bf16 %v1715_v54, %v1714_v53  ;;  %v1458_v18 = vld [vmem:[#allocation2 + $0x302] sm:$0xff]  ;;  %v1459_v19 = vld [vmem:[#allocation2 + $0x30a] sm:$0xff]  ;;  %v1460_v53 = vld [vmem:[#allocation2 + $0x31a] sm:$0xff]  ;;  %2290 = vst.msk [vmem:[#allocation4 + $0x168] sm:$0xff] %vm91_vm0, %v2258_v45 }
 0x15e   :  { %v1549_v33 = vpop.permute.xlu0 %1548  ;;  %v1717_v26 = vld [vmem:[#allocation2 + $0x320] sm:$0xff]  ;;  %v2325_v29 = vld [vmem:[#allocation4 + $0xc8] sm:$0xff] }
 0x15f   :  { %1635 = vst.msk [vmem:[#allocation4 + $0xa0] sm:$0xff] %vm1624_vm7, %v1549_v33  ;;  %v1807_v35 = vpop.permute.xlu1 %1806  ;;  %v8221_v30 = vpack.c.bf16 %v1717_v26, %v1716_v25  ;;  %v1461_v54 = vld [vmem:[#allocation2 + $0x322] sm:$0xff]  ;;  %v1959_v25 = vld [vmem:[#allocation2 + $0x271] sm:$0xff]  ;;  %v1960_v26 = vld [vmem:[#allocation2 + $0x279] sm:$0xff] }
 0x160   :  { %1893 = vst.msk [vmem:[#allocation4 + $0xa0] sm:$0xff] %vm1882_vm8, %v1807_v35  ;;  %2079 = vrot.lane.b32.xlu0 %v8148_v31, %s7066_s18  ;;  %v89_v35 = vld [vmem:[%s12576_s0 + $0x1f0] sm:$0xff] }
 0x161   :  { %538 = vrot.lane.b32.xlu1 %v8108_v0, %s7060_s12  ;;  %370 = vst.msk [vmem:[#allocation4 + $0x1e0] sm:$0xff] %vm91_vm0, %v8177_v49  ;;  %371 = vst.msk [vmem:[#allocation4 + $0x1f0] sm:$0xff] %vm91_vm0, %v8221_v30  ;;  %v1964_v45 = vld [vmem:[#allocation2 + $0x2a9] sm:$0xff] }
 0x162   :  { %v2064_v40 = vpop.permute.xlu0 %2063  ;;  %242 = vst.msk [vmem:[#allocation2 + $0x331] sm:$0xff] %vm91_vm0, %v89_v35 }
 0x163   :  { %2150 = vst.msk [vmem:[#allocation4 + $0xa0] sm:$0xff] %vm2139_vm9, %v2064_v40  ;;  %v523_v42 = vpop.permute.xlu1 %522  ;;  %v289_v40 = vld [vmem:[#allocation2 + $0x248] sm:$0xff] }
 0x164   :  { %608 = vst.msk [vmem:[#allocation4 + $0xb0] sm:$0xff] %vm596_vm3, %v523_v42  ;;  %795 = vrot.lane.b32.xlu0 %v7844_v20, %s7062_s14  ;;  %v1741_v20 = vpack.c.bf16 %v1697_v36, %v1696_v41  ;;  %v330_v42 = vpack.c.bf16 %v289_v40, %v288_v39  ;;  %v1442_v36 = vld [vmem:[#allocation2 + $0x242] sm:$0xff] }
 0x165   :  { %1052 = vrot.lane.b32.xlu1 %v1740_v28, %s7061_s13  ;;  %v8213_v28 = vpack.c.bf16 %v1459_v19, %v1458_v18  ;;  %v1703_v18 = vld [vmem:[#allocation2 + $0x278] sm:$0xff] }
 0x166   :  { %v780_v47 = vpop.permute.xlu0 %779  ;;  %362 = vst.msk [vmem:[#allocation4 + $0x160] sm:$0xff] %vm91_vm0, %v330_v42  ;;  %v1446_v42 = vld [vmem:[#allocation2 + $0x272] sm:$0xff] }
 0x167   :  { %865 = vst.msk [vmem:[#allocation4 + $0xb0] sm:$0xff] %vm853_vm4, %v780_v47  ;;  %v1037_v61 = vpop.permute.xlu1 %1036  ;;  %v1485_v47 = vpack.c.bf16 %v1443_v16, %v1442_v36 }
 0x168   :  { %1122 = vst.msk [vmem:[#allocation4 + $0xb0] sm:$0xff] %vm1110_vm5, %v1037_v61  ;;  %1309 = vrot.lane.b32.xlu0 %v8148_v31, %s7063_s15 }
 0x169   :  { %1566 = vrot.lane.b32.xlu1 %v7878_v43, %s7064_s16  ;;  %2296 = vst.msk [vmem:[#allocation4 + $0x1c8] sm:$0xff] %vm91_vm0, %v8213_v28  ;;  %v1462_v19 = vld [vmem:[#allocation2 + $0x332] sm:$0xff] }
 0x16a   :  { %v1294_v0 = vpop.permute.xlu0 %1293  ;;  %v2320_v1 = vld [vmem:[#allocation4 + $0xa0] sm:$0xff] }
 0x16b   :  { %1379 = vst.msk [vmem:[#allocation4 + $0xb0] sm:$0xff] %vm1367_vm6, %v1294_v0  ;;  %v1551_v4 = vpop.permute.xlu1 %1550  ;;  %2645 = vmatmul.mubr.bf16.gmra.mrb[40].mxu0 %v2320_v1 }
 0x16c   :  { %1636 = vst.msk [vmem:[#allocation4 + $0xb0] sm:$0xff] %vm1624_vm7, %v1551_v4  ;;  %1824 = vrot.lane.b32.xlu0 %v1741_v20, %s7065_s17  ;;  %6963 = vmatprep.mubr.msk.bf16.mxu0 %vm91_vm0, %v2323_v10  ;;  %v8253_v10 = vpack.c.bf16 %v1461_v54, %v1460_v53  ;;  %v2327_v4 = vld [vmem:[#allocation4 + $0xd8] sm:$0xff] }
 0x16d   :  { %2081 = vrot.lane.b32.xlu1 %v8186_v50, %s7066_s18  ;;  %v1962_v53 = vld [vmem:[#allocation2 + $0x291] sm:$0xff] }
 0x16e   :  { %v1809_v14 = vpop.permute.xlu0 %1808  ;;  %2297 = vst.msk [vmem:[#allocation4 + $0x1d8] sm:$0xff] %vm91_vm0, %v8253_v10 }
 0x16f   :  { %1894 = vst.msk [vmem:[#allocation4 + $0xb0] sm:$0xff] %vm1882_vm8, %v1809_v14  ;;  %v2066_v15 = vpop.permute.xlu1 %2065  ;;  %v331_v14 = vpack.c.bf16 %v291_v13, %v290_v12  ;;  %v1963_v13 = vld [vmem:[#allocation2 + $0x2a1] sm:$0xff] }
 0x170   :  { %2151 = vst.msk [vmem:[#allocation4 + $0xb0] sm:$0xff] %vm2139_vm9, %v2066_v15  ;;  %540 = vrot.lane.b32.xlu0 %v8148_v31, %s7060_s12 }
 0x171   :  { %797 = vrot.lane.b32.xlu1 %v7878_v43, %s7062_s14  ;;  %v1956_v43 = vld [vmem:[#allocation2 + $0x249] sm:$0xff]  ;;  %363 = vst.msk [vmem:[#allocation4 + $0x170] sm:$0xff] %vm91_vm0, %v331_v14 }
 0x172   :  { %v525_v62 = vpop.permute.xlu0 %524  ;;  %v8227_v48 = vpack.c.bf16 %v1956_v43, %v1955_v59 }
 0x173   :  { %609 = vst.msk [vmem:[#allocation4 + $0xc0] sm:$0xff] %vm596_vm3, %v525_v62  ;;  %v782_v21 = vpop.permute.xlu1 %781  ;;  %v1702_v62 = vld [vmem:[#allocation2 + $0x270] sm:$0xff] }
 0x174   :  { %866 = vst.msk [vmem:[#allocation4 + $0xc0] sm:$0xff] %vm853_vm4, %v782_v21  ;;  %1054 = vrot.lane.b32.xlu0 %v1741_v20, %s7061_s13  ;;  %v1957_v20 = vld [vmem:[#allocation2 + $0x259] sm:$0xff]  ;;  %v1744_v43 = vpack.c.bf16 %v1703_v18, %v1702_v62 }
 0x175   :  { %1311 = vrot.lane.b32.xlu1 %v8186_v50, %s7063_s15  ;;  %v1463_v21 = vld [vmem:[#allocation2 + $0x33a] sm:$0xff] }
 0x176   :  { %v1039_v27 = vpop.permute.xlu0 %1038 }
 0x177   :  { %1123 = vst.msk [vmem:[#allocation4 + $0xc0] sm:$0xff] %vm1110_vm5, %v1039_v27  ;;  %v1296_v31 = vpop.permute.xlu1 %1295  ;;  %v2322_v33 = vld [vmem:[#allocation4 + $0xb0] sm:$0xff] }
 0x178   :  { %1380 = vst.msk [vmem:[#allocation4 + $0xc0] sm:$0xff] %vm1367_vm6, %v1296_v31  ;;  %1568 = vrot.lane.b32.xlu0 %v7911_v11, %s7064_s16  ;;  %2653 = vmatmul.mubr.bf16.gmra.mrb[44].mxu0 %v2322_v33 }
 0x179   :  { %1826 = vrot.lane.b32.xlu1 %v1742_v23, %s7065_s17  ;;  %6964 = vmatprep.mubr.msk.bf16.mxu0 %vm91_vm0, %v2325_v29  ;;  %v2329_v29 = vld [vmem:[#allocation4 + $0xe8] sm:$0xff] }
 0x17a   :  { %v1553_v34 = vpop.permute.xlu0 %1552 }
 0x17b   :  { %1637 = vst.msk [vmem:[#allocation4 + $0xc0] sm:$0xff] %vm1624_vm7, %v1553_v34  ;;  %v1811_v38 = vpop.permute.xlu1 %1810 }
 0x17c   :  { %1895 = vst.msk [vmem:[#allocation4 + $0xc0] sm:$0xff] %vm1882_vm8, %v1811_v38  ;;  %2083 = vrot.lane.b32.xlu0 %v8227_v48, %s7066_s18  ;;  %v293_v38 = vld [vmem:[#allocation2 + $0x278] sm:$0xff] }
 0x17d   :  { %542 = vrot.lane.b32.xlu1 %v8186_v50, %s7060_s12  ;;  %v1958_v50 = vld [vmem:[#allocation2 + $0x261] sm:$0xff]  ;;  %v332_v39 = vpack.c.bf16 %v293_v38, %v292_v37  ;;  %v1965_v38 = vld [vmem:[#allocation2 + $0x2b9] sm:$0xff] }
 0x17e   :  { %v2068_v41 = vpop.permute.xlu0 %2067  ;;  %v2000_v1 = vpack.c.bf16 %v1958_v50, %v1957_v20 }
 0x17f   :  { %2152 = vst.msk [vmem:[#allocation4 + $0xc0] sm:$0xff] %vm2139_vm9, %v2068_v41  ;;  %v527_v5 = vpop.permute.xlu1 %526  ;;  %v1447_v41 = vld [vmem:[#allocation2 + $0x27a] sm:$0xff] }
 0x180   :  { %610 = vst.msk [vmem:[#allocation4 + $0xd0] sm:$0xff] %vm596_vm3, %v527_v5  ;;  %799 = vrot.lane.b32.xlu0 %v7911_v11, %s7062_s14  ;;  %v1743_v11 = vpack.c.bf16 %v1701_v51, %v1700_v46  ;;  %v1487_v16 = vpack.c.bf16 %v1447_v41, %v1446_v42  ;;  %v1704_v5 = vld [vmem:[#allocation2 + $0x288] sm:$0xff]  ;;  %v1705_v46 = vld [vmem:[#allocation2 + $0x290] sm:$0xff]  ;;  %v2335_v41 = vld [vmem:[#allocation4 + $0x118] sm:$0xff] }
 0x181   :  { %1056 = vrot.lane.b32.xlu1 %v1742_v23, %s7061_s13  ;;  %v8275_v23 = vpack.c.bf16 %v1463_v21, %v1462_v19  ;;  %364 = vst.msk [vmem:[#allocation4 + $0x180] sm:$0xff] %vm91_vm0, %v332_v39  ;;  %v1961_v51 = vld [vmem:[#allocation2 + $0x289] sm:$0xff]  ;;  %v1966_v39 = vld [vmem:[#allocation2 + $0x2c1] sm:$0xff] }
 0x182   :  { %v784_v61 = vpop.permute.xlu0 %783  ;;  %v2002_v20 = vpack.c.bf16 %v1962_v53, %v1961_v51  ;;  %v2004_v42 = vpack.c.bf16 %v1966_v39, %v1965_v38 }
 0x183   :  { %867 = vst.msk [vmem:[#allocation4 + $0xd0] sm:$0xff] %vm853_vm4, %v784_v61  ;;  %v1041_v0 = vpop.permute.xlu1 %1040  ;;  %v1745_v61 = vpack.c.bf16 %v1705_v46, %v1704_v5 }
 0x184   :  { %1124 = vst.msk [vmem:[#allocation4 + $0xd0] sm:$0xff] %vm1110_vm5, %v1041_v0  ;;  %1313 = vrot.lane.b32.xlu0 %v8227_v48, %s7063_s15 }
 0x185   :  { %1570 = vrot.lane.b32.xlu1 %v1485_v47, %s7064_s16  ;;  %2298 = vst.msk [vmem:[#allocation4 + $0x1e8] sm:$0xff] %vm91_vm0, %v8275_v23 }
 0x186   :  { %v1298_v6 = vpop.permute.xlu0 %1297  ;;  %v2324_v8 = vld [vmem:[#allocation4 + $0xc0] sm:$0xff] }
 0x187   :  { %1381 = vst.msk [vmem:[#allocation4 + $0xd0] sm:$0xff] %vm1367_vm6, %v1298_v6  ;;  %v1555_v55 = vpop.permute.xlu1 %1554  ;;  %2661 = vmatmul.mubr.bf16.gmra.mrb[48].mxu0 %v2324_v8 }
 0x188   :  { %1638 = vst.msk [vmem:[#allocation4 + $0xd0] sm:$0xff] %vm1624_vm7, %v1555_v55  ;;  %1828 = vrot.lane.b32.xlu0 %v1743_v11, %s7065_s17  ;;  %6965 = vmatprep.mubr.msk.bf16.mxu0 %vm91_vm0, %v2327_v4 }
 0x189   :  { %2085 = vrot.lane.b32.xlu1 %v2000_v1, %s7066_s18 }
 0x18a   :  { %v1813_v15 = vpop.permute.xlu0 %1812 }
 0x18b   :  { %1896 = vst.msk [vmem:[#allocation4 + $0xd0] sm:$0xff] %vm1882_vm8, %v1813_v15  ;;  %v2070_v17 = vpop.permute.xlu1 %2069  ;;  %v2333_v15 = vld [vmem:[#allocation4 + $0x108] sm:$0xff] }
 0x18c   :  { %2153 = vst.msk [vmem:[#allocation4 + $0xd0] sm:$0xff] %vm2139_vm9, %v2070_v17  ;;  %544 = vrot.lane.b32.xlu0 %v8227_v48, %s7060_s12  ;;  %v2001_v48 = vpack.c.bf16 %v1960_v26, %v1959_v25  ;;  %v297_v25 = vld [vmem:[#allocation2 + $0x2a8] sm:$0xff] }
 0x18d   :  { %801 = vrot.lane.b32.xlu1 %v1485_v47, %s7062_s14 }
 0x18e   :  { %v529_v63 = vpop.permute.xlu0 %528 }
 0x18f   :  { %611 = vst.msk [vmem:[#allocation4 + $0xe0] sm:$0xff] %vm596_vm3, %v529_v63  ;;  %v786_v59 = vpop.permute.xlu1 %785  ;;  %v2003_v63 = vpack.c.bf16 %v1964_v45, %v1963_v13 }
 0x190   :  { %868 = vst.msk [vmem:[#allocation4 + $0xe0] sm:$0xff] %vm853_vm4, %v786_v59  ;;  %1058 = vrot.lane.b32.xlu0 %v1743_v11, %s7061_s13  ;;  %v294_v11 = vld [vmem:[#allocation2 + $0x288] sm:$0xff] }
 0x191   :  { %1315 = vrot.lane.b32.xlu1 %v2000_v1, %s7063_s15 }
 0x192   :  { %v1043_v27 = vpop.permute.xlu0 %1042 }
 0x193   :  { %1125 = vst.msk [vmem:[#allocation4 + $0xe0] sm:$0xff] %vm1110_vm5, %v1043_v27  ;;  %v1300_v31 = vpop.permute.xlu1 %1299  ;;  %v2326_v33 = vld [vmem:[#allocation4 + $0xd0] sm:$0xff] }
 0x194   :  { %1382 = vst.msk [vmem:[#allocation4 + $0xe0] sm:$0xff] %vm1367_vm6, %v1300_v31  ;;  %1572 = vrot.lane.b32.xlu0 %v7967_v58, %s7064_s16  ;;  %2669 = vmatmul.mubr.bf16.gmra.mrb[52].mxu0 %v2326_v33 }
 0x195   :  { %1830 = vrot.lane.b32.xlu1 %v1744_v43, %s7065_s17  ;;  %6966 = vmatprep.mubr.msk.bf16.mxu0 %vm91_vm0, %v2329_v29 }
 0x196   :  { %v1557_v34 = vpop.permute.xlu0 %1556 }
 0x197   :  { %1639 = vst.msk [vmem:[#allocation4 + $0xe0] sm:$0xff] %vm1624_vm7, %v1557_v34  ;;  %v1815_v35 = vpop.permute.xlu1 %1814 }
 0x198   :  { %1897 = vst.msk [vmem:[#allocation4 + $0xe0] sm:$0xff] %vm1882_vm8, %v1815_v35  ;;  %2087 = vrot.lane.b32.xlu0 %v2001_v48, %s7066_s18 }
 0x199   :  { %546 = vrot.lane.b32.xlu1 %v2000_v1, %s7060_s12  ;;  %v295_v1 = vld [vmem:[#allocation2 + $0x290] sm:$0xff] }
 0x19a   :  { %v2072_v40 = vpop.permute.xlu0 %2071  ;;  %v333_v4 = vpack.c.bf16 %v295_v1, %v294_v11  ;;  %v1967_v1 = vld [vmem:[#allocation2 + $0x2d1] sm:$0xff] }
 0x19b   :  { %2154 = vst.msk [vmem:[#allocation4 + $0xe0] sm:$0xff] %vm2139_vm9, %v2072_v40  ;;  %v531_v36 = vpop.permute.xlu1 %530 }
 0x19c   :  { %612 = vst.msk [vmem:[#allocation4 + $0xf0] sm:$0xff] %vm596_vm3, %v531_v36  ;;  %803 = vrot.lane.b32.xlu0 %v7967_v58, %s7062_s14 }
 0x19d   :  { %1060 = vrot.lane.b32.xlu1 %v1744_v43, %s7061_s13  ;;  %365 = vst.msk [vmem:[#allocation4 + $0x190] sm:$0xff] %vm91_vm0, %v333_v4  ;;  %v296_v43 = vld [vmem:[#allocation2 + $0x2a0] sm:$0xff] }
 0x19e   :  { %v788_v47 = vpop.permute.xlu0 %787  ;;  %v334_v27 = vpack.c.bf16 %v297_v25, %v296_v43  ;;  %v1968_v4 = vld [vmem:[#allocation2 + $0x2d9] sm:$0xff]  ;;  %v1970_v43 = vld [vmem:[#allocation2 + $0x2f1] sm:$0xff] }
 0x19f   :  { %869 = vst.msk [vmem:[#allocation4 + $0xf0] sm:$0xff] %vm853_vm4, %v788_v47  ;;  %v1045_v54 = vpop.permute.xlu1 %1044 }
 0x1a0   :  { %1126 = vst.msk [vmem:[#allocation4 + $0xf0] sm:$0xff] %vm1110_vm5, %v1045_v54  ;;  %1317 = vrot.lane.b32.xlu0 %v2001_v48, %s7063_s15 }
 0x1a1   :  { %1574 = vrot.lane.b32.xlu1 %v1487_v16, %s7064_s16  ;;  %366 = vst.msk [vmem:[#allocation4 + $0x1a0] sm:$0xff] %vm91_vm0, %v334_v27 }
 0x1a2   :  { %v1302_v58 = vpop.permute.xlu0 %1301  ;;  %v2328_v50 = vld [vmem:[#allocation4 + $0xe0] sm:$0xff] }
 0x1a3   :  { %1383 = vst.msk [vmem:[#allocation4 + $0xf0] sm:$0xff] %vm1367_vm6, %v1302_v58  ;;  %v1559_v0 = vpop.permute.xlu1 %1558  ;;  %2677 = vmatmul.mubr.bf16.gmra.mrb[56].mxu0 %v2328_v50 }
 0x1a4   :  { %1640 = vst.msk [vmem:[#allocation4 + $0xf0] sm:$0xff] %vm1624_vm7, %v1559_v0  ;;  %1832 = vrot.lane.b32.xlu0 %v1745_v61, %s7065_s17  ;;  %6967 = vmatprep.mubr.msk.bf16.mxu0 %vm91_vm0, %v8038_v60  ;;  %v1707_v60 = vld [vmem:[#allocation2 + $0x2a8] sm:$0xff] }
 0x1a5   :  { %2089 = vrot.lane.b32.xlu1 %v2002_v20, %s7066_s18  ;;  %v1746_v12 = vpack.c.bf16 %v1707_v60, %v1706_v56 }
 0x1a6   :  { %v1817_v6 = vpop.permute.xlu0 %1816 }
 0x1a7   :  { %1898 = vst.msk [vmem:[#allocation4 + $0xf0] sm:$0xff] %vm1882_vm8, %v1817_v6  ;;  %v2074_v8 = vpop.permute.xlu1 %2073 }
 0x1a8   :  { %2155 = vst.msk [vmem:[#allocation4 + $0xf0] sm:$0xff] %vm2139_vm9, %v2074_v8  ;;  %548 = vrot.lane.b32.xlu0 %v2001_v48, %s7060_s12  ;;  %v2337_v8 = vld [vmem:[#allocation4 + $0x128] sm:$0xff] }
 0x1a9   :  { %805 = vrot.lane.b32.xlu1 %v1487_v16, %s7062_s14 }
 0x1aa   :  { %v533_v55 = vpop.permute.xlu0 %532 }
 0x1ab   :  { %613 = vst.msk [vmem:[#allocation4 + $0x100] sm:$0xff] %vm596_vm3, %v533_v55  ;;  %v790_v9 = vpop.permute.xlu1 %789 }
 0x1ac   :  { %870 = vst.msk [vmem:[#allocation4 + $0x100] sm:$0xff] %vm853_vm4, %v790_v9  ;;  %1062 = vrot.lane.b32.xlu0 %v1745_v61, %s7061_s13 }
 0x1ad   :  { %1319 = vrot.lane.b32.xlu1 %v2002_v20, %s7063_s15 }
 0x1ae   :  { %v1047_v14 = vpop.permute.xlu0 %1046 }
 0x1af   :  { %1127 = vst.msk [vmem:[#allocation4 + $0x100] sm:$0xff] %vm1110_vm5, %v1047_v14  ;;  %v1304_v17 = vpop.permute.xlu1 %1303  ;;  %v2330_v62 = vld [vmem:[#allocation4 + $0xf0] sm:$0xff] }
 0x1b0   :  { %1384 = vst.msk [vmem:[#allocation4 + $0x100] sm:$0xff] %vm1367_vm6, %v1304_v17  ;;  %1576 = vrot.lane.b32.xlu0 %v8029_v44, %s7064_s16  ;;  %2685 = vmatmul.mubr.bf16.gmra.mrb[60].mxu0 %v2330_v62 }
 0x1b1   :  { %1834 = vrot.lane.b32.xlu1 %v1746_v12, %s7065_s17  ;;  %6968 = vmatprep.mubr.msk.bf16.mxu0 %vm91_vm0, %v2333_v15 }
 0x1b2   :  { %v8323_v18 = vpop.f32.mrb[0].mxu0  ;;  %v1561_v19 = vpop.permute.xlu0 %1560 }
 0x1b3   :  { %1641 = vst.msk [vmem:[#allocation4 + $0x100] sm:$0xff] %vm1624_vm7, %v1561_v19  ;;  %v2568_v21 = vpop.f32.mrb[1].mxu0  ;;  %v1819_v59 = vpop.permute.xlu1 %1818  ;;  %v2821_v29 = vsel %vm91_vm0, %v8323_v18, 0.0 }
 0x1b4   :  { %1899 = vst.msk [vmem:[#allocation4 + $0x100] sm:$0xff] %vm1882_vm8, %v1819_v59  ;;  %v8327_v26 = vpop.f32.mrb[2].mxu0  ;;  %2091 = vrot.lane.b32.xlu0 %v2003_v63, %s7066_s18  ;;  %v1969_v59 = vld [vmem:[#allocation2 + $0x2e9] sm:$0xff] }
 0x1b5   :  { %v2822_v31 = vsel %vm91_vm0, %v8327_v26, 0.0  ;;  %v2571_v33 = vpop.f32.mrb[3].mxu0  ;;  %550 = vrot.lane.b32.xlu1 %v2002_v20, %s7060_s12  ;;  %v2006_v27 = vpack.c.bf16 %v1970_v43, %v1969_v59 }
 0x1b6   :  { %v2823_v48 = vadd.f32 %v2822_v31, %v2821_v29  ;;  %v2076_v34 = vpop.permute.xlu0 %2075  ;;  %v2339_v29 = vld [vmem:[#allocation4 + $0x138] sm:$0xff] }
 0x1b7   :  { %2156 = vst.msk [vmem:[#allocation4 + $0x100] sm:$0xff] %vm2139_vm9, %v2076_v34  ;;  %v535_v35 = vpop.permute.xlu1 %534 }
 0x1b8   :  { %614 = vst.msk [vmem:[#allocation4 + $0x110] sm:$0xff] %vm596_vm3, %v535_v35  ;;  %807 = vrot.lane.b32.xlu0 %v8029_v44, %s7062_s14 }
 0x1b9   :  { %1064 = vrot.lane.b32.xlu1 %v1746_v12, %s7061_s13 }
 0x1ba   :  { %v792_v37 = vpop.permute.xlu0 %791 }
 0x1bb   :  { %871 = vst.msk [vmem:[#allocation4 + $0x110] sm:$0xff] %vm853_vm4, %v792_v37  ;;  %v1049_v40 = vpop.permute.xlu1 %1048 }
 0x1bc   :  { %1128 = vst.msk [vmem:[#allocation4 + $0x110] sm:$0xff] %vm1110_vm5, %v1049_v40  ;;  %1321 = vrot.lane.b32.xlu0 %v2003_v63, %s7063_s15 }
 0x1bd   :  { %1578 = vrot.lane.b32.xlu1 %v8060_v22, %s7064_s16 }
 0x1be   :  { %v1306_v36 = vpop.permute.xlu0 %1305  ;;  %v2332_v16 = vld [vmem:[#allocation4 + $0x100] sm:$0xff] }
 0x1bf   :  { %1385 = vst.msk [vmem:[#allocation4 + $0x110] sm:$0xff] %vm1367_vm6, %v1306_v36  ;;  %v1563_v44 = vpop.permute.xlu1 %1562  ;;  %v8347_v5 = vpop.f32.mrb[4].mxu0  ;;  %2693 = vmatmul.mubr.bf16.gmra.mrb[64].mxu0 %v2332_v16 }
 0x1c0   :  { %1642 = vst.msk [vmem:[#allocation4 + $0x110] sm:$0xff] %vm1624_vm7, %v1563_v44  ;;  %v2824_v46 = vsel %vm91_vm0, %v8347_v5, 0.0  ;;  %1836 = vrot.lane.b32.xlu0 %v8067_v32, %s7065_s17  ;;  %v2576_v47 = vpop.f32.mrb[5].mxu0  ;;  %6969 = vmatprep.mubr.msk.bf16.mxu0 %vm91_vm0, %v2335_v41  ;;  %v1971_v44 = vld [vmem:[#allocation2 + $0x301] sm:$0xff] }
 0x1c1   :  { %v2825_v51 = vadd.f32 %v2824_v46, %v2823_v48  ;;  %2093 = vrot.lane.b32.xlu1 %v2004_v42, %s7066_s18  ;;  %v8356_v53 = vpop.f32.mrb[6].mxu0  ;;  %v1972_v46 = vld [vmem:[#allocation2 + $0x309] sm:$0xff] }
 0x1c2   :  { %v2826_v54 = vsel %vm91_vm0, %v8356_v53, 0.0  ;;  %v1821_v61 = vpop.permute.xlu0 %1820  ;;  %v2579_v20 = vpop.f32.mrb[7].mxu0 }
 0x1c3   :  { %v2827_v58 = vadd.f32 %v2826_v54, %v2825_v51  ;;  %1900 = vst.msk [vmem:[#allocation4 + $0x110] sm:$0xff] %vm1882_vm8, %v1821_v61  ;;  %v2078_v50 = vpop.permute.xlu1 %2077  ;;  %v2341_v51 = vld [vmem:[#allocation4 + $0x148] sm:$0xff] }
 0x1c4   :  { %2157 = vst.msk [vmem:[#allocation4 + $0x110] sm:$0xff] %vm2139_vm9, %v2078_v50  ;;  %552 = vrot.lane.b32.xlu0 %v2003_v63, %s7060_s12 }
 0x1c5   :  { %809 = vrot.lane.b32.xlu1 %v8060_v22, %s7062_s14  ;;  %v2005_v22 = vpack.c.bf16 %v1968_v4, %v1967_v1 }
 0x1c6   :  { %v537_v0 = vpop.permute.xlu0 %536 }
 0x1c7   :  { %615 = vst.msk [vmem:[#allocation4 + $0x120] sm:$0xff] %vm596_vm3, %v537_v0  ;;  %v794_v11 = vpop.permute.xlu1 %793 }
 0x1c8   :  { %872 = vst.msk [vmem:[#allocation4 + $0x120] sm:$0xff] %vm853_vm4, %v794_v11  ;;  %1066 = vrot.lane.b32.xlu0 %v8067_v32, %s7061_s13 }
 0x1c9   :  { %1323 = vrot.lane.b32.xlu1 %v2004_v42, %s7063_s15 }
 0x1ca   :  { %v1051_v6 = vpop.permute.xlu0 %1050 }
 0x1cb   :  { %1129 = vst.msk [vmem:[#allocation4 + $0x120] sm:$0xff] %vm1110_vm5, %v1051_v6  ;;  %v1308_v55 = vpop.permute.xlu1 %1307  ;;  %v2334_v56 = vld [vmem:[#allocation4 + $0x110] sm:$0xff] }
 0x1cc   :  { %1386 = vst.msk [vmem:[#allocation4 + $0x120] sm:$0xff] %vm1367_vm6, %v1308_v55  ;;  %1580 = vrot.lane.b32.xlu0 %v8096_v57, %s7064_s16  ;;  %2701 = vmatmul.mubr.bf16.gmra.mrb[68].mxu0 %v2334_v56 }
 0x1cd   :  { %1838 = vrot.lane.b32.xlu1 %v8099_v24, %s7065_s17  ;;  %6970 = vmatprep.mubr.msk.bf16.mxu0 %vm91_vm0, %v2337_v8 }
 0x1ce   :  { %v1565_v32 = vpop.permute.xlu0 %1564  ;;  %v8377_v60 = vpop.f32.mrb[8].mxu0 }
 0x1cf   :  { %1643 = vst.msk [vmem:[#allocation4 + $0x120] sm:$0xff] %vm1624_vm7, %v1565_v32  ;;  %v2828_v9 = vsel %vm91_vm0, %v8377_v60, 0.0  ;;  %v1823_v12 = vpop.permute.xlu1 %1822  ;;  %v2584_v13 = vpop.f32.mrb[9].mxu0  ;;  %v1973_v32 = vld [vmem:[#allocation2 + $0x319] sm:$0xff] }
 0x1d0   :  { %v2829_v45 = vadd.f32 %v2828_v9, %v2827_v58  ;;  %1901 = vst.msk [vmem:[#allocation4 + $0x120] sm:$0xff] %vm1882_vm8, %v1823_v12  ;;  %2095 = vrot.lane.b32.xlu0 %v2005_v22, %s7066_s18  ;;  %v8384_v14 = vpop.f32.mrb[10].mxu0  ;;  %v1974_v9 = vld [vmem:[#allocation2 + $0x321] sm:$0xff] }
 0x1d1   :  { %v2830_v15 = vsel %vm91_vm0, %v8384_v14, 0.0  ;;  %554 = vrot.lane.b32.xlu1 %v2004_v42, %s7060_s12  ;;  %v2587_v17 = vpop.f32.mrb[11].mxu0  ;;  %v8454_v13 = vpack.c.bf16 %v1974_v9, %v1973_v32  ;;  %v1977_v32 = vld [vmem:[#allocation2 + $0x349] sm:$0xff]  ;;  %v1978_v9 = vld [vmem:[#allocation2 + $0x351] sm:$0xff] }
 0x1d2   :  { %v2831_v62 = vadd.f32 %v2830_v15, %v2829_v45  ;;  %v2080_v63 = vpop.permute.xlu0 %2079  ;;  %v2343_v45 = vld [vmem:[#allocation4 + $0x158] sm:$0xff] }
 0x1d3   :  { %2158 = vst.msk [vmem:[#allocation4 + $0x120] sm:$0xff] %vm2139_vm9, %v2080_v63  ;;  %v539_v19 = vpop.permute.xlu1 %538 }
 0x1d4   :  { %616 = vst.msk [vmem:[#allocation4 + $0x130] sm:$0xff] %vm596_vm3, %v539_v19  ;;  %811 = vrot.lane.b32.xlu0 %v8096_v57, %s7062_s14 }
 0x1d5   :  { %1068 = vrot.lane.b32.xlu1 %v8099_v24, %s7061_s13 }
 0x1d6   :  { %v796_v21 = vpop.permute.xlu0 %795 }
 0x1d7   :  { %873 = vst.msk [vmem:[#allocation4 + $0x130] sm:$0xff] %vm853_vm4, %v796_v21  ;;  %v1053_v25 = vpop.permute.xlu1 %1052 }
 0x1d8   :  { %1130 = vst.msk [vmem:[#allocation4 + $0x130] sm:$0xff] %vm1110_vm5, %v1053_v25  ;;  %1325 = vrot.lane.b32.xlu0 %v2005_v22, %s7063_s15 }
 0x1d9   :  { %1582 = vrot.lane.b32.xlu1 %v8134_v3, %s7064_s16 }
 0x1da   :  { %v1310_v31 = vpop.permute.xlu0 %1309  ;;  %v2336_v57 = vld [vmem:[#allocation4 + $0x120] sm:$0xff] }
 0x1db   :  { %1387 = vst.msk [vmem:[#allocation4 + $0x130] sm:$0xff] %vm1367_vm6, %v1310_v31  ;;  %v1567_v24 = vpop.permute.xlu1 %1566  ;;  %v8401_v33 = vpop.f32.mrb[12].mxu0  ;;  %2709 = vmatmul.mubr.bf16.gmra.mrb[72].mxu0 %v2336_v57  ;;  %v1718_v57 = vld [vmem:[#allocation2 + $0x330] sm:$0xff] }
 0x1dc   :  { %1644 = vst.msk [vmem:[#allocation4 + $0x130] sm:$0xff] %vm1624_vm7, %v1567_v24  ;;  %v2832_v48 = vsel %vm91_vm0, %v8401_v33, 0.0  ;;  %1840 = vrot.lane.b32.xlu0 %v8142_v2, %s7065_s17  ;;  %v2592_v34 = vpop.f32.mrb[13].mxu0  ;;  %6971 = vmatprep.mubr.msk.bf16.mxu0 %vm91_vm0, %v2339_v29  ;;  %v1719_v24 = vld [vmem:[#allocation2 + $0x338] sm:$0xff] }
 0x1dd   :  { %v2833_v35 = vadd.f32 %v2832_v48, %v2831_v62  ;;  %2097 = vrot.lane.b32.xlu1 %v2006_v27, %s7066_s18  ;;  %v8410_v37 = vpop.f32.mrb[14].mxu0  ;;  %v1752_v34 = vpack.c.bf16 %v1719_v24, %v1718_v57 }
 0x1de   :  { %v2834_v38 = vsel %vm91_vm0, %v8410_v37, 0.0  ;;  %v1825_v39 = vpop.permute.xlu0 %1824  ;;  %v2595_v40 = vpop.f32.mrb[15].mxu0 }
 0x1df   :  { %v2835_v42 = vadd.f32 %v2834_v38, %v2833_v35  ;;  %1902 = vst.msk [vmem:[#allocation4 + $0x130] sm:$0xff] %vm1882_vm8, %v1825_v39  ;;  %v2082_v41 = vpop.permute.xlu1 %2081  ;;  %v1975_v35 = vld [vmem:[#allocation2 + $0x331] sm:$0xff]  ;;  %v1976_v38 = vld [vmem:[#allocation2 + $0x339] sm:$0xff]  ;;  %v2345_v40 = vld [vmem:[#allocation4 + $0x168] sm:$0xff] }
 0x1e0   :  { %2159 = vst.msk [vmem:[#allocation4 + $0x130] sm:$0xff] %vm2139_vm9, %v2082_v41  ;;  %556 = vrot.lane.b32.xlu0 %v2005_v22, %s7060_s12  ;;  %v2009_v41 = vpack.c.bf16 %v1976_v38, %v1975_v35  ;;  %v2349_v35 = vld [vmem:[#allocation4 + $0x188] sm:$0xff] }
 0x1e1   :  { %813 = vrot.lane.b32.xlu1 %v8134_v3, %s7062_s14  ;;  %v2007_v3 = vpack.c.bf16 %v1972_v46, %v1971_v44 }
 0x1e2   :  { %v541_v36 = vpop.permute.xlu0 %540 }
 0x1e3   :  { %617 = vst.msk [vmem:[#allocation4 + $0x140] sm:$0xff] %vm596_vm3, %v541_v36  ;;  %v798_v16 = vpop.permute.xlu1 %797  ;;  %v2235_v36 = vld [vmem:[#allocation2 + $0x352] sm:$0xff] }
 0x1e4   :  { %874 = vst.msk [vmem:[#allocation4 + $0x140] sm:$0xff] %vm853_vm4, %v798_v16  ;;  %1070 = vrot.lane.b32.xlu0 %v8142_v2, %s7061_s13 }
 0x1e5   :  { %1327 = vrot.lane.b32.xlu1 %v2006_v27, %s7063_s15 }
 0x1e6   :  { %v1055_v47 = vpop.permute.xlu0 %1054 }
 0x1e7   :  { %1131 = vst.msk [vmem:[#allocation4 + $0x140] sm:$0xff] %vm1110_vm5, %v1055_v47  ;;  %v1312_v54 = vpop.permute.xlu1 %1311  ;;  %v2338_v61 = vld [vmem:[#allocation4 + $0x130] sm:$0xff] }
 0x1e8   :  { %1388 = vst.msk [vmem:[#allocation4 + $0x140] sm:$0xff] %vm1367_vm6, %v1312_v54  ;;  %1584 = vrot.lane.b32.xlu0 %v8174_v52, %s7064_s16  ;;  %2717 = vmatmul.mubr.bf16.gmra.mrb[76].mxu0 %v2338_v61 }
 0x1e9   :  { %1842 = vrot.lane.b32.xlu1 %v8177_v49, %s7065_s17  ;;  %6972 = vmatprep.mubr.msk.bf16.mxu0 %vm91_vm0, %v2341_v51 }
 0x1ea   :  { %v1569_v2 = vpop.permute.xlu0 %1568  ;;  %v8431_v20 = vpop.f32.mrb[16].mxu0 }
 0x1eb   :  { %1645 = vst.msk [vmem:[#allocation4 + $0x140] sm:$0xff] %vm1624_vm7, %v1569_v2  ;;  %v2836_v58 = vsel %vm91_vm0, %v8431_v20, 0.0  ;;  %v1827_v50 = vpop.permute.xlu1 %1826  ;;  %v2600_v0 = vpop.f32.mrb[17].mxu0  ;;  %v5557_v2 = vld [vmem:[#allocation3 + $0x34a] sm:$0xff] }
 0x1ec   :  { %v2837_v11 = vadd.f32 %v2836_v58, %v2835_v42  ;;  %1903 = vst.msk [vmem:[#allocation4 + $0x140] sm:$0xff] %vm1882_vm8, %v1827_v50  ;;  %2099 = vrot.lane.b32.xlu0 %v2007_v3, %s7066_s18  ;;  %v8438_v1 = vpop.f32.mrb[18].mxu0  ;;  %v5558_v58 = vld [vmem:[#allocation3 + $0x352] sm:$0xff] }
 0x1ed   :  { %v2838_v4 = vsel %vm91_vm0, %v8438_v1, 0.0  ;;  %558 = vrot.lane.b32.xlu1 %v2006_v27, %s7060_s12  ;;  %v2603_v6 = vpop.f32.mrb[19].mxu0 }
 0x1ee   :  { %v2839_v8 = vadd.f32 %v2838_v4, %v2837_v11  ;;  %v2084_v55 = vpop.permute.xlu0 %2083 }
 0x1ef   :  { %2160 = vst.msk [vmem:[#allocation4 + $0x140] sm:$0xff] %vm2139_vm9, %v2084_v55  ;;  %v543_v56 = vpop.permute.xlu1 %542  ;;  %v1720_v55 = vld [vmem:[#allocation2 + $0x348] sm:$0xff] }
 0x1f0   :  { %618 = vst.msk [vmem:[#allocation4 + $0x150] sm:$0xff] %vm596_vm3, %v543_v56  ;;  %815 = vrot.lane.b32.xlu0 %v8174_v52, %s7062_s14  ;;  %v1721_v56 = vld [vmem:[#allocation2 + $0x350] sm:$0xff] }
 0x1f1   :  { %1072 = vrot.lane.b32.xlu1 %v8177_v49, %s7061_s13 }
 0x1f2   :  { %v800_v22 = vpop.permute.xlu0 %799 }
 0x1f3   :  { %875 = vst.msk [vmem:[#allocation4 + $0x150] sm:$0xff] %vm853_vm4, %v800_v22  ;;  %v1057_v12 = vpop.permute.xlu1 %1056 }
 0x1f4   :  { %1132 = vst.msk [vmem:[#allocation4 + $0x150] sm:$0xff] %vm1110_vm5, %v1057_v12  ;;  %1329 = vrot.lane.b32.xlu0 %v2007_v3, %s7063_s15 }
 0x1f5   :  { %1586 = vrot.lane.b32.xlu1 %v8213_v28, %s7064_s16 }
 0x1f6   :  { %v1314_v52 = vpop.permute.xlu0 %1313  ;;  %v2340_v15 = vld [vmem:[#allocation4 + $0x140] sm:$0xff] }
 0x1f7   :  { %1389 = vst.msk [vmem:[#allocation4 + $0x150] sm:$0xff] %vm1367_vm6, %v1314_v52  ;;  %v1571_v49 = vpop.permute.xlu1 %1570  ;;  %v8457_v17 = vpop.f32.mrb[20].mxu0  ;;  %2725 = vmatmul.mubr.bf16.gmra.mrb[80].mxu0 %v2340_v15  ;;  %v2347_v52 = vld [vmem:[#allocation4 + $0x178] sm:$0xff] }
 0x1f8   :  { %1646 = vst.msk [vmem:[#allocation4 + $0x150] sm:$0xff] %vm1624_vm7, %v1571_v49  ;;  %v2840_v62 = vsel %vm91_vm0, %v8457_v17, 0.0  ;;  %1844 = vrot.lane.b32.xlu0 %v8221_v30, %s7065_s17  ;;  %v2608_v63 = vpop.f32.mrb[21].mxu0  ;;  %6973 = vmatprep.mubr.msk.bf16.mxu0 %vm91_vm0, %v2343_v45  ;;  %v1753_v45 = vpack.c.bf16 %v1721_v56, %v1720_v55 }
 0x1f9   :  { %v2841_v19 = vadd.f32 %v2840_v62, %v2839_v8  ;;  %2101 = vrot.lane.b32.xlu1 %v8454_v13, %s7066_s18  ;;  %v8467_v21 = vpop.f32.mrb[22].mxu0  ;;  %v5590_v8 = vpack.c.bf16 %v5558_v58, %v5557_v2 }
 0x1fa   :  { %v2842_v59 = vsel %vm91_vm0, %v8467_v21, 0.0  ;;  %v1829_v43 = vpop.permute.xlu0 %1828  ;;  %v2611_v25 = vpop.f32.mrb[23].mxu0 }
 0x1fb   :  { %v2843_v27 = vadd.f32 %v2842_v59, %v2841_v19  ;;  %1904 = vst.msk [vmem:[#allocation4 + $0x150] sm:$0xff] %vm1882_vm8, %v1829_v43  ;;  %v2086_v29 = vpop.permute.xlu1 %2085 }
 0x1fc   :  { %2161 = vst.msk [vmem:[#allocation4 + $0x150] sm:$0xff] %vm2139_vm9, %v2086_v29  ;;  %560 = vrot.lane.b32.xlu0 %v2007_v3, %s7060_s12 }
 0x1fd   :  { %817 = vrot.lane.b32.xlu1 %v8213_v28, %s7062_s14 }
 0x1fe   :  { %v545_v31 = vpop.permute.xlu0 %544 }
 0x1ff   :  { %619 = vst.msk [vmem:[#allocation4 + $0x160] sm:$0xff] %vm596_vm3, %v545_v31  ;;  %v802_v48 = vpop.permute.xlu1 %801 }
 0x200   :  { %876 = vst.msk [vmem:[#allocation4 + $0x160] sm:$0xff] %vm853_vm4, %v802_v48  ;;  %1074 = vrot.lane.b32.xlu0 %v8221_v30, %s7061_s13  ;;  %v2234_v30 = vld [vmem:[#allocation2 + $0x34a] sm:$0xff] }
 0x201   :  { %1331 = vrot.lane.b32.xlu1 %v8454_v13, %s7063_s15  ;;  %v2267_v16 = vpack.c.bf16 %v2235_v36, %v2234_v30 }
 0x202   :  { %v1059_v39 = vpop.permute.xlu0 %1058 }
 0x203   :  { %1133 = vst.msk [vmem:[#allocation4 + $0x160] sm:$0xff] %vm1110_vm5, %v1059_v39  ;;  %v1316_v28 = vpop.permute.xlu1 %1315  ;;  %v2342_v42 = vld [vmem:[#allocation4 + $0x150] sm:$0xff] }
 0x204   :  { %1390 = vst.msk [vmem:[#allocation4 + $0x160] sm:$0xff] %vm1367_vm6, %v1316_v28  ;;  %1588 = vrot.lane.b32.xlu0 %v8253_v10, %s7064_s16  ;;  %2733 = vmatmul.mubr.bf16.gmra.mrb[84].mxu0 %v2342_v42 }
 0x205   :  { %1846 = vrot.lane.b32.xlu1 %v1752_v34, %s7065_s17  ;;  %6974 = vmatprep.mubr.msk.bf16.mxu0 %vm91_vm0, %v2345_v40  ;;  %2299 = vst.msk [vmem:[#allocation4 + $0x1f8] sm:$0xff] %vm91_vm0, %v2267_v16 }
 0x206   :  { %v1573_v44 = vpop.permute.xlu0 %1572  ;;  %v8488_v46 = vpop.f32.mrb[24].mxu0 }
 0x207   :  { %1647 = vst.msk [vmem:[#allocation4 + $0x160] sm:$0xff] %vm1624_vm7, %v1573_v44  ;;  %v2844_v47 = vsel %vm91_vm0, %v8488_v46, 0.0  ;;  %v1831_v51 = vpop.permute.xlu1 %1830  ;;  %v2616_v54 = vpop.f32.mrb[25].mxu0 }
 0x208   :  { %v2845_v61 = vadd.f32 %v2844_v47, %v2843_v27  ;;  %1905 = vst.msk [vmem:[#allocation4 + $0x160] sm:$0xff] %vm1882_vm8, %v1831_v51  ;;  %2103 = vrot.lane.b32.xlu0 %v2009_v41, %s7066_s18  ;;  %v8496_v3 = vpop.f32.mrb[26].mxu0 }
 0x209   :  { %v2846_v50 = vsel %vm91_vm0, %v8496_v3, 0.0  ;;  %562 = vrot.lane.b32.xlu1 %v8454_v13, %s7060_s12  ;;  %v2619_v0 = vpop.f32.mrb[27].mxu0 }
 0x20a   :  { %v2847_v11 = vadd.f32 %v2846_v50, %v2845_v61  ;;  %v2088_v4 = vpop.permute.xlu0 %2087  ;;  %v2351_v50 = vld [vmem:[#allocation4 + $0x198] sm:$0xff] }
 0x20b   :  { %2162 = vst.msk [vmem:[#allocation4 + $0x160] sm:$0xff] %vm2139_vm9, %v2088_v4  ;;  %v547_v6 = vpop.permute.xlu1 %546 }
 0x20c   :  { %620 = vst.msk [vmem:[#allocation4 + $0x170] sm:$0xff] %vm596_vm3, %v547_v6  ;;  %819 = vrot.lane.b32.xlu0 %v8253_v10, %s7062_s14  ;;  %v8507_v12 = vld [vmem:[#allocation4 + $0x1f8] sm:$0xff]  ;;  %v2010_v10 = vpack.c.bf16 %v1978_v9, %v1977_v32 }
 0x20d   :  { %1076 = vrot.lane.b32.xlu1 %v1752_v34, %s7061_s13  ;;  %5622 = vst.msk [vmem:[#allocation4 + $0x1f8] sm:$0xff] %vm91_vm0, %v5590_v8 }
 0x20e   :  { %v804_v22 = vpop.permute.xlu0 %803 }
 0x20f   :  { %877 = vst.msk [vmem:[#allocation4 + $0x170] sm:$0xff] %vm853_vm4, %v804_v22  ;;  %v1061_v13 = vpop.permute.xlu1 %1060 }
 0x210   :  { %1134 = vst.msk [vmem:[#allocation4 + $0x170] sm:$0xff] %vm1110_vm5, %v1061_v13  ;;  %1333 = vrot.lane.b32.xlu0 %v2009_v41, %s7063_s15 }
 0x211   :  { %1590 = vrot.lane.b32.xlu1 %v8275_v23, %s7064_s16 }
 0x212   :  { %v1318_v15 = vpop.permute.xlu0 %1317  ;;  %v2344_v49 = vld [vmem:[#allocation4 + $0x160] sm:$0xff] }
 0x213   :  { %1391 = vst.msk [vmem:[#allocation4 + $0x170] sm:$0xff] %vm1367_vm6, %v1318_v15  ;;  %v1575_v62 = vpop.permute.xlu1 %1574  ;;  %v8516_v63 = vpop.f32.mrb[28].mxu0  ;;  %2741 = vmatmul.mubr.bf16.gmra.mrb[88].mxu0 %v2344_v49 }
 0x214   :  { %1648 = vst.msk [vmem:[#allocation4 + $0x170] sm:$0xff] %vm1624_vm7, %v1575_v62  ;;  %v2848_v19 = vsel %vm91_vm0, %v8516_v63, 0.0  ;;  %1848 = vrot.lane.b32.xlu0 %v1753_v45, %s7065_s17  ;;  %v2624_v59 = vpop.f32.mrb[29].mxu0  ;;  %6975 = vmatprep.mubr.msk.bf16.mxu0 %vm91_vm0, %v2347_v52  ;;  %v2353_v62 = vld [vmem:[#allocation4 + $0x1a8] sm:$0xff] }
 0x215   :  { %v2849_v23 = vadd.f32 %v2848_v19, %v2847_v11  ;;  %2105 = vrot.lane.b32.xlu1 %v2010_v10, %s7066_s18  ;;  %v8524_v43 = vpop.f32.mrb[30].mxu0 }
 0x216   :  { %v2850_v25 = vsel %vm91_vm0, %v8524_v43, 0.0  ;;  %v1833_v27 = vpop.permute.xlu0 %1832  ;;  %v2627_v29 = vpop.f32.mrb[31].mxu0 }
 0x217   :  { %v2851_v31 = vadd.f32 %v2850_v25, %v2849_v23  ;;  %1906 = vst.msk [vmem:[#allocation4 + $0x170] sm:$0xff] %vm1882_vm8, %v1833_v27  ;;  %v2090_v57 = vpop.permute.xlu1 %2089 }
 0x218   :  { %2163 = vst.msk [vmem:[#allocation4 + $0x170] sm:$0xff] %vm2139_vm9, %v2090_v57 }
 0x21a   :  { %v549_v24 = vpop.permute.xlu0 %548 }
 0x21b   :  { %621 = vst.msk [vmem:[#allocation4 + $0x180] sm:$0xff] %vm596_vm3, %v549_v24  ;;  %v806_v48 = vpop.permute.xlu1 %805 }
 0x21c   :  { %878 = vst.msk [vmem:[#allocation4 + $0x180] sm:$0xff] %vm853_vm4, %v806_v48 }
 0x21e   :  { %v1063_v34 = vpop.permute.xlu0 %1062 }
 0x21f   :  { %1135 = vst.msk [vmem:[#allocation4 + $0x180] sm:$0xff] %vm1110_vm5, %v1063_v34  ;;  %v1320_v38 = vpop.permute.xlu1 %1319  ;;  %v2346_v39 = vld [vmem:[#allocation4 + $0x170] sm:$0xff] }
 0x220   :  { %1392 = vst.msk [vmem:[#allocation4 + $0x180] sm:$0xff] %vm1367_vm6, %v1320_v38  ;;  %2749 = vmatmul.mubr.bf16.gmra.mrb[92].mxu0 %v2346_v39 }
 0x221   :  { %6976 = vmatprep.mubr.msk.bf16.mxu0 %vm91_vm0, %v2349_v35 }
 0x222   :  { %v1577_v40 = vpop.permute.xlu0 %1576  ;;  %v8535_v28 = vpop.f32.mrb[32].mxu0 }
 0x223   :  { %1649 = vst.msk [vmem:[#allocation4 + $0x180] sm:$0xff] %vm1624_vm7, %v1577_v40  ;;  %v2852_v42 = vsel %vm91_vm0, %v8535_v28, 0.0  ;;  %v1835_v41 = vpop.permute.xlu1 %1834  ;;  %v2632_v30 = vpop.f32.mrb[33].mxu0 }
 0x224   :  { %v2853_v36 = vadd.f32 %v2852_v42, %v2851_v31  ;;  %1907 = vst.msk [vmem:[#allocation4 + $0x180] sm:$0xff] %vm1882_vm8, %v1835_v41  ;;  %v8541_v16 = vpop.f32.mrb[34].mxu0  ;;  %v2355_v41 = vld [vmem:[#allocation4 + $0x1b8] sm:$0xff] }
 0x225   :  { %v2854_v44 = vsel %vm91_vm0, %v8541_v16, 0.0  ;;  %v2635_v47 = vpop.f32.mrb[35].mxu0 }
 0x226   :  { %v2855_v51 = vadd.f32 %v2854_v44, %v2853_v36  ;;  %v2092_v54 = vpop.permute.xlu0 %2091 }
 0x227   :  { %2164 = vst.msk [vmem:[#allocation4 + $0x180] sm:$0xff] %vm2139_vm9, %v2092_v54  ;;  %v551_v61 = vpop.permute.xlu1 %550 }
 0x228   :  { %622 = vst.msk [vmem:[#allocation4 + $0x190] sm:$0xff] %vm596_vm3, %v551_v61 }
 0x22a   :  { %v808_v2 = vpop.permute.xlu0 %807 }
 0x22b   :  { %879 = vst.msk [vmem:[#allocation4 + $0x190] sm:$0xff] %vm853_vm4, %v808_v2  ;;  %v1065_v58 = vpop.permute.xlu1 %1064 }
 0x22c   :  { %1136 = vst.msk [vmem:[#allocation4 + $0x190] sm:$0xff] %vm1110_vm5, %v1065_v58 }
 0x22e   :  { %v1322_v0 = vpop.permute.xlu0 %1321  ;;  %v2348_v11 = vld [vmem:[#allocation4 + $0x180] sm:$0xff] }
 0x22f   :  { %1393 = vst.msk [vmem:[#allocation4 + $0x190] sm:$0xff] %vm1367_vm6, %v1322_v0  ;;  %v1579_v4 = vpop.permute.xlu1 %1578  ;;  %v8550_v6 = vpop.f32.mrb[36].mxu0  ;;  %2757 = vmatmul.mubr.bf16.gmra.mrb[96].mxu0 %v2348_v11 }
 0x230   :  { %1650 = vst.msk [vmem:[#allocation4 + $0x190] sm:$0xff] %vm1624_vm7, %v1579_v4  ;;  %v2856_v8 = vsel %vm91_vm0, %v8550_v6, 0.0  ;;  %v2640_v55 = vpop.f32.mrb[37].mxu0  ;;  %6977 = vmatprep.mubr.msk.bf16.mxu0 %vm91_vm0, %v2351_v50 }
 0x231   :  { %v2857_v56 = vadd.f32 %v2856_v8, %v2855_v51  ;;  %v8556_v22 = vpop.f32.mrb[38].mxu0 }
 0x232   :  { %v2858_v32 = vsel %vm91_vm0, %v8556_v22, 0.0  ;;  %v1837_v9 = vpop.permute.xlu0 %1836  ;;  %v2643_v13 = vpop.f32.mrb[39].mxu0 }
 0x233   :  { %v2859_v45 = vadd.f32 %v2858_v32, %v2857_v56  ;;  %1908 = vst.msk [vmem:[#allocation4 + $0x190] sm:$0xff] %vm1882_vm8, %v1837_v9  ;;  %v2094_v10 = vpop.permute.xlu1 %2093  ;;  %v2357_v32 = vld [vmem:[#allocation4 + $0x1c8] sm:$0xff] }
 0x234   :  { %2165 = vst.msk [vmem:[#allocation4 + $0x190] sm:$0xff] %vm2139_vm9, %v2094_v10 }
 0x236   :  { %v553_v52 = vpop.permute.xlu0 %552 }
 0x237   :  { %623 = vst.msk [vmem:[#allocation4 + $0x1a0] sm:$0xff] %vm596_vm3, %v553_v52  ;;  %v810_v15 = vpop.permute.xlu1 %809 }
 0x238   :  { %880 = vst.msk [vmem:[#allocation4 + $0x1a0] sm:$0xff] %vm853_vm4, %v810_v15 }
 0x23a   :  { %v1067_v49 = vpop.permute.xlu0 %1066 }
 0x23b   :  { %1137 = vst.msk [vmem:[#allocation4 + $0x1a0] sm:$0xff] %vm1110_vm5, %v1067_v49  ;;  %v1324_v19 = vpop.permute.xlu1 %1323  ;;  %v2350_v59 = vld [vmem:[#allocation4 + $0x190] sm:$0xff] }
 0x23c   :  { %1394 = vst.msk [vmem:[#allocation4 + $0x1a0] sm:$0xff] %vm1367_vm6, %v1324_v19  ;;  %2765 = vmatmul.mubr.bf16.gmra.mrb[100].mxu0 %v2350_v59 }
 0x23d   :  { %6978 = vmatprep.mubr.msk.bf16.mxu0 %vm91_vm0, %v2353_v62 }
 0x23e   :  { %v1581_v23 = vpop.permute.xlu0 %1580  ;;  %v8567_v25 = vpop.f32.mrb[40].mxu0 }
 0x23f   :  { %1651 = vst.msk [vmem:[#allocation4 + $0x1a0] sm:$0xff] %vm1624_vm7, %v1581_v23  ;;  %v2860_v27 = vsel %vm91_vm0, %v8567_v25, 0.0  ;;  %v1839_v29 = vpop.permute.xlu1 %1838  ;;  %v2648_v31 = vpop.f32.mrb[41].mxu0 }
 0x240   :  { %v2861_v57 = vadd.f32 %v2860_v27, %v2859_v45  ;;  %1909 = vst.msk [vmem:[#allocation4 + $0x1a0] sm:$0xff] %vm1882_vm8, %v1839_v29  ;;  %v8573_v24 = vpop.f32.mrb[42].mxu0 }
 0x241   :  { %v2862_v48 = vsel %vm91_vm0, %v8573_v24, 0.0  ;;  %v2651_v34 = vpop.f32.mrb[43].mxu0 }
 0x242   :  { %v2863_v35 = vadd.f32 %v2862_v48, %v2861_v57  ;;  %v2096_v38 = vpop.permute.xlu0 %2095  ;;  %v2359_v34 = vld [vmem:[#allocation4 + $0x1d8] sm:$0xff] }
 0x243   :  { %2166 = vst.msk [vmem:[#allocation4 + $0x1a0] sm:$0xff] %vm2139_vm9, %v2096_v38  ;;  %v555_v39 = vpop.permute.xlu1 %554 }
 0x244   :  { %624 = vst.msk [vmem:[#allocation4 + $0x1b0] sm:$0xff] %vm596_vm3, %v555_v39 }
 0x246   :  { %v812_v40 = vpop.permute.xlu0 %811 }
 0x247   :  { %881 = vst.msk [vmem:[#allocation4 + $0x1b0] sm:$0xff] %vm853_vm4, %v812_v40  ;;  %v1069_v42 = vpop.permute.xlu1 %1068 }
 0x248   :  { %1138 = vst.msk [vmem:[#allocation4 + $0x1b0] sm:$0xff] %vm1110_vm5, %v1069_v42 }
 0x24a   :  { %v1326_v30 = vpop.permute.xlu0 %1325  ;;  %v2352_v36 = vld [vmem:[#allocation4 + $0x1a0] sm:$0xff] }
 0x24b   :  { %1395 = vst.msk [vmem:[#allocation4 + $0x1b0] sm:$0xff] %vm1367_vm6, %v1326_v30  ;;  %v1583_v44 = vpop.permute.xlu1 %1582  ;;  %v8582_v47 = vpop.f32.mrb[44].mxu0  ;;  %2773 = vmatmul.mubr.bf16.gmra.mrb[104].mxu0 %v2352_v36 }
 0x24c   :  { %1652 = vst.msk [vmem:[#allocation4 + $0x1b0] sm:$0xff] %vm1624_vm7, %v1583_v44  ;;  %v2864_v51 = vsel %vm91_vm0, %v8582_v47, 0.0  ;;  %v2656_v54 = vpop.f32.mrb[45].mxu0  ;;  %6979 = vmatprep.mubr.msk.bf16.mxu0 %vm91_vm0, %v2355_v41 }
 0x24d   :  { %v2865_v61 = vadd.f32 %v2864_v51, %v2863_v35  ;;  %v8588_v2 = vpop.f32.mrb[46].mxu0 }
 0x24e   :  { %v2866_v58 = vsel %vm91_vm0, %v8588_v2, 0.0  ;;  %v1841_v50 = vpop.permute.xlu0 %1840  ;;  %v2659_v0 = vpop.f32.mrb[47].mxu0 }
 0x24f   :  { %v2867_v11 = vadd.f32 %v2866_v58, %v2865_v61  ;;  %1910 = vst.msk [vmem:[#allocation4 + $0x1b0] sm:$0xff] %vm1882_vm8, %v1841_v50  ;;  %v2098_v4 = vpop.permute.xlu1 %2097 }
 0x250   :  { %2167 = vst.msk [vmem:[#allocation4 + $0x1b0] sm:$0xff] %vm2139_vm9, %v2098_v4  ;;  %v2361_v4 = vld [vmem:[#allocation4 + $0x1e8] sm:$0xff] }
 0x252   :  { %v557_v8 = vpop.permute.xlu0 %556 }
 0x253   :  { %625 = vst.msk [vmem:[#allocation4 + $0x1c0] sm:$0xff] %vm596_vm3, %v557_v8  ;;  %v814_v55 = vpop.permute.xlu1 %813 }
 0x254   :  { %882 = vst.msk [vmem:[#allocation4 + $0x1c0] sm:$0xff] %vm853_vm4, %v814_v55 }
 0x256   :  { %v1071_v56 = vpop.permute.xlu0 %1070 }
 0x257   :  { %1139 = vst.msk [vmem:[#allocation4 + $0x1c0] sm:$0xff] %vm1110_vm5, %v1071_v56  ;;  %v1328_v9 = vpop.permute.xlu1 %1327  ;;  %v2354_v13 = vld [vmem:[#allocation4 + $0x1b0] sm:$0xff] }
 0x258   :  { %1396 = vst.msk [vmem:[#allocation4 + $0x1c0] sm:$0xff] %vm1367_vm6, %v1328_v9  ;;  %2781 = vmatmul.mubr.bf16.gmra.mrb[108].mxu0 %v2354_v13 }
 0x259   :  { %6980 = vmatprep.mubr.msk.bf16.mxu0 %vm91_vm0, %v2357_v32 }
 0x25a   :  { %v1585_v45 = vpop.permute.xlu0 %1584  ;;  %v8599_v10 = vpop.f32.mrb[48].mxu0 }
 0x25b   :  { %1653 = vst.msk [vmem:[#allocation4 + $0x1c0] sm:$0xff] %vm1624_vm7, %v1585_v45  ;;  %v2868_v52 = vsel %vm91_vm0, %v8599_v10, 0.0  ;;  %v1843_v15 = vpop.permute.xlu1 %1842  ;;  %v2664_v49 = vpop.f32.mrb[49].mxu0 }
 0x25c   :  { %v2869_v62 = vadd.f32 %v2868_v52, %v2867_v11  ;;  %1911 = vst.msk [vmem:[#allocation4 + $0x1c0] sm:$0xff] %vm1882_vm8, %v1843_v15  ;;  %v8605_v19 = vpop.f32.mrb[50].mxu0 }
 0x25d   :  { %v2870_v59 = vsel %vm91_vm0, %v8605_v19, 0.0  ;;  %v2667_v23 = vpop.f32.mrb[51].mxu0 }
 0x25e   :  { %v2871_v27 = vadd.f32 %v2870_v59, %v2869_v62  ;;  %v2100_v29 = vpop.permute.xlu0 %2099 }
 0x25f   :  { %2168 = vst.msk [vmem:[#allocation4 + $0x1c0] sm:$0xff] %vm2139_vm9, %v2100_v29  ;;  %v559_v31 = vpop.permute.xlu1 %558 }
 0x260   :  { %626 = vst.msk [vmem:[#allocation4 + $0x1d0] sm:$0xff] %vm596_vm3, %v559_v31 }
 0x262   :  { %v816_v57 = vpop.permute.xlu0 %815 }
 0x263   :  { %883 = vst.msk [vmem:[#allocation4 + $0x1d0] sm:$0xff] %vm853_vm4, %v816_v57  ;;  %v1073_v48 = vpop.permute.xlu1 %1072 }
 0x264   :  { %1140 = vst.msk [vmem:[#allocation4 + $0x1d0] sm:$0xff] %vm1110_vm5, %v1073_v48 }
 0x266   :  { %v1330_v35 = vpop.permute.xlu0 %1329  ;;  %v2356_v38 = vld [vmem:[#allocation4 + $0x1c0] sm:$0xff] }
 0x267   :  { %1397 = vst.msk [vmem:[#allocation4 + $0x1d0] sm:$0xff] %vm1367_vm6, %v1330_v35  ;;  %v1587_v39 = vpop.permute.xlu1 %1586  ;;  %v8614_v40 = vpop.f32.mrb[52].mxu0  ;;  %2789 = vmatmul.mubr.bf16.gmra.mrb[112].mxu0 %v2356_v38 }
 0x268   :  { %1654 = vst.msk [vmem:[#allocation4 + $0x1d0] sm:$0xff] %vm1624_vm7, %v1587_v39  ;;  %v2872_v42 = vsel %vm91_vm0, %v8614_v40, 0.0  ;;  %v2672_v41 = vpop.f32.mrb[53].mxu0  ;;  %6981 = vmatprep.mubr.msk.bf16.mxu0 %vm91_vm0, %v2359_v34 }
 0x269   :  { %v2873_v30 = vadd.f32 %v2872_v42, %v2871_v27  ;;  %v8620_v36 = vpop.f32.mrb[54].mxu0 }
 0x26a   :  { %v2874_v44 = vsel %vm91_vm0, %v8620_v36, 0.0  ;;  %v1845_v51 = vpop.permute.xlu0 %1844  ;;  %v2675_v54 = vpop.f32.mrb[55].mxu0 }
 0x26b   :  { %v2875_v61 = vadd.f32 %v2874_v44, %v2873_v30  ;;  %1912 = vst.msk [vmem:[#allocation4 + $0x1d0] sm:$0xff] %vm1882_vm8, %v1845_v51  ;;  %v2102_v58 = vpop.permute.xlu1 %2101 }
 0x26c   :  { %2169 = vst.msk [vmem:[#allocation4 + $0x1d0] sm:$0xff] %vm2139_vm9, %v2102_v58 }
 0x26e   :  { %v561_v50 = vpop.permute.xlu0 %560 }
 0x26f   :  { %627 = vst.msk [vmem:[#allocation4 + $0x1e0] sm:$0xff] %vm596_vm3, %v561_v50  ;;  %v818_v0 = vpop.permute.xlu1 %817 }
 0x270   :  { %884 = vst.msk [vmem:[#allocation4 + $0x1e0] sm:$0xff] %vm853_vm4, %v818_v0 }
 0x272   :  { %v1075_v11 = vpop.permute.xlu0 %1074 }
 0x273   :  { %1141 = vst.msk [vmem:[#allocation4 + $0x1e0] sm:$0xff] %vm1110_vm5, %v1075_v11  ;;  %v1332_v8 = vpop.permute.xlu1 %1331  ;;  %v2358_v55 = vld [vmem:[#allocation4 + $0x1d0] sm:$0xff] }
 0x274   :  { %1398 = vst.msk [vmem:[#allocation4 + $0x1e0] sm:$0xff] %vm1367_vm6, %v1332_v8  ;;  %2797 = vmatmul.mubr.bf16.gmra.mrb[116].mxu0 %v2358_v55 }
 0x275   :  { %6982 = vmatprep.mubr.msk.bf16.mxu0 %vm91_vm0, %v2361_v4 }
 0x276   :  { %v1589_v56 = vpop.permute.xlu0 %1588  ;;  %v8631_v32 = vpop.f32.mrb[56].mxu0 }
 0x277   :  { %1655 = vst.msk [vmem:[#allocation4 + $0x1e0] sm:$0xff] %vm1624_vm7, %v1589_v56  ;;  %v2876_v9 = vsel %vm91_vm0, %v8631_v32, 0.0  ;;  %v1847_v13 = vpop.permute.xlu1 %1846  ;;  %v2680_v45 = vpop.f32.mrb[57].mxu0 }
 0x278   :  { %v2877_v52 = vadd.f32 %v2876_v9, %v2875_v61  ;;  %1913 = vst.msk [vmem:[#allocation4 + $0x1e0] sm:$0xff] %vm1882_vm8, %v1847_v13  ;;  %v8637_v15 = vpop.f32.mrb[58].mxu0 }
 0x279   :  { %v2878_v49 = vsel %vm91_vm0, %v8637_v15, 0.0  ;;  %v2683_v62 = vpop.f32.mrb[59].mxu0 }
 0x27a   :  { %v2879_v59 = vadd.f32 %v2878_v49, %v2877_v52  ;;  %v2104_v23 = vpop.permute.xlu0 %2103 }
 0x27b   :  { %2170 = vst.msk [vmem:[#allocation4 + $0x1e0] sm:$0xff] %vm2139_vm9, %v2104_v23  ;;  %v563_v27 = vpop.permute.xlu1 %562 }
 0x27c   :  { %628 = vst.msk [vmem:[#allocation4 + $0x1f0] sm:$0xff] %vm596_vm3, %v563_v27 }
 0x27e   :  { %v820_v29 = vpop.permute.xlu0 %819 }
 0x27f   :  { %885 = vst.msk [vmem:[#allocation4 + $0x1f0] sm:$0xff] %vm853_vm4, %v820_v29  ;;  %v1077_v31 = vpop.permute.xlu1 %1076 }
 0x280   :  { %1142 = vst.msk [vmem:[#allocation4 + $0x1f0] sm:$0xff] %vm1110_vm5, %v1077_v31 }
 0x282   :  { %v1334_v57 = vpop.permute.xlu0 %1333  ;;  %v2360_v48 = vld [vmem:[#allocation4 + $0x1e0] sm:$0xff] }
 0x283   :  { %1399 = vst.msk [vmem:[#allocation4 + $0x1f0] sm:$0xff] %vm1367_vm6, %v1334_v57  ;;  %v1591_v34 = vpop.permute.xlu1 %1590  ;;  %v8646_v35 = vpop.f32.mrb[60].mxu0  ;;  %2805 = vmatmul.mubr.bf16.gmra.mrb[120].mxu0 %v2360_v48 }
 0x284   :  { %1656 = vst.msk [vmem:[#allocation4 + $0x1f0] sm:$0xff] %vm1624_vm7, %v1591_v34  ;;  %v2880_v38 = vsel %vm91_vm0, %v8646_v35, 0.0  ;;  %v2688_v39 = vpop.f32.mrb[61].mxu0  ;;  %6983 = vmatprep.mubr.msk.bf16.mxu0 %vm91_vm0, %v8507_v12 }
 0x285   :  { %v2881_v42 = vadd.f32 %v2880_v38, %v2879_v59  ;;  %v8653_v41 = vpop.f32.mrb[62].mxu0 }
 0x286   :  { %v2882_v30 = vsel %vm91_vm0, %v8653_v41, 0.0  ;;  %v1849_v44 = vpop.permute.xlu0 %1848  ;;  %v2691_v51 = vpop.f32.mrb[63].mxu0 }
 0x287   :  { %v2883_v54 = vadd.f32 %v2882_v30, %v2881_v42  ;;  %1914 = vst.msk [vmem:[#allocation4 + $0x1f0] sm:$0xff] %vm1882_vm8, %v1849_v44  ;;  %v2106_v61 = vpop.permute.xlu1 %2105 }
 0x288   :  { %2171 = vst.msk [vmem:[#allocation4 + $0x1f0] sm:$0xff] %vm2139_vm9, %v2106_v61 }
 0x28f   :  { %v2362_v58 = vld [vmem:[#allocation4 + $0x1f0] sm:$0xff] }
 0x290   :  { %2813 = vmatmul.mubr.bf16.gmra.mrb[124].mxu0 %v2362_v58 }
 0x292   :  { %v8659_v50 = vpop.f32.mrb[64].mxu0 }
 0x293   :  { %v2884_v12 = vsel %vm91_vm0, %v8659_v50, 0.0  ;;  %v2696_v0 = vpop.f32.mrb[65].mxu0 }
 0x294   :  { %v2885_v11 = vadd.f32 %v2884_v12, %v2883_v54  ;;  %v8663_v4 = vpop.f32.mrb[66].mxu0 }
 0x295   :  { %v2886_v8 = vsel %vm91_vm0, %v8663_v4, 0.0  ;;  %v2699_v55 = vpop.f32.mrb[67].mxu0 }
 0x296   :  { %v2887_v56 = vadd.f32 %v2886_v8, %v2885_v11 }
 0x29f   :  { %v8667_v9 = vpop.f32.mrb[68].mxu0 }
 0x2a0   :  { %v2888_v13 = vsel %vm91_vm0, %v8667_v9, 0.0  ;;  %v2704_v45 = vpop.f32.mrb[69].mxu0 }
 0x2a1   :  { %v2889_v52 = vadd.f32 %v2888_v13, %v2887_v56  ;;  %v8671_v49 = vpop.f32.mrb[70].mxu0 }
 0x2a2   :  { %v2890_v62 = vsel %vm91_vm0, %v8671_v49, 0.0  ;;  %v2707_v59 = vpop.f32.mrb[71].mxu0 }
 0x2a3   :  { %v2891_v23 = vadd.f32 %v2890_v62, %v2889_v52 }
 0x2ae   :  { %v8675_v27 = vpop.f32.mrb[72].mxu0 }
 0x2af   :  { %v2892_v29 = vsel %vm91_vm0, %v8675_v27, 0.0  ;;  %v2712_v31 = vpop.f32.mrb[73].mxu0 }
 0x2b0   :  { %v2893_v57 = vadd.f32 %v2892_v29, %v2891_v23  ;;  %v8679_v48 = vpop.f32.mrb[74].mxu0 }
 0x2b1   :  { %v2894_v34 = vsel %vm91_vm0, %v8679_v48, 0.0  ;;  %v2715_v38 = vpop.f32.mrb[75].mxu0 }
 0x2b2   :  { %v2895_v39 = vadd.f32 %v2894_v34, %v2893_v57 }
 0x2bb   :  { %v8683_v42 = vpop.f32.mrb[76].mxu0 }
 0x2bc   :  { %v2896_v30 = vsel %vm91_vm0, %v8683_v42, 0.0  ;;  %v2720_v44 = vpop.f32.mrb[77].mxu0 }
 0x2bd   :  { %v2897_v51 = vadd.f32 %v2896_v30, %v2895_v39  ;;  %v8687_v54 = vpop.f32.mrb[78].mxu0 }
 0x2be   :  { %v2898_v61 = vsel %vm91_vm0, %v8687_v54, 0.0  ;;  %v2723_v58 = vpop.f32.mrb[79].mxu0 }
 0x2bf   :  { %v2899_v12 = vadd.f32 %v2898_v61, %v2897_v51 }
 0x2ca   :  { %v8691_v0 = vpop.f32.mrb[80].mxu0 }
 0x2cb   :  { %v2900_v11 = vsel %vm91_vm0, %v8691_v0, 0.0  ;;  %v2728_v8 = vpop.f32.mrb[81].mxu0 }
 0x2cc   :  { %v2901_v55 = vadd.f32 %v2900_v11, %v2899_v12  ;;  %v8695_v56 = vpop.f32.mrb[82].mxu0 }
 0x2cd   :  { %v2902_v13 = vsel %vm91_vm0, %v8695_v56, 0.0  ;;  %v2731_v45 = vpop.f32.mrb[83].mxu0 }
 0x2ce   :  { %v2903_v52 = vadd.f32 %v2902_v13, %v2901_v55 }
 0x2d7   :  { %v8699_v62 = vpop.f32.mrb[84].mxu0 }
 0x2d8   :  { %v2904_v59 = vsel %vm91_vm0, %v8699_v62, 0.0  ;;  %v2736_v23 = vpop.f32.mrb[85].mxu0 }
 0x2d9   :  { %v2905_v29 = vadd.f32 %v2904_v59, %v2903_v52  ;;  %v8703_v31 = vpop.f32.mrb[86].mxu0 }
 0x2da   :  { %v2906_v57 = vsel %vm91_vm0, %v8703_v31, 0.0  ;;  %v2739_v34 = vpop.f32.mrb[87].mxu0 }
 0x2db   :  { %v2907_v38 = vadd.f32 %v2906_v57, %v2905_v29 }
 0x2e6   :  { %v8707_v39 = vpop.f32.mrb[88].mxu0 }
 0x2e7   :  { %v2908_v30 = vsel %vm91_vm0, %v8707_v39, 0.0  ;;  %v2744_v44 = vpop.f32.mrb[89].mxu0 }
 0x2e8   :  { %v2909_v51 = vadd.f32 %v2908_v30, %v2907_v38  ;;  %v8711_v61 = vpop.f32.mrb[90].mxu0 }
 0x2e9   :  { %v2910_v58 = vsel %vm91_vm0, %v8711_v61, 0.0  ;;  %v2747_v12 = vpop.f32.mrb[91].mxu0 }
 0x2ea   :  { %v2911_v11 = vadd.f32 %v2910_v58, %v2909_v51 }
 0x2f3   :  { %v8715_v8 = vpop.f32.mrb[92].mxu0 }
 0x2f4   :  { %v2912_v55 = vsel %vm91_vm0, %v8715_v8, 0.0  ;;  %v2752_v13 = vpop.f32.mrb[93].mxu0 }
 0x2f5   :  { %v2913_v45 = vadd.f32 %v2912_v55, %v2911_v11  ;;  %v8719_v52 = vpop.f32.mrb[94].mxu0 }
 0x2f6   :  { %v2914_v59 = vsel %vm91_vm0, %v8719_v52, 0.0  ;;  %v2755_v23 = vpop.f32.mrb[95].mxu0 }
 0x2f7   :  { %v2915_v29 = vadd.f32 %v2914_v59, %v2913_v45 }
 0x302   :  { %v8723_v57 = vpop.f32.mrb[96].mxu0 }
 0x303   :  { %12660 = vst [vmem:[#allocation5_spill] sm:$0xff] %v8723_v57  ;;  %v2916_v34 = vsel %vm91_vm0, %v8723_v57, 0.0  ;;  %v2760_v38 = vpop.f32.mrb[97].mxu0 }
 0x304   :  { %v2917_v30 = vadd.f32 %v2916_v34, %v2915_v29  ;;  %v8727_v44 = vpop.f32.mrb[98].mxu0 }
 0x305   :  { %12661 = vst [vmem:[#allocation6_spill] sm:$0xff] %v8727_v44  ;;  %v2918_v51 = vsel %vm91_vm0, %v8727_v44, 0.0  ;;  %v2763_v58 = vpop.f32.mrb[99].mxu0 }
 0x306   :  { %v2919_v12 = vadd.f32 %v2918_v51, %v2917_v30 }
 0x30f   :  { %v8731_v11 = vpop.f32.mrb[100].mxu0 }
 0x310   :  { %12662 = vst [vmem:[#allocation7_spill] sm:$0xff] %v8731_v11  ;;  %v2920_v55 = vsel %vm91_vm0, %v8731_v11, 0.0  ;;  %v2768_v13 = vpop.f32.mrb[101].mxu0 }
 0x311   :  { %v2921_v45 = vadd.f32 %v2920_v55, %v2919_v12  ;;  %v8735_v59 = vpop.f32.mrb[102].mxu0 }
 0x312   :  { %12663 = vst [vmem:[#allocation8_spill] sm:$0xff] %v8735_v59  ;;  %v2922_v23 = vsel %vm91_vm0, %v8735_v59, 0.0  ;;  %v2771_v29 = vpop.f32.mrb[103].mxu0 }
 0x313   :  { %v2923_v34 = vadd.f32 %v2922_v23, %v2921_v45 }
 0x31e   :  { %v8739_v38 = vpop.f32.mrb[104].mxu0 }
 0x31f   :  { %12664 = vst [vmem:[#allocation9_spill] sm:$0xff] %v8739_v38  ;;  %v2924_v58 = vsel %vm91_vm0, %v8739_v38, 0.0  ;;  %v2776_v30 = vpop.f32.mrb[105].mxu0 }
 0x320   :  { %v2925_v51 = vadd.f32 %v2924_v58, %v2923_v34  ;;  %v8743_v7 = vpop.f32.mrb[106].mxu0 }
 0x321   :  { %12665 = vst [vmem:[#allocation10_spill] sm:$0xff] %v8743_v7  ;;  %v2926_v13 = vsel %vm91_vm0, %v8743_v7, 0.0  ;;  %v2779_v12 = vpop.f32.mrb[107].mxu0 }
 0x322   :  { %v2927_v55 = vadd.f32 %v2926_v13, %v2925_v51 }
 0x32b   :  { %v8747_v11 = vpop.f32.mrb[108].mxu0 }
 0x32c   :  { %12666 = vst [vmem:[#allocation11_spill] sm:$0xff] %v8747_v11  ;;  %v2928_v29 = vsel %vm91_vm0, %v8747_v11, 0.0  ;;  %v2784_v45 = vpop.f32.mrb[109].mxu0 }
 0x32d   :  { %v2929_v23 = vadd.f32 %v2928_v29, %v2927_v55  ;;  %v8751_v59 = vpop.f32.mrb[110].mxu0 }
 0x32e   :  { %12667 = vst [vmem:[#allocation12_spill] sm:$0xff] %v8751_v59  ;;  %v2930_v30 = vsel %vm91_vm0, %v8751_v59, 0.0  ;;  %v2787_v34 = vpop.f32.mrb[111].mxu0 }
 0x32f   :  { %v2931_v58 = vadd.f32 %v2930_v30, %v2929_v23 }
 0x33a   :  { %v8755_v38 = vpop.f32.mrb[112].mxu0 }
 0x33b   :  { %12668 = vst [vmem:[#allocation13_spill] sm:$0xff] %v8755_v38  ;;  %v2932_v12 = vsel %vm91_vm0, %v8755_v38, 0.0  ;;  %v2792_v51 = vpop.f32.mrb[113].mxu0 }
 0x33c   :  { %v2933_v13 = vadd.f32 %v2932_v12, %v2931_v58  ;;  %v8759_v7 = vpop.f32.mrb[114].mxu0 }
 0x33d   :  { %12669 = vst [vmem:[#allocation14_spill] sm:$0xff] %v8759_v7  ;;  %v2934_v45 = vsel %vm91_vm0, %v8759_v7, 0.0  ;;  %v2795_v55 = vpop.f32.mrb[115].mxu0 }
 0x33e   :  { %v2935_v29 = vadd.f32 %v2934_v45, %v2933_v13 }
 0x347   :  { %v8763_v11 = vpop.f32.mrb[116].mxu0 }
 0x348   :  { %12670 = vst [vmem:[#allocation15_spill] sm:$0xff] %v8763_v11  ;;  %v2936_v34 = vsel %vm91_vm0, %v8763_v11, 0.0  ;;  %v2800_v23 = vpop.f32.mrb[117].mxu0 }
 0x349   :  { %v2937_v30 = vadd.f32 %v2936_v34, %v2935_v29  ;;  %v8767_v59 = vpop.f32.mrb[118].mxu0 }
 0x34a   :  { %12671 = vst [vmem:[#allocation16_spill] sm:$0xff] %v8767_v59  ;;  %v2938_v51 = vsel %vm91_vm0, %v8767_v59, 0.0  ;;  %v2803_v58 = vpop.f32.mrb[119].mxu0 }
 0x34b   :  { %v2939_v12 = vadd.f32 %v2938_v51, %v2937_v30 }
 0x356   :  { %v8771_v38 = vpop.f32.mrb[120].mxu0 }
 0x357   :  { %12672 = vst [vmem:[#allocation17_spill] sm:$0xff] %v8771_v38  ;;  %v2940_v55 = vsel %vm91_vm0, %v8771_v38, 0.0  ;;  %v2808_v13 = vpop.f32.mrb[121].mxu0 }
 0x358   :  { %v2941_v45 = vadd.f32 %v2940_v55, %v2939_v12  ;;  %v8775_v7 = vpop.f32.mrb[122].mxu0 }
 0x359   :  { %12673 = vst [vmem:[#allocation18_spill] sm:$0xff] %v8775_v7  ;;  %v2942_v23 = vsel %vm91_vm0, %v8775_v7, 0.0  ;;  %v2811_v29 = vpop.f32.mrb[123].mxu0 }
 0x35a   :  { %v2943_v34 = vadd.f32 %v2942_v23, %v2941_v45 }
 0x363   :  { %v8779_v11 = vpop.f32.mrb[124].mxu0 }
 0x364   :  { %12674 = vst [vmem:[#allocation19_spill] sm:$0xff] %v8779_v11  ;;  %v2944_v58 = vsel %vm91_vm0, %v8779_v11, 0.0  ;;  %v2816_v30 = vpop.f32.mrb[125].mxu0 }
 0x365   :  { %v2945_v51 = vadd.f32 %v2944_v58, %v2943_v34  ;;  %v8783_v59 = vpop.f32.mrb[126].mxu0  ;;  %v12685_v30 = vld [vmem:[#allocation7_spill] sm:$0xff] }
 0x366   :  { %v2946_v13 = vsel %vm91_vm0, %v8783_v59, 0.0  ;;  %v2819_v12 = vpop.f32.mrb[127].mxu0 }
 0x367   :  { %v2947_v55 = vadd.f32 %v2946_v13, %v2945_v51  ;;  %v12687_v51 = vld [vmem:[#allocation8_spill] sm:$0xff]  ;;  %v12689_v13 = vld [vmem:[#allocation9_spill] sm:$0xff]  ;;  %v12691_v12 = vld [vmem:[#allocation10_spill] sm:$0xff] }
 0x369   :  { %v2948_v38 = vrot.slane %v2947_v55, 4 }
 0x36b   :  { %v2949_v44 = vadd.f32 %v2948_v38, %v2947_v55 }
 0x36d   :  { %v2950_v57 = vrot.slane %v2949_v44, 2 }
 0x36f   :  { %v2951_v7 = vadd.f32 %v2950_v57, %v2949_v44  ;;  %v12682_v57 = vld [vmem:[#allocation5_spill] sm:$0xff]  ;;  %v12683_v44 = vld [vmem:[#allocation6_spill] sm:$0xff] }
 0x371   :  { %v2952_v29 = vrot.slane %v2951_v7, 1 }
 0x373   :  { %v2953_v45 = vadd.f32 %v2952_v29, %v2951_v7  ;;  %v12693_v29 = vld [vmem:[#allocation11_spill] sm:$0xff] }
 0x375   :  { %v8787_v23 = vmul.f32 0.001953125, %v2953_v45 }
 0x377   :  { %v8791_v11 = vsub.f32 %v8323_v18, %v8787_v23  ;;  %v8795_v34 = vsub.f32 %v8327_v26, %v8787_v23  ;;  %v8799_v58 = vsub.f32 %v8347_v5, %v8787_v23  ;;  %v8803_v38 = vsub.f32 %v8356_v53, %v8787_v23 }
 0x378   :  { %v8807_v7 = vsub.f32 %v8377_v60, %v8787_v23  ;;  %v8811_v18 = vsub.f32 %v8384_v14, %v8787_v23  ;;  %v8815_v26 = vsub.f32 %v8401_v33, %v8787_v23  ;;  %v8819_v5 = vsub.f32 %v8410_v37, %v8787_v23 }
 0x379   :  { %12675 = vst [vmem:[#allocation20_spill] sm:$0xff] %v8791_v11  ;;  %12676 = vst [vmem:[#allocation21_spill] sm:$0xff] %v8795_v34  ;;  %v8823_v53 = vsub.f32 %v8431_v20, %v8787_v23  ;;  %v8827_v60 = vsub.f32 %v8438_v1, %v8787_v23  ;;  %v8831_v14 = vsub.f32 %v8457_v17, %v8787_v23 }
 0x37a   :  { %12677 = vst [vmem:[#allocation22_spill] sm:$0xff] %v8799_v58  ;;  %12678 = vst [vmem:[#allocation23_spill] sm:$0xff] %v8803_v38  ;;  %v8835_v33 = vsub.f32 %v8467_v21, %v8787_v23  ;;  %v8839_v37 = vsub.f32 %v8488_v46, %v8787_v23  ;;  %v8843_v20 = vsub.f32 %v8496_v3, %v8787_v23 }
 0x37b   :  { %v8847_v1 = vsub.f32 %v8516_v63, %v8787_v23  ;;  %v8851_v17 = vsub.f32 %v8524_v43, %v8787_v23  ;;  %v8855_v21 = vsub.f32 %v8535_v28, %v8787_v23  ;;  %v8859_v46 = vsub.f32 %v8541_v16, %v8787_v23 }
 0x37c   :  { %v8863_v3 = vsub.f32 %v8550_v6, %v8787_v23  ;;  %v8867_v63 = vsub.f32 %v8556_v22, %v8787_v23  ;;  %v8871_v43 = vsub.f32 %v8567_v25, %v8787_v23  ;;  %v8875_v28 = vsub.f32 %v8573_v24, %v8787_v23 }
 0x37d   :  { %v8879_v16 = vsub.f32 %v8582_v47, %v8787_v23  ;;  %v8883_v6 = vsub.f32 %v8588_v2, %v8787_v23  ;;  %v8887_v22 = vsub.f32 %v8599_v10, %v8787_v23  ;;  %v8891_v25 = vsub.f32 %v8605_v19, %v8787_v23 }
 0x37e   :  { %v8895_v24 = vsub.f32 %v8614_v40, %v8787_v23  ;;  %v8899_v47 = vsub.f32 %v8620_v36, %v8787_v23  ;;  %v8903_v2 = vsub.f32 %v8631_v32, %v8787_v23  ;;  %v8907_v10 = vsub.f32 %v8637_v15, %v8787_v23 }
 0x37f   :  { %v8911_v19 = vsub.f32 %v8646_v35, %v8787_v23  ;;  %v8915_v40 = vsub.f32 %v8653_v41, %v8787_v23  ;;  %v8919_v36 = vsub.f32 %v8659_v50, %v8787_v23  ;;  %v8923_v32 = vsub.f32 %v8663_v4, %v8787_v23 }
 0x380   :  { %v8927_v15 = vsub.f32 %v8667_v9, %v8787_v23  ;;  %v8931_v35 = vsub.f32 %v8671_v49, %v8787_v23  ;;  %v8935_v41 = vsub.f32 %v8675_v27, %v8787_v23  ;;  %v8939_v50 = vsub.f32 %v8679_v48, %v8787_v23 }
 0x381   :  { %12679 = vst [vmem:[#allocation24_spill] sm:$0xff] %v8919_v36  ;;  %v8943_v4 = vsub.f32 %v8683_v42, %v8787_v23  ;;  %v8947_v9 = vsub.f32 %v8687_v54, %v8787_v23  ;;  %v8951_v49 = vsub.f32 %v8691_v0, %v8787_v23  ;;  %v8955_v27 = vsub.f32 %v8695_v56, %v8787_v23 }
 0x382   :  { %v8959_v48 = vsub.f32 %v8699_v62, %v8787_v23  ;;  %v8963_v42 = vsub.f32 %v8703_v31, %v8787_v23  ;;  %v8967_v54 = vsub.f32 %v8707_v39, %v8787_v23  ;;  %v8971_v0 = vsub.f32 %v8711_v61, %v8787_v23 }
 0x383   :  { %12680 = vst [vmem:[#allocation25_spill] sm:$0xff] %v8951_v49  ;;  %12681 = vst [vmem:[#allocation26_spill] sm:$0xff] %v8955_v27  ;;  %v8975_v56 = vsub.f32 %v8715_v8, %v8787_v23  ;;  %v8979_v62 = vsub.f32 %v8719_v52, %v8787_v23  ;;  %v8983_v31 = vsub.f32 %v12682_v57, %v8787_v23  ;;  %v12695_v57 = vld [vmem:[#allocation12_spill] sm:$0xff] }
 0x384   :  { %v8987_v39 = vsub.f32 %v12683_v44, %v8787_v23  ;;  %v8991_v61 = vsub.f32 %v12685_v30, %v8787_v23  ;;  %v8995_v8 = vsub.f32 %v12687_v51, %v8787_v23  ;;  %v8999_v52 = vsub.f32 %v12689_v13, %v8787_v23  ;;  %v12697_v30 = vld [vmem:[#allocation13_spill] sm:$0xff] }
 0x385   :  { %v9003_v55 = vsub.f32 %v12691_v12, %v8787_v23  ;;  %v9007_v45 = vsub.f32 %v12693_v29, %v8787_v23  ;;  %v9011_v44 = vsub.f32 %v12695_v57, %v8787_v23  ;;  %v9015_v51 = vsub.f32 %v12697_v30, %v8787_v23 }
 0x386   :  { %12684 = vst [vmem:[#allocation5_spill] sm:$0xff] %v8987_v39  ;;  %12686 = vst [vmem:[#allocation6_spill] sm:$0xff] %v8991_v61 }
 0x387   :  { %12688 = vst [vmem:[#allocation7_spill] sm:$0xff] %v8995_v8  ;;  %12690 = vst [vmem:[#allocation8_spill] sm:$0xff] %v8999_v52  ;;  %v12699_v8 = vld [vmem:[#allocation14_spill] sm:$0xff]  ;;  %v12701_v52 = vld [vmem:[#allocation15_spill] sm:$0xff] }
 0x388   :  { %12692 = vst [vmem:[#allocation9_spill] sm:$0xff] %v9003_v55  ;;  %12694 = vst [vmem:[#allocation10_spill] sm:$0xff] %v9007_v45  ;;  %v9019_v13 = vsub.f32 %v12699_v8, %v8787_v23  ;;  %v9023_v12 = vsub.f32 %v12701_v52, %v8787_v23  ;;  %v12703_v55 = vld [vmem:[#allocation16_spill] sm:$0xff]  ;;  %v12705_v45 = vld [vmem:[#allocation17_spill] sm:$0xff]  ;;  %v9043_v52 = vsub.f32 %v8783_v59, %v8787_v23 }
 0x389   :  { %12696 = vst [vmem:[#allocation11_spill] sm:$0xff] %v9011_v44  ;;  %12698 = vst [vmem:[#allocation12_spill] sm:$0xff] %v9015_v51  ;;  %v9027_v29 = vsub.f32 %v12703_v55, %v8787_v23  ;;  %v9031_v57 = vsub.f32 %v12705_v45, %v8787_v23  ;;  %v12707_v44 = vld [vmem:[#allocation18_spill] sm:$0xff]  ;;  %v12709_v51 = vld [vmem:[#allocation19_spill] sm:$0xff]  ;;  %v3019_v55 = vmul.f32 %v8791_v11, %v8791_v11 }
 0x38a   :  { %12700 = vst [vmem:[#allocation13_spill] sm:$0xff] %v9019_v13  ;;  %12702 = vst [vmem:[#allocation14_spill] sm:$0xff] %v9023_v12  ;;  %v9035_v30 = vsub.f32 %v12707_v44, %v8787_v23  ;;  %v9039_v8 = vsub.f32 %v12709_v51, %v8787_v23  ;;  %v3021_v45 = vmul.f32 %v8799_v58, %v8799_v58 }
 0x38b   :  { %12704 = vst [vmem:[#allocation15_spill] sm:$0xff] %v9027_v29  ;;  %12706 = vst [vmem:[#allocation16_spill] sm:$0xff] %v9031_v57  ;;  %v3020_v29 = vmul.f32 %v8795_v34, %v8795_v34  ;;  %v3022_v44 = vmul.f32 %v8803_v38, %v8803_v38  ;;  %v3023_v59 = vmul.f32 %v8807_v7, %v8807_v7 }
 0x38c   :  { %12708 = vst [vmem:[#allocation17_spill] sm:$0xff] %v9035_v30  ;;  %12710 = vst [vmem:[#allocation18_spill] sm:$0xff] %v9039_v8  ;;  %v3083_v30 = vsel %vm91_vm0, %v3019_v55, 0.0  ;;  %v3086_v23 = vsel %vm91_vm0, %v3021_v45, 0.0  ;;  %v3024_v34 = vmul.f32 %v8811_v18, %v8811_v18  ;;  %v3025_v38 = vmul.f32 %v8815_v26, %v8815_v26 }
 0x38d   :  { %12711 = vst [vmem:[#allocation19_spill] sm:$0xff] %v9043_v52  ;;  %v3084_v51 = vsel %vm91_vm0, %v3020_v29, 0.0  ;;  %v3088_v52 = vsel %vm91_vm0, %v3022_v44, 0.0  ;;  %v3090_v55 = vsel %vm91_vm0, %v3023_v59, 0.0  ;;  %v3026_v29 = vmul.f32 %v8819_v5, %v8819_v5 }
 0x38e   :  { %v3085_v8 = vadd.f32 %v3084_v51, %v3083_v30  ;;  %v3092_v30 = vsel %vm91_vm0, %v3024_v34, 0.0  ;;  %v3094_v45 = vsel %vm91_vm0, %v3025_v38, 0.0  ;;  %v3030_v34 = vmul.f32 %v8835_v33, %v8835_v33 }
 0x38f   :  { %v3031_v38 = vmul.f32 %v8839_v37, %v8839_v37 }
 0x390   :  { %v3087_v11 = vadd.f32 %v3086_v23, %v3085_v8  ;;  %v3027_v8 = vmul.f32 %v8823_v53, %v8823_v53 }
 0x392   :  { %v3089_v58 = vadd.f32 %v3088_v52, %v3087_v11  ;;  %v3028_v11 = vmul.f32 %v8827_v60, %v8827_v60  ;;  %v3096_v52 = vsel %vm91_vm0, %v3026_v29, 0.0  ;;  %v3098_v59 = vsel %vm91_vm0, %v3027_v8, 0.0 }
 0x393   :  { %v3032_v29 = vmul.f32 %v8843_v20, %v8843_v20  ;;  %v3033_v8 = vmul.f32 %v8847_v1, %v8847_v1 }
 0x394   :  { %v3091_v57 = vadd.f32 %v3090_v55, %v3089_v58  ;;  %v3029_v58 = vmul.f32 %v8831_v14, %v8831_v14 }
 0x396   :  { %v3093_v51 = vadd.f32 %v3092_v30, %v3091_v57  ;;  %v3100_v57 = vsel %vm91_vm0, %v3028_v11, 0.0  ;;  %v3034_v11 = vmul.f32 %v8851_v17, %v8851_v17 }
 0x398   :  { %v3095_v23 = vadd.f32 %v3094_v45, %v3093_v51  ;;  %v3102_v51 = vsel %vm91_vm0, %v3029_v58, 0.0  ;;  %v3035_v58 = vmul.f32 %v8855_v21, %v8855_v21 }
 0x39a   :  { %v3097_v44 = vadd.f32 %v3096_v52, %v3095_v23  ;;  %v3104_v23 = vsel %vm91_vm0, %v3030_v34, 0.0  ;;  %v3036_v34 = vmul.f32 %v8859_v46, %v8859_v46 }
 0x39c   :  { %v3099_v55 = vadd.f32 %v3098_v59, %v3097_v44  ;;  %v3106_v44 = vsel %vm91_vm0, %v3031_v38, 0.0  ;;  %v3037_v38 = vmul.f32 %v8863_v3, %v8863_v3 }
 0x39e   :  { %v3101_v30 = vadd.f32 %v3100_v57, %v3099_v55  ;;  %v3108_v55 = vsel %vm91_vm0, %v3032_v29, 0.0  ;;  %v3038_v29 = vmul.f32 %v8867_v63, %v8867_v63 }
 0x3a0   :  { %v3103_v45 = vadd.f32 %v3102_v51, %v3101_v30  ;;  %v3110_v30 = vsel %vm91_vm0, %v3033_v8, 0.0  ;;  %v3039_v8 = vmul.f32 %v8871_v43, %v8871_v43 }
 0x3a2   :  { %v3105_v52 = vadd.f32 %v3104_v23, %v3103_v45  ;;  %v3112_v45 = vsel %vm91_vm0, %v3034_v11, 0.0  ;;  %v3040_v11 = vmul.f32 %v8875_v28, %v8875_v28 }
 0x3a4   :  { %v3107_v59 = vadd.f32 %v3106_v44, %v3105_v52  ;;  %v3114_v52 = vsel %vm91_vm0, %v3035_v58, 0.0  ;;  %v3041_v58 = vmul.f32 %v8879_v16, %v8879_v16 }
 0x3a6   :  { %v3109_v57 = vadd.f32 %v3108_v55, %v3107_v59  ;;  %v3116_v59 = vsel %vm91_vm0, %v3036_v34, 0.0  ;;  %v3042_v34 = vmul.f32 %v8883_v6, %v8883_v6 }
 0x3a8   :  { %v3111_v51 = vadd.f32 %v3110_v30, %v3109_v57  ;;  %v3118_v57 = vsel %vm91_vm0, %v3037_v38, 0.0  ;;  %v3043_v38 = vmul.f32 %v8887_v22, %v8887_v22 }
 0x3aa   :  { %v3113_v23 = vadd.f32 %v3112_v45, %v3111_v51  ;;  %v3120_v51 = vsel %vm91_vm0, %v3038_v29, 0.0  ;;  %v3044_v29 = vmul.f32 %v8891_v25, %v8891_v25 }
 0x3ac   :  { %v3115_v44 = vadd.f32 %v3114_v52, %v3113_v23  ;;  %v3122_v23 = vsel %vm91_vm0, %v3039_v8, 0.0  ;;  %v3045_v8 = vmul.f32 %v8895_v24, %v8895_v24 }
 0x3ae   :  { %v3117_v55 = vadd.f32 %v3116_v59, %v3115_v44  ;;  %v3124_v44 = vsel %vm91_vm0, %v3040_v11, 0.0  ;;  %v3046_v11 = vmul.f32 %v8899_v47, %v8899_v47 }
 0x3b0   :  { %v3119_v30 = vadd.f32 %v3118_v57, %v3117_v55  ;;  %v3126_v55 = vsel %vm91_vm0, %v3041_v58, 0.0  ;;  %v3047_v58 = vmul.f32 %v8903_v2, %v8903_v2 }
 0x3b2   :  { %v3121_v45 = vadd.f32 %v3120_v51, %v3119_v30  ;;  %v3128_v30 = vsel %vm91_vm0, %v3042_v34, 0.0  ;;  %v3048_v34 = vmul.f32 %v8907_v10, %v8907_v10 }
 0x3b4   :  { %v3123_v52 = vadd.f32 %v3122_v23, %v3121_v45  ;;  %v3130_v45 = vsel %vm91_vm0, %v3043_v38, 0.0  ;;  %v3049_v38 = vmul.f32 %v8911_v19, %v8911_v19 }
 0x3b6   :  { %v3125_v59 = vadd.f32 %v3124_v44, %v3123_v52  ;;  %v3132_v52 = vsel %vm91_vm0, %v3044_v29, 0.0  ;;  %v3050_v29 = vmul.f32 %v8915_v40, %v8915_v40 }
 0x3b8   :  { %v3127_v57 = vadd.f32 %v3126_v55, %v3125_v59  ;;  %v3134_v59 = vsel %vm91_vm0, %v3045_v8, 0.0  ;;  %v3051_v8 = vmul.f32 %v8919_v36, %v8919_v36  ;;  %v3054_v36 = vmul.f32 %v8931_v35, %v8931_v35 }
 0x3ba   :  { %v3129_v51 = vadd.f32 %v3128_v30, %v3127_v57  ;;  %v3136_v57 = vsel %vm91_vm0, %v3046_v11, 0.0  ;;  %v3052_v11 = vmul.f32 %v8923_v32, %v8923_v32 }
 0x3bc   :  { %v3131_v23 = vadd.f32 %v3130_v45, %v3129_v51  ;;  %v3138_v51 = vsel %vm91_vm0, %v3047_v58, 0.0  ;;  %v3702_v58 = vld [vmem:[#allocation3 + $0x1] sm:$0xff] }
 0x3be   :  { %v3133_v44 = vadd.f32 %v3132_v52, %v3131_v23  ;;  %v3140_v23 = vsel %vm91_vm0, %v3048_v34, 0.0  ;;  %v3146_v34 = vsel %vm91_vm0, %v3051_v8, 0.0  ;;  %v3152_v8 = vsel %vm91_vm0, %v3054_v36, 0.0  ;;  %v3958_v36 = vld [vmem:[#allocation3 + $0x2] sm:$0xff] }
 0x3c0   :  { %v3135_v55 = vadd.f32 %v3134_v59, %v3133_v44  ;;  %v3142_v44 = vsel %vm91_vm0, %v3049_v38, 0.0  ;;  %v3148_v38 = vsel %vm91_vm0, %v3052_v11, 0.0 }
 0x3c2   :  { %v3137_v30 = vadd.f32 %v3136_v57, %v3135_v55  ;;  %v3144_v55 = vsel %vm91_vm0, %v3050_v29, 0.0  ;;  %v3055_v29 = vmul.f32 %v8935_v41, %v8935_v41 }
 0x3c4   :  { %v3139_v45 = vadd.f32 %v3138_v51, %v3137_v30  ;;  %v3703_v30 = vld [vmem:[#allocation3 + $0x9] sm:$0xff]  ;;  %v3053_v51 = vmul.f32 %v8927_v15, %v8927_v15  ;;  %v3154_v11 = vsel %vm91_vm0, %v3055_v29, 0.0 }
 0x3c6   :  { %v3141_v52 = vadd.f32 %v3140_v23, %v3139_v45  ;;  %v3766_v45 = vpack.c.bf16 %v3703_v30, %v3702_v58  ;;  %v3057_v58 = vmul.f32 %v8943_v4, %v8943_v4 }
 0x3c8   :  { %v3143_v59 = vadd.f32 %v3142_v44, %v3141_v52  ;;  %3830 = vrot.lane.b32.xlu0 %v3766_v45, %s7060_s12  ;;  %v3150_v44 = vsel %vm91_vm0, %v3053_v51, 0.0  ;;  %v3059_v51 = vmul.f32 %v8951_v49, %v8951_v49 }
 0x3ca   :  { %v3145_v57 = vadd.f32 %v3144_v55, %v3143_v59  ;;  %v3056_v55 = vmul.f32 %v8939_v50, %v8939_v50 }
 0x3cc   :  { %v3147_v23 = vadd.f32 %v3146_v34, %v3145_v57  ;;  %v3058_v34 = vmul.f32 %v8947_v9, %v8947_v9  ;;  %v3156_v45 = vsel %vm91_vm0, %v3056_v55, 0.0  ;;  %v3162_v55 = vsel %vm91_vm0, %v3059_v51, 0.0 }
 0x3ce   :  { %v3149_v52 = vadd.f32 %v3148_v38, %v3147_v23  ;;  %v3158_v38 = vsel %vm91_vm0, %v3057_v58, 0.0  ;;  %v3160_v29 = vsel %vm91_vm0, %v3058_v34, 0.0  ;;  %v5014_v58 = vld [vmem:[#allocation3 + $0x1a0] sm:$0xff]  ;;  %v3063_v34 = vmul.f32 %v8967_v54, %v8967_v54 }
 0x3d0   :  { %v3151_v59 = vadd.f32 %v3150_v44, %v3149_v52  ;;  %v3959_v44 = vld [vmem:[#allocation3 + $0xa] sm:$0xff] }
 0x3d2   :  { %v3153_v57 = vadd.f32 %v3152_v8, %v3151_v59  ;;  %v3060_v59 = vmul.f32 %v8955_v27, %v8955_v27  ;;  %v4022_v8 = vpack.c.bf16 %v3959_v44, %v3958_v36  ;;  %v3064_v36 = vmul.f32 %v8971_v0, %v8971_v0 }
 0x3d4   :  { %v3155_v30 = vadd.f32 %v3154_v11, %v3153_v57  ;;  %v3061_v11 = vmul.f32 %v8959_v48, %v8959_v48  ;;  %4086 = vrot.lane.b32.xlu1 %v4022_v8, %s7062_s14  ;;  %v5269_v8 = vld [vmem:[#allocation3 + $0x199] sm:$0xff] }
 0x3d6   :  { %v3157_v23 = vadd.f32 %v3156_v45, %v3155_v30  ;;  %v5013_v45 = vld [vmem:[#allocation3 + $0x198] sm:$0xff] }
 0x3d7   :  { %v5062_v27 = vpack.c.bf16 %v5014_v58, %v5013_v45  ;;  %v3734_v58 = vld [vmem:[#allocation3 + $0x1b1] sm:$0xff] }
 0x3d8   :  { %v3159_v52 = vadd.f32 %v3158_v38, %v3157_v23  ;;  %v3062_v23 = vmul.f32 %v8963_v42, %v8963_v42  ;;  %v3164_v38 = vsel %vm91_vm0, %v3060_v59, 0.0  ;;  %v3065_v59 = vmul.f32 %v8975_v56, %v8975_v56 }
 0x3d9   :  { %5141 = vrot.lane.b32.xlu0 %v5062_v27, %s7065_s17 }
 0x3da   :  { %v3161_v57 = vadd.f32 %v3160_v29, %v3159_v52  ;;  %v3166_v52 = vsel %vm91_vm0, %v3061_v11, 0.0  ;;  %v3168_v44 = vsel %vm91_vm0, %v3062_v23, 0.0  ;;  %v3066_v11 = vmul.f32 %v8979_v62, %v8979_v62  ;;  %v3735_v23 = vld [vmem:[#allocation3 + $0x1b9] sm:$0xff] }
 0x3dc   :  { %v3163_v30 = vadd.f32 %v3162_v55, %v3161_v57  ;;  %v5270_v57 = vld [vmem:[#allocation3 + $0x1a1] sm:$0xff]  ;;  %v3170_v55 = vsel %vm91_vm0, %v3063_v34, 0.0 }
 0x3dd   :  { %v3991_v34 = vld [vmem:[#allocation3 + $0x1ba] sm:$0xff] }
 0x3de   :  { %v3165_v49 = vadd.f32 %v3164_v38, %v3163_v30  ;;  %v5318_v30 = vpack.c.bf16 %v5270_v57, %v5269_v8  ;;  %v3990_v38 = vld [vmem:[#allocation3 + $0x1b2] sm:$0xff]  ;;  %v3068_v57 = vmul.f32 %v8987_v39, %v8987_v39 }
 0x3e0   :  { %v3167_v51 = vadd.f32 %v3166_v52, %v3165_v49  ;;  %v3172_v49 = vsel %vm91_vm0, %v3064_v36, 0.0  ;;  %5397 = vrot.lane.b32.xlu1 %v5318_v30, %s7066_s18  ;;  %v3067_v52 = vmul.f32 %v8983_v31, %v8983_v31  ;;  %v3176_v36 = vsel %vm91_vm0, %v3066_v11, 0.0 }
 0x3e1   :  { %v3069_v30 = vmul.f32 %v8991_v61, %v8991_v61 }
 0x3e2   :  { %v3169_v29 = vadd.f32 %v3168_v44, %v3167_v51  ;;  %v3174_v51 = vsel %vm91_vm0, %v3065_v59, 0.0  ;;  %v3782_v44 = vpack.c.bf16 %v3735_v23, %v3734_v58  ;;  %v3180_v58 = vsel %vm91_vm0, %v3068_v57, 0.0  ;;  %v12716_v57 = vld [vmem:[#allocation11_spill] sm:$0xff] }
 0x3e4   :  { %v3171_v45 = vadd.f32 %v3170_v55, %v3169_v29  ;;  %v4038_v29 = vpack.c.bf16 %v3991_v34, %v3990_v38  ;;  %3862 = vrot.lane.b32.xlu0 %v3782_v44, %s7060_s12  ;;  %v12713_v38 = vld [vmem:[#allocation8_spill] sm:$0xff]  ;;  %v12714_v34 = vld [vmem:[#allocation9_spill] sm:$0xff] }
 0x3e5   :  { %v3071_v11 = vmul.f32 %v12713_v38, %v12713_v38 }
 0x3e6   :  { %v3173_v27 = vadd.f32 %v3172_v49, %v3171_v45  ;;  %4118 = vrot.lane.b32.xlu1 %v4038_v29, %s7062_s14  ;;  %v3178_v45 = vsel %vm91_vm0, %v3067_v52, 0.0  ;;  %v12712_v49 = vld [vmem:[#allocation7_spill] sm:$0xff]  ;;  %v12715_v52 = vld [vmem:[#allocation10_spill] sm:$0xff] }
 0x3e8   :  { %v3175_v8 = vadd.f32 %v3174_v51, %v3173_v27  ;;  %v3070_v27 = vmul.f32 %v12712_v49, %v12712_v49  ;;  %v3182_v51 = vsel %vm91_vm0, %v3069_v30, 0.0  ;;  %v12717_v30 = vld [vmem:[#allocation12_spill] sm:$0xff] }
 0x3ea   :  { %v3177_v55 = vadd.f32 %v3176_v36, %v3175_v8  ;;  %v3072_v8 = vmul.f32 %v12714_v34, %v12714_v34  ;;  %v3184_v29 = vsel %vm91_vm0, %v3070_v27, 0.0  ;;  %v3076_v27 = vmul.f32 %v9019_v13, %v9019_v13 }
 0x3ec   :  { %v3179_v59 = vadd.f32 %v3178_v45, %v3177_v55  ;;  %v3073_v55 = vmul.f32 %v12715_v52, %v12715_v52  ;;  %v3186_v45 = vsel %vm91_vm0, %v3071_v11, 0.0  ;;  %v3077_v11 = vmul.f32 %v9023_v12, %v9023_v12 }
 0x3ee   :  { %v3181_v23 = vadd.f32 %v3180_v58, %v3179_v59  ;;  %v3074_v59 = vmul.f32 %v12716_v57, %v12716_v57  ;;  %v3188_v58 = vsel %vm91_vm0, %v3072_v8, 0.0  ;;  %v12718_v8 = vld [vmem:[#allocation15_spill] sm:$0xff] }
 0x3f0   :  { %v3183_v44 = vadd.f32 %v3182_v51, %v3181_v23  ;;  %v3075_v23 = vmul.f32 %v12717_v30, %v12717_v30  ;;  %v3190_v51 = vsel %vm91_vm0, %v3073_v55, 0.0  ;;  %v12719_v55 = vld [vmem:[#allocation16_spill] sm:$0xff] }
 0x3f2   :  { %v3185_v36 = vadd.f32 %v3184_v29, %v3183_v44  ;;  %v3192_v44 = vsel %vm91_vm0, %v3074_v59, 0.0  ;;  %v12720_v59 = vld [vmem:[#allocation17_spill] sm:$0xff] }
 0x3f4   :  { %v3187_v49 = vadd.f32 %v3186_v45, %v3185_v36  ;;  %v3194_v36 = vsel %vm91_vm0, %v3075_v23, 0.0  ;;  %v12721_v23 = vld [vmem:[#allocation18_spill] sm:$0xff] }
 0x3f6   :  { %v3189_v38 = vadd.f32 %v3188_v58, %v3187_v49  ;;  %v3078_v49 = vmul.f32 %v12718_v8, %v12718_v8  ;;  %v3196_v58 = vsel %vm91_vm0, %v3076_v27, 0.0  ;;  %v12722_v27 = vld [vmem:[#allocation19_spill] sm:$0xff] }
 0x3f8   :  { %v3191_v34 = vadd.f32 %v3190_v51, %v3189_v38  ;;  %v3079_v38 = vmul.f32 %v12719_v55, %v12719_v55  ;;  %v3198_v51 = vsel %vm91_vm0, %v3077_v11, 0.0 }
 0x3fa   :  { %v3193_v29 = vadd.f32 %v3192_v44, %v3191_v34  ;;  %v3080_v34 = vmul.f32 %v12720_v59, %v12720_v59  ;;  %v3200_v44 = vsel %vm91_vm0, %v3078_v49, 0.0 }
 0x3fc   :  { %v3195_v45 = vadd.f32 %v3194_v36, %v3193_v29  ;;  %v3081_v29 = vmul.f32 %v12721_v23, %v12721_v23  ;;  %v3202_v36 = vsel %vm91_vm0, %v3079_v38, 0.0 }
 0x3fe   :  { %v3197_v30 = vadd.f32 %v3196_v58, %v3195_v45  ;;  %v3082_v45 = vmul.f32 %v12722_v27, %v12722_v27  ;;  %v3204_v58 = vsel %vm91_vm0, %v3080_v34, 0.0 }
 0x400   :  { %v3199_v13 = vadd.f32 %v3198_v51, %v3197_v30  ;;  %v3206_v30 = vsel %vm91_vm0, %v3081_v29, 0.0  ;;  %v3208_v51 = vsel %vm91_vm0, %v3082_v45, 0.0  ;;  %v12724_v45 = vld [vmem:[#allocation20_spill] sm:$0xff] }
 0x402   :  { %v3201_v12 = vadd.f32 %v3200_v44, %v3199_v13 }
 0x404   :  { %v3203_v8 = vadd.f32 %v3202_v36, %v3201_v12  ;;  %v3221_v36 = vlaneseq }
 0x406   :  { %v3205_v55 = vadd.f32 %v3204_v58, %v3203_v8  ;;  %v9243_v39 = vshrl.u32 %v3221_v36, 7  ;;  %v3219_v8 = vld [vmem:[%s12578_s3] sm:$0x1] }
 0x408   :  { %v3207_v11 = vadd.f32 %v3206_v30, %v3205_v55  ;;  %12723 = vst [vmem:[#allocation18_spill] sm:$0xff] %v9243_v39  ;;  %v12623_v55 = vsub.s32 0, %v9243_v39  ;;  %v12725_v30 = vld [vmem:[#allocation21_spill] sm:$0xff] }
 0x409   :  { %v12738_v39 = vld [vmem:[#allocation9_spill] sm:$0xff] }
 0x40a   :  { %v3209_v59 = vadd.f32 %v3208_v51, %v3207_v11  ;;  %v12726_v51 = vld [vmem:[#allocation22_spill] sm:$0xff] }
 0x40c   :  { %v3210_v49 = vrot.slane %v3209_v59, 4 }
 0x40e   :  { %v3211_v13 = vadd.f32 %v3210_v49, %v3209_v59 }
 0x410   :  { %v3212_v44 = vrot.slane %v3211_v13, 2 }
 0x412   :  { %v3213_v57 = vadd.f32 %v3212_v44, %v3211_v13  ;;  %v12727_v13 = vld [vmem:[#allocation23_spill] sm:$0xff] }
 0x414   :  { %v3214_v52 = vrot.slane %v3213_v57, 1 }
 0x416   :  { %v3215_v61 = vadd.f32 %v3214_v52, %v3213_v57 }
 0x418   :  { %v3216_v38 = vmul.f32 0.001953125, %v3215_v61  ;;  %v9256_v61 = vld [vmem:[%s12579_s4] ss:$0 sm:$0xff] }
 0x41a   :  { %v3217_v12 = vadd.f32 1e-05, %v3216_v38 }
 0x41c   :  { %7054 = vrsqrt.f32 %v3217_v12 }
 0x426   :  { %v7055_v34 = vpop.eup %7054 }
 0x427   :  { %v3220_v29 = vmul.f32 %v7055_v34, %v3219_v8 }
 0x429   :  { %v9251_v59 = vrot.slane %v3220_v29, %v12623_v55  ;;  %v12736_v55 = vld [vmem:[#allocation8_spill] sm:$0xff] }
 0x42b   :  { %v3287_v52 = vmul.f32 %v9251_v59, %v12721_v23  ;;  %v3288_v57 = vmul.f32 %v9251_v59, %v12722_v27  ;;  %v9264_v58 = vmul.f32 %v9251_v59, %v12724_v45  ;;  %v9268_v11 = vmul.f32 %v9251_v59, %v12725_v30  ;;  %v12729_v30 = vld [vmem:[#allocation25_spill] sm:$0xff] }
 0x42c   :  { %v9272_v49 = vmul.f32 %v9251_v59, %v12726_v51  ;;  %v9276_v44 = vmul.f32 %v9251_v59, %v12727_v13  ;;  %v9280_v23 = vmul.f32 %v9251_v59, %v8807_v7  ;;  %v9284_v27 = vmul.f32 %v9251_v59, %v8811_v18  ;;  %v12730_v51 = vld [vmem:[#allocation26_spill] sm:$0xff] }
 0x42d   :  { %v3358_v38 = vadd.f32 %v9256_v61, %v3287_v52  ;;  %v3359_v12 = vadd.f32 %v9256_v61, %v3288_v57  ;;  %v9290_v36 = vmul.f32 %v9251_v59, %v8815_v26  ;;  %v9294_v8 = vmul.f32 %v9251_v59, %v8819_v5  ;;  %v12728_v57 = vld [vmem:[#allocation24_spill] sm:$0xff] }
 0x42e   :  { %v9298_v7 = vmul.f32 %v9251_v59, %v8823_v53  ;;  %v9302_v18 = vmul.f32 %v9251_v59, %v8827_v60  ;;  %v9306_v34 = vmul.f32 %v9251_v59, %v8831_v14  ;;  %v9310_v26 = vmul.f32 %v9251_v59, %v8835_v33 }
 0x42f   :  { %v3422_v29 = vmax.f32 %v3358_v38, 0.0  ;;  %v3423_v52 = vmax.f32 %v3359_v12, 0.0  ;;  %v9314_v5 = vmul.f32 %v9251_v59, %v8839_v37  ;;  %v9318_v53 = vmul.f32 %v9251_v59, %v8843_v20 }
 0x430   :  { %v9322_v60 = vmul.f32 %v9251_v59, %v8847_v1  ;;  %v9326_v14 = vmul.f32 %v9251_v59, %v8851_v17  ;;  %v9330_v33 = vmul.f32 %v9251_v59, %v8855_v21  ;;  %v9334_v37 = vmul.f32 %v9251_v59, %v8859_v46 }
 0x431   :  { %3572 = vst.msk [vmem:[#allocation3 + $0x331] sm:$0xff] %vm91_vm0, %v3422_v29  ;;  %3573 = vst.msk [vmem:[#allocation3 + $0x339] sm:$0xff] %vm91_vm0, %v3423_v52  ;;  %v9340_v20 = vmul.f32 %v9251_v59, %v8863_v3  ;;  %v9344_v1 = vmul.f32 %v9251_v59, %v8867_v63  ;;  %v9348_v17 = vmul.f32 %v9251_v59, %v8871_v43 }
 0x432   :  { %v9352_v21 = vmul.f32 %v9251_v59, %v8875_v28  ;;  %v9356_v46 = vmul.f32 %v9251_v59, %v8879_v16  ;;  %v9360_v3 = vmul.f32 %v9251_v59, %v8883_v6  ;;  %v9364_v63 = vmul.f32 %v9251_v59, %v8887_v22 }
 0x433   :  { %v9368_v43 = vmul.f32 %v9251_v59, %v8891_v25  ;;  %v9372_v28 = vmul.f32 %v9251_v59, %v8895_v24  ;;  %v9376_v16 = vmul.f32 %v9251_v59, %v8899_v47  ;;  %v9380_v6 = vmul.f32 %v9251_v59, %v8903_v2 }
 0x434   :  { %v9384_v22 = vmul.f32 %v9251_v59, %v8907_v10  ;;  %v9388_v25 = vmul.f32 %v9251_v59, %v8911_v19  ;;  %v9392_v24 = vmul.f32 %v9251_v59, %v8915_v40  ;;  %v9396_v47 = vmul.f32 %v9251_v59, %v12728_v57  ;;  %v12733_v57 = vld [vmem:[#allocation6_spill] sm:$0xff] }
 0x435   :  { %v9400_v2 = vmul.f32 %v9251_v59, %v8923_v32  ;;  %v9404_v10 = vmul.f32 %v9251_v59, %v8927_v15  ;;  %v9408_v19 = vmul.f32 %v9251_v59, %v8931_v35  ;;  %v9412_v40 = vmul.f32 %v9251_v59, %v8935_v41 }
 0x436   :  { %v9416_v45 = vmul.f32 %v9251_v59, %v8939_v50  ;;  %v9420_v32 = vmul.f32 %v9251_v59, %v8943_v4  ;;  %v9424_v15 = vmul.f32 %v9251_v59, %v8947_v9  ;;  %v9428_v35 = vmul.f32 %v9251_v59, %v12729_v30 }
 0x437   :  { %v9432_v41 = vmul.f32 %v9251_v59, %v12730_v51  ;;  %v9436_v50 = vmul.f32 %v9251_v59, %v8959_v48  ;;  %v9440_v4 = vmul.f32 %v9251_v59, %v8963_v42  ;;  %v9444_v9 = vmul.f32 %v9251_v59, %v8967_v54  ;;  %v12732_v54 = vld [vmem:[#allocation5_spill] sm:$0xff]  ;;  %v12734_v51 = vld [vmem:[#allocation7_spill] sm:$0xff] }
 0x438   :  { %v9448_v13 = vmul.f32 %v9251_v59, %v8971_v0  ;;  %v5555_v38 = vld [vmem:[#allocation3 + $0x332] sm:$0xff]  ;;  %v5556_v12 = vld [vmem:[#allocation3 + $0x33a] sm:$0xff]  ;;  %v9452_v29 = vmul.f32 %v9251_v59, %v8975_v56  ;;  %v9456_v48 = vmul.f32 %v9251_v59, %v8979_v62  ;;  %v9460_v42 = vmul.f32 %v9251_v59, %v8983_v31 }
 0x439   :  { %v9464_v52 = vmul.f32 %v9251_v59, %v12732_v54  ;;  %v5589_v0 = vpack.c.bf16 %v5556_v12, %v5555_v38  ;;  %v9468_v30 = vmul.f32 %v9251_v59, %v12733_v57  ;;  %v9472_v56 = vmul.f32 %v9251_v59, %v12734_v51  ;;  %v12742_v38 = vld [vmem:[#allocation11_spill] sm:$0xff]  ;;  %v12743_v57 = vld [vmem:[#allocation12_spill] sm:$0xff] }
 0x43a   :  { %12731 = vst [vmem:[#allocation19_spill] sm:$0xff] %v9460_v42  ;;  %v9476_v62 = vmul.f32 %v9251_v59, %v12736_v55  ;;  %v9480_v31 = vmul.f32 %v9251_v59, %v12738_v39  ;;  %v12740_v42 = vld [vmem:[#allocation10_spill] sm:$0xff]  ;;  %v9488_v12 = vmul.f32 %v9251_v59, %v12742_v38  ;;  %v9492_v51 = vmul.f32 %v9251_v59, %v12743_v57  ;;  %v12749_v57 = vld [vmem:[#allocation17_spill] sm:$0xff] }
 0x43b   :  { %12735 = vst [vmem:[#allocation20_spill] sm:$0xff] %v9472_v56  ;;  %v9484_v54 = vmul.f32 %v9251_v59, %v12740_v42  ;;  %v12745_v56 = vld [vmem:[#allocation13_spill] sm:$0xff]  ;;  %5621 = vst.msk [vmem:[#allocation4 + $0x1e8] sm:$0xff] %vm91_vm0, %v5589_v0 }
 0x43c   :  { %12737 = vst [vmem:[#allocation21_spill] sm:$0xff] %v9476_v62  ;;  %12739 = vst [vmem:[#allocation22_spill] sm:$0xff] %v9480_v31  ;;  %v9496_v55 = vmul.f32 %v9251_v59, %v12745_v56  ;;  %v12746_v62 = vld [vmem:[#allocation14_spill] sm:$0xff]  ;;  %v12747_v31 = vld [vmem:[#allocation15_spill] sm:$0xff]  ;;  %v9517_v56 = vadd.f32 %v9256_v61, %v9264_v58  ;;  %v9537_v58 = vadd.f32 %v9256_v61, %v9284_v27 }
 0x43d   :  { %12741 = vst [vmem:[#allocation23_spill] sm:$0xff] %v9484_v54  ;;  %12744 = vst [vmem:[#allocation24_spill] sm:$0xff] %v9492_v51  ;;  %v9500_v39 = vmul.f32 %v9251_v59, %v12746_v62  ;;  %v9504_v42 = vmul.f32 %v9251_v59, %v12747_v31  ;;  %v12748_v54 = vld [vmem:[#allocation16_spill] sm:$0xff]  ;;  %v9513_v51 = vmul.f32 %v9251_v59, %v12749_v57 }
 0x43e   :  { %v9508_v38 = vmul.f32 %v9251_v59, %v12748_v54  ;;  %v9521_v62 = vadd.f32 %v9256_v61, %v9268_v11  ;;  %v9525_v31 = vadd.f32 %v9256_v61, %v9272_v49  ;;  %v9529_v54 = vadd.f32 %v9256_v61, %v9276_v44 }
 0x43f   :  { %v9533_v59 = vadd.f32 %v9256_v61, %v9280_v23  ;;  %v9541_v11 = vadd.f32 %v9256_v61, %v9290_v36  ;;  %v9545_v49 = vadd.f32 %v9256_v61, %v9294_v8  ;;  %v9549_v44 = vadd.f32 %v9256_v61, %v9298_v7 }
 0x440   :  { %v9553_v23 = vadd.f32 %v9256_v61, %v9302_v18  ;;  %v9557_v27 = vadd.f32 %v9256_v61, %v9306_v34  ;;  %v9561_v36 = vadd.f32 %v9256_v61, %v9310_v26  ;;  %v9565_v8 = vadd.f32 %v9256_v61, %v9314_v5 }
 0x441   :  { %v9569_v7 = vadd.f32 %v9256_v61, %v9318_v53  ;;  %v9573_v18 = vadd.f32 %v9256_v61, %v9322_v60  ;;  %v9577_v34 = vadd.f32 %v9256_v61, %v9326_v14  ;;  %v9581_v26 = vadd.f32 %v9256_v61, %v9330_v33  ;;  %v12752_v0 = vld [vmem:[#allocation19_spill] sm:$0xff] }
 0x442   :  { %v9585_v5 = vadd.f32 %v9256_v61, %v9334_v37  ;;  %v9589_v53 = vadd.f32 %v9256_v61, %v9340_v20  ;;  %v9593_v60 = vadd.f32 %v9256_v61, %v9344_v1  ;;  %v9597_v14 = vadd.f32 %v9256_v61, %v9348_v17  ;;  %v12755_v57 = vld [vmem:[#allocation20_spill] sm:$0xff] }
 0x443   :  { %v9601_v33 = vadd.f32 %v9256_v61, %v9352_v21  ;;  %v9605_v37 = vadd.f32 %v9256_v61, %v9356_v46  ;;  %v9609_v20 = vadd.f32 %v9256_v61, %v9360_v3  ;;  %v9613_v1 = vadd.f32 %v9256_v61, %v9364_v63 }
 0x444   :  { %v9617_v17 = vadd.f32 %v9256_v61, %v9368_v43  ;;  %v9621_v21 = vadd.f32 %v9256_v61, %v9372_v28  ;;  %v9625_v46 = vadd.f32 %v9256_v61, %v9376_v16  ;;  %v9629_v3 = vadd.f32 %v9256_v61, %v9380_v6 }
 0x445   :  { %v9633_v63 = vadd.f32 %v9256_v61, %v9384_v22  ;;  %v9637_v43 = vadd.f32 %v9256_v61, %v9388_v25  ;;  %v9641_v28 = vadd.f32 %v9256_v61, %v9392_v24  ;;  %v9645_v16 = vadd.f32 %v9256_v61, %v9396_v47 }
 0x446   :  { %v9649_v6 = vadd.f32 %v9256_v61, %v9400_v2  ;;  %v9653_v22 = vadd.f32 %v9256_v61, %v9404_v10  ;;  %v9657_v25 = vadd.f32 %v9256_v61, %v9408_v19  ;;  %v9661_v24 = vadd.f32 %v9256_v61, %v9412_v40 }
 0x447   :  { %v9665_v47 = vadd.f32 %v9256_v61, %v9416_v45  ;;  %v9669_v2 = vadd.f32 %v9256_v61, %v9420_v32  ;;  %v9673_v10 = vadd.f32 %v9256_v61, %v9424_v15  ;;  %v9677_v19 = vadd.f32 %v9256_v61, %v9428_v35 }
 0x448   :  { %v9681_v40 = vadd.f32 %v9256_v61, %v9432_v41  ;;  %v9685_v45 = vadd.f32 %v9256_v61, %v9436_v50  ;;  %v9689_v32 = vadd.f32 %v9256_v61, %v9440_v4  ;;  %v9693_v15 = vadd.f32 %v9256_v61, %v9444_v9 }
 0x449   :  { %v9697_v35 = vadd.f32 %v9256_v61, %v9448_v13  ;;  %v9701_v41 = vadd.f32 %v9256_v61, %v9452_v29  ;;  %v9705_v50 = vadd.f32 %v9256_v61, %v9456_v48  ;;  %v9709_v4 = vadd.f32 %v9256_v61, %v12752_v0 }
 0x44a   :  { %v9713_v9 = vadd.f32 %v9256_v61, %v9464_v52  ;;  %v9717_v13 = vadd.f32 %v9256_v61, %v9468_v30  ;;  %v9721_v29 = vadd.f32 %v9256_v61, %v12755_v57  ;;  %v9737_v30 = vadd.f32 %v9256_v61, %v9488_v12 }
 0x44b   :  { %12750 = vst [vmem:[#allocation25_spill] sm:$0xff] %v9701_v41  ;;  %12751 = vst [vmem:[#allocation26_spill] sm:$0xff] %v9705_v50  ;;  %v12756_v41 = vld [vmem:[#allocation21_spill] sm:$0xff]  ;;  %v12757_v50 = vld [vmem:[#allocation22_spill] sm:$0xff]  ;;  %v9756_v12 = vadd.f32 %v9256_v61, %v9504_v42  ;;  %v3365_v42 = vmax.f32 %v9537_v58, 0.0  ;;  %v3373_v58 = vmax.f32 %v9569_v7, 0.0 }
 0x44c   :  { %12753 = vst [vmem:[#allocation5_spill] sm:$0xff] %v9709_v4  ;;  %12754 = vst [vmem:[#allocation6_spill] sm:$0xff] %v9717_v13  ;;  %v9725_v48 = vadd.f32 %v9256_v61, %v12756_v41  ;;  %v9729_v0 = vadd.f32 %v9256_v61, %v12757_v50  ;;  %v12758_v4 = vld [vmem:[#allocation23_spill] sm:$0xff]  ;;  %v12760_v13 = vld [vmem:[#allocation24_spill] sm:$0xff]  ;;  %v9745_v41 = vadd.f32 %v9256_v61, %v9496_v55  ;;  %v3381_v7 = vmax.f32 %v9601_v33, 0.0 }
 0x44d   :  { %v9733_v52 = vadd.f32 %v9256_v61, %v12758_v4  ;;  %12759 = vst [vmem:[#allocation7_spill] sm:$0xff] %v9737_v30  ;;  %v9741_v57 = vadd.f32 %v9256_v61, %v12760_v13  ;;  %v9749_v50 = vadd.f32 %v9256_v61, %v9500_v39  ;;  %v7045_v4 = vld [vmem:[%s12580_s2] sm:$0xff]   ;;  %v9760_v13 = vadd.f32 %v9256_v61, %v9508_v38  ;;  %v7047_v33 = vld [vmem:[%s12580_s2 + $0x10] sm:$0xff]  }
 0x44e   :  { %12762 = vst [vmem:[#allocation9_spill] sm:$0xff] %v9745_v41  ;;  %v9764_v55 = vadd.f32 %v9256_v61, %v9513_v51  ;;  %v3360_v41 = vmax.f32 %v9517_v56, 0.0  ;;  %v3361_v39 = vmax.f32 %v9521_v62, 0.0  ;;  %v3364_v30 = vmax.f32 %v9533_v59, 0.0  ;;  %5856 = vmatpush1.bf16.msra.mxu1 %v7045_v4  ;;  %v7046_v56 = vld [vmem:[%s12580_s2 + $0x8] sm:$0xff]   ;;  %3515 = vst.msk [vmem:[#allocation3 + $0x51] sm:$0xff] %vm91_vm0, %v3365_v42 }
 0x44f   :  { %12761 = vst [vmem:[#allocation8_spill] sm:$0xff] %v9741_v57  ;;  %12763 = vst [vmem:[#allocation10_spill] sm:$0xff] %v9749_v50  ;;  %v3362_v50 = vmax.f32 %v9525_v31, 0.0  ;;  %v3363_v57 = vmax.f32 %v9529_v54, 0.0  ;;  %v3366_v38 = vmax.f32 %v9541_v11, 0.0  ;;  %v3368_v61 = vmax.f32 %v9549_v44, 0.0 }
 0x450   :  { %12764 = vst [vmem:[#allocation11_spill] sm:$0xff] %v9760_v13  ;;  %v3367_v13 = vmax.f32 %v9545_v49, 0.0  ;;  %3510 = vst.msk [vmem:[#allocation3 + $0x19] sm:$0xff] %vm91_vm0, %v3360_v41  ;;  %v12765_v51 = vmov 0   ;;  %v3369_v62 = vmax.f32 %v9553_v23, 0.0  ;;  %v3370_v31 = vmax.f32 %v9557_v27, 0.0 }
 0x451   :  { %5857 = vmatprep.subr.bf16.mxu1 %v12765_v51  ;;  %v3371_v54 = vmax.f32 %v9561_v36, 0.0  ;;  %v3372_v59 = vmax.f32 %v9565_v8, 0.0  ;;  %3511 = vst.msk [vmem:[#allocation3 + $0x21] sm:$0xff] %vm91_vm0, %v3361_v39  ;;  %3512 = vst.msk [vmem:[#allocation3 + $0x31] sm:$0xff] %vm91_vm0, %v3362_v50  ;;  %v3374_v11 = vmax.f32 %v9573_v18, 0.0  ;;  %v3375_v49 = vmax.f32 %v9577_v34, 0.0 }
 0x452   :  { %3513 = vst.msk [vmem:[#allocation3 + $0x39] sm:$0xff] %vm91_vm0, %v3363_v57  ;;  %3514 = vst.msk [vmem:[#allocation3 + $0x49] sm:$0xff] %vm91_vm0, %v3364_v30  ;;  %v3376_v44 = vmax.f32 %v9581_v26, 0.0  ;;  %v3377_v23 = vmax.f32 %v9585_v5, 0.0  ;;  %v3378_v27 = vmax.f32 %v9589_v53, 0.0  ;;  %v3379_v36 = vmax.f32 %v9593_v60, 0.0  ;;  %5858 = vmatpush1.bf16.msra.mxu1 %v7046_v56 }
 0x453   :  { %3516 = vst.msk [vmem:[#allocation3 + $0x61] sm:$0xff] %vm91_vm0, %v3366_v38  ;;  %3517 = vst.msk [vmem:[#allocation3 + $0x69] sm:$0xff] %vm91_vm0, %v3367_v13  ;;  %v3380_v8 = vmax.f32 %v9597_v14, 0.0  ;;  %v3382_v18 = vmax.f32 %v9605_v37, 0.0  ;;  %v3383_v34 = vmax.f32 %v9609_v20, 0.0  ;;  %v3384_v26 = vmax.f32 %v9613_v1, 0.0  ;;  %5859 = vmatprep.subr.bf16.mxu1 %v12765_v51 }
 0x454   :  { %3518 = vst.msk [vmem:[#allocation3 + $0x79] sm:$0xff] %vm91_vm0, %v3368_v61  ;;  %3519 = vst.msk [vmem:[#allocation3 + $0x81] sm:$0xff] %vm91_vm0, %v3369_v62  ;;  %v3385_v5 = vmax.f32 %v9617_v17, 0.0  ;;  %v3386_v53 = vmax.f32 %v9621_v21, 0.0  ;;  %v3387_v60 = vmax.f32 %v9625_v46, 0.0  ;;  %v3388_v14 = vmax.f32 %v9629_v3, 0.0 }
 0x455   :  { %3520 = vst.msk [vmem:[#allocation3 + $0x91] sm:$0xff] %vm91_vm0, %v3370_v31  ;;  %3521 = vst.msk [vmem:[#allocation3 + $0x99] sm:$0xff] %vm91_vm0, %v3371_v54  ;;  %v3389_v37 = vmax.f32 %v9633_v63, 0.0  ;;  %v3390_v20 = vmax.f32 %v9637_v43, 0.0  ;;  %v3391_v1 = vmax.f32 %v9641_v28, 0.0  ;;  %v3392_v17 = vmax.f32 %v9645_v16, 0.0 }
 0x456   :  { %3522 = vst.msk [vmem:[#allocation3 + $0xa9] sm:$0xff] %vm91_vm0, %v3372_v59  ;;  %3523 = vst.msk [vmem:[#allocation3 + $0xb1] sm:$0xff] %vm91_vm0, %v3373_v58  ;;  %v3393_v21 = vmax.f32 %v9649_v6, 0.0  ;;  %v3394_v46 = vmax.f32 %v9653_v22, 0.0  ;;  %v3395_v3 = vmax.f32 %v9657_v25, 0.0  ;;  %v3396_v63 = vmax.f32 %v9661_v24, 0.0  ;;  %5860 = vmatpush1.bf16.msra.mxu1 %v7047_v33 }
 0x457   :  { %3524 = vst.msk [vmem:[#allocation3 + $0xc1] sm:$0xff] %vm91_vm0, %v3374_v11  ;;  %3525 = vst.msk [vmem:[#allocation3 + $0xc9] sm:$0xff] %vm91_vm0, %v3375_v49  ;;  %v3397_v43 = vmax.f32 %v9665_v47, 0.0  ;;  %v3398_v28 = vmax.f32 %v9669_v2, 0.0  ;;  %v3399_v16 = vmax.f32 %v9673_v10, 0.0  ;;  %v3400_v6 = vmax.f32 %v9677_v19, 0.0  ;;  %5861 = vmatprep.subr.bf16.mxu1 %v12765_v51 }
 0x458   :  { %3526 = vst.msk [vmem:[#allocation3 + $0xd9] sm:$0xff] %vm91_vm0, %v3376_v44  ;;  %3527 = vst.msk [vmem:[#allocation3 + $0xe1] sm:$0xff] %vm91_vm0, %v3377_v23  ;;  %v3401_v22 = vmax.f32 %v9681_v40, 0.0  ;;  %v3402_v25 = vmax.f32 %v9685_v45, 0.0  ;;  %v3403_v24 = vmax.f32 %v9689_v32, 0.0  ;;  %v3404_v47 = vmax.f32 %v9693_v15, 0.0 }
 0x459   :  { %3528 = vst.msk [vmem:[#allocation3 + $0xf1] sm:$0xff] %vm91_vm0, %v3378_v27  ;;  %3529 = vst.msk [vmem:[#allocation3 + $0xf9] sm:$0xff] %vm91_vm0, %v3379_v36  ;;  %v5497_v2 = vld [vmem:[#allocation3 + $0x4a] sm:$0xff]  ;;  %v5498_v10 = vld [vmem:[#allocation3 + $0x52] sm:$0xff]  ;;  %v3405_v19 = vmax.f32 %v9697_v35, 0.0  ;;  %v3409_v35 = vmax.f32 %v9713_v9, 0.0 }
 0x45a   :  { %3530 = vst.msk [vmem:[#allocation3 + $0x109] sm:$0xff] %vm91_vm0, %v3380_v8  ;;  %3531 = vst.msk [vmem:[#allocation3 + $0x111] sm:$0xff] %vm91_vm0, %v3381_v7  ;;  %v12766_v30 = vld [vmem:[#allocation25_spill] sm:$0xff]  ;;  %v12767_v57 = vld [vmem:[#allocation26_spill] sm:$0xff]  ;;  %v3411_v38 = vmax.f32 %v9721_v29, 0.0  ;;  %v3412_v61 = vmax.f32 %v9725_v48, 0.0 }
 0x45b   :  { %3532 = vst.msk [vmem:[#allocation3 + $0x121] sm:$0xff] %vm91_vm0, %v3382_v18  ;;  %3533 = vst.msk [vmem:[#allocation3 + $0x129] sm:$0xff] %vm91_vm0, %v3383_v34  ;;  %v3406_v40 = vmax.f32 %v12766_v30, 0.0  ;;  %v3407_v45 = vmax.f32 %v12767_v57, 0.0  ;;  %v12768_v41 = vld [vmem:[#allocation5_spill] sm:$0xff]  ;;  %v5495_v15 = vld [vmem:[#allocation3 + $0x32] sm:$0xff] }
 0x45c   :  { %3534 = vst.msk [vmem:[#allocation3 + $0x139] sm:$0xff] %vm91_vm0, %v3384_v26  ;;  %3535 = vst.msk [vmem:[#allocation3 + $0x141] sm:$0xff] %vm91_vm0, %v3385_v5  ;;  %v3408_v32 = vmax.f32 %v12768_v41, 0.0  ;;  %v5496_v50 = vld [vmem:[#allocation3 + $0x3a] sm:$0xff]  ;;  %v5499_v4 = vld [vmem:[#allocation3 + $0x62] sm:$0xff]  ;;  %v3413_v9 = vmax.f32 %v9729_v0, 0.0 }
 0x45d   :  { %3536 = vst.msk [vmem:[#allocation3 + $0x151] sm:$0xff] %vm91_vm0, %v3386_v53  ;;  %3537 = vst.msk [vmem:[#allocation3 + $0x159] sm:$0xff] %vm91_vm0, %v3387_v60  ;;  %v5500_v13 = vld [vmem:[#allocation3 + $0x6a] sm:$0xff]  ;;  %v5501_v56 = vld [vmem:[#allocation3 + $0x7a] sm:$0xff]  ;;  %v3414_v29 = vmax.f32 %v9733_v52, 0.0  ;;  %v3419_v52 = vmax.f32 %v9756_v12, 0.0  ;;  %v9898_v60 = vpack.c.bf16 %v5498_v10, %v5497_v2  ;;  %v4087_v10 = vpop.permute.xlu1 %4086 }
 0x45e   :  { %3538 = vst.msk [vmem:[#allocation3 + $0x169] sm:$0xff] %vm91_vm0, %v3388_v14  ;;  %3539 = vst.msk [vmem:[#allocation3 + $0x171] sm:$0xff] %vm91_vm0, %v3389_v37  ;;  %v12769_v39 = vld [vmem:[#allocation6_spill] sm:$0xff]  ;;  %v9873_v31 = vld [vmem:[#allocation3] sm:$0xff]  ;;  %v3421_v26 = vmax.f32 %v9764_v55, 0.0  ;;  %v9900_v14 = vpack.c.bf16 %v5500_v13, %v5499_v4 }
 0x45f   :  { %3540 = vst.msk [vmem:[#allocation3 + $0x181] sm:$0xff] %vm91_vm0, %v3390_v20  ;;  %3541 = vst.msk [vmem:[#allocation3 + $0x189] sm:$0xff] %vm91_vm0, %v3391_v1  ;;  %v3410_v42 = vmax.f32 %v12769_v39, 0.0  ;;  %v5502_v62 = vld [vmem:[#allocation3 + $0x82] sm:$0xff]  ;;  %v12770_v59 = vld [vmem:[#allocation7_spill] sm:$0xff] }
 0x460   :  { %3542 = vst.msk [vmem:[#allocation3 + $0x1c9] sm:$0xff] %vm91_vm0, %v3392_v17  ;;  %3543 = vst.msk [vmem:[#allocation3 + $0x1d1] sm:$0xff] %vm91_vm0, %v3393_v21  ;;  %v9875_v54 = vld [vmem:[#allocation3 + $0x8] sm:$0xff]  ;;  %v3415_v48 = vmax.f32 %v12770_v59, 0.0  ;;  %v12771_v58 = vld [vmem:[#allocation8_spill] sm:$0xff]  ;;  %v9902_v33 = vpack.c.bf16 %v5502_v62, %v5501_v56 }
 0x461   :  { %3544 = vst.msk [vmem:[#allocation3 + $0x1e1] sm:$0xff] %vm91_vm0, %v3394_v46  ;;  %3545 = vst.msk [vmem:[#allocation3 + $0x1e9] sm:$0xff] %vm91_vm0, %v3395_v3  ;;  %v3416_v11 = vmax.f32 %v12771_v58, 0.0  ;;  %v5503_v49 = vld [vmem:[#allocation3 + $0x92] sm:$0xff]  ;;  %v5504_v44 = vld [vmem:[#allocation3 + $0x9a] sm:$0xff]  ;;  %v9914_v46 = vpack.c.bf16 %v5496_v50, %v5495_v15 }
 0x462   :  { %3546 = vst.msk [vmem:[#allocation3 + $0x1f9] sm:$0xff] %vm91_vm0, %v3396_v63  ;;  %3547 = vst.msk [vmem:[#allocation3 + $0x201] sm:$0xff] %vm91_vm0, %v3397_v43  ;;  %v12772_v23 = vld [vmem:[#allocation9_spill] sm:$0xff]  ;;  %v12773_v36 = vld [vmem:[#allocation10_spill] sm:$0xff]  ;;  %v9908_v1 = vpack.c.bf16 %v5504_v44, %v5503_v49 }
 0x463   :  { %3548 = vst.msk [vmem:[#allocation3 + $0x211] sm:$0xff] %vm91_vm0, %v3398_v28  ;;  %3549 = vst.msk [vmem:[#allocation3 + $0x219] sm:$0xff] %vm91_vm0, %v3399_v16  ;;  %v3417_v27 = vmax.f32 %v12772_v23, 0.0  ;;  %v3418_v0 = vmax.f32 %v12773_v36, 0.0  ;;  %v12774_v8 = vld [vmem:[#allocation11_spill] sm:$0xff]  ;;  %v5507_v12 = vld [vmem:[#allocation3 + $0xc2] sm:$0xff] }
 0x464   :  { %3550 = vst.msk [vmem:[#allocation3 + $0x229] sm:$0xff] %vm91_vm0, %v3400_v6  ;;  %3551 = vst.msk [vmem:[#allocation3 + $0x231] sm:$0xff] %vm91_vm0, %v3401_v22  ;;  %v3420_v7 = vmax.f32 %v12774_v8, 0.0  ;;  %v5505_v18 = vld [vmem:[#allocation3 + $0xaa] sm:$0xff]  ;;  %v5506_v34 = vld [vmem:[#allocation3 + $0xb2] sm:$0xff]  ;;  %v3638_v6 = vpack.c.bf16 %v9875_v54, %v9873_v31  ;;  %v3831_v22 = vpop.permute.xlu0 %3830 }
 0x465   :  { %3552 = vst.msk [vmem:[#allocation3 + $0x241] sm:$0xff] %vm91_vm0, %v3402_v25  ;;  %3553 = vst.msk [vmem:[#allocation3 + $0x249] sm:$0xff] %vm91_vm0, %v3403_v24  ;;  %v5508_v5 = vld [vmem:[#allocation3 + $0xca] sm:$0xff]  ;;  %v5509_v53 = vld [vmem:[#allocation3 + $0xda] sm:$0xff]  ;;  %v9910_v17 = vpack.c.bf16 %v5506_v34, %v5505_v18 }
 0x466   :  { %3554 = vst.msk [vmem:[#allocation3 + $0x259] sm:$0xff] %vm91_vm0, %v3404_v47  ;;  %3555 = vst.msk [vmem:[#allocation3 + $0x261] sm:$0xff] %vm91_vm0, %v3405_v19  ;;  %v5510_v55 = vld [vmem:[#allocation3 + $0xe2] sm:$0xff]  ;;  %v5511_v37 = vld [vmem:[#allocation3 + $0xf2] sm:$0xff]  ;;  %v9912_v21 = vpack.c.bf16 %v5508_v5, %v5507_v12 }
 0x467   :  { %3556 = vst.msk [vmem:[#allocation3 + $0x271] sm:$0xff] %vm91_vm0, %v3406_v40  ;;  %3557 = vst.msk [vmem:[#allocation3 + $0x279] sm:$0xff] %vm91_vm0, %v3407_v45  ;;  %v5512_v20 = vld [vmem:[#allocation3 + $0xfa] sm:$0xff]  ;;  %v5513_v3 = vld [vmem:[#allocation3 + $0x10a] sm:$0xff]  ;;  %v9917_v28 = vpack.c.bf16 %v5510_v55, %v5509_v53 }
 0x468   :  { %3558 = vst.msk [vmem:[#allocation3 + $0x289] sm:$0xff] %vm91_vm0, %v3408_v32  ;;  %3559 = vst.msk [vmem:[#allocation3 + $0x291] sm:$0xff] %vm91_vm0, %v3409_v35  ;;  %v5514_v63 = vld [vmem:[#allocation3 + $0x112] sm:$0xff]  ;;  %v5515_v43 = vld [vmem:[#allocation3 + $0x122] sm:$0xff]  ;;  %v9919_v16 = vpack.c.bf16 %v5512_v20, %v5511_v37 }
 0x469   :  { %3560 = vst.msk [vmem:[#allocation3 + $0x2a1] sm:$0xff] %vm91_vm0, %v3410_v42  ;;  %3561 = vst.msk [vmem:[#allocation3 + $0x2a9] sm:$0xff] %vm91_vm0, %v3411_v38  ;;  %v5516_v25 = vld [vmem:[#allocation3 + $0x12a] sm:$0xff]  ;;  %v5517_v24 = vld [vmem:[#allocation3 + $0x13a] sm:$0xff]  ;;  %v9929_v2 = vpack.c.bf16 %v5514_v63, %v5513_v3 }
 0x46a   :  { %3562 = vst.msk [vmem:[#allocation3 + $0x2b9] sm:$0xff] %vm91_vm0, %v3412_v61  ;;  %3563 = vst.msk [vmem:[#allocation3 + $0x2c1] sm:$0xff] %vm91_vm0, %v3413_v9  ;;  %v5518_v47 = vld [vmem:[#allocation3 + $0x142] sm:$0xff]  ;;  %v5519_v19 = vld [vmem:[#allocation3 + $0x152] sm:$0xff]  ;;  %v5569_v57 = vpack.c.bf16 %v5516_v25, %v5515_v43 }
 0x46b   :  { %3564 = vst.msk [vmem:[#allocation3 + $0x2d1] sm:$0xff] %vm91_vm0, %v3414_v29  ;;  %3565 = vst.msk [vmem:[#allocation3 + $0x2d9] sm:$0xff] %vm91_vm0, %v3415_v48  ;;  %v5520_v30 = vld [vmem:[#allocation3 + $0x15a] sm:$0xff]  ;;  %v5521_v40 = vld [vmem:[#allocation3 + $0x16a] sm:$0xff]  ;;  %v5570_v45 = vpack.c.bf16 %v5518_v47, %v5517_v24 }
 0x46c   :  { %3566 = vst.msk [vmem:[#allocation3 + $0x2e9] sm:$0xff] %vm91_vm0, %v3416_v11  ;;  %3567 = vst.msk [vmem:[#allocation3 + $0x2f1] sm:$0xff] %vm91_vm0, %v3417_v27  ;;  %v5522_v41 = vld [vmem:[#allocation3 + $0x172] sm:$0xff]  ;;  %v5523_v32 = vld [vmem:[#allocation3 + $0x182] sm:$0xff]  ;;  %v5571_v50 = vpack.c.bf16 %v5520_v30, %v5519_v19 }
 0x46d   :  { %3568 = vst.msk [vmem:[#allocation3 + $0x301] sm:$0xff] %vm91_vm0, %v3418_v0  ;;  %3569 = vst.msk [vmem:[#allocation3 + $0x309] sm:$0xff] %vm91_vm0, %v3419_v52  ;;  %v5524_v15 = vld [vmem:[#allocation3 + $0x18a] sm:$0xff]  ;;  %v5527_v4 = vld [vmem:[#allocation3 + $0x1e2] sm:$0xff]  ;;  %v5572_v39 = vpack.c.bf16 %v5522_v41, %v5521_v40 }
 0x46e   :  { %3570 = vst.msk [vmem:[#allocation3 + $0x319] sm:$0xff] %vm91_vm0, %v3420_v7  ;;  %3571 = vst.msk [vmem:[#allocation3 + $0x321] sm:$0xff] %vm91_vm0, %v3421_v26  ;;  %v5528_v13 = vld [vmem:[#allocation3 + $0x1ea] sm:$0xff]  ;;  %v5529_v35 = vld [vmem:[#allocation3 + $0x1fa] sm:$0xff]  ;;  %v5573_v42 = vpack.c.bf16 %v5524_v15, %v5523_v32 }
 0x46f   :  { %5592 = vst.msk [vmem:[#allocation4 + $0x18] sm:$0xff] %vm91_vm0, %v9898_v60  ;;  %5593 = vst.msk [vmem:[#allocation4 + $0x28] sm:$0xff] %vm91_vm0, %v9900_v14  ;;  %v5530_v38 = vld [vmem:[#allocation3 + $0x202] sm:$0xff]  ;;  %v5531_v61 = vld [vmem:[#allocation3 + $0x212] sm:$0xff]  ;;  %v5575_v62 = vpack.c.bf16 %v5528_v13, %v5527_v4 }
 0x470   :  { %5594 = vst.msk [vmem:[#allocation4 + $0x38] sm:$0xff] %vm91_vm0, %v9902_v33  ;;  %5595 = vst.msk [vmem:[#allocation4 + $0x48] sm:$0xff] %vm91_vm0, %v9908_v1  ;;  %v5532_v56 = vld [vmem:[#allocation3 + $0x21a] sm:$0xff]  ;;  %v5533_v31 = vld [vmem:[#allocation3 + $0x22a] sm:$0xff]  ;;  %v5576_v29 = vpack.c.bf16 %v5530_v38, %v5529_v35 }
 0x471   :  { %5596 = vst.msk [vmem:[#allocation4 + $0x58] sm:$0xff] %vm91_vm0, %v9910_v17  ;;  %5597 = vst.msk [vmem:[#allocation4 + $0x68] sm:$0xff] %vm91_vm0, %v9912_v21  ;;  %v5534_v54 = vld [vmem:[#allocation3 + $0x232] sm:$0xff]  ;;  %v5535_v9 = vld [vmem:[#allocation3 + $0x242] sm:$0xff]  ;;  %v5577_v59 = vpack.c.bf16 %v5532_v56, %v5531_v61 }
 0x472   :  { %5591 = vst.msk [vmem:[#allocation4 + $0x8] sm:$0xff] %vm91_vm0, %v9914_v46  ;;  %5598 = vst.msk [vmem:[#allocation4 + $0x78] sm:$0xff] %vm91_vm0, %v9917_v28  ;;  %v5536_v48 = vld [vmem:[#allocation3 + $0x24a] sm:$0xff]  ;;  %v5537_v58 = vld [vmem:[#allocation3 + $0x25a] sm:$0xff]  ;;  %v5578_v49 = vpack.c.bf16 %v5534_v54, %v5533_v31 }
 0x473   :  { %5599 = vst.msk [vmem:[#allocation4 + $0x88] sm:$0xff] %vm91_vm0, %v9919_v16  ;;  %3670 = vst.msk [vmem:[#allocation4] sm:$0xff] %vm91_vm0, %v3638_v6  ;;  %v5538_v11 = vld [vmem:[#allocation3 + $0x262] sm:$0xff]  ;;  %v5539_v44 = vld [vmem:[#allocation3 + $0x272] sm:$0xff]  ;;  %v5579_v36 = vpack.c.bf16 %v5536_v48, %v5535_v9 }
 0x474   :  { %5600 = vst.msk [vmem:[#allocation4 + $0x98] sm:$0xff] %vm91_vm0, %v9929_v2  ;;  %5601 = vst.msk [vmem:[#allocation4 + $0xa8] sm:$0xff] %vm91_vm0, %v5569_v57  ;;  %v5540_v23 = vld [vmem:[#allocation3 + $0x27a] sm:$0xff]  ;;  %v5541_v27 = vld [vmem:[#allocation3 + $0x28a] sm:$0xff]  ;;  %v5580_v0 = vpack.c.bf16 %v5538_v11, %v5537_v58 }
 0x475   :  { %3926 = vst.msk [vmem:[#allocation4] sm:$0xff] %vm596_vm3, %v3831_v22  ;;  %v5542_v52 = vld [vmem:[#allocation3 + $0x292] sm:$0xff]  ;;  %v5543_v8 = vld [vmem:[#allocation3 + $0x2a2] sm:$0xff]  ;;  %v5544_v7 = vld [vmem:[#allocation3 + $0x2aa] sm:$0xff]  ;;  %v5581_v18 = vpack.c.bf16 %v5540_v23, %v5539_v44  ;;  %v9984_v23 = vpop.permute.xlu0 %5141 }
 0x476   :  { %5602 = vst.msk [vmem:[#allocation4 + $0xb8] sm:$0xff] %vm91_vm0, %v5570_v45  ;;  %5603 = vst.msk [vmem:[#allocation4 + $0xc8] sm:$0xff] %vm91_vm0, %v5571_v50  ;;  %v4470_v34 = vld [vmem:[#allocation3 + $0x19] sm:$0xff]  ;;  %v5546_v5 = vld [vmem:[#allocation3 + $0x2c2] sm:$0xff]  ;;  %v5582_v55 = vpack.c.bf16 %v5542_v52, %v5541_v27  ;;  %v5583_v37 = vpack.c.bf16 %v5544_v7, %v5543_v8 }
 0x477   :  { %4182 = vst.msk [vmem:[#allocation4] sm:$0xff] %vm853_vm4, %v4087_v10  ;;  %v4214_v26 = vld [vmem:[#allocation3 + $0x18] sm:$0xff]  ;;  %v5549_v3 = vld [vmem:[#allocation3 + $0x2ea] sm:$0xff]  ;;  %v5551_v6 = vld [vmem:[#allocation3 + $0x302] sm:$0xff] }
 0x478   :  { %5604 = vst.msk [vmem:[#allocation4 + $0xd8] sm:$0xff] %vm91_vm0, %v5572_v39  ;;  %5605 = vst.msk [vmem:[#allocation4 + $0xe8] sm:$0xff] %vm91_vm0, %v5573_v42  ;;  %v5545_v12 = vld [vmem:[#allocation3 + $0x2ba] sm:$0xff]  ;;  %v5547_v53 = vld [vmem:[#allocation3 + $0x2d2] sm:$0xff] }
 0x479   :  { %5607 = vst.msk [vmem:[#allocation4 + $0x108] sm:$0xff] %vm91_vm0, %v5575_v62  ;;  %5608 = vst.msk [vmem:[#allocation4 + $0x118] sm:$0xff] %vm91_vm0, %v5576_v29  ;;  %v5548_v20 = vld [vmem:[#allocation3 + $0x2da] sm:$0xff]  ;;  %v5550_v63 = vld [vmem:[#allocation3 + $0x2f2] sm:$0xff]  ;;  %v5584_v43 = vpack.c.bf16 %v5546_v5, %v5545_v12 }
 0x47a   :  { %5609 = vst.msk [vmem:[#allocation4 + $0x128] sm:$0xff] %vm91_vm0, %v5577_v59  ;;  %5610 = vst.msk [vmem:[#allocation4 + $0x138] sm:$0xff] %vm91_vm0, %v5578_v49  ;;  %v5552_v22 = vld [vmem:[#allocation3 + $0x30a] sm:$0xff]  ;;  %v5553_v25 = vld [vmem:[#allocation3 + $0x31a] sm:$0xff]  ;;  %v5585_v24 = vpack.c.bf16 %v5548_v20, %v5547_v53  ;;  %v5586_v47 = vpack.c.bf16 %v5550_v63, %v5549_v3  ;;  %v3863_v20 = vpop.permute.xlu0 %3862 }
 0x47b   :  { %5611 = vst.msk [vmem:[#allocation4 + $0x148] sm:$0xff] %vm91_vm0, %v5579_v36  ;;  %5612 = vst.msk [vmem:[#allocation4 + $0x158] sm:$0xff] %vm91_vm0, %v5580_v0  ;;  %v5554_v10 = vld [vmem:[#allocation3 + $0x322] sm:$0xff]  ;;  %v5587_v19 = vpack.c.bf16 %v5552_v22, %v5551_v6  ;;  %v4983_v32 = vld [vmem:[#allocation3 + $0x30] sm:$0xff]  ;;  %v9988_v0 = vpop.permute.xlu1 %5397 }
 0x47c   :  { %5613 = vst.msk [vmem:[#allocation4 + $0x168] sm:$0xff] %vm91_vm0, %v5581_v18  ;;  %5614 = vst.msk [vmem:[#allocation4 + $0x178] sm:$0xff] %vm91_vm0, %v5582_v55  ;;  %v4471_v30 = vld [vmem:[#allocation3 + $0x21] sm:$0xff]  ;;  %v5588_v57 = vpack.c.bf16 %v5554_v10, %v5553_v25  ;;  %v4984_v15 = vld [vmem:[#allocation3 + $0x38] sm:$0xff] }
 0x47d   :  { %5615 = vst.msk [vmem:[#allocation4 + $0x188] sm:$0xff] %vm91_vm0, %v5583_v37  ;;  %5616 = vst.msk [vmem:[#allocation4 + $0x198] sm:$0xff] %vm91_vm0, %v5584_v43  ;;  %v4215_v40 = vld [vmem:[#allocation3 + $0x20] sm:$0xff]  ;;  %v4534_v45 = vpack.c.bf16 %v4471_v30, %v4470_v34  ;;  %v5047_v50 = vpack.c.bf16 %v4984_v15, %v4983_v32  ;;  %v5624_v35 = vld [vmem:[#allocation4 + $0x8] sm:$0xff] }
 0x47e   :  { %5617 = vst.msk [vmem:[#allocation4 + $0x1a8] sm:$0xff] %vm91_vm0, %v5585_v24  ;;  %5618 = vst.msk [vmem:[#allocation4 + $0x1b8] sm:$0xff] %vm91_vm0, %v5586_v47  ;;  %v4278_v41 = vpack.c.bf16 %v4215_v40, %v4214_v26  ;;  %v4726_v4 = vld [vmem:[#allocation3 + $0x1a] sm:$0xff]  ;;  %v4727_v13 = vld [vmem:[#allocation3 + $0x22] sm:$0xff]  ;;  %6994 = vmatprep.mubr.msk.bf16.mxu1 %vm91_vm0, %v5624_v35 }
 0x47f   :  { %5619 = vst.msk [vmem:[#allocation4 + $0x1c8] sm:$0xff] %vm91_vm0, %v5587_v19  ;;  %5620 = vst.msk [vmem:[#allocation4 + $0x1d8] sm:$0xff] %vm91_vm0, %v5588_v57  ;;  %4598 = vrot.lane.b32.xlu1 %v4534_v45, %s7063_s15  ;;  %v4985_v39 = vld [vmem:[#allocation3 + $0x48] sm:$0xff]  ;;  %v4986_v42 = vld [vmem:[#allocation3 + $0x50] sm:$0xff]  ;;  %v4790_v56 = vpack.c.bf16 %v4727_v13, %v4726_v4  ;;  %v4119_v63 = vpop.permute.xlu1 %4118 }
 0x480   :  { %4342 = vrot.lane.b32.xlu0 %v4278_v41, %s7061_s13  ;;  %3671 = vst.msk [vmem:[#allocation4 + $0x10] sm:$0xff] %vm91_vm0, %v4278_v41  ;;  %v9971_v38 = vpack.c.bf16 %v4986_v42, %v4985_v39  ;;  %v4987_v61 = vld [vmem:[#allocation3 + $0x60] sm:$0xff]  ;;  %3672 = vst.msk [vmem:[#allocation4 + $0x20] sm:$0xff] %vm91_vm0, %v5047_v50  ;;  %v5239_v62 = vld [vmem:[#allocation3 + $0x31] sm:$0xff] }
 0x481   :  { %v4988_v31 = vld [vmem:[#allocation3 + $0x68] sm:$0xff]  ;;  %v5240_v54 = vld [vmem:[#allocation3 + $0x39] sm:$0xff]  ;;  %v4991_v58 = vld [vmem:[#allocation3 + $0x90] sm:$0xff] }
 0x482   :  { %v9974_v9 = vpack.c.bf16 %v4988_v31, %v4987_v61  ;;  %v4989_v29 = vld [vmem:[#allocation3 + $0x78] sm:$0xff]  ;;  %v4990_v59 = vld [vmem:[#allocation3 + $0x80] sm:$0xff]  ;;  %3673 = vst.msk [vmem:[#allocation4 + $0x30] sm:$0xff] %vm91_vm0, %v9971_v38  ;;  %v4993_v44 = vld [vmem:[#allocation3 + $0xa8] sm:$0xff]  ;;  %v5303_v27 = vpack.c.bf16 %v5240_v54, %v5239_v62 }
 0x483   :  { %5111 = vrot.lane.b32.xlu1 %v5047_v50, %s7065_s17  ;;  %v9980_v48 = vpack.c.bf16 %v4990_v59, %v4989_v29  ;;  %v4992_v11 = vld [vmem:[#allocation3 + $0x98] sm:$0xff]  ;;  %v4994_v36 = vld [vmem:[#allocation3 + $0xb0] sm:$0xff]  ;;  %v4995_v8 = vld [vmem:[#allocation3 + $0xc0] sm:$0xff] }
 0x484   :  { %4854 = vrot.lane.b32.xlu0 %v4790_v56, %s7064_s16  ;;  %v9982_v49 = vpack.c.bf16 %v4992_v11, %v4991_v58  ;;  %3674 = vst.msk [vmem:[#allocation4 + $0x40] sm:$0xff] %vm91_vm0, %v9974_v9  ;;  %v9992_v52 = vpack.c.bf16 %v4994_v36, %v4993_v44  ;;  %v4996_v7 = vld [vmem:[#allocation3 + $0xc8] sm:$0xff]  ;;  %v4997_v34 = vld [vmem:[#allocation3 + $0xd8] sm:$0xff]  ;;  %v4998_v26 = vld [vmem:[#allocation3 + $0xe0] sm:$0xff] }
 0x485   :  { %3675 = vst.msk [vmem:[#allocation4 + $0x50] sm:$0xff] %vm91_vm0, %v9980_v48  ;;  %v9998_v18 = vpack.c.bf16 %v4996_v7, %v4995_v8  ;;  %v10000_v12 = vpack.c.bf16 %v4998_v26, %v4997_v34  ;;  %v7048_v5 = vld [vmem:[%s12580_s2 + $0x18] sm:$0xff]   ;;  %v3606_v53 = vld [vmem:[#allocation3 + $0x1b0] sm:$0xff]  ;;  %v7049_v3 = vld [vmem:[%s12580_s2 + $0x20] sm:$0xff]  }
 0x486   :  { %3676 = vst.msk [vmem:[#allocation4 + $0x60] sm:$0xff] %vm91_vm0, %v9982_v49  ;;  %3677 = vst.msk [vmem:[#allocation4 + $0x70] sm:$0xff] %vm91_vm0, %v9992_v52  ;;  %v3607_v55 = vld [vmem:[#allocation3 + $0x1b8] sm:$0xff]  ;;  %5862 = vmatpush1.bf16.msra.mxu1 %v7048_v5  ;;  %v4999_v43 = vld [vmem:[#allocation3 + $0xf0] sm:$0xff] }
 0x487   :  { %3832 = vrot.lane.b32.xlu1 %v4534_v45, %s7060_s12  ;;  %3678 = vst.msk [vmem:[#allocation4 + $0x80] sm:$0xff] %vm91_vm0, %v9998_v18  ;;  %v3654_v37 = vpack.c.bf16 %v3607_v55, %v3606_v53  ;;  %3679 = vst.msk [vmem:[#allocation4 + $0x90] sm:$0xff] %vm91_vm0, %v10000_v12  ;;  %v5000_v6 = vld [vmem:[#allocation3 + $0xf8] sm:$0xff]  ;;  %5863 = vmatprep.subr.bf16.mxu1 %v12765_v51  ;;  %v5241_v25 = vld [vmem:[#allocation3 + $0x49] sm:$0xff] }
 0x488   :  { %5367 = vrot.lane.b32.xlu0 %v5303_v27, %s7066_s18  ;;  %v10018_v22 = vpack.c.bf16 %v5000_v6, %v4999_v43  ;;  %v5242_v24 = vld [vmem:[#allocation3 + $0x51] sm:$0xff]  ;;  %v7050_v47 = vld [vmem:[%s12580_s2 + $0x28] sm:$0xff]   ;;  %v5003_v57 = vld [vmem:[#allocation3 + $0x120] sm:$0xff] }
 0x489   :  { %3686 = vst.msk [vmem:[#allocation4 + $0x100] sm:$0xff] %vm91_vm0, %v3654_v37  ;;  %v5001_v10 = vld [vmem:[#allocation3 + $0x108] sm:$0xff]  ;;  %v5002_v19 = vld [vmem:[#allocation3 + $0x110] sm:$0xff]  ;;  %v5304_v30 = vpack.c.bf16 %v5242_v24, %v5241_v25  ;;  %v5005_v15 = vld [vmem:[#allocation3 + $0x138] sm:$0xff] }
 0x48a   :  { %3942 = vst.msk [vmem:[#allocation4 + $0x100] sm:$0xff] %vm596_vm3, %v3863_v20  ;;  %5864 = vmatpush1.bf16.msra.mxu1 %v7049_v3  ;;  %v10031_v40 = vpack.c.bf16 %v5002_v19, %v5001_v10  ;;  %v5004_v45 = vld [vmem:[#allocation3 + $0x128] sm:$0xff]  ;;  %v7051_v41 = vld [vmem:[%s12580_s2 + $0x30] sm:$0xff]   ;;  %v7052_v13 = vld [vmem:[%s12580_s2 + $0x38] sm:$0xff]  }
 0x48b   :  { %4344 = vrot.lane.b32.xlu1 %v5047_v50, %s7061_s13  ;;  %4198 = vst.msk [vmem:[#allocation4 + $0x100] sm:$0xff] %vm853_vm4, %v4119_v63  ;;  %5865 = vmatprep.subr.bf16.mxu1 %v12765_v51  ;;  %v10036_v32 = vpack.c.bf16 %v5004_v45, %v5003_v57  ;;  %v5006_v50 = vld [vmem:[#allocation3 + $0x140] sm:$0xff]  ;;  %v5007_v35 = vld [vmem:[#allocation3 + $0x150] sm:$0xff]  ;;  %v5008_v39 = vld [vmem:[#allocation3 + $0x158] sm:$0xff] }
 0x48c   :  { %4088 = vrot.lane.b32.xlu0 %v4790_v56, %s7062_s14  ;;  %3680 = vst.msk [vmem:[#allocation4 + $0xa0] sm:$0xff] %vm91_vm0, %v10018_v22  ;;  %3681 = vst.msk [vmem:[#allocation4 + $0xb0] sm:$0xff] %vm91_vm0, %v10031_v40  ;;  %v10046_v4 = vpack.c.bf16 %v5006_v50, %v5005_v15  ;;  %v10057_v42 = vpack.c.bf16 %v5008_v39, %v5007_v35  ;;  %v5009_v61 = vld [vmem:[#allocation3 + $0x168] sm:$0xff]  ;;  %v5010_v56 = vld [vmem:[#allocation3 + $0x170] sm:$0xff] }
 0x48d   :  { %3682 = vst.msk [vmem:[#allocation4 + $0xc0] sm:$0xff] %vm91_vm0, %v10036_v32  ;;  %v7053_v62 = vld [vmem:[%s12580_s2 + $0x40] sm:$0xff]   ;;  %v10062_v31 = vpack.c.bf16 %v5010_v56, %v5009_v61  ;;  %v5244_v29 = vld [vmem:[#allocation3 + $0x69] sm:$0xff]  ;;  %v5020_v34 = vld [vmem:[#allocation3 + $0x218] sm:$0xff] }
 0x48e   :  { %5866 = vmatpush1.bf16.msra.mxu1 %v7050_v47  ;;  %3683 = vst.msk [vmem:[#allocation4 + $0xd0] sm:$0xff] %vm91_vm0, %v10046_v4  ;;  %3684 = vst.msk [vmem:[#allocation4 + $0xe0] sm:$0xff] %vm91_vm0, %v10057_v42  ;;  %v5243_v54 = vld [vmem:[#allocation3 + $0x61] sm:$0xff]  ;;  %v4247_v59 = vld [vmem:[#allocation3 + $0x1d0] sm:$0xff] }
 0x48f   :  { %4856 = vrot.lane.b32.xlu1 %v9914_v46, %s7064_s16  ;;  %5867 = vmatprep.subr.bf16.mxu1 %v12765_v51  ;;  %3685 = vst.msk [vmem:[#allocation4 + $0xf0] sm:$0xff] %vm91_vm0, %v10062_v31  ;;  %v5016_v11 = vld [vmem:[#allocation3 + $0x1e8] sm:$0xff]  ;;  %v5305_v44 = vpack.c.bf16 %v5244_v29, %v5243_v54  ;;  %v5018_v36 = vld [vmem:[#allocation3 + $0x200] sm:$0xff]  ;;  %v5019_v7 = vld [vmem:[#allocation3 + $0x210] sm:$0xff] }
 0x490   :  { %4600 = vrot.lane.b32.xlu0 %v5303_v27, %s7063_s15  ;;  %v10090_v26 = vpack.c.bf16 %v5020_v34, %v5019_v7  ;;  %v5021_v5 = vld [vmem:[#allocation3 + $0x228] sm:$0xff]  ;;  %v5022_v53 = vld [vmem:[#allocation3 + $0x230] sm:$0xff]  ;;  %v5245_v37 = vld [vmem:[#allocation3 + $0x79] sm:$0xff] }
 0x491   :  { %v10096_v55 = vpack.c.bf16 %v5022_v53, %v5021_v5  ;;  %v5246_v20 = vld [vmem:[#allocation3 + $0x81] sm:$0xff]  ;;  %v5030_v3 = vld [vmem:[#allocation3 + $0x290] sm:$0xff]  ;;  %v5033_v24 = vld [vmem:[#allocation3 + $0x2b8] sm:$0xff] }
 0x492   :  { %5868 = vmatpush1.bf16.msra.mxu1 %v7051_v41  ;;  %3690 = vst.msk [vmem:[#allocation4 + $0x140] sm:$0xff] %vm91_vm0, %v10090_v26  ;;  %v5031_v43 = vld [vmem:[#allocation3 + $0x2a0] sm:$0xff]  ;;  %v5032_v6 = vld [vmem:[#allocation3 + $0x2a8] sm:$0xff]  ;;  %v5035_v19 = vld [vmem:[#allocation3 + $0x2d0] sm:$0xff] }
 0x493   :  { %5369 = vrot.lane.b32.xlu1 %v5304_v30, %s7066_s18  ;;  %5869 = vmatprep.subr.bf16.mxu1 %v12765_v51  ;;  %3691 = vst.msk [vmem:[#allocation4 + $0x150] sm:$0xff] %vm91_vm0, %v10096_v55  ;;  %v10113_v25 = vpack.c.bf16 %v5032_v6, %v5031_v43  ;;  %v5034_v47 = vld [vmem:[#allocation3 + $0x2c0] sm:$0xff]  ;;  %v5037_v57 = vld [vmem:[#allocation3 + $0x2e8] sm:$0xff]  ;;  %v5038_v45 = vld [vmem:[#allocation3 + $0x2f0] sm:$0xff] }
 0x494   :  { %5113 = vrot.lane.b32.xlu0 %v9971_v38, %s7065_s17  ;;  %v10119_v10 = vpack.c.bf16 %v5034_v47, %v5033_v24  ;;  %v5247_v41 = vld [vmem:[#allocation3 + $0x91] sm:$0xff]  ;;  %v5248_v15 = vld [vmem:[#allocation3 + $0x99] sm:$0xff]  ;;  %v10128_v50 = vpack.c.bf16 %v5038_v45, %v5037_v57  ;;  %v3619_v54 = vld [vmem:[#allocation3 + $0x248] sm:$0xff] }
 0x495   :  { %3696 = vst.msk [vmem:[#allocation4 + $0x1a0] sm:$0xff] %vm91_vm0, %v10113_v25  ;;  %v5307_v35 = vpack.c.bf16 %v5248_v15, %v5247_v41  ;;  %v5041_v61 = vld [vmem:[#allocation3 + $0x318] sm:$0xff]  ;;  %v5042_v56 = vld [vmem:[#allocation3 + $0x320] sm:$0xff]  ;;  %v5249_v7 = vld [vmem:[#allocation3 + $0xa9] sm:$0xff] }
 0x496   :  { %5870 = vmatpush1.bf16.msra.mxu1 %v7052_v13  ;;  %3697 = vst.msk [vmem:[#allocation4 + $0x1b0] sm:$0xff] %vm91_vm0, %v10119_v10  ;;  %v5040_v13 = vld [vmem:[#allocation3 + $0x308] sm:$0xff]  ;;  %3699 = vst.msk [vmem:[#allocation4 + $0x1d0] sm:$0xff] %vm91_vm0, %v10128_v50  ;;  %v5250_v34 = vld [vmem:[#allocation3 + $0xb1] sm:$0xff] }
 0x497   :  { %4090 = vrot.lane.b32.xlu1 %v9914_v46, %s7062_s14  ;;  %5871 = vmatprep.subr.bf16.mxu1 %v12765_v51  ;;  %v4246_v46 = vld [vmem:[#allocation3 + $0x1c8] sm:$0xff]  ;;  %v5308_v5 = vpack.c.bf16 %v5250_v34, %v5249_v7 }
 0x498   :  { %3834 = vrot.lane.b32.xlu0 %v5303_v27, %s7060_s12  ;;  %v10076_v58 = vpack.c.bf16 %v4247_v59, %v4246_v46  ;;  %v5017_v27 = vld [vmem:[#allocation3 + $0x1f8] sm:$0xff]  ;;  %v3618_v46 = vld [vmem:[#allocation3 + $0x240] sm:$0xff]  ;;  %v5257_v47 = vld [vmem:[#allocation3 + $0x109] sm:$0xff] }
 0x499   :  { %v10084_v8 = vpack.c.bf16 %v5018_v36, %v5017_v27  ;;  %v3660_v29 = vpack.c.bf16 %v3619_v54, %v3618_v46  ;;  %v3620_v59 = vld [vmem:[#allocation3 + $0x258] sm:$0xff]  ;;  %v5259_v46 = vld [vmem:[#allocation3 + $0x121] sm:$0xff]  ;;  %v5260_v54 = vld [vmem:[#allocation3 + $0x129] sm:$0xff] }
 0x49a   :  { %5872 = vmatpush1.bf16.msra.mxu1 %v7053_v62  ;;  %3687 = vst.msk [vmem:[#allocation4 + $0x110] sm:$0xff] %vm91_vm0, %v10076_v58  ;;  %v10142_v62 = vpack.c.bf16 %v5042_v56, %v5041_v61  ;;  %v3623_v27 = vld [vmem:[#allocation3 + $0x278] sm:$0xff]  ;;  %v4749_v7 = vld [vmem:[#allocation3 + $0x12a] sm:$0xff] }
 0x49b   :  { %4602 = vrot.lane.b32.xlu1 %v5304_v30, %s7063_s15  ;;  %3689 = vst.msk [vmem:[#allocation4 + $0x130] sm:$0xff] %vm91_vm0, %v10084_v8  ;;  %3692 = vst.msk [vmem:[#allocation4 + $0x160] sm:$0xff] %vm91_vm0, %v3660_v29 }
 0x49c   :  { %4346 = vrot.lane.b32.xlu0 %v9971_v38, %s7061_s13  ;;  %v5015_v38 = vld [vmem:[#allocation3 + $0x1e0] sm:$0xff]  ;;  %3701 = vst.msk [vmem:[#allocation4 + $0x1f0] sm:$0xff] %vm91_vm0, %v10142_v62 }
 0x49d   :  { %v10078_v51 = vpack.c.bf16 %v5016_v11, %v5015_v38  ;;  %v3621_v38 = vld [vmem:[#allocation3 + $0x260] sm:$0xff] }
 0x49e   :  { %v3661_v11 = vpack.c.bf16 %v3621_v38, %v3620_v59  ;;  %v5313_v59 = vpack.c.bf16 %v5260_v54, %v5259_v46  ;;  %v3980_v38 = vld [vmem:[#allocation3 + $0x10a] sm:$0xff] }
 0x49f   :  { %5115 = vrot.lane.b32.xlu1 %v9974_v9, %s7065_s17  ;;  %3688 = vst.msk [vmem:[#allocation4 + $0x120] sm:$0xff] %vm91_vm0, %v10078_v51 }
 0x4a0   :  { %4858 = vrot.lane.b32.xlu0 %v9898_v60, %s7064_s16  ;;  %3693 = vst.msk [vmem:[#allocation4 + $0x170] sm:$0xff] %vm91_vm0, %v3661_v11  ;;  %v3981_v11 = vld [vmem:[#allocation3 + $0x112] sm:$0xff] }
 0x4a3   :  { %3836 = vrot.lane.b32.xlu1 %v5304_v30, %s7060_s12  ;;  %v5036_v30 = vld [vmem:[#allocation3 + $0x2d8] sm:$0xff] }
 0x4a4   :  { %5371 = vrot.lane.b32.xlu0 %v5305_v44, %s7066_s18 }
 0x4a7   :  { %4348 = vrot.lane.b32.xlu1 %v9974_v9, %s7061_s13  ;;  %v5029_v9 = vld [vmem:[#allocation3 + $0x288] sm:$0xff] }
 0x4a8   :  { %4092 = vrot.lane.b32.xlu0 %v9898_v60, %s7062_s14  ;;  %v5306_v60 = vpack.c.bf16 %v5246_v20, %v5245_v37  ;;  %v10108_v63 = vpack.c.bf16 %v5030_v3, %v5029_v9  ;;  %v5255_v20 = vld [vmem:[#allocation3 + $0xf1] sm:$0xff] }
 0x4aa   :  { %3695 = vst.msk [vmem:[#allocation4 + $0x190] sm:$0xff] %vm91_vm0, %v10108_v63 }
 0x4ab   :  { %4860 = vrot.lane.b32.xlu1 %v9900_v14, %s7064_s16 }
 0x4ac   :  { %4604 = vrot.lane.b32.xlu0 %v5305_v44, %s7063_s15 }
 0x4af   :  { %5373 = vrot.lane.b32.xlu1 %v5306_v60, %s7066_s18 }
 0x4b0   :  { %5117 = vrot.lane.b32.xlu0 %v9980_v48, %s7065_s17 }
 0x4b3   :  { %4094 = vrot.lane.b32.xlu1 %v9900_v14, %s7062_s14  ;;  %v10124_v14 = vpack.c.bf16 %v5036_v30, %v5035_v19  ;;  %v5258_v19 = vld [vmem:[#allocation3 + $0x111] sm:$0xff] }
 0x4b4   :  { %3838 = vrot.lane.b32.xlu0 %v5305_v44, %s7060_s12  ;;  %v3622_v44 = vld [vmem:[#allocation3 + $0x270] sm:$0xff] }
 0x4b5   :  { %3698 = vst.msk [vmem:[#allocation4 + $0x1c0] sm:$0xff] %vm91_vm0, %v10124_v14  ;;  %v3662_v36 = vpack.c.bf16 %v3623_v27, %v3622_v44  ;;  %v4033_v27 = vpack.c.bf16 %v3981_v11, %v3980_v38 }
 0x4b7   :  { %4606 = vrot.lane.b32.xlu1 %v5306_v60, %s7063_s15  ;;  %3694 = vst.msk [vmem:[#allocation4 + $0x180] sm:$0xff] %vm91_vm0, %v3662_v36  ;;  %v4748_v36 = vld [vmem:[#allocation3 + $0x122] sm:$0xff] }
 0x4b8   :  { %4350 = vrot.lane.b32.xlu0 %v9980_v48, %s7061_s13  ;;  %v5039_v48 = vld [vmem:[#allocation3 + $0x300] sm:$0xff] }
 0x4b9   :  { %v10138_v39 = vpack.c.bf16 %v5040_v13, %v5039_v48 }
 0x4bb   :  { %5119 = vrot.lane.b32.xlu1 %v9982_v49, %s7065_s17  ;;  %3700 = vst.msk [vmem:[#allocation4 + $0x1e0] sm:$0xff] %vm91_vm0, %v10138_v39 }
 0x4bc   :  { %4862 = vrot.lane.b32.xlu0 %v9902_v33, %s7064_s16 }
 0x4bf   :  { %3840 = vrot.lane.b32.xlu1 %v5306_v60, %s7060_s12  ;;  %v5256_v60 = vld [vmem:[#allocation3 + $0xf9] sm:$0xff] }
 0x4c0   :  { %5375 = vrot.lane.b32.xlu0 %v5307_v35, %s7066_s18  ;;  %v5311_v3 = vpack.c.bf16 %v5256_v60, %v5255_v20 }
 0x4c3   :  { %4352 = vrot.lane.b32.xlu1 %v9982_v49, %s7061_s13  ;;  %v5252_v49 = vld [vmem:[#allocation3 + $0xc9] sm:$0xff] }
 0x4c4   :  { %4096 = vrot.lane.b32.xlu0 %v9902_v33, %s7062_s14  ;;  %v5251_v33 = vld [vmem:[#allocation3 + $0xc1] sm:$0xff] }
 0x4c5   :  { %v5309_v53 = vpack.c.bf16 %v5252_v49, %v5251_v33  ;;  %v4801_v33 = vpack.c.bf16 %v4749_v7, %v4748_v36  ;;  %v5261_v49 = vld [vmem:[#allocation3 + $0x139] sm:$0xff]  ;;  %v5012_v36 = vld [vmem:[#allocation3 + $0x188] sm:$0xff] }
 0x4c7   :  { %4864 = vrot.lane.b32.xlu1 %v9908_v1, %s7064_s16 }
 0x4c8   :  { %4608 = vrot.lane.b32.xlu0 %v5307_v35, %s7063_s15 }
 0x4cb   :  { %5377 = vrot.lane.b32.xlu1 %v5308_v5, %s7066_s18 }
 0x4cc   :  { %5121 = vrot.lane.b32.xlu0 %v9992_v52, %s7065_s17 }
 0x4cf   :  { %4098 = vrot.lane.b32.xlu1 %v9908_v1, %s7062_s14  ;;  %v5253_v1 = vld [vmem:[#allocation3 + $0xd9] sm:$0xff] }
 0x4d0   :  { %3842 = vrot.lane.b32.xlu0 %v5307_v35, %s7060_s12 }
 0x4d3   :  { %4610 = vrot.lane.b32.xlu1 %v5308_v5, %s7063_s15 }
 0x4d4   :  { %4354 = vrot.lane.b32.xlu0 %v9992_v52, %s7061_s13  ;;  %v5254_v52 = vld [vmem:[#allocation3 + $0xe1] sm:$0xff] }
 0x4d5   :  { %v5310_v37 = vpack.c.bf16 %v5254_v52, %v5253_v1 }
 0x4d7   :  { %5123 = vrot.lane.b32.xlu1 %v9998_v18, %s7065_s17 }
 0x4d8   :  { %4866 = vrot.lane.b32.xlu0 %v9910_v17, %s7064_s16 }
 0x4db   :  { %3844 = vrot.lane.b32.xlu1 %v5308_v5, %s7060_s12 }
 0x4dc   :  { %5379 = vrot.lane.b32.xlu0 %v5309_v53, %s7066_s18 }
 0x4df   :  { %4356 = vrot.lane.b32.xlu1 %v9998_v18, %s7061_s13 }
 0x4e0   :  { %4100 = vrot.lane.b32.xlu0 %v9910_v17, %s7062_s14 }
 0x4e3   :  { %4868 = vrot.lane.b32.xlu1 %v9912_v21, %s7064_s16 }
 0x4e4   :  { %4612 = vrot.lane.b32.xlu0 %v5309_v53, %s7063_s15 }
 0x4e7   :  { %5381 = vrot.lane.b32.xlu1 %v5310_v37, %s7066_s18 }
 0x4e8   :  { %5125 = vrot.lane.b32.xlu0 %v10000_v12, %s7065_s17 }
 0x4eb   :  { %4102 = vrot.lane.b32.xlu1 %v9912_v21, %s7062_s14 }
 0x4ec   :  { %3846 = vrot.lane.b32.xlu0 %v5309_v53, %s7060_s12  ;;  %v5262_v53 = vld [vmem:[#allocation3 + $0x141] sm:$0xff] }
 0x4ef   :  { %4614 = vrot.lane.b32.xlu1 %v5310_v37, %s7063_s15 }
 0x4f0   :  { %4358 = vrot.lane.b32.xlu0 %v10000_v12, %s7061_s13 }
 0x4f1   :  { %v4599_v17 = vpop.permute.xlu1 %4598 }
 0x4f2   :  { %v4343_v18 = vpop.permute.xlu0 %4342 }
 0x4f3   :  { %4438 = vst.msk [vmem:[#allocation4] sm:$0xff] %vm1110_vm5, %v4343_v18  ;;  %5127 = vrot.lane.b32.xlu1 %v10018_v22, %s7065_s17 }
 0x4f4   :  { %4694 = vst.msk [vmem:[#allocation4] sm:$0xff] %vm1367_vm6, %v4599_v17  ;;  %4870 = vrot.lane.b32.xlu0 %v9917_v28, %s7064_s16  ;;  %v5630_v17 = vld [vmem:[#allocation4 + $0x38] sm:$0xff] }
 0x4f5   :  { %v5112_v21 = vpop.permute.xlu1 %5111 }
 0x4f6   :  { %v4855_v9 = vpop.permute.xlu0 %4854 }
 0x4f7   :  { %4950 = vst.msk [vmem:[#allocation4] sm:$0xff] %vm1624_vm7, %v4855_v9  ;;  %3848 = vrot.lane.b32.xlu1 %v5310_v37, %s7060_s12  ;;  %v4750_v9 = vld [vmem:[#allocation3 + $0x13a] sm:$0xff] }
 0x4f8   :  { %5207 = vst.msk [vmem:[#allocation4] sm:$0xff] %vm1882_vm8, %v5112_v21  ;;  %5383 = vrot.lane.b32.xlu0 %v5311_v3, %s7066_s18 }
 0x4f9   :  { %v3833_v43 = vpop.permute.xlu1 %3832 }
 0x4fa   :  { %v5368_v12 = vpop.permute.xlu0 %5367  ;;  %3927 = vst.msk [vmem:[#allocation4 + $0x10] sm:$0xff] %vm596_vm3, %v3833_v43 }
 0x4fb   :  { %5463 = vst.msk [vmem:[#allocation4] sm:$0xff] %vm2139_vm9, %v5368_v12  ;;  %4360 = vrot.lane.b32.xlu1 %v10018_v22, %s7061_s13  ;;  %v5312_v22 = vpack.c.bf16 %v5258_v19, %v5257_v47  ;;  %v5263_v47 = vld [vmem:[#allocation3 + $0x151] sm:$0xff]  ;;  %v5264_v19 = vld [vmem:[#allocation3 + $0x159] sm:$0xff] }
 0x4fc   :  { %4104 = vrot.lane.b32.xlu0 %v9917_v28, %s7062_s14  ;;  %v5626_v28 = vld [vmem:[#allocation4 + $0x18] sm:$0xff] }
 0x4fd   :  { %v4345_v24 = vpop.permute.xlu1 %4344 }
 0x4fe   :  { %v4089_v6 = vpop.permute.xlu0 %4088 }
 0x4ff   :  { %4183 = vst.msk [vmem:[#allocation4 + $0x10] sm:$0xff] %vm853_vm4, %v4089_v6  ;;  %4872 = vrot.lane.b32.xlu1 %v9919_v16, %s7064_s16 }
 0x500   :  { %4439 = vst.msk [vmem:[#allocation4 + $0x10] sm:$0xff] %vm1110_vm5, %v4345_v24  ;;  %4616 = vrot.lane.b32.xlu0 %v5311_v3, %s7063_s15 }
 0x501   :  { %v4857_v57 = vpop.permute.xlu1 %4856 }
 0x502   :  { %v4601_v30 = vpop.permute.xlu0 %4600  ;;  %v5623_v45 = vld [vmem:[#allocation4] sm:$0xff] }
 0x503   :  { %4695 = vst.msk [vmem:[#allocation4 + $0x10] sm:$0xff] %vm1367_vm6, %v4601_v30  ;;  %5888 = vmatmul.mubr.bf16.vlgmr.msra.gmra.mrb[0].mxu1 %v5623_v45  ;;  %5385 = vrot.lane.b32.xlu1 %v5312_v22, %s7066_s18  ;;  %v5632_v30 = vld [vmem:[#allocation4 + $0x48] sm:$0xff]  ;;  %v5315_v45 = vpack.c.bf16 %v5264_v19, %v5263_v47 }
 0x504   :  { %4951 = vst.msk [vmem:[#allocation4 + $0x10] sm:$0xff] %vm1624_vm7, %v4857_v57  ;;  %6995 = vmatprep.mubr.msk.bf16.mxu1 %vm91_vm0, %v5626_v28  ;;  %5129 = vrot.lane.b32.xlu0 %v10031_v40, %s7065_s17 }
 0x505   :  { %v5370_v15 = vpop.permute.xlu1 %5369 }
 0x506   :  { %v5114_v41 = vpop.permute.xlu0 %5113 }
 0x507   :  { %5208 = vst.msk [vmem:[#allocation4 + $0x10] sm:$0xff] %vm1882_vm8, %v5114_v41  ;;  %4106 = vrot.lane.b32.xlu1 %v9919_v16, %s7062_s14  ;;  %v5628_v16 = vld [vmem:[#allocation4 + $0x28] sm:$0xff]  ;;  %v4752_v41 = vld [vmem:[#allocation3 + $0x152] sm:$0xff] }
 0x508   :  { %5464 = vst.msk [vmem:[#allocation4 + $0x10] sm:$0xff] %vm2139_vm9, %v5370_v15  ;;  %3850 = vrot.lane.b32.xlu0 %v5311_v3, %s7060_s12  ;;  %v4751_v3 = vld [vmem:[#allocation3 + $0x142] sm:$0xff]  ;;  %v4753_v15 = vld [vmem:[#allocation3 + $0x15a] sm:$0xff] }
 0x509   :  { %v4091_v13 = vpop.permute.xlu1 %4090  ;;  %v4802_v6 = vpack.c.bf16 %v4751_v3, %v4750_v9 }
 0x50a   :  { %v3835_v48 = vpop.permute.xlu0 %3834 }
 0x50b   :  { %3928 = vst.msk [vmem:[#allocation4 + $0x20] sm:$0xff] %vm596_vm3, %v3835_v48  ;;  %4618 = vrot.lane.b32.xlu1 %v5312_v22, %s7063_s15 }
 0x50c   :  { %4184 = vst.msk [vmem:[#allocation4 + $0x20] sm:$0xff] %vm853_vm4, %v4091_v13  ;;  %4362 = vrot.lane.b32.xlu0 %v10031_v40, %s7061_s13 }
 0x50d   :  { %v4603_v61 = vpop.permute.xlu1 %4602 }
 0x50e   :  { %v4347_v35 = vpop.permute.xlu0 %4346 }
 0x50f   :  { %4440 = vst.msk [vmem:[#allocation4 + $0x20] sm:$0xff] %vm1110_vm5, %v4347_v35  ;;  %v5625_v56 = vld [vmem:[#allocation4 + $0x10] sm:$0xff]  ;;  %5131 = vrot.lane.b32.xlu1 %v10036_v32, %s7065_s17  ;;  %v4803_v35 = vpack.c.bf16 %v4753_v15, %v4752_v41  ;;  %v5271_v41 = vld [vmem:[#allocation3 + $0x1e1] sm:$0xff] }
 0x510   :  { %4696 = vst.msk [vmem:[#allocation4 + $0x20] sm:$0xff] %vm1367_vm6, %v4603_v61  ;;  %4874 = vrot.lane.b32.xlu0 %v9929_v2, %s7064_s16  ;;  %5896 = vmatmul.mubr.bf16.gmra.mrb[4].mxu1 %v5625_v56  ;;  %v5265_v61 = vld [vmem:[#allocation3 + $0x169] sm:$0xff]  ;;  %v5266_v56 = vld [vmem:[#allocation3 + $0x171] sm:$0xff] }
 0x511   :  { %6996 = vmatprep.mubr.msk.bf16.mxu1 %vm91_vm0, %v5628_v16  ;;  %v5116_v29 = vpop.permute.xlu1 %5115  ;;  %v5272_v15 = vld [vmem:[#allocation3 + $0x1e9] sm:$0xff] }
 0x512   :  { %v4859_v40 = vpop.permute.xlu0 %4858 }
 0x513   :  { %4952 = vst.msk [vmem:[#allocation4 + $0x20] sm:$0xff] %vm1624_vm7, %v4859_v40  ;;  %3852 = vrot.lane.b32.xlu1 %v5312_v22, %s7060_s12  ;;  %v5634_v40 = vld [vmem:[#allocation4 + $0x58] sm:$0xff] }
 0x514   :  { %5209 = vst.msk [vmem:[#allocation4 + $0x20] sm:$0xff] %vm1882_vm8, %v5116_v29  ;;  %5387 = vrot.lane.b32.xlu0 %v5313_v59, %s7066_s18 }
 0x515   :  { %v3837_v44 = vpop.permute.xlu1 %3836 }
 0x516   :  { %v5372_v2 = vpop.permute.xlu0 %5371  ;;  %3929 = vst.msk [vmem:[#allocation4 + $0x30] sm:$0xff] %vm596_vm3, %v3837_v44  ;;  %v4755_v44 = vld [vmem:[#allocation3 + $0x172] sm:$0xff] }
 0x517   :  { %5465 = vst.msk [vmem:[#allocation4 + $0x20] sm:$0xff] %vm2139_vm9, %v5372_v2  ;;  %4364 = vrot.lane.b32.xlu1 %v10036_v32, %s7061_s13  ;;  %v5314_v32 = vpack.c.bf16 %v5262_v53, %v5261_v49  ;;  %v4754_v2 = vld [vmem:[#allocation3 + $0x16a] sm:$0xff]  ;;  %v5267_v53 = vld [vmem:[#allocation3 + $0x181] sm:$0xff] }
 0x518   :  { %4108 = vrot.lane.b32.xlu0 %v4033_v27, %s7062_s14  ;;  %v5011_v27 = vld [vmem:[#allocation3 + $0x180] sm:$0xff] }
 0x519   :  { %v4349_v5 = vpop.permute.xlu1 %4348 }
 0x51a   :  { %v4093_v34 = vpop.permute.xlu0 %4092 }
 0x51b   :  { %4185 = vst.msk [vmem:[#allocation4 + $0x30] sm:$0xff] %vm853_vm4, %v4093_v34  ;;  %4876 = vrot.lane.b32.xlu1 %v4801_v33, %s7064_s16 }
 0x51c   :  { %4441 = vst.msk [vmem:[#allocation4 + $0x30] sm:$0xff] %vm1110_vm5, %v4349_v5  ;;  %4620 = vrot.lane.b32.xlu0 %v5313_v59, %s7063_s15  ;;  %v4804_v5 = vpack.c.bf16 %v4755_v44, %v4754_v2 }
 0x51d   :  { %v4861_v52 = vpop.permute.xlu1 %4860 }
 0x51e   :  { %v4605_v1 = vpop.permute.xlu0 %4604  ;;  %v5627_v37 = vld [vmem:[#allocation4 + $0x20] sm:$0xff] }
 0x51f   :  { %4697 = vst.msk [vmem:[#allocation4 + $0x30] sm:$0xff] %vm1367_vm6, %v4605_v1  ;;  %5904 = vmatmul.mubr.bf16.gmra.mrb[8].mxu1 %v5627_v37  ;;  %5389 = vrot.lane.b32.xlu1 %v5314_v32, %s7066_s18  ;;  %v5268_v1 = vld [vmem:[#allocation3 + $0x189] sm:$0xff] }
 0x520   :  { %4953 = vst.msk [vmem:[#allocation4 + $0x30] sm:$0xff] %vm1624_vm7, %v4861_v52  ;;  %5133 = vrot.lane.b32.xlu0 %v10046_v4, %s7065_s17  ;;  %6997 = vmatprep.mubr.msk.bf16.mxu1 %vm91_vm0, %v5630_v17  ;;  %v5636_v52 = vld [vmem:[#allocation4 + $0x68] sm:$0xff] }
 0x521   :  { %v5374_v20 = vpop.permute.xlu1 %5373 }
 0x522   :  { %v5118_v18 = vpop.permute.xlu0 %5117 }
 0x523   :  { %5210 = vst.msk [vmem:[#allocation4 + $0x30] sm:$0xff] %vm1882_vm8, %v5118_v18  ;;  %4110 = vrot.lane.b32.xlu1 %v4801_v33, %s7062_s14  ;;  %v5061_v33 = vpack.c.bf16 %v5012_v36, %v5011_v27 }
 0x524   :  { %5466 = vst.msk [vmem:[#allocation4 + $0x30] sm:$0xff] %vm2139_vm9, %v5374_v20  ;;  %3854 = vrot.lane.b32.xlu0 %v5313_v59, %s7060_s12  ;;  %v4756_v20 = vld [vmem:[#allocation3 + $0x182] sm:$0xff] }
 0x525   :  { %v4095_v21 = vpop.permute.xlu1 %4094 }
 0x526   :  { %v3839_v60 = vpop.permute.xlu0 %3838 }
 0x527   :  { %3930 = vst.msk [vmem:[#allocation4 + $0x40] sm:$0xff] %vm596_vm3, %v3839_v60  ;;  %4622 = vrot.lane.b32.xlu1 %v5314_v32, %s7063_s15  ;;  %v4757_v60 = vld [vmem:[#allocation3 + $0x18a] sm:$0xff] }
 0x528   :  { %4186 = vst.msk [vmem:[#allocation4 + $0x40] sm:$0xff] %vm853_vm4, %v4095_v21  ;;  %4366 = vrot.lane.b32.xlu0 %v10046_v4, %s7061_s13  ;;  %v4805_v3 = vpack.c.bf16 %v4757_v60, %v4756_v20 }
 0x529   :  { %v4607_v43 = vpop.permute.xlu1 %4606 }
 0x52a   :  { %v4351_v12 = vpop.permute.xlu0 %4350 }
 0x52b   :  { %4442 = vst.msk [vmem:[#allocation4 + $0x40] sm:$0xff] %vm1110_vm5, %v4351_v12  ;;  %v5629_v24 = vld [vmem:[#allocation4 + $0x30] sm:$0xff]  ;;  %5135 = vrot.lane.b32.xlu1 %v10057_v42, %s7065_s17 }
 0x52c   :  { %4698 = vst.msk [vmem:[#allocation4 + $0x40] sm:$0xff] %vm1367_vm6, %v4607_v43  ;;  %4878 = vrot.lane.b32.xlu0 %v4802_v6, %s7064_s16  ;;  %5912 = vmatmul.mubr.bf16.gmra.mrb[12].mxu1 %v5629_v24  ;;  %v4502_v12 = vld [vmem:[#allocation3 + $0x1c9] sm:$0xff]  ;;  %v4503_v43 = vld [vmem:[#allocation3 + $0x1d1] sm:$0xff] }
 0x52d   :  { %6998 = vmatprep.mubr.msk.bf16.mxu1 %vm91_vm0, %v5632_v30  ;;  %v5120_v57 = vpop.permute.xlu1 %5119  ;;  %v4550_v19 = vpack.c.bf16 %v4503_v43, %v4502_v12  ;;  %v5638_v30 = vld [vmem:[#allocation4 + $0x78] sm:$0xff] }
 0x52e   :  { %v4863_v4 = vpop.permute.xlu0 %4862 }
 0x52f   :  { %4954 = vst.msk [vmem:[#allocation4 + $0x40] sm:$0xff] %vm1624_vm7, %v4863_v4  ;;  %3856 = vrot.lane.b32.xlu1 %v5314_v32, %s7060_s12  ;;  %v5317_v32 = vpack.c.bf16 %v5268_v1, %v5267_v53  ;;  %v4758_v4 = vld [vmem:[#allocation3 + $0x1ca] sm:$0xff] }
 0x530   :  { %5211 = vst.msk [vmem:[#allocation4 + $0x40] sm:$0xff] %vm1882_vm8, %v5120_v57  ;;  %5391 = vrot.lane.b32.xlu0 %v5315_v45, %s7066_s18  ;;  %v4759_v57 = vld [vmem:[#allocation3 + $0x1d2] sm:$0xff] }
 0x531   :  { %v3841_v22 = vpop.permute.xlu1 %3840 }
 0x532   :  { %v5376_v28 = vpop.permute.xlu0 %5375  ;;  %3931 = vst.msk [vmem:[#allocation4 + $0x50] sm:$0xff] %vm596_vm3, %v3841_v22  ;;  %v4806_v22 = vpack.c.bf16 %v4759_v57, %v4758_v4 }
 0x533   :  { %5467 = vst.msk [vmem:[#allocation4 + $0x40] sm:$0xff] %vm2139_vm9, %v5376_v28  ;;  %4368 = vrot.lane.b32.xlu1 %v10057_v42, %s7061_s13  ;;  %v5316_v42 = vpack.c.bf16 %v5266_v56, %v5265_v61 }
 0x534   :  { %4112 = vrot.lane.b32.xlu0 %v4802_v6, %s7062_s14 }
 0x535   :  { %v4353_v13 = vpop.permute.xlu1 %4352 }
 0x536   :  { %v4097_v48 = vpop.permute.xlu0 %4096 }
 0x537   :  { %4187 = vst.msk [vmem:[#allocation4 + $0x50] sm:$0xff] %vm853_vm4, %v4097_v48  ;;  %4880 = vrot.lane.b32.xlu1 %v4803_v35, %s7064_s16 }
 0x538   :  { %4443 = vst.msk [vmem:[#allocation4 + $0x50] sm:$0xff] %vm1110_vm5, %v4353_v13  ;;  %4624 = vrot.lane.b32.xlu0 %v5315_v45, %s7063_s15  ;;  %v5319_v13 = vpack.c.bf16 %v5272_v15, %v5271_v41  ;;  %v5646_v41 = vld [vmem:[#allocation4 + $0xb8] sm:$0xff]  ;;  %v4766_v15 = vld [vmem:[#allocation3 + $0x22a] sm:$0xff] }
 0x539   :  { %v4865_v54 = vpop.permute.xlu1 %4864 }
 0x53a   :  { %v4609_v46 = vpop.permute.xlu0 %4608  ;;  %v5631_v16 = vld [vmem:[#allocation4 + $0x40] sm:$0xff] }
 0x53b   :  { %4699 = vst.msk [vmem:[#allocation4 + $0x50] sm:$0xff] %vm1367_vm6, %v4609_v46  ;;  %5920 = vmatmul.mubr.bf16.gmra.mrb[16].mxu1 %v5631_v16  ;;  %5393 = vrot.lane.b32.xlu1 %v5316_v42, %s7066_s18  ;;  %v5640_v46 = vld [vmem:[#allocation4 + $0x88] sm:$0xff] }
 0x53c   :  { %4955 = vst.msk [vmem:[#allocation4 + $0x50] sm:$0xff] %vm1624_vm7, %v4865_v54  ;;  %5137 = vrot.lane.b32.xlu0 %v10062_v31, %s7065_s17  ;;  %6999 = vmatprep.mubr.msk.bf16.mxu1 %vm91_vm0, %v5634_v40  ;;  %v4760_v54 = vld [vmem:[#allocation3 + $0x1e2] sm:$0xff]  ;;  %v4761_v16 = vld [vmem:[#allocation3 + $0x1ea] sm:$0xff] }
 0x53d   :  { %v5378_v59 = vpop.permute.xlu1 %5377 }
 0x53e   :  { %v5122_v29 = vpop.permute.xlu0 %5121 }
 0x53f   :  { %5212 = vst.msk [vmem:[#allocation4 + $0x50] sm:$0xff] %vm1882_vm8, %v5122_v29  ;;  %4114 = vrot.lane.b32.xlu1 %v4803_v35, %s7062_s14  ;;  %v4807_v29 = vpack.c.bf16 %v4761_v16, %v4760_v54  ;;  %v5279_v54 = vld [vmem:[#allocation3 + $0x241] sm:$0xff]  ;;  %v5280_v16 = vld [vmem:[#allocation3 + $0x249] sm:$0xff] }
 0x540   :  { %5468 = vst.msk [vmem:[#allocation4 + $0x50] sm:$0xff] %vm2139_vm9, %v5378_v59  ;;  %3858 = vrot.lane.b32.xlu0 %v5315_v45, %s7060_s12  ;;  %v5273_v59 = vld [vmem:[#allocation3 + $0x1f9] sm:$0xff] }
 0x541   :  { %v4099_v11 = vpop.permute.xlu1 %4098 }
 0x542   :  { %v3843_v38 = vpop.permute.xlu0 %3842 }
 0x543   :  { %3932 = vst.msk [vmem:[#allocation4 + $0x60] sm:$0xff] %vm596_vm3, %v3843_v38  ;;  %4626 = vrot.lane.b32.xlu1 %v5316_v42, %s7063_s15  ;;  %v5274_v38 = vld [vmem:[#allocation3 + $0x201] sm:$0xff] }
 0x544   :  { %4188 = vst.msk [vmem:[#allocation4 + $0x60] sm:$0xff] %vm853_vm4, %v4099_v11  ;;  %4370 = vrot.lane.b32.xlu0 %v10062_v31, %s7061_s13 }
 0x545   :  { %v4611_v34 = vpop.permute.xlu1 %4610 }
 0x546   :  { %v4355_v7 = vpop.permute.xlu0 %4354 }
 0x547   :  { %4444 = vst.msk [vmem:[#allocation4 + $0x60] sm:$0xff] %vm1110_vm5, %v4355_v7  ;;  %v5633_v49 = vld [vmem:[#allocation4 + $0x50] sm:$0xff]  ;;  %5139 = vrot.lane.b32.xlu1 %v5061_v33, %s7065_s17 }
 0x548   :  { %4700 = vst.msk [vmem:[#allocation4 + $0x60] sm:$0xff] %vm1367_vm6, %v4611_v34  ;;  %4882 = vrot.lane.b32.xlu0 %v4804_v5, %s7064_s16  ;;  %5928 = vmatmul.mubr.bf16.gmra.mrb[20].mxu1 %v5633_v49  ;;  %v4763_v49 = vld [vmem:[#allocation3 + $0x202] sm:$0xff] }
 0x549   :  { %7000 = vmatprep.mubr.msk.bf16.mxu1 %vm91_vm0, %v5636_v52  ;;  %v5124_v37 = vpop.permute.xlu1 %5123 }
 0x54a   :  { %v4867_v31 = vpop.permute.xlu0 %4866 }
 0x54b   :  { %4956 = vst.msk [vmem:[#allocation4 + $0x60] sm:$0xff] %vm1624_vm7, %v4867_v31  ;;  %3860 = vrot.lane.b32.xlu1 %v5316_v42, %s7060_s12  ;;  %v5275_v31 = vld [vmem:[#allocation3 + $0x211] sm:$0xff] }
 0x54c   :  { %5213 = vst.msk [vmem:[#allocation4 + $0x60] sm:$0xff] %vm1882_vm8, %v5124_v37  ;;  %5395 = vrot.lane.b32.xlu0 %v5317_v32, %s7066_s18  ;;  %v5276_v37 = vld [vmem:[#allocation3 + $0x219] sm:$0xff] }
 0x54d   :  { %v3845_v18 = vpop.permute.xlu1 %3844 }
 0x54e   :  { %v5380_v17 = vpop.permute.xlu0 %5379  ;;  %3933 = vst.msk [vmem:[#allocation4 + $0x70] sm:$0xff] %vm596_vm3, %v3845_v18 }
 0x54f   :  { %5469 = vst.msk [vmem:[#allocation4 + $0x60] sm:$0xff] %vm2139_vm9, %v5380_v17  ;;  %4372 = vrot.lane.b32.xlu1 %v5061_v33, %s7061_s13  ;;  %v4762_v33 = vld [vmem:[#allocation3 + $0x1fa] sm:$0xff] }
 0x550   :  { %4116 = vrot.lane.b32.xlu0 %v4804_v5, %s7062_s14  ;;  %v5642_v5 = vld [vmem:[#allocation4 + $0x98] sm:$0xff]  ;;  %v4808_v1 = vpack.c.bf16 %v4763_v49, %v4762_v33  ;;  %v5282_v33 = vld [vmem:[#allocation3 + $0x261] sm:$0xff] }
 0x551   :  { %v4357_v9 = vpop.permute.xlu1 %4356 }
 0x552   :  { %v4101_v21 = vpop.permute.xlu0 %4100 }
 0x553   :  { %4189 = vst.msk [vmem:[#allocation4 + $0x70] sm:$0xff] %vm853_vm4, %v4101_v21  ;;  %4884 = vrot.lane.b32.xlu1 %v4805_v3, %s7064_s16  ;;  %v5644_v21 = vld [vmem:[#allocation4 + $0xa8] sm:$0xff]  ;;  %v4765_v3 = vld [vmem:[#allocation3 + $0x21a] sm:$0xff] }
 0x554   :  { %4445 = vst.msk [vmem:[#allocation4 + $0x70] sm:$0xff] %vm1110_vm5, %v4357_v9  ;;  %4628 = vrot.lane.b32.xlu0 %v5317_v32, %s7063_s15  ;;  %v4764_v9 = vld [vmem:[#allocation3 + $0x212] sm:$0xff] }
 0x555   :  { %v4869_v24 = vpop.permute.xlu1 %4868 }
 0x556   :  { %v4613_v6 = vpop.permute.xlu0 %4612  ;;  %v5635_v47 = vld [vmem:[#allocation4 + $0x60] sm:$0xff] }
 0x557   :  { %4701 = vst.msk [vmem:[#allocation4 + $0x70] sm:$0xff] %vm1367_vm6, %v4613_v6  ;;  %5936 = vmatmul.mubr.bf16.gmra.mrb[24].mxu1 %v5635_v47  ;;  %4630 = vrot.lane.b32.xlu1 %v4550_v19, %s7063_s15  ;;  %v4809_v6 = vpack.c.bf16 %v4765_v3, %v4764_v9  ;;  %v5278_v47 = vld [vmem:[#allocation3 + $0x231] sm:$0xff] }
 0x558   :  { %4957 = vst.msk [vmem:[#allocation4 + $0x70] sm:$0xff] %vm1624_vm7, %v4869_v24  ;;  %4374 = vrot.lane.b32.xlu0 %v10076_v58, %s7061_s13  ;;  %7001 = vmatprep.mubr.msk.bf16.mxu1 %vm91_vm0, %v5638_v30  ;;  %v5277_v24 = vld [vmem:[#allocation3 + $0x229] sm:$0xff]  ;;  %v5028_v9 = vld [vmem:[#allocation3 + $0x278] sm:$0xff] }
 0x559   :  { %v5382_v28 = vpop.permute.xlu1 %5381 }
 0x55a   :  { %v5126_v45 = vpop.permute.xlu0 %5125 }
 0x55b   :  { %5214 = vst.msk [vmem:[#allocation4 + $0x70] sm:$0xff] %vm1882_vm8, %v5126_v45  ;;  %5143 = vrot.lane.b32.xlu1 %v10078_v51, %s7065_s17 }
 0x55c   :  { %5470 = vst.msk [vmem:[#allocation4 + $0x70] sm:$0xff] %vm2139_vm9, %v5382_v28  ;;  %4886 = vrot.lane.b32.xlu0 %v4806_v22, %s7064_s16 }
 0x55d   :  { %v4103_v58 = vpop.permute.xlu1 %4102 }
 0x55e   :  { %v3847_v48 = vpop.permute.xlu0 %3846 }
 0x55f   :  { %3934 = vst.msk [vmem:[#allocation4 + $0x80] sm:$0xff] %vm596_vm3, %v3847_v48  ;;  %3864 = vrot.lane.b32.xlu1 %v4550_v19, %s7060_s12  ;;  %v4767_v48 = vld [vmem:[#allocation3 + $0x232] sm:$0xff] }
 0x560   :  { %4190 = vst.msk [vmem:[#allocation4 + $0x80] sm:$0xff] %vm853_vm4, %v4103_v58  ;;  %5399 = vrot.lane.b32.xlu0 %v5319_v13, %s7066_s18  ;;  %v5023_v58 = vld [vmem:[#allocation3 + $0x240] sm:$0xff] }
 0x561   :  { %v4615_v61 = vpop.permute.xlu1 %4614 }
 0x562   :  { %v4359_v35 = vpop.permute.xlu0 %4358 }
 0x563   :  { %4446 = vst.msk [vmem:[#allocation4 + $0x80] sm:$0xff] %vm1110_vm5, %v4359_v35  ;;  %v5637_v56 = vld [vmem:[#allocation4 + $0x70] sm:$0xff]  ;;  %4376 = vrot.lane.b32.xlu1 %v10078_v51, %s7061_s13  ;;  %v5320_v51 = vpack.c.bf16 %v5274_v38, %v5273_v59 }
 0x564   :  { %4702 = vst.msk [vmem:[#allocation4 + $0x80] sm:$0xff] %vm1367_vm6, %v4615_v61  ;;  %4120 = vrot.lane.b32.xlu0 %v4806_v22, %s7062_s14  ;;  %5944 = vmatmul.mubr.bf16.gmra.mrb[28].mxu1 %v5637_v56  ;;  %v4810_v61 = vpack.c.bf16 %v4767_v48, %v4766_v15 }
 0x565   :  { %7002 = vmatprep.mubr.msk.bf16.mxu1 %vm91_vm0, %v5640_v46  ;;  %v5128_v40 = vpop.permute.xlu1 %5127 }
 0x566   :  { %v4871_v42 = vpop.permute.xlu0 %4870 }
 0x567   :  { %4958 = vst.msk [vmem:[#allocation4 + $0x80] sm:$0xff] %vm1624_vm7, %v4871_v42  ;;  %4888 = vrot.lane.b32.xlu1 %v4807_v29, %s7064_s16  ;;  %v5323_v42 = vpack.c.bf16 %v5280_v16, %v5279_v54 }
 0x568   :  { %5215 = vst.msk [vmem:[#allocation4 + $0x80] sm:$0xff] %vm1882_vm8, %v5128_v40  ;;  %4632 = vrot.lane.b32.xlu0 %v5319_v13, %s7063_s15 }
 0x569   :  { %v3849_v2 = vpop.permute.xlu1 %3848 }
 0x56a   :  { %v5384_v11 = vpop.permute.xlu0 %5383  ;;  %3935 = vst.msk [vmem:[#allocation4 + $0x90] sm:$0xff] %vm596_vm3, %v3849_v2  ;;  %v4768_v2 = vld [vmem:[#allocation3 + $0x242] sm:$0xff] }
 0x56b   :  { %5471 = vst.msk [vmem:[#allocation4 + $0x80] sm:$0xff] %vm2139_vm9, %v5384_v11  ;;  %5401 = vrot.lane.b32.xlu1 %v5320_v51, %s7066_s18  ;;  %v5648_v11 = vld [vmem:[#allocation4 + $0xc8] sm:$0xff] }
 0x56c   :  { %5145 = vrot.lane.b32.xlu0 %v10084_v8, %s7065_s17 }
 0x56d   :  { %v4361_v27 = vpop.permute.xlu1 %4360 }
 0x56e   :  { %v4105_v44 = vpop.permute.xlu0 %4104 }
 0x56f   :  { %4191 = vst.msk [vmem:[#allocation4 + $0x90] sm:$0xff] %vm853_vm4, %v4105_v44  ;;  %4122 = vrot.lane.b32.xlu1 %v4807_v29, %s7062_s14 }
 0x570   :  { %4447 = vst.msk [vmem:[#allocation4 + $0x90] sm:$0xff] %vm1110_vm5, %v4361_v27  ;;  %3866 = vrot.lane.b32.xlu0 %v5319_v13, %s7060_s12  ;;  %v5024_v13 = vld [vmem:[#allocation3 + $0x248] sm:$0xff] }
 0x571   :  { %v4873_v7 = vpop.permute.xlu1 %4872  ;;  %v5067_v46 = vpack.c.bf16 %v5024_v13, %v5023_v58  ;;  %v5285_v13 = vld [vmem:[#allocation3 + $0x289] sm:$0xff] }
 0x572   :  { %v4617_v36 = vpop.permute.xlu0 %4616  ;;  %v5639_v34 = vld [vmem:[#allocation4 + $0x80] sm:$0xff] }
 0x573   :  { %4703 = vst.msk [vmem:[#allocation4 + $0x90] sm:$0xff] %vm1367_vm6, %v4617_v36  ;;  %5952 = vmatmul.mubr.bf16.gmra.mrb[32].mxu1 %v5639_v34  ;;  %4634 = vrot.lane.b32.xlu1 %v5320_v51, %s7063_s15  ;;  %v5026_v34 = vld [vmem:[#allocation3 + $0x260] sm:$0xff] }
 0x574   :  { %4959 = vst.msk [vmem:[#allocation4 + $0x90] sm:$0xff] %vm1624_vm7, %v4873_v7  ;;  %4378 = vrot.lane.b32.xlu0 %v10084_v8, %s7061_s13  ;;  %7003 = vmatprep.mubr.msk.bf16.mxu1 %vm91_vm0, %v5642_v5  ;;  %v5321_v8 = vpack.c.bf16 %v5276_v37, %v5275_v31  ;;  %v5025_v7 = vld [vmem:[#allocation3 + $0x258] sm:$0xff] }
 0x575   :  { %v5386_v52 = vpop.permute.xlu1 %5385  ;;  %v5281_v5 = vld [vmem:[#allocation3 + $0x259] sm:$0xff] }
 0x576   :  { %v5130_v53 = vpop.permute.xlu0 %5129 }
 0x577   :  { %5216 = vst.msk [vmem:[#allocation4 + $0x90] sm:$0xff] %vm1882_vm8, %v5130_v53  ;;  %5147 = vrot.lane.b32.xlu1 %v10090_v26, %s7065_s17  ;;  %v5068_v53 = vpack.c.bf16 %v5026_v34, %v5025_v7  ;;  %v5656_v34 = vld [vmem:[#allocation4 + $0x108] sm:$0xff] }
 0x578   :  { %5472 = vst.msk [vmem:[#allocation4 + $0x90] sm:$0xff] %vm2139_vm9, %v5386_v52  ;;  %4890 = vrot.lane.b32.xlu0 %v4808_v1, %s7064_s16  ;;  %v5324_v52 = vpack.c.bf16 %v5282_v33, %v5281_v5  ;;  %v4776_v33 = vld [vmem:[#allocation3 + $0x2a2] sm:$0xff] }
 0x579   :  { %v4107_v17 = vpop.permute.xlu1 %4106 }
 0x57a   :  { %v3851_v32 = vpop.permute.xlu0 %3850 }
 0x57b   :  { %3936 = vst.msk [vmem:[#allocation4 + $0xa0] sm:$0xff] %vm596_vm3, %v3851_v32  ;;  %3868 = vrot.lane.b32.xlu1 %v5320_v51, %s7060_s12  ;;  %v4769_v51 = vld [vmem:[#allocation3 + $0x24a] sm:$0xff] }
 0x57c   :  { %4192 = vst.msk [vmem:[#allocation4 + $0xa0] sm:$0xff] %vm853_vm4, %v4107_v17  ;;  %5403 = vrot.lane.b32.xlu0 %v5321_v8, %s7066_s18  ;;  %v4811_v36 = vpack.c.bf16 %v4769_v51, %v4768_v2 }
 0x57d   :  { %v4619_v20 = vpop.permute.xlu1 %4618 }
 0x57e   :  { %v4363_v18 = vpop.permute.xlu0 %4362 }
 0x57f   :  { %4448 = vst.msk [vmem:[#allocation4 + $0xa0] sm:$0xff] %vm1110_vm5, %v4363_v18  ;;  %v5641_v60 = vld [vmem:[#allocation4 + $0x90] sm:$0xff]  ;;  %4380 = vrot.lane.b32.xlu1 %v10090_v26, %s7061_s13  ;;  %v5322_v26 = vpack.c.bf16 %v5278_v47, %v5277_v24  ;;  %v5650_v18 = vld [vmem:[#allocation4 + $0xd8] sm:$0xff] }
 0x580   :  { %4704 = vst.msk [vmem:[#allocation4 + $0xa0] sm:$0xff] %vm1367_vm6, %v4619_v20  ;;  %4124 = vrot.lane.b32.xlu0 %v4808_v1, %s7062_s14  ;;  %5960 = vmatmul.mubr.bf16.gmra.mrb[36].mxu1 %v5641_v60  ;;  %v4770_v20 = vld [vmem:[#allocation3 + $0x25a] sm:$0xff]  ;;  %v4771_v60 = vld [vmem:[#allocation3 + $0x262] sm:$0xff]  ;;  %v5283_v24 = vld [vmem:[#allocation3 + $0x271] sm:$0xff] }
 0x581   :  { %7004 = vmatprep.mubr.msk.bf16.mxu1 %vm91_vm0, %v5644_v21  ;;  %v5132_v43 = vpop.permute.xlu1 %5131  ;;  %v5027_v21 = vld [vmem:[#allocation3 + $0x270] sm:$0xff]  ;;  %v5284_v47 = vld [vmem:[#allocation3 + $0x279] sm:$0xff] }
 0x582   :  { %v4875_v12 = vpop.permute.xlu0 %4874 }
 0x583   :  { %4960 = vst.msk [vmem:[#allocation4 + $0xa0] sm:$0xff] %vm1624_vm7, %v4875_v12  ;;  %4892 = vrot.lane.b32.xlu1 %v4809_v6, %s7064_s16  ;;  %v4812_v12 = vpack.c.bf16 %v4771_v60, %v4770_v20 }
 0x584   :  { %5217 = vst.msk [vmem:[#allocation4 + $0xa0] sm:$0xff] %vm1882_vm8, %v5132_v43  ;;  %4636 = vrot.lane.b32.xlu0 %v5321_v8, %s7063_s15 }
 0x585   :  { %v3853_v30 = vpop.permute.xlu1 %3852 }
 0x586   :  { %v5388_v19 = vpop.permute.xlu0 %5387  ;;  %3937 = vst.msk [vmem:[#allocation4 + $0xb0] sm:$0xff] %vm596_vm3, %v3853_v30  ;;  %v5325_v30 = vpack.c.bf16 %v5284_v47, %v5283_v24 }
 0x587   :  { %5473 = vst.msk [vmem:[#allocation4 + $0xa0] sm:$0xff] %vm2139_vm9, %v5388_v19  ;;  %5405 = vrot.lane.b32.xlu1 %v5322_v26, %s7066_s18 }
 0x588   :  { %5149 = vrot.lane.b32.xlu0 %v10096_v55, %s7065_s17 }
 0x589   :  { %v4365_v57 = vpop.permute.xlu1 %4364 }
 0x58a   :  { %v4109_v4 = vpop.permute.xlu0 %4108 }
 0x58b   :  { %4193 = vst.msk [vmem:[#allocation4 + $0xb0] sm:$0xff] %vm853_vm4, %v4109_v4  ;;  %4126 = vrot.lane.b32.xlu1 %v4809_v6, %s7062_s14  ;;  %v5069_v6 = vpack.c.bf16 %v5028_v9, %v5027_v21 }
 0x58c   :  { %4449 = vst.msk [vmem:[#allocation4 + $0xb0] sm:$0xff] %vm1110_vm5, %v4365_v57  ;;  %3870 = vrot.lane.b32.xlu0 %v5321_v8, %s7060_s12 }
 0x58d   :  { %v4877_v22 = vpop.permute.xlu1 %4876 }
 0x58e   :  { %v4621_v45 = vpop.permute.xlu0 %4620  ;;  %v5643_v28 = vld [vmem:[#allocation4 + $0xa0] sm:$0xff] }
 0x58f   :  { %4705 = vst.msk [vmem:[#allocation4 + $0xb0] sm:$0xff] %vm1367_vm6, %v4621_v45  ;;  %5968 = vmatmul.mubr.bf16.gmra.mrb[40].mxu1 %v5643_v28  ;;  %4638 = vrot.lane.b32.xlu1 %v5322_v26, %s7063_s15  ;;  %v5652_v28 = vld [vmem:[#allocation4 + $0xe8] sm:$0xff] }
 0x590   :  { %4961 = vst.msk [vmem:[#allocation4 + $0xb0] sm:$0xff] %vm1624_vm7, %v4877_v22  ;;  %4382 = vrot.lane.b32.xlu0 %v10096_v55, %s7061_s13  ;;  %7005 = vmatprep.mubr.msk.bf16.mxu1 %vm91_vm0, %v5646_v41  ;;  %v4772_v22 = vld [vmem:[#allocation3 + $0x272] sm:$0xff]  ;;  %v4773_v41 = vld [vmem:[#allocation3 + $0x27a] sm:$0xff] }
 0x591   :  { %v5390_v56 = vpop.permute.xlu1 %5389  ;;  %v4813_v58 = vpack.c.bf16 %v4773_v41, %v4772_v22 }
 0x592   :  { %v5134_v35 = vpop.permute.xlu0 %5133 }
 0x593   :  { %5218 = vst.msk [vmem:[#allocation4 + $0xb0] sm:$0xff] %vm1882_vm8, %v5134_v35  ;;  %5151 = vrot.lane.b32.xlu1 %v5067_v46, %s7065_s17  ;;  %v5286_v35 = vld [vmem:[#allocation3 + $0x291] sm:$0xff] }
 0x594   :  { %5474 = vst.msk [vmem:[#allocation4 + $0xb0] sm:$0xff] %vm2139_vm9, %v5390_v56  ;;  %4894 = vrot.lane.b32.xlu0 %v4810_v61, %s7064_s16 }
 0x595   :  { %v4111_v40 = vpop.permute.xlu1 %4110 }
 0x596   :  { %v3855_v55 = vpop.permute.xlu0 %3854 }
 0x597   :  { %3938 = vst.msk [vmem:[#allocation4 + $0xc0] sm:$0xff] %vm596_vm3, %v3855_v55  ;;  %3872 = vrot.lane.b32.xlu1 %v5322_v26, %s7060_s12  ;;  %v5654_v55 = vld [vmem:[#allocation4 + $0xf8] sm:$0xff] }
 0x598   :  { %4194 = vst.msk [vmem:[#allocation4 + $0xc0] sm:$0xff] %vm853_vm4, %v4111_v40  ;;  %5407 = vrot.lane.b32.xlu0 %v5323_v42, %s7066_s18 }
 0x599   :  { %v4623_v59 = vpop.permute.xlu1 %4622 }
 0x59a   :  { %v4367_v29 = vpop.permute.xlu0 %4366 }
 0x59b   :  { %4450 = vst.msk [vmem:[#allocation4 + $0xc0] sm:$0xff] %vm1110_vm5, %v4367_v29  ;;  %v5645_v38 = vld [vmem:[#allocation4 + $0xb0] sm:$0xff]  ;;  %4384 = vrot.lane.b32.xlu1 %v5067_v46, %s7061_s13  ;;  %v5326_v46 = vpack.c.bf16 %v5286_v35, %v5285_v13 }
 0x59c   :  { %4706 = vst.msk [vmem:[#allocation4 + $0xc0] sm:$0xff] %vm1367_vm6, %v4623_v59  ;;  %4128 = vrot.lane.b32.xlu0 %v4810_v61, %s7062_s14  ;;  %5976 = vmatmul.mubr.bf16.gmra.mrb[44].mxu1 %v5645_v38  ;;  %v4774_v59 = vld [vmem:[#allocation3 + $0x28a] sm:$0xff]  ;;  %v4775_v38 = vld [vmem:[#allocation3 + $0x292] sm:$0xff] }
 0x59d   :  { %7006 = vmatprep.mubr.msk.bf16.mxu1 %vm91_vm0, %v5648_v11  ;;  %v5136_v27 = vpop.permute.xlu1 %5135  ;;  %v4814_v2 = vpack.c.bf16 %v4775_v38, %v4774_v59  ;;  %v4781_v59 = vld [vmem:[#allocation3 + $0x2da] sm:$0xff] }
 0x59e   :  { %v4879_v44 = vpop.permute.xlu0 %4878 }
 0x59f   :  { %4962 = vst.msk [vmem:[#allocation4 + $0xc0] sm:$0xff] %vm1624_vm7, %v4879_v44  ;;  %4896 = vrot.lane.b32.xlu1 %v4811_v36, %s7064_s16  ;;  %v5287_v44 = vld [vmem:[#allocation3 + $0x2a1] sm:$0xff] }
 0x5a0   :  { %5219 = vst.msk [vmem:[#allocation4 + $0xc0] sm:$0xff] %vm1882_vm8, %v5136_v27  ;;  %4640 = vrot.lane.b32.xlu0 %v5323_v42, %s7063_s15  ;;  %v5288_v27 = vld [vmem:[#allocation3 + $0x2a9] sm:$0xff] }
 0x5a1   :  { %v3857_v1 = vpop.permute.xlu1 %3856 }
 0x5a2   :  { %v5392_v49 = vpop.permute.xlu0 %5391  ;;  %3939 = vst.msk [vmem:[#allocation4 + $0xd0] sm:$0xff] %vm596_vm3, %v3857_v1 }
 0x5a3   :  { %5475 = vst.msk [vmem:[#allocation4 + $0xc0] sm:$0xff] %vm2139_vm9, %v5392_v49  ;;  %5409 = vrot.lane.b32.xlu1 %v5324_v52, %s7066_s18  ;;  %v4777_v49 = vld [vmem:[#allocation3 + $0x2aa] sm:$0xff] }
 0x5a4   :  { %5153 = vrot.lane.b32.xlu0 %v5068_v53, %s7065_s17 }
 0x5a5   :  { %v4369_v37 = vpop.permute.xlu1 %4368 }
 0x5a6   :  { %v4113_v31 = vpop.permute.xlu0 %4112 }
 0x5a7   :  { %4195 = vst.msk [vmem:[#allocation4 + $0xd0] sm:$0xff] %vm853_vm4, %v4113_v31  ;;  %4130 = vrot.lane.b32.xlu1 %v4811_v36, %s7062_s14 }
 0x5a8   :  { %4451 = vst.msk [vmem:[#allocation4 + $0xd0] sm:$0xff] %vm1110_vm5, %v4369_v37  ;;  %3874 = vrot.lane.b32.xlu0 %v5323_v42, %s7060_s12  ;;  %v4815_v37 = vpack.c.bf16 %v4777_v49, %v4776_v33 }
 0x5a9   :  { %v4881_v17 = vpop.permute.xlu1 %4880 }
 0x5aa   :  { %v4625_v32 = vpop.permute.xlu0 %4624  ;;  %v5647_v8 = vld [vmem:[#allocation4 + $0xc0] sm:$0xff] }
 0x5ab   :  { %4707 = vst.msk [vmem:[#allocation4 + $0xd0] sm:$0xff] %vm1367_vm6, %v4625_v32  ;;  %5984 = vmatmul.mubr.bf16.gmra.mrb[48].mxu1 %v5647_v8  ;;  %4642 = vrot.lane.b32.xlu1 %v5324_v52, %s7063_s15  ;;  %v5289_v8 = vld [vmem:[#allocation3 + $0x2b9] sm:$0xff] }
 0x5ac   :  { %4963 = vst.msk [vmem:[#allocation4 + $0xd0] sm:$0xff] %vm1624_vm7, %v4881_v17  ;;  %4386 = vrot.lane.b32.xlu0 %v5068_v53, %s7061_s13  ;;  %7007 = vmatprep.mubr.msk.bf16.mxu1 %vm91_vm0, %v5650_v18  ;;  %v5290_v17 = vld [vmem:[#allocation3 + $0x2c1] sm:$0xff] }
 0x5ad   :  { %v5394_v43 = vpop.permute.xlu1 %5393 }
 0x5ae   :  { %v5138_v3 = vpop.permute.xlu0 %5137 }
 0x5af   :  { %5220 = vst.msk [vmem:[#allocation4 + $0xd0] sm:$0xff] %vm1882_vm8, %v5138_v3  ;;  %5155 = vrot.lane.b32.xlu1 %v5069_v6, %s7065_s17 }
 0x5b0   :  { %5476 = vst.msk [vmem:[#allocation4 + $0xd0] sm:$0xff] %vm2139_vm9, %v5394_v43  ;;  %4898 = vrot.lane.b32.xlu0 %v4812_v12, %s7064_s16  ;;  %v5658_v43 = vld [vmem:[#allocation4 + $0x118] sm:$0xff] }
 0x5b1   :  { %v4115_v26 = vpop.permute.xlu1 %4114 }
 0x5b2   :  { %v3859_v19 = vpop.permute.xlu0 %3858 }
 0x5b3   :  { %3940 = vst.msk [vmem:[#allocation4 + $0xe0] sm:$0xff] %vm596_vm3, %v3859_v19  ;;  %3876 = vrot.lane.b32.xlu1 %v5324_v52, %s7060_s12 }
 0x5b4   :  { %4196 = vst.msk [vmem:[#allocation4 + $0xe0] sm:$0xff] %vm853_vm4, %v4115_v26  ;;  %5411 = vrot.lane.b32.xlu0 %v5325_v30, %s7066_s18  ;;  %v4778_v26 = vld [vmem:[#allocation3 + $0x2ba] sm:$0xff] }
 0x5b5   :  { %v4627_v57 = vpop.permute.xlu1 %4626 }
 0x5b6   :  { %v4371_v4 = vpop.permute.xlu0 %4370 }
 0x5b7   :  { %4452 = vst.msk [vmem:[#allocation4 + $0xe0] sm:$0xff] %vm1110_vm5, %v4371_v4  ;;  %v5649_v45 = vld [vmem:[#allocation4 + $0xd0] sm:$0xff]  ;;  %4388 = vrot.lane.b32.xlu1 %v5069_v6, %s7061_s13  ;;  %v4779_v4 = vld [vmem:[#allocation3 + $0x2c2] sm:$0xff] }
 0x5b8   :  { %4708 = vst.msk [vmem:[#allocation4 + $0xe0] sm:$0xff] %vm1367_vm6, %v4627_v57  ;;  %4132 = vrot.lane.b32.xlu0 %v4812_v12, %s7062_s14  ;;  %5992 = vmatmul.mubr.bf16.gmra.mrb[52].mxu1 %v5649_v45  ;;  %v5328_v12 = vpack.c.bf16 %v5290_v17, %v5289_v8 }
 0x5b9   :  { %7008 = vmatprep.mubr.msk.bf16.mxu1 %vm91_vm0, %v5652_v28  ;;  %v5140_v48 = vpop.permute.xlu1 %5139 }
 0x5ba   :  { %v4883_v15 = vpop.permute.xlu0 %4882 }
 0x5bb   :  { %4964 = vst.msk [vmem:[#allocation4 + $0xe0] sm:$0xff] %vm1624_vm7, %v4883_v15  ;;  %4900 = vrot.lane.b32.xlu1 %v4813_v58, %s7064_s16 }
 0x5bc   :  { %5221 = vst.msk [vmem:[#allocation4 + $0xe0] sm:$0xff] %vm1882_vm8, %v5140_v48  ;;  %4644 = vrot.lane.b32.xlu0 %v5325_v30, %s7063_s15 }
 0x5bd   :  { %v3861_v56 = vpop.permute.xlu1 %3860 }
 0x5be   :  { %v5396_v61 = vpop.permute.xlu0 %5395  ;;  %3941 = vst.msk [vmem:[#allocation4 + $0xf0] sm:$0xff] %vm596_vm3, %v3861_v56  ;;  %v5291_v56 = vld [vmem:[#allocation3 + $0x2d1] sm:$0xff] }
 0x5bf   :  { %5477 = vst.msk [vmem:[#allocation4 + $0xe0] sm:$0xff] %vm2139_vm9, %v5396_v61  ;;  %5413 = vrot.lane.b32.xlu1 %v5326_v46, %s7066_s18 }
 0x5c0   :  { %5157 = vrot.lane.b32.xlu0 %v10108_v63, %s7065_s17 }
 0x5c1   :  { %v4373_v16 = vpop.permute.xlu1 %4372 }
 0x5c2   :  { %v4117_v54 = vpop.permute.xlu0 %4116 }
 0x5c3   :  { %4197 = vst.msk [vmem:[#allocation4 + $0xf0] sm:$0xff] %vm853_vm4, %v4117_v54  ;;  %4134 = vrot.lane.b32.xlu1 %v4813_v58, %s7062_s14  ;;  %v4816_v58 = vpack.c.bf16 %v4779_v4, %v4778_v26  ;;  %v5295_v4 = vld [vmem:[#allocation3 + $0x301] sm:$0xff] }
 0x5c4   :  { %4453 = vst.msk [vmem:[#allocation4 + $0xf0] sm:$0xff] %vm1110_vm5, %v4373_v16  ;;  %3878 = vrot.lane.b32.xlu0 %v5325_v30, %s7060_s12 }
 0x5c5   :  { %v4885_v29 = vpop.permute.xlu1 %4884 }
 0x5c6   :  { %v4629_v42 = vpop.permute.xlu0 %4628  ;;  %v5651_v40 = vld [vmem:[#allocation4 + $0xe0] sm:$0xff] }
 0x5c7   :  { %4709 = vst.msk [vmem:[#allocation4 + $0xf0] sm:$0xff] %vm1367_vm6, %v4629_v42  ;;  %6000 = vmatmul.mubr.bf16.gmra.mrb[56].mxu1 %v5651_v40  ;;  %4646 = vrot.lane.b32.xlu1 %v5326_v46, %s7063_s15 }
 0x5c8   :  { %4965 = vst.msk [vmem:[#allocation4 + $0xf0] sm:$0xff] %vm1624_vm7, %v4885_v29  ;;  %4390 = vrot.lane.b32.xlu0 %v10108_v63, %s7061_s13  ;;  %7009 = vmatprep.mubr.msk.bf16.mxu1 %vm91_vm0, %v5654_v55  ;;  %v5327_v63 = vpack.c.bf16 %v5288_v27, %v5287_v44  ;;  %v4780_v29 = vld [vmem:[#allocation3 + $0x2d2] sm:$0xff] }
 0x5c9   :  { %5222 = vst.msk [vmem:[#allocation4 + $0xf0] sm:$0xff] %vm1882_vm8, %v9984_v23  ;;  %v4631_v51 = vpop.permute.xlu1 %4630  ;;  %v4817_v27 = vpack.c.bf16 %v4781_v59, %v4780_v29 }
 0x5ca   :  { %5478 = vst.msk [vmem:[#allocation4 + $0xf0] sm:$0xff] %vm2139_vm9, %v9988_v0  ;;  %v4375_v11 = vpop.permute.xlu0 %4374 }
 0x5cb   :  { %4454 = vst.msk [vmem:[#allocation4 + $0x100] sm:$0xff] %vm1110_vm5, %v4375_v11  ;;  %5159 = vrot.lane.b32.xlu1 %v10113_v25, %s7065_s17 }
 0x5cc   :  { %4710 = vst.msk [vmem:[#allocation4 + $0x100] sm:$0xff] %vm1367_vm6, %v4631_v51  ;;  %4902 = vrot.lane.b32.xlu0 %v4814_v2, %s7064_s16 }
 0x5cd   :  { %v5144_v36 = vpop.permute.xlu1 %5143 }
 0x5ce   :  { %v4887_v23 = vpop.permute.xlu0 %4886 }
 0x5cf   :  { %4966 = vst.msk [vmem:[#allocation4 + $0x100] sm:$0xff] %vm1624_vm7, %v4887_v23  ;;  %3880 = vrot.lane.b32.xlu1 %v5326_v46, %s7060_s12  ;;  %v5292_v46 = vld [vmem:[#allocation3 + $0x2d9] sm:$0xff] }
 0x5d0   :  { %5223 = vst.msk [vmem:[#allocation4 + $0x100] sm:$0xff] %vm1882_vm8, %v5144_v36  ;;  %5415 = vrot.lane.b32.xlu0 %v5327_v63, %s7066_s18  ;;  %v5329_v16 = vpack.c.bf16 %v5292_v46, %v5291_v56  ;;  %v5293_v36 = vld [vmem:[#allocation3 + $0x2e9] sm:$0xff] }
 0x5d1   :  { %v5653_v0 = vld [vmem:[#allocation4 + $0xf0] sm:$0xff]  ;;  %v3865_v5 = vpop.permute.xlu1 %3864 }
 0x5d2   :  { %v5400_v7 = vpop.permute.xlu0 %5399  ;;  %6008 = vmatmul.mubr.bf16.gmra.mrb[60].mxu1 %v5653_v0  ;;  %3943 = vst.msk [vmem:[#allocation4 + $0x110] sm:$0xff] %vm596_vm3, %v3865_v5 }
 0x5d3   :  { %5479 = vst.msk [vmem:[#allocation4 + $0x100] sm:$0xff] %vm2139_vm9, %v5400_v7  ;;  %7010 = vmatprep.mubr.msk.bf16.mxu1 %vm91_vm0, %v5656_v34  ;;  %4392 = vrot.lane.b32.xlu1 %v10113_v25, %s7061_s13 }
 0x5d4   :  { %4136 = vrot.lane.b32.xlu0 %v4814_v2, %s7062_s14 }
 0x5d5   :  { %v4377_v52 = vpop.permute.xlu1 %4376 }
 0x5d6   :  { %v10467_v53 = vpop.f32.mrb[0].mxu1  ;;  %v4121_v1 = vpop.permute.xlu0 %4120 }
 0x5d7   :  { %4199 = vst.msk [vmem:[#allocation4 + $0x110] sm:$0xff] %vm853_vm4, %v4121_v1  ;;  %v5891_v31 = vpop.f32.mrb[1].mxu1  ;;  %v6144_v18 = vsel %vm91_vm0, %v10467_v53, 0.0  ;;  %4904 = vrot.lane.b32.xlu1 %v4815_v37, %s7064_s16 }
 0x5d8   :  { %4455 = vst.msk [vmem:[#allocation4 + $0x110] sm:$0xff] %vm1110_vm5, %v4377_v52  ;;  %v10471_v32 = vpop.f32.mrb[2].mxu1  ;;  %4648 = vrot.lane.b32.xlu0 %v5327_v63, %s7063_s15  ;;  %v5662_v52 = vld [vmem:[#allocation4 + $0x138] sm:$0xff] }
 0x5d9   :  { %v6145_v25 = vsel %vm91_vm0, %v10471_v32, 0.0  ;;  %v5894_v20 = vpop.f32.mrb[3].mxu1  ;;  %v4889_v3 = vpop.permute.xlu1 %4888 }
 0x5da   :  { %v6146_v60 = vadd.f32 %v6145_v25, %v6144_v18  ;;  %v4633_v21 = vpop.permute.xlu0 %4632  ;;  %v5655_v9 = vld [vmem:[#allocation4 + $0x100] sm:$0xff]  ;;  %v4782_v25 = vld [vmem:[#allocation3 + $0x2ea] sm:$0xff]  ;;  %v4783_v20 = vld [vmem:[#allocation3 + $0x2f2] sm:$0xff] }
 0x5db   :  { %4711 = vst.msk [vmem:[#allocation4 + $0x110] sm:$0xff] %vm1367_vm6, %v4633_v21  ;;  %6016 = vmatmul.mubr.bf16.gmra.mrb[64].mxu1 %v5655_v9  ;;  %5417 = vrot.lane.b32.xlu1 %v5328_v12, %s7066_s18 }
 0x5dc   :  { %4967 = vst.msk [vmem:[#allocation4 + $0x110] sm:$0xff] %vm1624_vm7, %v4889_v3  ;;  %5161 = vrot.lane.b32.xlu0 %v10119_v10, %s7065_s17  ;;  %7011 = vmatprep.mubr.msk.bf16.mxu1 %vm91_vm0, %v5658_v43 }
 0x5dd   :  { %v5402_v24 = vpop.permute.xlu1 %5401 }
 0x5de   :  { %v5146_v6 = vpop.permute.xlu0 %5145 }
 0x5df   :  { %5224 = vst.msk [vmem:[#allocation4 + $0x110] sm:$0xff] %vm1882_vm8, %v5146_v6  ;;  %4138 = vrot.lane.b32.xlu1 %v4815_v37, %s7062_s14 }
 0x5e0   :  { %5480 = vst.msk [vmem:[#allocation4 + $0x110] sm:$0xff] %vm2139_vm9, %v5402_v24  ;;  %3882 = vrot.lane.b32.xlu0 %v5327_v63, %s7060_s12  ;;  %v4818_v24 = vpack.c.bf16 %v4783_v20, %v4782_v25 }
 0x5e1   :  { %v4123_v19 = vpop.permute.xlu1 %4122 }
 0x5e2   :  { %v3867_v47 = vpop.permute.xlu0 %3866 }
 0x5e3   :  { %3944 = vst.msk [vmem:[#allocation4 + $0x120] sm:$0xff] %vm596_vm3, %v3867_v47  ;;  %v10490_v30 = vpop.f32.mrb[4].mxu1  ;;  %4650 = vrot.lane.b32.xlu1 %v5328_v12, %s7063_s15 }
 0x5e4   :  { %4200 = vst.msk [vmem:[#allocation4 + $0x120] sm:$0xff] %vm853_vm4, %v4123_v19  ;;  %v6147_v57 = vsel %vm91_vm0, %v10490_v30, 0.0  ;;  %4394 = vrot.lane.b32.xlu0 %v10119_v10, %s7061_s13  ;;  %v5899_v45 = vpop.f32.mrb[5].mxu1  ;;  %v5660_v10 = vld [vmem:[#allocation4 + $0x128] sm:$0xff] }
 0x5e5   :  { %v6148_v28 = vadd.f32 %v6147_v57, %v6146_v60  ;;  %v10498_v22 = vpop.f32.mrb[6].mxu1  ;;  %v4635_v35 = vpop.permute.xlu1 %4634  ;;  %v5296_v57 = vld [vmem:[#allocation3 + $0x309] sm:$0xff] }
 0x5e6   :  { %v6149_v41 = vsel %vm91_vm0, %v10498_v22, 0.0  ;;  %v4379_v15 = vpop.permute.xlu0 %4378  ;;  %v5902_v48 = vpop.f32.mrb[7].mxu1 }
 0x5e7   :  { %v6150_v13 = vadd.f32 %v6149_v41, %v6148_v28  ;;  %4456 = vst.msk [vmem:[#allocation4 + $0x120] sm:$0xff] %vm1110_vm5, %v4379_v15  ;;  %v5657_v61 = vld [vmem:[#allocation4 + $0x110] sm:$0xff]  ;;  %5163 = vrot.lane.b32.xlu1 %v10124_v14, %s7065_s17  ;;  %v5331_v28 = vpack.c.bf16 %v5296_v57, %v5295_v4 }
 0x5e8   :  { %4712 = vst.msk [vmem:[#allocation4 + $0x120] sm:$0xff] %vm1367_vm6, %v4635_v35  ;;  %4906 = vrot.lane.b32.xlu0 %v4816_v58, %s7064_s16  ;;  %6024 = vmatmul.mubr.bf16.gmra.mrb[68].mxu1 %v5657_v61  ;;  %v4788_v57 = vld [vmem:[#allocation3 + $0x332] sm:$0xff] }
 0x5e9   :  { %7012 = vmatprep.mubr.msk.bf16.mxu1 %vm91_vm0, %v5660_v10  ;;  %v5148_v55 = vpop.permute.xlu1 %5147 }
 0x5ea   :  { %v4891_v54 = vpop.permute.xlu0 %4890 }
 0x5eb   :  { %4968 = vst.msk [vmem:[#allocation4 + $0x120] sm:$0xff] %vm1624_vm7, %v4891_v54  ;;  %3884 = vrot.lane.b32.xlu1 %v5328_v12, %s7060_s12 }
 0x5ec   :  { %5225 = vst.msk [vmem:[#allocation4 + $0x120] sm:$0xff] %vm1882_vm8, %v5148_v55  ;;  %5419 = vrot.lane.b32.xlu0 %v5329_v16, %s7066_s18 }
 0x5ed   :  { %v3869_v40 = vpop.permute.xlu1 %3868 }
 0x5ee   :  { %v5404_v42 = vpop.permute.xlu0 %5403  ;;  %3945 = vst.msk [vmem:[#allocation4 + $0x130] sm:$0xff] %vm596_vm3, %v3869_v40 }
 0x5ef   :  { %5481 = vst.msk [vmem:[#allocation4 + $0x120] sm:$0xff] %vm2139_vm9, %v5404_v42  ;;  %4396 = vrot.lane.b32.xlu1 %v10124_v14, %s7061_s13  ;;  %v5294_v14 = vld [vmem:[#allocation3 + $0x2f1] sm:$0xff]  ;;  %v5297_v42 = vld [vmem:[#allocation3 + $0x319] sm:$0xff] }
 0x5f0   :  { %4140 = vrot.lane.b32.xlu0 %v4816_v58, %s7062_s14  ;;  %v5330_v1 = vpack.c.bf16 %v5294_v14, %v5293_v36  ;;  %v4784_v58 = vld [vmem:[#allocation3 + $0x302] sm:$0xff] }
 0x5f1   :  { %v4381_v2 = vpop.permute.xlu1 %4380 }
 0x5f2   :  { %v4125_v38 = vpop.permute.xlu0 %4124  ;;  %v10517_v11 = vpop.f32.mrb[8].mxu1 }
 0x5f3   :  { %4201 = vst.msk [vmem:[#allocation4 + $0x130] sm:$0xff] %vm853_vm4, %v4125_v38  ;;  %v6151_v51 = vsel %vm91_vm0, %v10517_v11, 0.0  ;;  %v5907_v44 = vpop.f32.mrb[9].mxu1  ;;  %4908 = vrot.lane.b32.xlu1 %v4817_v27, %s7064_s16 }
 0x5f4   :  { %4457 = vst.msk [vmem:[#allocation4 + $0x130] sm:$0xff] %vm1110_vm5, %v4381_v2  ;;  %v6152_v23 = vadd.f32 %v6151_v51, %v6150_v13  ;;  %4652 = vrot.lane.b32.xlu0 %v5329_v16, %s7063_s15  ;;  %v10524_v63 = vpop.f32.mrb[10].mxu1  ;;  %v4785_v13 = vld [vmem:[#allocation3 + $0x30a] sm:$0xff] }
 0x5f5   :  { %v6153_v0 = vsel %vm91_vm0, %v10524_v63, 0.0  ;;  %v5910_v7 = vpop.f32.mrb[11].mxu1  ;;  %v4893_v49 = vpop.permute.xlu1 %4892  ;;  %v4819_v54 = vpack.c.bf16 %v4785_v13, %v4784_v58  ;;  %v5302_v58 = vld [vmem:[#allocation3 + $0x351] sm:$0xff] }
 0x5f6   :  { %v6154_v34 = vadd.f32 %v6153_v0, %v6152_v23  ;;  %v4637_v5 = vpop.permute.xlu0 %4636  ;;  %v5659_v33 = vld [vmem:[#allocation4 + $0x120] sm:$0xff] }
 0x5f7   :  { %4713 = vst.msk [vmem:[#allocation4 + $0x130] sm:$0xff] %vm1367_vm6, %v4637_v5  ;;  %6032 = vmatmul.mubr.bf16.gmra.mrb[72].mxu1 %v5659_v33  ;;  %5421 = vrot.lane.b32.xlu1 %v5330_v1, %s7066_s18  ;;  %v4787_v5 = vld [vmem:[#allocation3 + $0x322] sm:$0xff] }
 0x5f8   :  { %4969 = vst.msk [vmem:[#allocation4 + $0x130] sm:$0xff] %vm1624_vm7, %v4893_v49  ;;  %5165 = vrot.lane.b32.xlu0 %v10128_v50, %s7065_s17  ;;  %7013 = vmatprep.mubr.msk.bf16.mxu1 %vm91_vm0, %v5662_v52  ;;  %v5044_v52 = vld [vmem:[#allocation3 + $0x338] sm:$0xff] }
 0x5f9   :  { %v5406_v37 = vpop.permute.xlu1 %5405 }
 0x5fa   :  { %v5150_v31 = vpop.permute.xlu0 %5149 }
 0x5fb   :  { %5226 = vst.msk [vmem:[#allocation4 + $0x130] sm:$0xff] %vm1882_vm8, %v5150_v31  ;;  %4142 = vrot.lane.b32.xlu1 %v4817_v27, %s7062_s14  ;;  %v5666_v27 = vld [vmem:[#allocation4 + $0x158] sm:$0xff] }
 0x5fc   :  { %5482 = vst.msk [vmem:[#allocation4 + $0x130] sm:$0xff] %vm2139_vm9, %v5406_v37  ;;  %3886 = vrot.lane.b32.xlu0 %v5329_v16, %s7060_s12 }
 0x5fd   :  { %v4127_v17 = vpop.permute.xlu1 %4126 }
 0x5fe   :  { %v3871_v8 = vpop.permute.xlu0 %3870 }
 0x5ff   :  { %3946 = vst.msk [vmem:[#allocation4 + $0x140] sm:$0xff] %vm596_vm3, %v3871_v8  ;;  %v10540_v18 = vpop.f32.mrb[12].mxu1  ;;  %4654 = vrot.lane.b32.xlu1 %v5330_v1, %s7063_s15 }
 0x600   :  { %4202 = vst.msk [vmem:[#allocation4 + $0x140] sm:$0xff] %vm853_vm4, %v4127_v17  ;;  %v6155_v60 = vsel %vm91_vm0, %v10540_v18, 0.0  ;;  %4398 = vrot.lane.b32.xlu0 %v10128_v50, %s7061_s13  ;;  %v5915_v21 = vpop.f32.mrb[13].mxu1  ;;  %v5664_v50 = vld [vmem:[#allocation4 + $0x148] sm:$0xff] }
 0x601   :  { %v6156_v9 = vadd.f32 %v6155_v60, %v6154_v34  ;;  %v10548_v3 = vpop.f32.mrb[14].mxu1  ;;  %v4639_v19 = vpop.permute.xlu1 %4638  ;;  %v4786_v34 = vld [vmem:[#allocation3 + $0x31a] sm:$0xff] }
 0x602   :  { %v6157_v12 = vsel %vm91_vm0, %v10548_v3, 0.0  ;;  %v4383_v43 = vpop.permute.xlu0 %4382  ;;  %v5918_v6 = vpop.f32.mrb[15].mxu1  ;;  %v4820_v20 = vpack.c.bf16 %v4787_v5, %v4786_v34 }
 0x603   :  { %v6158_v47 = vadd.f32 %v6157_v12, %v6156_v9  ;;  %4458 = vst.msk [vmem:[#allocation4 + $0x140] sm:$0xff] %vm1110_vm5, %v4383_v43  ;;  %v5661_v26 = vld [vmem:[#allocation4 + $0x130] sm:$0xff]  ;;  %5167 = vrot.lane.b32.xlu1 %v10138_v39, %s7065_s17  ;;  %v5300_v43 = vld [vmem:[#allocation3 + $0x339] sm:$0xff]  ;;  %v5668_v6 = vld [vmem:[#allocation4 + $0x168] sm:$0xff] }
 0x604   :  { %4714 = vst.msk [vmem:[#allocation4 + $0x140] sm:$0xff] %vm1367_vm6, %v4639_v19  ;;  %4910 = vrot.lane.b32.xlu0 %v4818_v24, %s7064_s16  ;;  %6040 = vmatmul.mubr.bf16.gmra.mrb[76].mxu1 %v5661_v26  ;;  %v5299_v12 = vld [vmem:[#allocation3 + $0x331] sm:$0xff] }
 0x605   :  { %7014 = vmatprep.mubr.msk.bf16.mxu1 %vm91_vm0, %v5664_v50  ;;  %v5152_v41 = vpop.permute.xlu1 %5151  ;;  %v4789_v50 = vld [vmem:[#allocation3 + $0x33a] sm:$0xff] }
 0x606   :  { %v4895_v45 = vpop.permute.xlu0 %4894 }
 0x607   :  { %4970 = vst.msk [vmem:[#allocation4 + $0x140] sm:$0xff] %vm1624_vm7, %v4895_v45  ;;  %3888 = vrot.lane.b32.xlu1 %v5330_v1, %s7060_s12  ;;  %v5043_v1 = vld [vmem:[#allocation3 + $0x330] sm:$0xff]  ;;  %v5045_v45 = vld [vmem:[#allocation3 + $0x348] sm:$0xff] }
 0x608   :  { %5227 = vst.msk [vmem:[#allocation4 + $0x140] sm:$0xff] %vm1882_vm8, %v5152_v41  ;;  %5423 = vrot.lane.b32.xlu0 %v5331_v28, %s7066_s18  ;;  %v5077_v9 = vpack.c.bf16 %v5044_v52, %v5043_v1 }
 0x609   :  { %v3873_v48 = vpop.permute.xlu1 %3872 }
 0x60a   :  { %v5408_v15 = vpop.permute.xlu0 %5407  ;;  %3947 = vst.msk [vmem:[#allocation4 + $0x150] sm:$0xff] %vm596_vm3, %v3873_v48  ;;  %v5301_v48 = vld [vmem:[#allocation3 + $0x349] sm:$0xff] }
 0x60b   :  { %5483 = vst.msk [vmem:[#allocation4 + $0x140] sm:$0xff] %vm2139_vm9, %v5408_v15  ;;  %4400 = vrot.lane.b32.xlu1 %v10138_v39, %s7061_s13  ;;  %v5298_v39 = vld [vmem:[#allocation3 + $0x321] sm:$0xff] }
 0x60c   :  { %4144 = vrot.lane.b32.xlu0 %v4818_v24, %s7062_s14  ;;  %v5332_v44 = vpack.c.bf16 %v5298_v39, %v5297_v42 }
 0x60d   :  { %v4385_v56 = vpop.permute.xlu1 %4384 }
 0x60e   :  { %v4129_v35 = vpop.permute.xlu0 %4128  ;;  %v10567_v61 = vpop.f32.mrb[16].mxu1 }
 0x60f   :  { %4203 = vst.msk [vmem:[#allocation4 + $0x150] sm:$0xff] %vm853_vm4, %v4129_v35  ;;  %v6159_v46 = vsel %vm91_vm0, %v10567_v61, 0.0  ;;  %v5923_v10 = vpop.f32.mrb[17].mxu1  ;;  %4912 = vrot.lane.b32.xlu1 %v4819_v54, %s7064_s16 }
 0x610   :  { %4459 = vst.msk [vmem:[#allocation4 + $0x150] sm:$0xff] %vm1110_vm5, %v4385_v56  ;;  %v6160_v16 = vadd.f32 %v6159_v46, %v6158_v47  ;;  %4656 = vrot.lane.b32.xlu0 %v5331_v28, %s7063_s15  ;;  %v10574_v55 = vpop.f32.mrb[18].mxu1  ;;  %v5333_v47 = vpack.c.bf16 %v5300_v43, %v5299_v12  ;;  %v4821_v46 = vpack.c.bf16 %v4789_v50, %v4788_v57 }
 0x611   :  { %v6161_v40 = vsel %vm91_vm0, %v10574_v55, 0.0  ;;  %v5926_v29 = vpop.f32.mrb[19].mxu1  ;;  %v4897_v51 = vpop.permute.xlu1 %4896 }
 0x612   :  { %v6162_v59 = vadd.f32 %v6161_v40, %v6160_v16  ;;  %v4641_v38 = vpop.permute.xlu0 %4640  ;;  %v5663_v2 = vld [vmem:[#allocation4 + $0x140] sm:$0xff]  ;;  %v5334_v40 = vpack.c.bf16 %v5302_v58, %v5301_v48 }
 0x613   :  { %4715 = vst.msk [vmem:[#allocation4 + $0x150] sm:$0xff] %vm1367_vm6, %v4641_v38  ;;  %6048 = vmatmul.mubr.bf16.gmra.mrb[80].mxu1 %v5663_v2  ;;  %5425 = vrot.lane.b32.xlu1 %v5332_v44, %s7066_s18 }
 0x614   :  { %4971 = vst.msk [vmem:[#allocation4 + $0x150] sm:$0xff] %vm1624_vm7, %v4897_v51  ;;  %5169 = vrot.lane.b32.xlu0 %v10142_v62, %s7065_s17  ;;  %7015 = vmatprep.mubr.msk.bf16.mxu1 %vm91_vm0, %v5666_v27  ;;  %v5670_v51 = vld [vmem:[#allocation4 + $0x178] sm:$0xff] }
 0x615   :  { %v5410_v36 = vpop.permute.xlu1 %5409 }
 0x616   :  { %v5154_v23 = vpop.permute.xlu0 %5153 }
 0x617   :  { %5228 = vst.msk [vmem:[#allocation4 + $0x150] sm:$0xff] %vm1882_vm8, %v5154_v23  ;;  %4146 = vrot.lane.b32.xlu1 %v4819_v54, %s7062_s14 }
 0x618   :  { %5484 = vst.msk [vmem:[#allocation4 + $0x150] sm:$0xff] %vm2139_vm9, %v5410_v36  ;;  %3890 = vrot.lane.b32.xlu0 %v5331_v28, %s7060_s12  ;;  %v5046_v28 = vld [vmem:[#allocation3 + $0x350] sm:$0xff] }
 0x619   :  { %v4131_v0 = vpop.permute.xlu1 %4130  ;;  %v5078_v16 = vpack.c.bf16 %v5046_v28, %v5045_v45 }
 0x61a   :  { %v3875_v14 = vpop.permute.xlu0 %3874 }
 0x61b   :  { %3948 = vst.msk [vmem:[#allocation4 + $0x160] sm:$0xff] %vm596_vm3, %v3875_v14  ;;  %v10590_v7 = vpop.f32.mrb[20].mxu1  ;;  %4658 = vrot.lane.b32.xlu1 %v5332_v44, %s7063_s15 }
 0x61c   :  { %4204 = vst.msk [vmem:[#allocation4 + $0x160] sm:$0xff] %vm853_vm4, %v4131_v0  ;;  %v6163_v33 = vsel %vm91_vm0, %v10590_v7, 0.0  ;;  %4402 = vrot.lane.b32.xlu0 %v10142_v62, %s7061_s13  ;;  %v5931_v49 = vpop.f32.mrb[21].mxu1 }
 0x61d   :  { %v6164_v31 = vadd.f32 %v6163_v33, %v6162_v59  ;;  %v10598_v37 = vpop.f32.mrb[22].mxu1  ;;  %v4643_v21 = vpop.permute.xlu1 %4642 }
 0x61e   :  { %v6165_v8 = vsel %vm91_vm0, %v10598_v37, 0.0  ;;  %v4387_v17 = vpop.permute.xlu0 %4386  ;;  %v5934_v25 = vpop.f32.mrb[23].mxu1 }
 0x61f   :  { %v6166_v60 = vadd.f32 %v6165_v8, %v6164_v31  ;;  %4460 = vst.msk [vmem:[#allocation4 + $0x160] sm:$0xff] %vm1110_vm5, %v4387_v17  ;;  %v5665_v62 = vld [vmem:[#allocation4 + $0x150] sm:$0xff]  ;;  %5171 = vrot.lane.b32.xlu1 %v5077_v9, %s7065_s17  ;;  %v5672_v25 = vld [vmem:[#allocation4 + $0x188] sm:$0xff] }
 0x620   :  { %4716 = vst.msk [vmem:[#allocation4 + $0x160] sm:$0xff] %vm1367_vm6, %v4643_v21  ;;  %4914 = vrot.lane.b32.xlu0 %v4820_v20, %s7064_s16  ;;  %6056 = vmatmul.mubr.bf16.gmra.mrb[84].mxu1 %v5665_v62 }
 0x621   :  { %7016 = vmatprep.mubr.msk.bf16.mxu1 %vm91_vm0, %v5668_v6  ;;  %v5156_v19 = vpop.permute.xlu1 %5155 }
 0x622   :  { %v4899_v24 = vpop.permute.xlu0 %4898 }
 0x623   :  { %4972 = vst.msk [vmem:[#allocation4 + $0x160] sm:$0xff] %vm1624_vm7, %v4899_v24  ;;  %3892 = vrot.lane.b32.xlu1 %v5332_v44, %s7060_s12 }
 0x624   :  { %5229 = vst.msk [vmem:[#allocation4 + $0x160] sm:$0xff] %vm1882_vm8, %v5156_v19  ;;  %5427 = vrot.lane.b32.xlu0 %v5333_v47, %s7066_s18 }
 0x625   :  { %v3877_v4 = vpop.permute.xlu1 %3876 }
 0x626   :  { %v5412_v26 = vpop.permute.xlu0 %5411  ;;  %3949 = vst.msk [vmem:[#allocation4 + $0x170] sm:$0xff] %vm596_vm3, %v3877_v4 }
 0x627   :  { %5485 = vst.msk [vmem:[#allocation4 + $0x160] sm:$0xff] %vm2139_vm9, %v5412_v26  ;;  %4404 = vrot.lane.b32.xlu1 %v5077_v9, %s7061_s13 }
 0x628   :  { %4148 = vrot.lane.b32.xlu0 %v4820_v20, %s7062_s14 }
 0x629   :  { %v4389_v13 = vpop.permute.xlu1 %4388 }
 0x62a   :  { %v4133_v41 = vpop.permute.xlu0 %4132  ;;  %v10615_v15 = vpop.f32.mrb[24].mxu1 }
 0x62b   :  { %4205 = vst.msk [vmem:[#allocation4 + $0x170] sm:$0xff] %vm853_vm4, %v4133_v41  ;;  %v6167_v35 = vsel %vm91_vm0, %v10615_v15, 0.0  ;;  %v5939_v56 = vpop.f32.mrb[25].mxu1  ;;  %4916 = vrot.lane.b32.xlu1 %v4821_v46, %s7064_s16  ;;  %v5674_v41 = vld [vmem:[#allocation4 + $0x198] sm:$0xff] }
 0x62c   :  { %4461 = vst.msk [vmem:[#allocation4 + $0x170] sm:$0xff] %vm1110_vm5, %v4389_v13  ;;  %v6168_v10 = vadd.f32 %v6167_v35, %v6166_v60  ;;  %4660 = vrot.lane.b32.xlu0 %v5333_v47, %s7063_s15  ;;  %v10622_v54 = vpop.f32.mrb[26].mxu1 }
 0x62d   :  { %v6169_v42 = vsel %vm91_vm0, %v10622_v54, 0.0  ;;  %v5942_v39 = vpop.f32.mrb[27].mxu1  ;;  %v4901_v2 = vpop.permute.xlu1 %4900 }
 0x62e   :  { %v6170_v29 = vadd.f32 %v6169_v42, %v6168_v10  ;;  %v4645_v59 = vpop.permute.xlu0 %4644  ;;  %v5667_v38 = vld [vmem:[#allocation4 + $0x160] sm:$0xff] }
 0x62f   :  { %4717 = vst.msk [vmem:[#allocation4 + $0x170] sm:$0xff] %vm1367_vm6, %v4645_v59  ;;  %6064 = vmatmul.mubr.bf16.gmra.mrb[88].mxu1 %v5667_v38  ;;  %5429 = vrot.lane.b32.xlu1 %v5334_v40, %s7066_s18 }
 0x630   :  { %4973 = vst.msk [vmem:[#allocation4 + $0x170] sm:$0xff] %vm1624_vm7, %v4901_v2  ;;  %5173 = vrot.lane.b32.xlu0 %v5078_v16, %s7065_s17  ;;  %7017 = vmatprep.mubr.msk.bf16.mxu1 %vm91_vm0, %v5670_v51  ;;  %v5676_v51 = vld [vmem:[#allocation4 + $0x1a8] sm:$0xff] }
 0x631   :  { %v5414_v27 = vpop.permute.xlu1 %5413 }
 0x632   :  { %v5158_v44 = vpop.permute.xlu0 %5157 }
 0x633   :  { %5230 = vst.msk [vmem:[#allocation4 + $0x170] sm:$0xff] %vm1882_vm8, %v5158_v44 }
 0x634   :  { %5486 = vst.msk [vmem:[#allocation4 + $0x170] sm:$0xff] %vm2139_vm9, %v5414_v27 }
 0x635   :  { %v4135_v36 = vpop.permute.xlu1 %4134 }
 0x636   :  { %v3879_v23 = vpop.permute.xlu0 %3878 }
 0x637   :  { %3950 = vst.msk [vmem:[#allocation4 + $0x180] sm:$0xff] %vm596_vm3, %v3879_v23  ;;  %v10635_v14 = vpop.f32.mrb[28].mxu1 }
 0x638   :  { %4206 = vst.msk [vmem:[#allocation4 + $0x180] sm:$0xff] %vm853_vm4, %v4135_v36  ;;  %v6171_v0 = vsel %vm91_vm0, %v10635_v14, 0.0  ;;  %v5947_v34 = vpop.f32.mrb[29].mxu1 }
 0x639   :  { %v6172_v5 = vadd.f32 %v6171_v0, %v6170_v29  ;;  %v10640_v33 = vpop.f32.mrb[30].mxu1  ;;  %v4647_v8 = vpop.permute.xlu1 %4646 }
 0x63a   :  { %v6173_v49 = vsel %vm91_vm0, %v10640_v33, 0.0  ;;  %v4391_v1 = vpop.permute.xlu0 %4390  ;;  %v5950_v52 = vpop.f32.mrb[31].mxu1 }
 0x63b   :  { %v6174_v31 = vadd.f32 %v6173_v49, %v6172_v5  ;;  %4462 = vst.msk [vmem:[#allocation4 + $0x180] sm:$0xff] %vm1110_vm5, %v4391_v1  ;;  %v5669_v17 = vld [vmem:[#allocation4 + $0x170] sm:$0xff] }
 0x63c   :  { %4718 = vst.msk [vmem:[#allocation4 + $0x180] sm:$0xff] %vm1367_vm6, %v4647_v8  ;;  %6072 = vmatmul.mubr.bf16.gmra.mrb[92].mxu1 %v5669_v17 }
 0x63d   :  { %7018 = vmatprep.mubr.msk.bf16.mxu1 %vm91_vm0, %v5672_v25  ;;  %v5160_v60 = vpop.permute.xlu1 %5159 }
 0x63e   :  { %v4903_v20 = vpop.permute.xlu0 %4902 }
 0x63f   :  { %4974 = vst.msk [vmem:[#allocation4 + $0x180] sm:$0xff] %vm1624_vm7, %v4903_v20 }
 0x640   :  { %5231 = vst.msk [vmem:[#allocation4 + $0x180] sm:$0xff] %vm1882_vm8, %v5160_v60 }
 0x641   :  { %v3881_v9 = vpop.permute.xlu1 %3880 }
 0x642   :  { %v5416_v21 = vpop.permute.xlu0 %5415  ;;  %3951 = vst.msk [vmem:[#allocation4 + $0x190] sm:$0xff] %vm596_vm3, %v3881_v9  ;;  %v5678_v9 = vld [vmem:[#allocation4 + $0x1b8] sm:$0xff] }
 0x643   :  { %5487 = vst.msk [vmem:[#allocation4 + $0x180] sm:$0xff] %vm2139_vm9, %v5416_v21 }
 0x645   :  { %v4393_v43 = vpop.permute.xlu1 %4392 }
 0x646   :  { %v4137_v62 = vpop.permute.xlu0 %4136  ;;  %v10651_v12 = vpop.f32.mrb[32].mxu1 }
 0x647   :  { %4207 = vst.msk [vmem:[#allocation4 + $0x190] sm:$0xff] %vm853_vm4, %v4137_v62  ;;  %v6175_v6 = vsel %vm91_vm0, %v10651_v12, 0.0  ;;  %v5955_v24 = vpop.f32.mrb[33].mxu1 }
 0x648   :  { %4463 = vst.msk [vmem:[#allocation4 + $0x190] sm:$0xff] %vm1110_vm5, %v4393_v43  ;;  %v6176_v47 = vadd.f32 %v6175_v6, %v6174_v31  ;;  %v10657_v19 = vpop.f32.mrb[34].mxu1 }
 0x649   :  { %v6177_v26 = vsel %vm91_vm0, %v10657_v19, 0.0  ;;  %v5958_v4 = vpop.f32.mrb[35].mxu1  ;;  %v4905_v28 = vpop.permute.xlu1 %4904 }
 0x64a   :  { %v6178_v57 = vadd.f32 %v6177_v26, %v6176_v47  ;;  %v4649_v50 = vpop.permute.xlu0 %4648  ;;  %v5671_v45 = vld [vmem:[#allocation4 + $0x180] sm:$0xff] }
 0x64b   :  { %4719 = vst.msk [vmem:[#allocation4 + $0x190] sm:$0xff] %vm1367_vm6, %v4649_v50  ;;  %6080 = vmatmul.mubr.bf16.gmra.mrb[96].mxu1 %v5671_v45 }
 0x64c   :  { %4975 = vst.msk [vmem:[#allocation4 + $0x190] sm:$0xff] %vm1624_vm7, %v4905_v28  ;;  %7019 = vmatprep.mubr.msk.bf16.mxu1 %vm91_vm0, %v5674_v41 }
 0x64d   :  { %v5418_v58 = vpop.permute.xlu1 %5417 }
 0x64e   :  { %v5162_v48 = vpop.permute.xlu0 %5161 }
 0x64f   :  { %5232 = vst.msk [vmem:[#allocation4 + $0x190] sm:$0xff] %vm1882_vm8, %v5162_v48 }
 0x650   :  { %5488 = vst.msk [vmem:[#allocation4 + $0x190] sm:$0xff] %vm2139_vm9, %v5418_v58 }
 0x651   :  { %v4139_v35 = vpop.permute.xlu1 %4138 }
 0x652   :  { %v3883_v13 = vpop.permute.xlu0 %3882 }
 0x653   :  { %3952 = vst.msk [vmem:[#allocation4 + $0x1a0] sm:$0xff] %vm596_vm3, %v3883_v13  ;;  %v10667_v56 = vpop.f32.mrb[36].mxu1 }
 0x654   :  { %4208 = vst.msk [vmem:[#allocation4 + $0x1a0] sm:$0xff] %vm853_vm4, %v4139_v35  ;;  %v6179_v46 = vsel %vm91_vm0, %v10667_v56, 0.0  ;;  %v5963_v10 = vpop.f32.mrb[37].mxu1  ;;  %v5680_v35 = vld [vmem:[#allocation4 + $0x1c8] sm:$0xff] }
 0x655   :  { %v6180_v16 = vadd.f32 %v6179_v46, %v6178_v57  ;;  %v10672_v42 = vpop.f32.mrb[38].mxu1  ;;  %v4651_v38 = vpop.permute.xlu1 %4650 }
 0x656   :  { %v6181_v39 = vsel %vm91_vm0, %v10672_v42, 0.0  ;;  %v4395_v40 = vpop.permute.xlu0 %4394  ;;  %v5966_v29 = vpop.f32.mrb[39].mxu1 }
 0x657   :  { %v6182_v59 = vadd.f32 %v6181_v39, %v6180_v16  ;;  %4464 = vst.msk [vmem:[#allocation4 + $0x1a0] sm:$0xff] %vm1110_vm5, %v4395_v40  ;;  %v5673_v2 = vld [vmem:[#allocation4 + $0x190] sm:$0xff] }
 0x658   :  { %4720 = vst.msk [vmem:[#allocation4 + $0x1a0] sm:$0xff] %vm1367_vm6, %v4651_v38  ;;  %6088 = vmatmul.mubr.bf16.gmra.mrb[100].mxu1 %v5673_v2 }
 0x659   :  { %7020 = vmatprep.mubr.msk.bf16.mxu1 %vm91_vm0, %v5676_v51  ;;  %v5164_v27 = vpop.permute.xlu1 %5163 }
 0x65a   :  { %v4907_v44 = vpop.permute.xlu0 %4906 }
 0x65b   :  { %4976 = vst.msk [vmem:[#allocation4 + $0x1a0] sm:$0xff] %vm1624_vm7, %v4907_v44 }
 0x65c   :  { %5233 = vst.msk [vmem:[#allocation4 + $0x1a0] sm:$0xff] %vm1882_vm8, %v5164_v27 }
 0x65d   :  { %v3885_v36 = vpop.permute.xlu1 %3884 }
 0x65e   :  { %v5420_v23 = vpop.permute.xlu0 %5419  ;;  %3953 = vst.msk [vmem:[#allocation4 + $0x1b0] sm:$0xff] %vm596_vm3, %v3885_v36 }
 0x65f   :  { %5489 = vst.msk [vmem:[#allocation4 + $0x1a0] sm:$0xff] %vm2139_vm9, %v5420_v23 }
 0x661   :  { %v4397_v5 = vpop.permute.xlu1 %4396 }
 0x662   :  { %v4141_v0 = vpop.permute.xlu0 %4140  ;;  %v10683_v34 = vpop.f32.mrb[40].mxu1 }
 0x663   :  { %4209 = vst.msk [vmem:[#allocation4 + $0x1b0] sm:$0xff] %vm853_vm4, %v4141_v0  ;;  %v6183_v49 = vsel %vm91_vm0, %v10683_v34, 0.0  ;;  %v5971_v1 = vpop.f32.mrb[41].mxu1 }
 0x664   :  { %4465 = vst.msk [vmem:[#allocation4 + $0x1b0] sm:$0xff] %vm1110_vm5, %v4397_v5  ;;  %v6184_v52 = vadd.f32 %v6183_v49, %v6182_v59  ;;  %v10689_v31 = vpop.f32.mrb[42].mxu1  ;;  %v5682_v1 = vld [vmem:[#allocation4 + $0x1d8] sm:$0xff] }
 0x665   :  { %v6185_v8 = vsel %vm91_vm0, %v10689_v31, 0.0  ;;  %v5974_v17 = vpop.f32.mrb[43].mxu1  ;;  %v4909_v21 = vpop.permute.xlu1 %4908 }
 0x666   :  { %v6186_v25 = vadd.f32 %v6185_v8, %v6184_v52  ;;  %v4653_v20 = vpop.permute.xlu0 %4652  ;;  %v5675_v60 = vld [vmem:[#allocation4 + $0x1a0] sm:$0xff] }
 0x667   :  { %4721 = vst.msk [vmem:[#allocation4 + $0x1b0] sm:$0xff] %vm1367_vm6, %v4653_v20  ;;  %6096 = vmatmul.mubr.bf16.gmra.mrb[104].mxu1 %v5675_v60 }
 0x668   :  { %4977 = vst.msk [vmem:[#allocation4 + $0x1b0] sm:$0xff] %vm1624_vm7, %v4909_v21  ;;  %7021 = vmatprep.mubr.msk.bf16.mxu1 %vm91_vm0, %v5678_v9 }
 0x669   :  { %v5422_v43 = vpop.permute.xlu1 %5421 }
 0x66a   :  { %v5166_v62 = vpop.permute.xlu0 %5165 }
 0x66b   :  { %5234 = vst.msk [vmem:[#allocation4 + $0x1b0] sm:$0xff] %vm1882_vm8, %v5166_v62 }
 0x66c   :  { %5490 = vst.msk [vmem:[#allocation4 + $0x1b0] sm:$0xff] %vm2139_vm9, %v5422_v43 }
 0x66d   :  { %v4143_v24 = vpop.permute.xlu1 %4142 }
 0x66e   :  { %v3887_v6 = vpop.permute.xlu0 %3886 }
 0x66f   :  { %3954 = vst.msk [vmem:[#allocation4 + $0x1c0] sm:$0xff] %vm596_vm3, %v3887_v6  ;;  %v10699_v47 = vpop.f32.mrb[44].mxu1 }
 0x670   :  { %4210 = vst.msk [vmem:[#allocation4 + $0x1c0] sm:$0xff] %vm853_vm4, %v4143_v24  ;;  %v6187_v26 = vsel %vm91_vm0, %v10699_v47, 0.0  ;;  %v5979_v4 = vpop.f32.mrb[45].mxu1 }
 0x671   :  { %v6188_v57 = vadd.f32 %v6187_v26, %v6186_v25  ;;  %v10704_v50 = vpop.f32.mrb[46].mxu1  ;;  %v4655_v58 = vpop.permute.xlu1 %4654 }
 0x672   :  { %v6189_v45 = vsel %vm91_vm0, %v10704_v50, 0.0  ;;  %v4399_v28 = vpop.permute.xlu0 %4398  ;;  %v5982_v41 = vpop.f32.mrb[47].mxu1 }
 0x673   :  { %v6190_v48 = vadd.f32 %v6189_v45, %v6188_v57  ;;  %4466 = vst.msk [vmem:[#allocation4 + $0x1c0] sm:$0xff] %vm1110_vm5, %v4399_v28  ;;  %v5677_v13 = vld [vmem:[#allocation4 + $0x1b0] sm:$0xff]  ;;  %v5684_v45 = vld [vmem:[#allocation4 + $0x1e8] sm:$0xff] }
 0x674   :  { %4722 = vst.msk [vmem:[#allocation4 + $0x1c0] sm:$0xff] %vm1367_vm6, %v4655_v58  ;;  %6104 = vmatmul.mubr.bf16.gmra.mrb[108].mxu1 %v5677_v13 }
 0x675   :  { %7022 = vmatprep.mubr.msk.bf16.mxu1 %vm91_vm0, %v5680_v35  ;;  %v5168_v10 = vpop.permute.xlu1 %5167 }
 0x676   :  { %v4911_v46 = vpop.permute.xlu0 %4910 }
 0x677   :  { %4978 = vst.msk [vmem:[#allocation4 + $0x1c0] sm:$0xff] %vm1624_vm7, %v4911_v46 }
 0x678   :  { %5235 = vst.msk [vmem:[#allocation4 + $0x1c0] sm:$0xff] %vm1882_vm8, %v5168_v10 }
 0x679   :  { %v3889_v39 = vpop.permute.xlu1 %3888 }
 0x67a   :  { %v5424_v16 = vpop.permute.xlu0 %5423  ;;  %3955 = vst.msk [vmem:[#allocation4 + $0x1d0] sm:$0xff] %vm596_vm3, %v3889_v39 }
 0x67b   :  { %5491 = vst.msk [vmem:[#allocation4 + $0x1c0] sm:$0xff] %vm2139_vm9, %v5424_v16 }
 0x67d   :  { %v4401_v59 = vpop.permute.xlu1 %4400 }
 0x67e   :  { %v4145_v40 = vpop.permute.xlu0 %4144  ;;  %v10715_v29 = vpop.f32.mrb[48].mxu1 }
 0x67f   :  { %4211 = vst.msk [vmem:[#allocation4 + $0x1d0] sm:$0xff] %vm853_vm4, %v4145_v40  ;;  %v6191_v38 = vsel %vm91_vm0, %v10715_v29, 0.0  ;;  %v5987_v2 = vpop.f32.mrb[49].mxu1 }
 0x680   :  { %4467 = vst.msk [vmem:[#allocation4 + $0x1d0] sm:$0xff] %vm1110_vm5, %v4401_v59  ;;  %v6192_v51 = vadd.f32 %v6191_v38, %v6190_v48  ;;  %v10721_v44 = vpop.f32.mrb[50].mxu1  ;;  %v5686_v2 = vld [vmem:[#allocation4 + $0x1f8] sm:$0xff] }
 0x681   :  { %v6193_v27 = vsel %vm91_vm0, %v10721_v44, 0.0  ;;  %v5990_v23 = vpop.f32.mrb[51].mxu1  ;;  %v4913_v49 = vpop.permute.xlu1 %4912 }
 0x682   :  { %v6194_v36 = vadd.f32 %v6193_v27, %v6192_v51  ;;  %v4657_v0 = vpop.permute.xlu0 %4656  ;;  %v5679_v5 = vld [vmem:[#allocation4 + $0x1c0] sm:$0xff] }
 0x683   :  { %4723 = vst.msk [vmem:[#allocation4 + $0x1d0] sm:$0xff] %vm1367_vm6, %v4657_v0  ;;  %6112 = vmatmul.mubr.bf16.gmra.mrb[112].mxu1 %v5679_v5 }
 0x684   :  { %4979 = vst.msk [vmem:[#allocation4 + $0x1d0] sm:$0xff] %vm1624_vm7, %v4913_v49  ;;  %7023 = vmatprep.mubr.msk.bf16.mxu1 %vm91_vm0, %v5682_v1 }
 0x685   :  { %v5426_v8 = vpop.permute.xlu1 %5425 }
 0x686   :  { %v5170_v52 = vpop.permute.xlu0 %5169 }
 0x687   :  { %5236 = vst.msk [vmem:[#allocation4 + $0x1d0] sm:$0xff] %vm1882_vm8, %v5170_v52 }
 0x688   :  { %5492 = vst.msk [vmem:[#allocation4 + $0x1d0] sm:$0xff] %vm2139_vm9, %v5426_v8 }
 0x689   :  { %v4147_v25 = vpop.permute.xlu1 %4146 }
 0x68a   :  { %v3891_v17 = vpop.permute.xlu0 %3890 }
 0x68b   :  { %3956 = vst.msk [vmem:[#allocation4 + $0x1e0] sm:$0xff] %vm596_vm3, %v3891_v17  ;;  %v10731_v20 = vpop.f32.mrb[52].mxu1 }
 0x68c   :  { %4212 = vst.msk [vmem:[#allocation4 + $0x1e0] sm:$0xff] %vm853_vm4, %v4147_v25  ;;  %v6195_v60 = vsel %vm91_vm0, %v10731_v20, 0.0  ;;  %v5995_v21 = vpop.f32.mrb[53].mxu1 }
 0x68d   :  { %v6196_v9 = vadd.f32 %v6195_v60, %v6194_v36  ;;  %v10736_v62 = vpop.f32.mrb[54].mxu1  ;;  %v4659_v4 = vpop.permute.xlu1 %4658 }
 0x68e   :  { %v6197_v43 = vsel %vm91_vm0, %v10736_v62, 0.0  ;;  %v4403_v6 = vpop.permute.xlu0 %4402  ;;  %v5998_v24 = vpop.f32.mrb[55].mxu1 }
 0x68f   :  { %v6198_v26 = vadd.f32 %v6197_v43, %v6196_v9  ;;  %4468 = vst.msk [vmem:[#allocation4 + $0x1e0] sm:$0xff] %vm1110_vm5, %v4403_v6  ;;  %v5681_v57 = vld [vmem:[#allocation4 + $0x1d0] sm:$0xff] }
 0x690   :  { %4724 = vst.msk [vmem:[#allocation4 + $0x1e0] sm:$0xff] %vm1367_vm6, %v4659_v4  ;;  %6120 = vmatmul.mubr.bf16.gmra.mrb[116].mxu1 %v5681_v57 }
 0x691   :  { %7024 = vmatprep.mubr.msk.bf16.mxu1 %vm91_vm0, %v5684_v45  ;;  %v5172_v41 = vpop.permute.xlu1 %5171 }
 0x692   :  { %v4915_v28 = vpop.permute.xlu0 %4914 }
 0x693   :  { %4980 = vst.msk [vmem:[#allocation4 + $0x1e0] sm:$0xff] %vm1624_vm7, %v4915_v28 }
 0x694   :  { %5237 = vst.msk [vmem:[#allocation4 + $0x1e0] sm:$0xff] %vm1882_vm8, %v5172_v41 }
 0x695   :  { %v3893_v58 = vpop.permute.xlu1 %3892 }
 0x696   :  { %v5428_v48 = vpop.permute.xlu0 %5427  ;;  %3957 = vst.msk [vmem:[#allocation4 + $0x1f0] sm:$0xff] %vm596_vm3, %v3893_v58 }
 0x697   :  { %5493 = vst.msk [vmem:[#allocation4 + $0x1e0] sm:$0xff] %vm2139_vm9, %v5428_v48 }
 0x699   :  { %v4405_v46 = vpop.permute.xlu1 %4404 }
 0x69a   :  { %v4149_v13 = vpop.permute.xlu0 %4148  ;;  %v10747_v35 = vpop.f32.mrb[56].mxu1 }
 0x69b   :  { %4213 = vst.msk [vmem:[#allocation4 + $0x1f0] sm:$0xff] %vm853_vm4, %v4149_v13  ;;  %v6199_v10 = vsel %vm91_vm0, %v10747_v35, 0.0  ;;  %v6003_v16 = vpop.f32.mrb[57].mxu1 }
 0x69c   :  { %4469 = vst.msk [vmem:[#allocation4 + $0x1f0] sm:$0xff] %vm1110_vm5, %v4405_v46  ;;  %v6200_v39 = vadd.f32 %v6199_v10, %v6198_v26  ;;  %v10753_v40 = vpop.f32.mrb[58].mxu1 }
 0x69d   :  { %v6201_v59 = vsel %vm91_vm0, %v10753_v40, 0.0  ;;  %v6006_v38 = vpop.f32.mrb[59].mxu1  ;;  %v4917_v36 = vpop.permute.xlu1 %4916 }
 0x69e   :  { %v6202_v51 = vadd.f32 %v6201_v59, %v6200_v39  ;;  %v4661_v27 = vpop.permute.xlu0 %4660  ;;  %v5683_v23 = vld [vmem:[#allocation4 + $0x1e0] sm:$0xff] }
 0x69f   :  { %4725 = vst.msk [vmem:[#allocation4 + $0x1f0] sm:$0xff] %vm1367_vm6, %v4661_v27  ;;  %6128 = vmatmul.mubr.bf16.gmra.mrb[120].mxu1 %v5683_v23 }
 0x6a0   :  { %4981 = vst.msk [vmem:[#allocation4 + $0x1f0] sm:$0xff] %vm1624_vm7, %v4917_v36  ;;  %7025 = vmatprep.mubr.msk.bf16.mxu1 %vm91_vm0, %v5686_v2 }
 0x6a1   :  { %v5430_v5 = vpop.permute.xlu1 %5429 }
 0x6a2   :  { %v5174_v0 = vpop.permute.xlu0 %5173 }
 0x6a3   :  { %5238 = vst.msk [vmem:[#allocation4 + $0x1f0] sm:$0xff] %vm1882_vm8, %v5174_v0 }
 0x6a4   :  { %5494 = vst.msk [vmem:[#allocation4 + $0x1f0] sm:$0xff] %vm2139_vm9, %v5430_v5 }
 0x6a5   :  { %v10762_v49 = vpop.f32.mrb[60].mxu1 }
 0x6a6   :  { %v6203_v1 = vsel %vm91_vm0, %v10762_v49, 0.0  ;;  %v6011_v52 = vpop.f32.mrb[61].mxu1 }
 0x6a7   :  { %v6204_v8 = vadd.f32 %v6203_v1, %v6202_v51  ;;  %v10766_v17 = vpop.f32.mrb[62].mxu1 }
 0x6a8   :  { %v6205_v25 = vsel %vm91_vm0, %v10766_v17, 0.0  ;;  %v6014_v60 = vpop.f32.mrb[63].mxu1 }
 0x6a9   :  { %v6206_v21 = vadd.f32 %v6205_v25, %v6204_v8 }
 0x6ab   :  { %v5685_v9 = vld [vmem:[#allocation4 + $0x1f0] sm:$0xff] }
 0x6ac   :  { %6136 = vmatmul.mubr.bf16.gmra.mrb[124].mxu1 %v5685_v9 }
 0x6ae   :  { %v10770_v43 = vpop.f32.mrb[64].mxu1 }
 0x6af   :  { %v6207_v6 = vsel %vm91_vm0, %v10770_v43, 0.0  ;;  %v6019_v24 = vpop.f32.mrb[65].mxu1 }
 0x6b0   :  { %v6208_v26 = vadd.f32 %v6207_v6, %v6206_v21  ;;  %v10774_v4 = vpop.f32.mrb[66].mxu1 }
 0x6b1   :  { %v6209_v57 = vsel %vm91_vm0, %v10774_v4, 0.0  ;;  %v6022_v45 = vpop.f32.mrb[67].mxu1 }
 0x6b2   :  { %v6210_v28 = vadd.f32 %v6209_v57, %v6208_v26 }
 0x6bb   :  { %v10778_v41 = vpop.f32.mrb[68].mxu1 }
 0x6bc   :  { %v6211_v48 = vsel %vm91_vm0, %v10778_v41, 0.0  ;;  %v6027_v58 = vpop.f32.mrb[69].mxu1 }
 0x6bd   :  { %v6212_v13 = vadd.f32 %v6211_v48, %v6210_v28  ;;  %v10782_v46 = vpop.f32.mrb[70].mxu1 }
 0x6be   :  { %v6213_v10 = vsel %vm91_vm0, %v10782_v46, 0.0  ;;  %v6030_v16 = vpop.f32.mrb[71].mxu1 }
 0x6bf   :  { %v6214_v39 = vadd.f32 %v6213_v10, %v6212_v13 }
 0x6ca   :  { %v10786_v59 = vpop.f32.mrb[72].mxu1 }
 0x6cb   :  { %v6215_v38 = vsel %vm91_vm0, %v10786_v59, 0.0  ;;  %v6035_v2 = vpop.f32.mrb[73].mxu1 }
 0x6cc   :  { %v6216_v51 = vadd.f32 %v6215_v38, %v6214_v39  ;;  %v10790_v27 = vpop.f32.mrb[74].mxu1 }
 0x6cd   :  { %v6217_v23 = vsel %vm91_vm0, %v10790_v27, 0.0  ;;  %v6038_v36 = vpop.f32.mrb[75].mxu1 }
 0x6ce   :  { %v6218_v0 = vadd.f32 %v6217_v23, %v6216_v51 }
 0x6d7   :  { %v10794_v5 = vpop.f32.mrb[76].mxu1 }
 0x6d8   :  { %v6219_v1 = vsel %vm91_vm0, %v10794_v5, 0.0  ;;  %v6043_v52 = vpop.f32.mrb[77].mxu1 }
 0x6d9   :  { %v6220_v8 = vadd.f32 %v6219_v1, %v6218_v0  ;;  %v10798_v25 = vpop.f32.mrb[78].mxu1 }
 0x6da   :  { %v6221_v60 = vsel %vm91_vm0, %v10798_v25, 0.0  ;;  %v6046_v21 = vpop.f32.mrb[79].mxu1 }
 0x6db   :  { %v6222_v9 = vadd.f32 %v6221_v60, %v6220_v8 }
 0x6e6   :  { %v10802_v6 = vpop.f32.mrb[80].mxu1 }
 0x6e7   :  { %v6223_v24 = vsel %vm91_vm0, %v10802_v6, 0.0  ;;  %v6051_v26 = vpop.f32.mrb[81].mxu1 }
 0x6e8   :  { %v6224_v57 = vadd.f32 %v6223_v24, %v6222_v9  ;;  %v10806_v45 = vpop.f32.mrb[82].mxu1 }
 0x6e9   :  { %v6225_v28 = vsel %vm91_vm0, %v10806_v45, 0.0  ;;  %v6054_v48 = vpop.f32.mrb[83].mxu1 }
 0x6ea   :  { %v6226_v58 = vadd.f32 %v6225_v28, %v6224_v57 }
 0x6f3   :  { %v10810_v13 = vpop.f32.mrb[84].mxu1 }
 0x6f4   :  { %v6227_v10 = vsel %vm91_vm0, %v10810_v13, 0.0  ;;  %v6059_v16 = vpop.f32.mrb[85].mxu1 }
 0x6f5   :  { %v6228_v39 = vadd.f32 %v6227_v10, %v6226_v58  ;;  %v10814_v38 = vpop.f32.mrb[86].mxu1 }
 0x6f6   :  { %v6229_v2 = vsel %vm91_vm0, %v10814_v38, 0.0  ;;  %v6062_v51 = vpop.f32.mrb[87].mxu1 }
 0x6f7   :  { %v6230_v23 = vadd.f32 %v6229_v2, %v6228_v39 }
 0x702   :  { %v10818_v36 = vpop.f32.mrb[88].mxu1 }
 0x703   :  { %v6231_v0 = vsel %vm91_vm0, %v10818_v36, 0.0  ;;  %v6067_v1 = vpop.f32.mrb[89].mxu1 }
 0x704   :  { %v6232_v52 = vadd.f32 %v6231_v0, %v6230_v23  ;;  %v10822_v8 = vpop.f32.mrb[90].mxu1 }
 0x705   :  { %v6233_v60 = vsel %vm91_vm0, %v10822_v8, 0.0  ;;  %v6070_v21 = vpop.f32.mrb[91].mxu1 }
 0x706   :  { %v6234_v9 = vadd.f32 %v6233_v60, %v6232_v52 }
 0x70f   :  { %v10826_v24 = vpop.f32.mrb[92].mxu1 }
 0x710   :  { %v6235_v26 = vsel %vm91_vm0, %v10826_v24, 0.0  ;;  %v6075_v57 = vpop.f32.mrb[93].mxu1 }
 0x711   :  { %v6236_v28 = vadd.f32 %v6235_v26, %v6234_v9  ;;  %v10830_v48 = vpop.f32.mrb[94].mxu1 }
 0x712   :  { %v6237_v58 = vsel %vm91_vm0, %v10830_v48, 0.0  ;;  %v6078_v10 = vpop.f32.mrb[95].mxu1 }
 0x713   :  { %v6238_v16 = vadd.f32 %v6237_v58, %v6236_v28 }
 0x71e   :  { %v10834_v39 = vpop.f32.mrb[96].mxu1 }
 0x71f   :  { %12775 = vst [vmem:[#allocation12_spill] sm:$0xff] %v10834_v39  ;;  %v6239_v2 = vsel %vm91_vm0, %v10834_v39, 0.0  ;;  %v6083_v51 = vpop.f32.mrb[97].mxu1 }
 0x720   :  { %v6240_v23 = vadd.f32 %v6239_v2, %v6238_v16  ;;  %v10838_v0 = vpop.f32.mrb[98].mxu1 }
 0x721   :  { %12776 = vst [vmem:[#allocation13_spill] sm:$0xff] %v10838_v0  ;;  %v6241_v1 = vsel %vm91_vm0, %v10838_v0, 0.0  ;;  %v6086_v52 = vpop.f32.mrb[99].mxu1 }
 0x722   :  { %v6242_v60 = vadd.f32 %v6241_v1, %v6240_v23 }
 0x72b   :  { %v10842_v21 = vpop.f32.mrb[100].mxu1 }
 0x72c   :  { %12777 = vst [vmem:[#allocation14_spill] sm:$0xff] %v10842_v21  ;;  %v6243_v9 = vsel %vm91_vm0, %v10842_v21, 0.0  ;;  %v6091_v26 = vpop.f32.mrb[101].mxu1 }
 0x72d   :  { %v6244_v57 = vadd.f32 %v6243_v9, %v6242_v60  ;;  %v10846_v28 = vpop.f32.mrb[102].mxu1 }
 0x72e   :  { %12778 = vst [vmem:[#allocation15_spill] sm:$0xff] %v10846_v28  ;;  %v6245_v58 = vsel %vm91_vm0, %v10846_v28, 0.0  ;;  %v6094_v10 = vpop.f32.mrb[103].mxu1 }
 0x72f   :  { %v6246_v16 = vadd.f32 %v6245_v58, %v6244_v57 }
 0x73a   :  { %v10850_v2 = vpop.f32.mrb[104].mxu1 }
 0x73b   :  { %12779 = vst [vmem:[#allocation16_spill] sm:$0xff] %v10850_v2  ;;  %v6247_v51 = vsel %vm91_vm0, %v10850_v2, 0.0  ;;  %v6099_v23 = vpop.f32.mrb[105].mxu1 }
 0x73c   :  { %v6248_v1 = vadd.f32 %v6247_v51, %v6246_v16  ;;  %v10854_v52 = vpop.f32.mrb[106].mxu1 }
 0x73d   :  { %12780 = vst [vmem:[#allocation17_spill] sm:$0xff] %v10854_v52  ;;  %v6249_v26 = vsel %vm91_vm0, %v10854_v52, 0.0  ;;  %v6102_v60 = vpop.f32.mrb[107].mxu1 }
 0x73e   :  { %v6250_v9 = vadd.f32 %v6249_v26, %v6248_v1 }
 0x747   :  { %v10858_v21 = vpop.f32.mrb[108].mxu1 }
 0x748   :  { %12781 = vst [vmem:[#allocation19_spill] sm:$0xff] %v10858_v21  ;;  %v6251_v10 = vsel %vm91_vm0, %v10858_v21, 0.0  ;;  %v6107_v57 = vpop.f32.mrb[109].mxu1 }
 0x749   :  { %v6252_v58 = vadd.f32 %v6251_v10, %v6250_v9  ;;  %v10862_v28 = vpop.f32.mrb[110].mxu1 }
 0x74a   :  { %12782 = vst [vmem:[#allocation20_spill] sm:$0xff] %v10862_v28  ;;  %v6253_v23 = vsel %vm91_vm0, %v10862_v28, 0.0  ;;  %v6110_v16 = vpop.f32.mrb[111].mxu1 }
 0x74b   :  { %v6254_v51 = vadd.f32 %v6253_v23, %v6252_v58 }
 0x756   :  { %v10866_v2 = vpop.f32.mrb[112].mxu1 }
 0x757   :  { %12783 = vst [vmem:[#allocation21_spill] sm:$0xff] %v10866_v2  ;;  %v6255_v60 = vsel %vm91_vm0, %v10866_v2, 0.0  ;;  %v6115_v1 = vpop.f32.mrb[113].mxu1 }
 0x758   :  { %v6256_v26 = vadd.f32 %v6255_v60, %v6254_v51  ;;  %v10870_v52 = vpop.f32.mrb[114].mxu1 }
 0x759   :  { %12784 = vst [vmem:[#allocation22_spill] sm:$0xff] %v10870_v52  ;;  %v6257_v57 = vsel %vm91_vm0, %v10870_v52, 0.0  ;;  %v6118_v9 = vpop.f32.mrb[115].mxu1 }
 0x75a   :  { %v6258_v10 = vadd.f32 %v6257_v57, %v6256_v26 }
 0x763   :  { %v10874_v21 = vpop.f32.mrb[116].mxu1 }
 0x764   :  { %12785 = vst [vmem:[#allocation23_spill] sm:$0xff] %v10874_v21  ;;  %v6259_v16 = vsel %vm91_vm0, %v10874_v21, 0.0  ;;  %v6123_v58 = vpop.f32.mrb[117].mxu1 }
 0x765   :  { %v6260_v23 = vadd.f32 %v6259_v16, %v6258_v10  ;;  %v10878_v28 = vpop.f32.mrb[118].mxu1 }
 0x766   :  { %12786 = vst [vmem:[#allocation24_spill] sm:$0xff] %v10878_v28  ;;  %v6261_v1 = vsel %vm91_vm0, %v10878_v28, 0.0  ;;  %v6126_v51 = vpop.f32.mrb[119].mxu1 }
 0x767   :  { %v6262_v60 = vadd.f32 %v6261_v1, %v6260_v23 }
 0x772   :  { %v10882_v2 = vpop.f32.mrb[120].mxu1 }
 0x773   :  { %12787 = vst [vmem:[#allocation25_spill] sm:$0xff] %v10882_v2  ;;  %v6263_v9 = vsel %vm91_vm0, %v10882_v2, 0.0  ;;  %v6131_v26 = vpop.f32.mrb[121].mxu1 }
 0x774   :  { %v6264_v57 = vadd.f32 %v6263_v9, %v6262_v60  ;;  %v10886_v52 = vpop.f32.mrb[122].mxu1 }
 0x775   :  { %12788 = vst [vmem:[#allocation26_spill] sm:$0xff] %v10886_v52  ;;  %v6265_v58 = vsel %vm91_vm0, %v10886_v52, 0.0  ;;  %v6134_v10 = vpop.f32.mrb[123].mxu1 }
 0x776   :  { %v6266_v16 = vadd.f32 %v6265_v58, %v6264_v57 }
 0x77f   :  { %v10890_v21 = vpop.f32.mrb[124].mxu1 }
 0x780   :  { %12789 = vst [vmem:[#allocation5_spill] sm:$0xff] %v10890_v21  ;;  %v6267_v51 = vsel %vm91_vm0, %v10890_v21, 0.0  ;;  %v6139_v23 = vpop.f32.mrb[125].mxu1 }
 0x781   :  { %v6268_v1 = vadd.f32 %v6267_v51, %v6266_v16  ;;  %v10894_v28 = vpop.f32.mrb[126].mxu1  ;;  %v12798_v23 = vld [vmem:[#allocation14_spill] sm:$0xff] }
 0x782   :  { %v6269_v26 = vsel %vm91_vm0, %v10894_v28, 0.0  ;;  %v6142_v60 = vpop.f32.mrb[127].mxu1 }
 0x783   :  { %v6270_v9 = vadd.f32 %v6269_v26, %v6268_v1  ;;  %v12800_v1 = vld [vmem:[#allocation15_spill] sm:$0xff]  ;;  %v12802_v26 = vld [vmem:[#allocation16_spill] sm:$0xff]  ;;  %v12804_v60 = vld [vmem:[#allocation17_spill] sm:$0xff] }
 0x785   :  { %v6271_v2 = vrot.slane %v6270_v9, 4 }
 0x787   :  { %v6272_v0 = vadd.f32 %v6271_v2, %v6270_v9 }
 0x789   :  { %v6273_v39 = vrot.slane %v6272_v0, 2 }
 0x78b   :  { %v6274_v52 = vadd.f32 %v6273_v39, %v6272_v0  ;;  %v12794_v0 = vld [vmem:[#allocation12_spill] sm:$0xff] }
 0x78d   :  { %v6275_v10 = vrot.slane %v6274_v52, 1 }
 0x78f   :  { %v6276_v57 = vadd.f32 %v6275_v10, %v6274_v52  ;;  %v12796_v52 = vld [vmem:[#allocation13_spill] sm:$0xff]  ;;  %v12806_v10 = vld [vmem:[#allocation19_spill] sm:$0xff] }
 0x791   :  { %v10898_v58 = vmul.f32 0.001953125, %v6276_v57 }
 0x793   :  { %v10902_v21 = vsub.f32 %v10467_v53, %v10898_v58  ;;  %v10906_v16 = vsub.f32 %v10471_v32, %v10898_v58  ;;  %v10910_v51 = vsub.f32 %v10490_v30, %v10898_v58  ;;  %v10914_v2 = vsub.f32 %v10498_v22, %v10898_v58 }
 0x794   :  { %v10918_v39 = vsub.f32 %v10517_v11, %v10898_v58  ;;  %v10922_v53 = vsub.f32 %v10524_v63, %v10898_v58  ;;  %v10926_v32 = vsub.f32 %v10540_v18, %v10898_v58  ;;  %v10930_v30 = vsub.f32 %v10548_v3, %v10898_v58 }
 0x795   :  { %12790 = vst [vmem:[#allocation6_spill] sm:$0xff] %v10902_v21  ;;  %12791 = vst [vmem:[#allocation7_spill] sm:$0xff] %v10906_v16  ;;  %v10934_v22 = vsub.f32 %v10567_v61, %v10898_v58  ;;  %v10938_v11 = vsub.f32 %v10574_v55, %v10898_v58  ;;  %v10942_v63 = vsub.f32 %v10590_v7, %v10898_v58 }
 0x796   :  { %12792 = vst [vmem:[#allocation8_spill] sm:$0xff] %v10910_v51  ;;  %12793 = vst [vmem:[#allocation9_spill] sm:$0xff] %v10914_v2  ;;  %v10946_v18 = vsub.f32 %v10598_v37, %v10898_v58  ;;  %v10950_v3 = vsub.f32 %v10615_v15, %v10898_v58  ;;  %v10954_v61 = vsub.f32 %v10622_v54, %v10898_v58 }
 0x797   :  { %v10958_v55 = vsub.f32 %v10635_v14, %v10898_v58  ;;  %v10962_v7 = vsub.f32 %v10640_v33, %v10898_v58  ;;  %v10966_v37 = vsub.f32 %v10651_v12, %v10898_v58  ;;  %v10970_v15 = vsub.f32 %v10657_v19, %v10898_v58 }
 0x798   :  { %v10974_v54 = vsub.f32 %v10667_v56, %v10898_v58  ;;  %v10978_v14 = vsub.f32 %v10672_v42, %v10898_v58  ;;  %v10982_v33 = vsub.f32 %v10683_v34, %v10898_v58  ;;  %v10986_v12 = vsub.f32 %v10689_v31, %v10898_v58 }
 0x799   :  { %v10990_v19 = vsub.f32 %v10699_v47, %v10898_v58  ;;  %v10994_v56 = vsub.f32 %v10704_v50, %v10898_v58  ;;  %v10998_v42 = vsub.f32 %v10715_v29, %v10898_v58  ;;  %v11002_v34 = vsub.f32 %v10721_v44, %v10898_v58 }
 0x79a   :  { %v11006_v31 = vsub.f32 %v10731_v20, %v10898_v58  ;;  %v11010_v47 = vsub.f32 %v10736_v62, %v10898_v58  ;;  %v11014_v50 = vsub.f32 %v10747_v35, %v10898_v58  ;;  %v11018_v29 = vsub.f32 %v10753_v40, %v10898_v58 }
 0x79b   :  { %v11022_v44 = vsub.f32 %v10762_v49, %v10898_v58  ;;  %v11026_v20 = vsub.f32 %v10766_v17, %v10898_v58  ;;  %v11030_v62 = vsub.f32 %v10770_v43, %v10898_v58  ;;  %v11034_v35 = vsub.f32 %v10774_v4, %v10898_v58 }
 0x79c   :  { %v11038_v40 = vsub.f32 %v10778_v41, %v10898_v58  ;;  %v11042_v49 = vsub.f32 %v10782_v46, %v10898_v58  ;;  %v11046_v17 = vsub.f32 %v10786_v59, %v10898_v58  ;;  %v11050_v43 = vsub.f32 %v10790_v27, %v10898_v58 }
 0x79d   :  { %v11054_v4 = vsub.f32 %v10794_v5, %v10898_v58  ;;  %v11058_v41 = vsub.f32 %v10798_v25, %v10898_v58  ;;  %v11062_v46 = vsub.f32 %v10802_v6, %v10898_v58  ;;  %v11066_v59 = vsub.f32 %v10806_v45, %v10898_v58 }
 0x79e   :  { %v11070_v27 = vsub.f32 %v10810_v13, %v10898_v58  ;;  %v11074_v5 = vsub.f32 %v10814_v38, %v10898_v58  ;;  %v11078_v25 = vsub.f32 %v10818_v36, %v10898_v58  ;;  %v11082_v6 = vsub.f32 %v10822_v8, %v10898_v58 }
 0x79f   :  { %v11086_v45 = vsub.f32 %v10826_v24, %v10898_v58  ;;  %v11090_v13 = vsub.f32 %v10830_v48, %v10898_v58  ;;  %v11094_v38 = vsub.f32 %v12794_v0, %v10898_v58  ;;  %v11098_v36 = vsub.f32 %v12796_v52, %v10898_v58  ;;  %v12808_v0 = vld [vmem:[#allocation20_spill] sm:$0xff] }
 0x7a0   :  { %v11102_v8 = vsub.f32 %v12798_v23, %v10898_v58  ;;  %v11106_v24 = vsub.f32 %v12800_v1, %v10898_v58  ;;  %v11110_v48 = vsub.f32 %v12802_v26, %v10898_v58  ;;  %v11114_v9 = vsub.f32 %v12804_v60, %v10898_v58  ;;  %v12810_v23 = vld [vmem:[#allocation21_spill] sm:$0xff] }
 0x7a1   :  { %12795 = vst [vmem:[#allocation10_spill] sm:$0xff] %v11094_v38  ;;  %12797 = vst [vmem:[#allocation11_spill] sm:$0xff] %v11098_v36  ;;  %v11118_v57 = vsub.f32 %v12806_v10, %v10898_v58  ;;  %v11122_v52 = vsub.f32 %v12808_v0, %v10898_v58  ;;  %v11126_v1 = vsub.f32 %v12810_v23, %v10898_v58 }
 0x7a2   :  { %12799 = vst [vmem:[#allocation12_spill] sm:$0xff] %v11102_v8  ;;  %12801 = vst [vmem:[#allocation13_spill] sm:$0xff] %v11106_v24  ;;  %v12812_v24 = vld [vmem:[#allocation22_spill] sm:$0xff] }
 0x7a3   :  { %12803 = vst [vmem:[#allocation14_spill] sm:$0xff] %v11110_v48  ;;  %12805 = vst [vmem:[#allocation15_spill] sm:$0xff] %v11114_v9  ;;  %v11130_v26 = vsub.f32 %v12812_v24, %v10898_v58  ;;  %v12814_v48 = vld [vmem:[#allocation23_spill] sm:$0xff]  ;;  %v12816_v9 = vld [vmem:[#allocation24_spill] sm:$0xff] }
 0x7a4   :  { %12807 = vst [vmem:[#allocation16_spill] sm:$0xff] %v11118_v57  ;;  %12809 = vst [vmem:[#allocation17_spill] sm:$0xff] %v11122_v52  ;;  %v11134_v60 = vsub.f32 %v12814_v48, %v10898_v58  ;;  %v11138_v10 = vsub.f32 %v12816_v9, %v10898_v58  ;;  %v12818_v57 = vld [vmem:[#allocation25_spill] sm:$0xff]  ;;  %v12820_v52 = vld [vmem:[#allocation26_spill] sm:$0xff]  ;;  %v11154_v48 = vsub.f32 %v10894_v28, %v10898_v58 }
 0x7a5   :  { %12811 = vst [vmem:[#allocation19_spill] sm:$0xff] %v11126_v1  ;;  %12813 = vst [vmem:[#allocation20_spill] sm:$0xff] %v11130_v26  ;;  %v11142_v0 = vsub.f32 %v12818_v57, %v10898_v58  ;;  %v11146_v23 = vsub.f32 %v12820_v52, %v10898_v58  ;;  %v12822_v1 = vld [vmem:[#allocation5_spill] sm:$0xff]  ;;  %v6342_v9 = vmul.f32 %v10902_v21, %v10902_v21 }
 0x7a6   :  { %12815 = vst [vmem:[#allocation21_spill] sm:$0xff] %v11134_v60  ;;  %12817 = vst [vmem:[#allocation22_spill] sm:$0xff] %v11138_v10  ;;  %v11150_v24 = vsub.f32 %v12822_v1, %v10898_v58  ;;  %v6343_v10 = vmul.f32 %v10906_v16, %v10906_v16  ;;  %v6344_v57 = vmul.f32 %v10910_v51, %v10910_v51 }
 0x7a7   :  { %12819 = vst [vmem:[#allocation23_spill] sm:$0xff] %v11142_v0  ;;  %12821 = vst [vmem:[#allocation24_spill] sm:$0xff] %v11146_v23  ;;  %v6345_v52 = vmul.f32 %v10914_v2, %v10914_v2  ;;  %v6406_v23 = vsel %vm91_vm0, %v6342_v9, 0.0  ;;  %v6346_v28 = vmul.f32 %v10918_v39, %v10918_v39  ;;  %v6347_v16 = vmul.f32 %v10922_v53, %v10922_v53 }
 0x7a8   :  { %12823 = vst [vmem:[#allocation25_spill] sm:$0xff] %v11150_v24  ;;  %12824 = vst [vmem:[#allocation26_spill] sm:$0xff] %v11154_v48  ;;  %v6407_v1 = vsel %vm91_vm0, %v6343_v10, 0.0  ;;  %v6409_v58 = vsel %vm91_vm0, %v6344_v57, 0.0  ;;  %v6348_v2 = vmul.f32 %v10926_v32, %v10926_v32  ;;  %v6349_v10 = vmul.f32 %v10930_v30, %v10930_v30 }
 0x7a9   :  { %v6408_v24 = vadd.f32 %v6407_v1, %v6406_v23  ;;  %v6411_v48 = vsel %vm91_vm0, %v6345_v52, 0.0  ;;  %v6413_v9 = vsel %vm91_vm0, %v6346_v28, 0.0  ;;  %v6415_v23 = vsel %vm91_vm0, %v6347_v16, 0.0 }
 0x7aa   :  { %v6417_v57 = vsel %vm91_vm0, %v6348_v2, 0.0  ;;  %v6353_v16 = vmul.f32 %v10946_v18, %v10946_v18  ;;  %v6354_v2 = vmul.f32 %v10950_v3, %v10950_v3 }
 0x7ab   :  { %v6410_v21 = vadd.f32 %v6409_v58, %v6408_v24  ;;  %v6350_v24 = vmul.f32 %v10934_v22, %v10934_v22 }
 0x7ad   :  { %v6412_v51 = vadd.f32 %v6411_v48, %v6410_v21  ;;  %v6351_v21 = vmul.f32 %v10938_v11, %v10938_v11  ;;  %v6419_v48 = vsel %vm91_vm0, %v6349_v10, 0.0  ;;  %v6421_v28 = vsel %vm91_vm0, %v6350_v24, 0.0 }
 0x7ae   :  { %v6355_v10 = vmul.f32 %v10954_v61, %v10954_v61  ;;  %v6356_v24 = vmul.f32 %v10958_v55, %v10958_v55 }
 0x7af   :  { %v6414_v0 = vadd.f32 %v6413_v9, %v6412_v51  ;;  %v6352_v51 = vmul.f32 %v10942_v63, %v10942_v63 }
 0x7b1   :  { %v6416_v1 = vadd.f32 %v6415_v23, %v6414_v0  ;;  %v6423_v0 = vsel %vm91_vm0, %v6351_v21, 0.0  ;;  %v6357_v21 = vmul.f32 %v10962_v7, %v10962_v7 }
 0x7b3   :  { %v6418_v58 = vadd.f32 %v6417_v57, %v6416_v1  ;;  %v6425_v1 = vsel %vm91_vm0, %v6352_v51, 0.0  ;;  %v6358_v51 = vmul.f32 %v10966_v37, %v10966_v37 }
 0x7b5   :  { %v6420_v52 = vadd.f32 %v6419_v48, %v6418_v58  ;;  %v6427_v58 = vsel %vm91_vm0, %v6353_v16, 0.0  ;;  %v6359_v16 = vmul.f32 %v10970_v15, %v10970_v15 }
 0x7b7   :  { %v6422_v9 = vadd.f32 %v6421_v28, %v6420_v52  ;;  %v6429_v52 = vsel %vm91_vm0, %v6354_v2, 0.0  ;;  %v6360_v2 = vmul.f32 %v10974_v54, %v10974_v54 }
 0x7b9   :  { %v6424_v23 = vadd.f32 %v6423_v0, %v6422_v9  ;;  %v6431_v9 = vsel %vm91_vm0, %v6355_v10, 0.0  ;;  %v6361_v10 = vmul.f32 %v10978_v14, %v10978_v14 }
 0x7bb   :  { %v6426_v57 = vadd.f32 %v6425_v1, %v6424_v23  ;;  %v6433_v23 = vsel %vm91_vm0, %v6356_v24, 0.0  ;;  %v6362_v24 = vmul.f32 %v10982_v33, %v10982_v33 }
 0x7bd   :  { %v6428_v48 = vadd.f32 %v6427_v58, %v6426_v57  ;;  %v6435_v57 = vsel %vm91_vm0, %v6357_v21, 0.0  ;;  %v6363_v21 = vmul.f32 %v10986_v12, %v10986_v12 }
 0x7bf   :  { %v6430_v28 = vadd.f32 %v6429_v52, %v6428_v48  ;;  %v6437_v48 = vsel %vm91_vm0, %v6358_v51, 0.0  ;;  %v6364_v51 = vmul.f32 %v10990_v19, %v10990_v19 }
 0x7c1   :  { %v6432_v0 = vadd.f32 %v6431_v9, %v6430_v28  ;;  %v6439_v28 = vsel %vm91_vm0, %v6359_v16, 0.0  ;;  %v6365_v16 = vmul.f32 %v10994_v56, %v10994_v56 }
 0x7c3   :  { %v6434_v1 = vadd.f32 %v6433_v23, %v6432_v0  ;;  %v6441_v0 = vsel %vm91_vm0, %v6360_v2, 0.0  ;;  %v6366_v2 = vmul.f32 %v10998_v42, %v10998_v42 }
 0x7c5   :  { %v6436_v58 = vadd.f32 %v6435_v57, %v6434_v1  ;;  %v6443_v1 = vsel %vm91_vm0, %v6361_v10, 0.0  ;;  %v6367_v10 = vmul.f32 %v11002_v34, %v11002_v34 }
 0x7c7   :  { %v6438_v52 = vadd.f32 %v6437_v48, %v6436_v58  ;;  %v6445_v58 = vsel %vm91_vm0, %v6362_v24, 0.0  ;;  %v6368_v24 = vmul.f32 %v11006_v31, %v11006_v31 }
 0x7c9   :  { %v6440_v9 = vadd.f32 %v6439_v28, %v6438_v52  ;;  %v6447_v52 = vsel %vm91_vm0, %v6363_v21, 0.0  ;;  %v6369_v21 = vmul.f32 %v11010_v47, %v11010_v47 }
 0x7cb   :  { %v6442_v23 = vadd.f32 %v6441_v0, %v6440_v9  ;;  %v6449_v9 = vsel %vm91_vm0, %v6364_v51, 0.0  ;;  %v6370_v51 = vmul.f32 %v11014_v50, %v11014_v50 }
 0x7cd   :  { %v6444_v57 = vadd.f32 %v6443_v1, %v6442_v23  ;;  %v6451_v23 = vsel %vm91_vm0, %v6365_v16, 0.0  ;;  %v6371_v16 = vmul.f32 %v11018_v29, %v11018_v29 }
 0x7cf   :  { %v6446_v48 = vadd.f32 %v6445_v58, %v6444_v57  ;;  %v6453_v57 = vsel %vm91_vm0, %v6366_v2, 0.0  ;;  %v6372_v2 = vmul.f32 %v11022_v44, %v11022_v44 }
 0x7d1   :  { %v6448_v28 = vadd.f32 %v6447_v52, %v6446_v48  ;;  %v6455_v48 = vsel %vm91_vm0, %v6367_v10, 0.0  ;;  %v6373_v10 = vmul.f32 %v11026_v20, %v11026_v20 }
 0x7d3   :  { %v6450_v0 = vadd.f32 %v6449_v9, %v6448_v28  ;;  %v6457_v28 = vsel %vm91_vm0, %v6368_v24, 0.0  ;;  %v6374_v24 = vmul.f32 %v11030_v62, %v11030_v62 }
 0x7d5   :  { %v6452_v1 = vadd.f32 %v6451_v23, %v6450_v0  ;;  %v6459_v0 = vsel %vm91_vm0, %v6369_v21, 0.0  ;;  %v6375_v21 = vmul.f32 %v11034_v35, %v11034_v35 }
 0x7d7   :  { %v6454_v58 = vadd.f32 %v6453_v57, %v6452_v1  ;;  %v6461_v1 = vsel %vm91_vm0, %v6370_v51, 0.0  ;;  %v6376_v51 = vmul.f32 %v11038_v40, %v11038_v40 }
 0x7d9   :  { %v6456_v52 = vadd.f32 %v6455_v48, %v6454_v58  ;;  %v6463_v58 = vsel %vm91_vm0, %v6371_v16, 0.0  ;;  %v6377_v16 = vmul.f32 %v11042_v49, %v11042_v49 }
 0x7db   :  { %v6458_v9 = vadd.f32 %v6457_v28, %v6456_v52  ;;  %v6465_v52 = vsel %vm91_vm0, %v6372_v2, 0.0  ;;  %v6378_v2 = vmul.f32 %v11046_v17, %v11046_v17 }
 0x7dd   :  { %v6460_v23 = vadd.f32 %v6459_v0, %v6458_v9  ;;  %v6467_v9 = vsel %vm91_vm0, %v6373_v10, 0.0  ;;  %v6379_v10 = vmul.f32 %v11050_v43, %v11050_v43 }
 0x7df   :  { %v6462_v57 = vadd.f32 %v6461_v1, %v6460_v23  ;;  %v6469_v23 = vsel %vm91_vm0, %v6374_v24, 0.0  ;;  %v6380_v24 = vmul.f32 %v11054_v4, %v11054_v4 }
 0x7e1   :  { %v6464_v48 = vadd.f32 %v6463_v58, %v6462_v57  ;;  %v6471_v57 = vsel %vm91_vm0, %v6375_v21, 0.0  ;;  %v6381_v21 = vmul.f32 %v11058_v41, %v11058_v41 }
 0x7e3   :  { %v6466_v28 = vadd.f32 %v6465_v52, %v6464_v48  ;;  %v6473_v48 = vsel %vm91_vm0, %v6376_v51, 0.0  ;;  %v6382_v51 = vmul.f32 %v11062_v46, %v11062_v46 }
 0x7e5   :  { %v6468_v0 = vadd.f32 %v6467_v9, %v6466_v28  ;;  %v6475_v28 = vsel %vm91_vm0, %v6377_v16, 0.0  ;;  %v6383_v16 = vmul.f32 %v11066_v59, %v11066_v59 }
 0x7e7   :  { %v6470_v1 = vadd.f32 %v6469_v23, %v6468_v0  ;;  %v6477_v0 = vsel %vm91_vm0, %v6378_v2, 0.0  ;;  %v6384_v2 = vmul.f32 %v11070_v27, %v11070_v27 }
 0x7e9   :  { %v6472_v58 = vadd.f32 %v6471_v57, %v6470_v1  ;;  %v6479_v1 = vsel %vm91_vm0, %v6379_v10, 0.0  ;;  %v6385_v10 = vmul.f32 %v11074_v5, %v11074_v5 }
 0x7eb   :  { %v6474_v52 = vadd.f32 %v6473_v48, %v6472_v58  ;;  %v6481_v58 = vsel %vm91_vm0, %v6380_v24, 0.0  ;;  %v6386_v24 = vmul.f32 %v11078_v25, %v11078_v25 }
 0x7ed   :  { %v6476_v9 = vadd.f32 %v6475_v28, %v6474_v52  ;;  %v6483_v52 = vsel %vm91_vm0, %v6381_v21, 0.0  ;;  %v6387_v21 = vmul.f32 %v11082_v6, %v11082_v6 }
 0x7ef   :  { %v6478_v23 = vadd.f32 %v6477_v0, %v6476_v9  ;;  %v6485_v9 = vsel %vm91_vm0, %v6382_v51, 0.0  ;;  %v6388_v51 = vmul.f32 %v11086_v45, %v11086_v45 }
 0x7f1   :  { %v6480_v57 = vadd.f32 %v6479_v1, %v6478_v23  ;;  %v6487_v23 = vsel %vm91_vm0, %v6383_v16, 0.0  ;;  %v6389_v16 = vmul.f32 %v11090_v13, %v11090_v13 }
 0x7f3   :  { %v6482_v48 = vadd.f32 %v6481_v58, %v6480_v57  ;;  %v6489_v57 = vsel %vm91_vm0, %v6384_v2, 0.0  ;;  %v6390_v2 = vmul.f32 %v11094_v38, %v11094_v38 }
 0x7f5   :  { %v6484_v28 = vadd.f32 %v6483_v52, %v6482_v48  ;;  %v6491_v48 = vsel %vm91_vm0, %v6385_v10, 0.0  ;;  %v6391_v10 = vmul.f32 %v11098_v36, %v11098_v36 }
 0x7f7   :  { %v6486_v0 = vadd.f32 %v6485_v9, %v6484_v28  ;;  %v6493_v28 = vsel %vm91_vm0, %v6386_v24, 0.0  ;;  %v6392_v24 = vmul.f32 %v11102_v8, %v11102_v8 }
 0x7f9   :  { %v6488_v1 = vadd.f32 %v6487_v23, %v6486_v0  ;;  %v6495_v0 = vsel %vm91_vm0, %v6387_v21, 0.0  ;;  %v12825_v21 = vld [vmem:[#allocation13_spill] sm:$0xff] }
 0x7fb   :  { %v6490_v58 = vadd.f32 %v6489_v57, %v6488_v1  ;;  %v6497_v1 = vsel %vm91_vm0, %v6388_v51, 0.0  ;;  %v12826_v51 = vld [vmem:[#allocation14_spill] sm:$0xff] }
 0x7fd   :  { %v6492_v52 = vadd.f32 %v6491_v48, %v6490_v58  ;;  %v6499_v58 = vsel %vm91_vm0, %v6389_v16, 0.0  ;;  %v12827_v16 = vld [vmem:[#allocation15_spill] sm:$0xff] }
 0x7ff   :  { %v6494_v9 = vadd.f32 %v6493_v28, %v6492_v52  ;;  %v6501_v52 = vsel %vm91_vm0, %v6390_v2, 0.0  ;;  %v12828_v2 = vld [vmem:[#allocation16_spill] sm:$0xff] }
 0x801   :  { %v6496_v23 = vadd.f32 %v6495_v0, %v6494_v9  ;;  %v6393_v9 = vmul.f32 %v12825_v21, %v12825_v21  ;;  %v6503_v0 = vsel %vm91_vm0, %v6391_v10, 0.0  ;;  %v12829_v10 = vld [vmem:[#allocation17_spill] sm:$0xff] }
 0x803   :  { %v6498_v57 = vadd.f32 %v6497_v1, %v6496_v23  ;;  %v6394_v23 = vmul.f32 %v12826_v51, %v12826_v51  ;;  %v6505_v1 = vsel %vm91_vm0, %v6392_v24, 0.0  ;;  %v12830_v24 = vld [vmem:[#allocation19_spill] sm:$0xff] }
 0x805   :  { %v6500_v48 = vadd.f32 %v6499_v58, %v6498_v57  ;;  %v6395_v57 = vmul.f32 %v12827_v16, %v12827_v16  ;;  %v6507_v58 = vsel %vm91_vm0, %v6393_v9, 0.0 }
 0x807   :  { %v6502_v28 = vadd.f32 %v6501_v52, %v6500_v48  ;;  %v6396_v48 = vmul.f32 %v12828_v2, %v12828_v2  ;;  %v6509_v52 = vsel %vm91_vm0, %v6394_v23, 0.0 }
 0x809   :  { %v6504_v38 = vadd.f32 %v6503_v0, %v6502_v28  ;;  %v6397_v28 = vmul.f32 %v12829_v10, %v12829_v10  ;;  %v6511_v0 = vsel %vm91_vm0, %v6395_v57, 0.0  ;;  %v12831_v57 = vld [vmem:[#allocation22_spill] sm:$0xff] }
 0x80b   :  { %v6506_v36 = vadd.f32 %v6505_v1, %v6504_v38  ;;  %v6398_v38 = vmul.f32 %v12830_v24, %v12830_v24  ;;  %v6513_v1 = vsel %vm91_vm0, %v6396_v48, 0.0  ;;  %v6515_v9 = vsel %vm91_vm0, %v6397_v28, 0.0  ;;  %v12832_v48 = vld [vmem:[#allocation23_spill] sm:$0xff]  ;;  %v12833_v28 = vld [vmem:[#allocation24_spill] sm:$0xff] }
 0x80d   :  { %v6508_v8 = vadd.f32 %v6507_v58, %v6506_v36  ;;  %v6399_v36 = vmul.f32 %v11130_v26, %v11130_v26  ;;  %v6517_v23 = vsel %vm91_vm0, %v6398_v38, 0.0  ;;  %v12834_v38 = vld [vmem:[#allocation25_spill] sm:$0xff] }
 0x80f   :  { %v6510_v21 = vadd.f32 %v6509_v52, %v6508_v8  ;;  %v6400_v8 = vmul.f32 %v11134_v60, %v11134_v60 }
 0x811   :  { %v6512_v51 = vadd.f32 %v6511_v0, %v6510_v21  ;;  %v6401_v21 = vmul.f32 %v12831_v57, %v12831_v57  ;;  %v6519_v0 = vsel %vm91_vm0, %v6399_v36, 0.0  ;;  %v12835_v36 = vld [vmem:[#allocation26_spill] sm:$0xff] }
 0x813   :  { %v6514_v16 = vadd.f32 %v6513_v1, %v6512_v51  ;;  %v6402_v51 = vmul.f32 %v12832_v48, %v12832_v48  ;;  %v6521_v1 = vsel %vm91_vm0, %v6400_v8, 0.0 }
 0x815   :  { %v6516_v58 = vadd.f32 %v6515_v9, %v6514_v16  ;;  %v6403_v16 = vmul.f32 %v12833_v28, %v12833_v28  ;;  %v6523_v9 = vsel %vm91_vm0, %v6401_v21, 0.0 }
 0x817   :  { %v6518_v52 = vadd.f32 %v6517_v23, %v6516_v58  ;;  %v6404_v58 = vmul.f32 %v12834_v38, %v12834_v38  ;;  %v6525_v23 = vsel %vm91_vm0, %v6402_v51, 0.0 }
 0x819   :  { %v6520_v24 = vadd.f32 %v6519_v0, %v6518_v52  ;;  %v6405_v52 = vmul.f32 %v12835_v36, %v12835_v36  ;;  %v6527_v0 = vsel %vm91_vm0, %v6403_v16, 0.0  ;;  %v6542_v16 = vld [vmem:[%s12581_s5] sm:$0x1] }
 0x81b   :  { %v6522_v26 = vadd.f32 %v6521_v1, %v6520_v24  ;;  %v6529_v24 = vsel %vm91_vm0, %v6404_v58, 0.0  ;;  %v6531_v1 = vsel %vm91_vm0, %v6405_v52, 0.0  ;;  %v12836_v58 = vld [vmem:[#allocation18_spill] sm:$0xff] }
 0x81c   :  { %v12838_v52 = vld [vmem:[#allocation6_spill] sm:$0xff] }
 0x81d   :  { %v6524_v60 = vadd.f32 %v6523_v9, %v6522_v26 }
 0x81f   :  { %v6526_v57 = vadd.f32 %v6525_v23, %v6524_v60 }
 0x821   :  { %v6528_v48 = vadd.f32 %v6527_v0, %v6526_v57 }
 0x823   :  { %v6530_v8 = vadd.f32 %v6529_v24, %v6528_v48  ;;  %v12837_v48 = vsub.s32 0, %v12836_v58  ;;  %v12839_v24 = vld [vmem:[#allocation7_spill] sm:$0xff]  ;;  %v12846_v58 = vld [vmem:[#allocation13_spill] sm:$0xff] }
 0x825   :  { %v6532_v28 = vadd.f32 %v6531_v1, %v6530_v8  ;;  %v12841_v8 = vld [vmem:[#allocation9_spill] sm:$0xff] }
 0x827   :  { %v6533_v21 = vrot.slane %v6532_v28, 4 }
 0x829   :  { %v6534_v26 = vadd.f32 %v6533_v21, %v6532_v28 }
 0x82b   :  { %v6535_v9 = vrot.slane %v6534_v26, 2 }
 0x82d   :  { %v6536_v10 = vadd.f32 %v6535_v9, %v6534_v26 }
 0x82f   :  { %v6537_v38 = vrot.slane %v6536_v10, 1 }
 0x831   :  { %v6538_v2 = vadd.f32 %v6537_v38, %v6536_v10 }
 0x833   :  { %v6539_v51 = vmul.f32 0.001953125, %v6538_v2  ;;  %v12840_v2 = vld [vmem:[#allocation8_spill] sm:$0xff] }
 0x835   :  { %v6540_v60 = vadd.f32 1e-05, %v6539_v51 }
 0x837   :  { %7056 = vrsqrt.f32 %v6540_v60 }
 0x841   :  { %v7057_v57 = vpop.eup %7056 }
 0x842   :  { %v6543_v23 = vmul.f32 %v7057_v57, %v6542_v16  ;;  %v12842_v16 = vld [vmem:[#allocation10_spill] sm:$0xff]  ;;  %v12843_v57 = vld [vmem:[#allocation11_spill] sm:$0xff] }
 0x844   :  { %v11353_v0 = vrot.slane %v6543_v23, %v12837_v48  ;;  %v12844_v23 = vld [vmem:[#allocation12_spill] sm:$0xff]  ;;  %v12848_v48 = vld [vmem:[#allocation14_spill] sm:$0xff] }
 0x846   :  { %v11357_v28 = vmul.f32 %v11353_v0, %v12838_v52  ;;  %v11361_v10 = vmul.f32 %v11353_v0, %v12839_v24  ;;  %v11365_v38 = vmul.f32 %v11353_v0, %v12840_v2  ;;  %v11369_v1 = vmul.f32 %v11353_v0, %v12841_v8  ;;  %v12850_v52 = vld [vmem:[#allocation15_spill] sm:$0xff]  ;;  %v12852_v2 = vld [vmem:[#allocation16_spill] sm:$0xff] }
 0x847   :  { %v11373_v21 = vmul.f32 %v11353_v0, %v10918_v39  ;;  %v11377_v26 = vmul.f32 %v11353_v0, %v10922_v53  ;;  %v11381_v9 = vmul.f32 %v11353_v0, %v10926_v32  ;;  %v11385_v51 = vmul.f32 %v11353_v0, %v10930_v30 }
 0x848   :  { %v11389_v60 = vmul.f32 %v11353_v0, %v10934_v22  ;;  %v11393_v39 = vmul.f32 %v11353_v0, %v10938_v11  ;;  %v11397_v53 = vmul.f32 %v11353_v0, %v10942_v63  ;;  %v11401_v32 = vmul.f32 %v11353_v0, %v10946_v18 }
 0x849   :  { %v11405_v30 = vmul.f32 %v11353_v0, %v10950_v3  ;;  %v11409_v22 = vmul.f32 %v11353_v0, %v10954_v61  ;;  %v11413_v11 = vmul.f32 %v11353_v0, %v10958_v55  ;;  %v11417_v63 = vmul.f32 %v11353_v0, %v10962_v7 }
 0x84a   :  { %v11421_v18 = vmul.f32 %v11353_v0, %v10966_v37  ;;  %v11425_v3 = vmul.f32 %v11353_v0, %v10970_v15  ;;  %v11429_v61 = vmul.f32 %v11353_v0, %v10974_v54  ;;  %v11433_v55 = vmul.f32 %v11353_v0, %v10978_v14 }
 0x84b   :  { %v11437_v7 = vmul.f32 %v11353_v0, %v10982_v33  ;;  %v11441_v37 = vmul.f32 %v11353_v0, %v10986_v12  ;;  %v11445_v15 = vmul.f32 %v11353_v0, %v10990_v19  ;;  %v11449_v54 = vmul.f32 %v11353_v0, %v10994_v56 }
 0x84c   :  { %v11453_v14 = vmul.f32 %v11353_v0, %v10998_v42  ;;  %v11457_v33 = vmul.f32 %v11353_v0, %v11002_v34  ;;  %v11461_v12 = vmul.f32 %v11353_v0, %v11006_v31  ;;  %v11465_v19 = vmul.f32 %v11353_v0, %v11010_v47 }
 0x84d   :  { %v11469_v56 = vmul.f32 %v11353_v0, %v11014_v50  ;;  %v11473_v42 = vmul.f32 %v11353_v0, %v11018_v29  ;;  %v11477_v34 = vmul.f32 %v11353_v0, %v11022_v44  ;;  %v11481_v31 = vmul.f32 %v11353_v0, %v11026_v20 }
 0x84e   :  { %v11485_v47 = vmul.f32 %v11353_v0, %v11030_v62  ;;  %v11489_v50 = vmul.f32 %v11353_v0, %v11034_v35  ;;  %v11493_v29 = vmul.f32 %v11353_v0, %v11038_v40  ;;  %v11497_v44 = vmul.f32 %v11353_v0, %v11042_v49 }
 0x84f   :  { %v11501_v20 = vmul.f32 %v11353_v0, %v11046_v17  ;;  %v11505_v62 = vmul.f32 %v11353_v0, %v11050_v43  ;;  %v11509_v35 = vmul.f32 %v11353_v0, %v11054_v4  ;;  %v11513_v40 = vmul.f32 %v11353_v0, %v11058_v41 }
 0x850   :  { %v11517_v49 = vmul.f32 %v11353_v0, %v11062_v46  ;;  %v11521_v17 = vmul.f32 %v11353_v0, %v11066_v59  ;;  %v11525_v43 = vmul.f32 %v11353_v0, %v11070_v27  ;;  %v11529_v4 = vmul.f32 %v11353_v0, %v11074_v5 }
 0x851   :  { %v11533_v41 = vmul.f32 %v11353_v0, %v11078_v25  ;;  %v11537_v46 = vmul.f32 %v11353_v0, %v11082_v6  ;;  %v11541_v59 = vmul.f32 %v11353_v0, %v11086_v45  ;;  %v11545_v27 = vmul.f32 %v11353_v0, %v11090_v13 }
 0x852   :  { %v11549_v5 = vmul.f32 %v11353_v0, %v12842_v16  ;;  %v11553_v25 = vmul.f32 %v11353_v0, %v12843_v57  ;;  %v11557_v6 = vmul.f32 %v11353_v0, %v12844_v23  ;;  %v11561_v45 = vmul.f32 %v11353_v0, %v12846_v58  ;;  %v12854_v16 = vld [vmem:[#allocation17_spill] sm:$0xff]  ;;  %v12856_v58 = vld [vmem:[#allocation19_spill] sm:$0xff] }
 0x853   :  { %v11565_v13 = vmul.f32 %v11353_v0, %v12848_v48  ;;  %v11569_v24 = vmul.f32 %v11353_v0, %v12850_v52  ;;  %v11573_v8 = vmul.f32 %v11353_v0, %v12852_v2  ;;  %v11577_v57 = vmul.f32 %v11353_v0, %v12854_v16  ;;  %v11582_v23 = vld [vmem:[%s12582_s6] ss:$0 sm:$0xff] }
 0x854   :  { %12845 = vst [vmem:[#allocation5_spill] sm:$0xff] %v11557_v6  ;;  %12847 = vst [vmem:[#allocation26_spill] sm:$0xff] %v11561_v45  ;;  %v11586_v48 = vmul.f32 %v11353_v0, %v12856_v58  ;;  %v12862_v6 = vld [vmem:[#allocation24_spill] sm:$0xff] }
 0x855   :  { %12849 = vst [vmem:[#allocation18_spill] sm:$0xff] %v11565_v13  ;;  %12851 = vst [vmem:[#allocation6_spill] sm:$0xff] %v11569_v24  ;;  %v12858_v13 = vld [vmem:[#allocation20_spill] sm:$0xff]  ;;  %v12859_v24 = vld [vmem:[#allocation21_spill] sm:$0xff]  ;;  %v11606_v58 = vmul.f32 %v11353_v0, %v12862_v6  ;;  %v11626_v6 = vadd.f32 %v11582_v23, %v11365_v38  ;;  %v11650_v38 = vadd.f32 %v11582_v23, %v11389_v60 }
 0x856   :  { %12853 = vst [vmem:[#allocation7_spill] sm:$0xff] %v11573_v8  ;;  %12855 = vst [vmem:[#allocation8_spill] sm:$0xff] %v11577_v57  ;;  %v11590_v52 = vmul.f32 %v11353_v0, %v12858_v13  ;;  %v11594_v2 = vmul.f32 %v11353_v0, %v12859_v24  ;;  %v12860_v8 = vld [vmem:[#allocation22_spill] sm:$0xff]  ;;  %v12861_v57 = vld [vmem:[#allocation23_spill] sm:$0xff]  ;;  %v11614_v24 = vmul.f32 %v11353_v0, %v12835_v36 }
 0x857   :  { %12857 = vst [vmem:[#allocation9_spill] sm:$0xff] %v11586_v48  ;;  %v11598_v16 = vmul.f32 %v11353_v0, %v12860_v8  ;;  %v11602_v45 = vmul.f32 %v11353_v0, %v12861_v57  ;;  %v12863_v48 = vld [vmem:[#allocation25_spill] sm:$0xff]  ;;  %v11618_v8 = vadd.f32 %v11582_v23, %v11357_v28  ;;  %v11622_v57 = vadd.f32 %v11582_v23, %v11361_v10 }
 0x858   :  { %v11610_v13 = vmul.f32 %v11353_v0, %v12863_v48  ;;  %v11630_v48 = vadd.f32 %v11582_v23, %v11369_v1  ;;  %v11634_v36 = vadd.f32 %v11582_v23, %v11373_v21  ;;  %v11638_v0 = vadd.f32 %v11582_v23, %v11377_v26 }
 0x859   :  { %v11642_v28 = vadd.f32 %v11582_v23, %v11381_v9  ;;  %v11646_v10 = vadd.f32 %v11582_v23, %v11385_v51  ;;  %v11654_v1 = vadd.f32 %v11582_v23, %v11393_v39  ;;  %v11658_v21 = vadd.f32 %v11582_v23, %v11397_v53 }
 0x85a   :  { %v11662_v26 = vadd.f32 %v11582_v23, %v11401_v32  ;;  %v11666_v9 = vadd.f32 %v11582_v23, %v11405_v30  ;;  %v11670_v51 = vadd.f32 %v11582_v23, %v11409_v22  ;;  %v11674_v60 = vadd.f32 %v11582_v23, %v11413_v11 }
 0x85b   :  { %v11678_v39 = vadd.f32 %v11582_v23, %v11417_v63  ;;  %v11682_v53 = vadd.f32 %v11582_v23, %v11421_v18  ;;  %v11686_v32 = vadd.f32 %v11582_v23, %v11425_v3  ;;  %v11690_v30 = vadd.f32 %v11582_v23, %v11429_v61 }
 0x85c   :  { %v11694_v22 = vadd.f32 %v11582_v23, %v11433_v55  ;;  %v11698_v11 = vadd.f32 %v11582_v23, %v11437_v7  ;;  %v11702_v63 = vadd.f32 %v11582_v23, %v11441_v37  ;;  %v11706_v18 = vadd.f32 %v11582_v23, %v11445_v15 }
 0x85d   :  { %v11710_v3 = vadd.f32 %v11582_v23, %v11449_v54  ;;  %v11714_v61 = vadd.f32 %v11582_v23, %v11453_v14  ;;  %v11718_v55 = vadd.f32 %v11582_v23, %v11457_v33  ;;  %v11722_v7 = vadd.f32 %v11582_v23, %v11461_v12 }
 0x85e   :  { %v11726_v37 = vadd.f32 %v11582_v23, %v11465_v19  ;;  %v11730_v15 = vadd.f32 %v11582_v23, %v11469_v56  ;;  %v11734_v54 = vadd.f32 %v11582_v23, %v11473_v42  ;;  %v11738_v14 = vadd.f32 %v11582_v23, %v11477_v34 }
 0x85f   :  { %v11742_v33 = vadd.f32 %v11582_v23, %v11481_v31  ;;  %v11746_v12 = vadd.f32 %v11582_v23, %v11485_v47  ;;  %v11750_v19 = vadd.f32 %v11582_v23, %v11489_v50  ;;  %v11754_v56 = vadd.f32 %v11582_v23, %v11493_v29 }
 0x860   :  { %v11758_v42 = vadd.f32 %v11582_v23, %v11497_v44  ;;  %v11762_v34 = vadd.f32 %v11582_v23, %v11501_v20  ;;  %v11766_v31 = vadd.f32 %v11582_v23, %v11505_v62  ;;  %v11770_v47 = vadd.f32 %v11582_v23, %v11509_v35 }
 0x861   :  { %12864 = vst [vmem:[#allocation10_spill] sm:$0xff] %v11754_v56  ;;  %v11774_v50 = vadd.f32 %v11582_v23, %v11513_v40  ;;  %v11778_v29 = vadd.f32 %v11582_v23, %v11517_v49  ;;  %v11782_v44 = vadd.f32 %v11582_v23, %v11521_v17  ;;  %v11786_v20 = vadd.f32 %v11582_v23, %v11525_v43  ;;  %v6683_v43 = vld [vmem:[%s12576_s0] sm:$0xff]  ;;  %v6708_v56 = vld [vmem:[%s12576_s0 + $0xc8] sm:$0xff] }
 0x862   :  { %12865 = vst [vmem:[#allocation11_spill] sm:$0xff] %v11758_v42  ;;  %12866 = vst [vmem:[#allocation12_spill] sm:$0xff] %v11762_v34  ;;  %v11790_v62 = vadd.f32 %v11582_v23, %v11529_v4  ;;  %v11794_v35 = vadd.f32 %v11582_v23, %v11533_v41  ;;  %v11798_v40 = vadd.f32 %v11582_v23, %v11537_v46  ;;  %v6684_v4 = vld [vmem:[%s12576_s0 + $0x8] sm:$0xff]  ;;  %v6685_v41 = vld [vmem:[%s12576_s0 + $0x10] sm:$0xff] }
 0x863   :  { %12867 = vst [vmem:[#allocation13_spill] sm:$0xff] %v11766_v31  ;;  %12868 = vst [vmem:[#allocation14_spill] sm:$0xff] %v11770_v47  ;;  %v11802_v49 = vadd.f32 %v11582_v23, %v11541_v59  ;;  %v11806_v17 = vadd.f32 %v11582_v23, %v11545_v27  ;;  %v6686_v46 = vld [vmem:[%s12576_s0 + $0x18] sm:$0xff]  ;;  %v11822_v59 = vadd.f32 %v11582_v23, %v11549_v5  ;;  %v6688_v5 = vld [vmem:[%s12576_s0 + $0x28] sm:$0xff] }
 0x864   :  { %12869 = vst [vmem:[#allocation15_spill] sm:$0xff] %v11774_v50  ;;  %12870 = vst [vmem:[#allocation16_spill] sm:$0xff] %v11778_v29  ;;  %v11826_v27 = vadd.f32 %v11582_v23, %v11553_v25  ;;  %v6689_v25 = vld [vmem:[%s12576_s0 + $0x30] sm:$0xff]  ;;  %v6691_v50 = vld [vmem:[%s12576_s0 + $0x40] sm:$0xff]  ;;  %v11951_v31 = vadd.f32 %v6685_v41, %v11626_v6  ;;  %v11954_v34 = vadd.f32 %v6686_v46, %v11630_v48 }
 0x865   :  { %12871 = vst [vmem:[#allocation17_spill] sm:$0xff] %v11782_v44  ;;  %12872 = vst [vmem:[#allocation19_spill] sm:$0xff] %v11786_v20  ;;  %v12890_v44 = vld [vmem:[#allocation8_spill] sm:$0xff]  ;;  %v6695_v47 = vld [vmem:[%s12576_s0 + $0x60] sm:$0xff]  ;;  %v11972_v48 = vadd.f32 %v6688_v5, %v11638_v0 }
 0x866   :  { %12873 = vst [vmem:[#allocation20_spill] sm:$0xff] %v11790_v62  ;;  %12874 = vst [vmem:[#allocation21_spill] sm:$0xff] %v11794_v35  ;;  %v6687_v62 = vld [vmem:[%s12576_s0 + $0x20] sm:$0xff]  ;;  %v11862_v29 = vadd.f32 %v11582_v23, %v12890_v44  ;;  %v6712_v46 = vld [vmem:[%s12576_s0 + $0xe8] sm:$0xff] }
 0x867   :  { %12875 = vst [vmem:[#allocation22_spill] sm:$0xff] %v11798_v40  ;;  %12876 = vst [vmem:[#allocation23_spill] sm:$0xff] %v11802_v49  ;;  %v12882_v40 = vld [vmem:[#allocation26_spill] sm:$0xff]  ;;  %v6707_v42 = vld [vmem:[%s12576_s0 + $0xc0] sm:$0xff]  ;;  %v11969_v6 = vadd.f32 %v6687_v62, %v11634_v36 }
 0x868   :  { %12877 = vst [vmem:[#allocation24_spill] sm:$0xff] %v11806_v17  ;;  %12878 = vst [vmem:[#allocation25_spill] sm:$0xff] %v11822_v59  ;;  %v12880_v17 = vld [vmem:[#allocation5_spill] sm:$0xff]  ;;  %v11834_v35 = vadd.f32 %v11582_v23, %v12882_v40  ;;  %v12888_v59 = vld [vmem:[#allocation7_spill] sm:$0xff] }
 0x869   :  { %12879 = vst [vmem:[#allocation27_spill] sm:$0xff] %v11826_v27  ;;  %v11830_v49 = vadd.f32 %v11582_v23, %v12880_v17  ;;  %v6690_v17 = vld [vmem:[%s12576_s0 + $0x38] sm:$0xff]  ;;  %v11858_v20 = vadd.f32 %v11582_v23, %v12888_v59  ;;  %12891 = vst [vmem:[#allocation8_spill] sm:$0xff] %v11862_v29  ;;  %v11882_v29 = vadd.f32 %v11582_v23, %v11590_v52  ;;  %v6697_v52 = vld [vmem:[%s12576_s0 + $0x70] sm:$0xff] }
 0x86a   :  { %12883 = vst [vmem:[#allocation26_spill] sm:$0xff] %v11834_v35  ;;  %v12886_v35 = vld [vmem:[#allocation6_spill] sm:$0xff]  ;;  %v6694_v59 = vld [vmem:[%s12576_s0 + $0x58] sm:$0xff]  ;;  %v6711_v41 = vld [vmem:[%s12576_s0 + $0xe0] sm:$0xff] }
 0x86b   :  { %12881 = vst [vmem:[#allocation5_spill] sm:$0xff] %v11830_v49  ;;  %v12884_v49 = vld [vmem:[#allocation18_spill] sm:$0xff]  ;;  %v11854_v27 = vadd.f32 %v11582_v23, %v12886_v35  ;;  %12889 = vst [vmem:[#allocation7_spill] sm:$0xff] %v11858_v20  ;;  %v6693_v35 = vld [vmem:[%s12576_s0 + $0x50] sm:$0xff]  ;;  %v12002_v5 = vadd.f32 %v6694_v59, %v11662_v26 }
 0x86c   :  { %v11850_v40 = vadd.f32 %v11582_v23, %v12884_v49  ;;  %v6692_v49 = vld [vmem:[%s12576_s0 + $0x48] sm:$0xff]  ;;  %v12892_v20 = vld [vmem:[#allocation9_spill] sm:$0xff]  ;;  %12894 = vst [vmem:[#allocation28_spill] sm:$0xff] %v11882_v29  ;;  %v11918_v29 = vadd.f32 %v11582_v23, %v11614_v24  ;;  %v6713_v36 = vld [vmem:[%s12576_s0 + $0xf0] sm:$0xff]  ;;  %v11999_v62 = vadd.f32 %v6693_v35, %v11658_v21  ;;  %v12017_v21 = vadd.f32 %v6695_v47, %v11666_v9 }
 0x86d   :  { %12887 = vst [vmem:[#allocation6_spill] sm:$0xff] %v11854_v27  ;;  %v11878_v44 = vadd.f32 %v11582_v23, %v12892_v20  ;;  %v11886_v27 = vadd.f32 %v11582_v23, %v11594_v2  ;;  %v6696_v20 = vld [vmem:[%s12576_s0 + $0x68] sm:$0xff]  ;;  %v6698_v2 = vld [vmem:[%s12576_s0 + $0x78] sm:$0xff]  ;;  %v6719_v35 = vld [vmem:[%s12576_s0 + $0x120] sm:$0xff] }
 0x86e   :  { %12885 = vst [vmem:[#allocation18_spill] sm:$0xff] %v11850_v40  ;;  %v11890_v40 = vadd.f32 %v11582_v23, %v11598_v16  ;;  %v11906_v16 = vadd.f32 %v11582_v23, %v11602_v45  ;;  %12900 = vst [vmem:[#allocation34_spill] sm:$0xff] %v11918_v29  ;;  %v6700_v45 = vld [vmem:[%s12576_s0 + $0x88] sm:$0xff]  ;;  %v6705_v29 = vld [vmem:[%s12576_s0 + $0xb0] sm:$0xff]  ;;  %v12020_v26 = vadd.f32 %v6696_v20, %v11670_v51 }
 0x86f   :  { %12893 = vst [vmem:[#allocation9_spill] sm:$0xff] %v11878_v44  ;;  %12895 = vst [vmem:[#allocation29_spill] sm:$0xff] %v11886_v27  ;;  %v11914_v27 = vadd.f32 %v11582_v23, %v11610_v13  ;;  %v6699_v44 = vld [vmem:[%s12576_s0 + $0x80] sm:$0xff]  ;;  %v6702_v13 = vld [vmem:[%s12576_s0 + $0x98] sm:$0xff] }
 0x870   :  { %12896 = vst [vmem:[#allocation30_spill] sm:$0xff] %v11890_v40  ;;  %12897 = vst [vmem:[#allocation31_spill] sm:$0xff] %v11906_v16  ;;  %v11910_v40 = vadd.f32 %v11582_v23, %v11606_v58  ;;  %v6701_v58 = vld [vmem:[%s12576_s0 + $0x90] sm:$0xff]  ;;  %v6703_v23 = vld [vmem:[%s12576_s0 + $0xa0] sm:$0xff]  ;;  %v11948_v16 = vadd.f32 %v6684_v4, %v11622_v57  ;;  %v11978_v4 = vadd.f32 %v6690_v17, %v11646_v10 }
 0x871   :  { %12899 = vst [vmem:[#allocation33_spill] sm:$0xff] %v11914_v27  ;;  %v6704_v24 = vld [vmem:[%s12576_s0 + $0xa8] sm:$0xff]  ;;  %v6706_v27 = vld [vmem:[%s12576_s0 + $0xb8] sm:$0xff]  ;;  %v11996_v10 = vadd.f32 %v6692_v49, %v11654_v1  ;;  %v12026_v49 = vadd.f32 %v6698_v2, %v11678_v39  ;;  %v6721_v9 = vld [vmem:[%s12576_s0 + $0x130] sm:$0xff]  ;;  %v12044_v39 = vadd.f32 %v6700_v45, %v11686_v32  ;;  %v12047_v47 = vadd.f32 %v6701_v58, %v11690_v30 }
 0x872   :  { %12898 = vst [vmem:[#allocation32_spill] sm:$0xff] %v11910_v40  ;;  %v11945_v40 = vadd.f32 %v6683_v43, %v11618_v8  ;;  %v6709_v8 = vld [vmem:[%s12576_s0 + $0xd0] sm:$0xff]  ;;  %v6710_v57 = vld [vmem:[%s12576_s0 + $0xd8] sm:$0xff]  ;;  %v11975_v43 = vadd.f32 %v6689_v25, %v11642_v28  ;;  %v11993_v28 = vadd.f32 %v6691_v50, %v11650_v38  ;;  %v6715_v25 = vld [vmem:[%s12576_s0 + $0x100] sm:$0xff]  ;;  %v12023_v50 = vadd.f32 %v6697_v52, %v11674_v60 }
 0x873   :  { %v6714_v0 = vld [vmem:[%s12576_s0 + $0xf8] sm:$0xff]  ;;  %v6716_v17 = vld [vmem:[%s12576_s0 + $0x108] sm:$0xff]  ;;  %v6717_v38 = vld [vmem:[%s12576_s0 + $0x110] sm:$0xff]  ;;  %v12041_v60 = vadd.f32 %v6699_v44, %v11682_v53  ;;  %v12050_v20 = vadd.f32 %v6702_v13, %v11694_v22  ;;  %v12062_v32 = vadd.f32 %v6703_v23, %v11698_v11  ;;  %v12065_v30 = vadd.f32 %v6704_v24, %v11702_v63 }
 0x874   :  { %v6718_v1 = vld [vmem:[%s12576_s0 + $0x118] sm:$0xff]  ;;  %v6720_v59 = vld [vmem:[%s12576_s0 + $0x128] sm:$0xff]  ;;  %v6723_v52 = vld [vmem:[%s12576_s0 + $0x140] sm:$0xff]  ;;  %v12068_v22 = vadd.f32 %v6705_v29, %v11706_v18  ;;  %v12071_v44 = vadd.f32 %v6706_v27, %v11710_v3  ;;  %v12083_v63 = vadd.f32 %v6707_v42, %v11714_v61  ;;  %v12086_v18 = vadd.f32 %v6708_v56, %v11718_v55 }
 0x875   :  { %v6722_v51 = vld [vmem:[%s12576_s0 + $0x138] sm:$0xff]  ;;  %v6724_v2 = vld [vmem:[%s12576_s0 + $0x148] sm:$0xff]  ;;  %v6725_v53 = vld [vmem:[%s12576_s0 + $0x150] sm:$0xff]  ;;  %v12089_v3 = vadd.f32 %v6709_v8, %v11722_v7  ;;  %v12092_v29 = vadd.f32 %v6710_v57, %v11726_v37  ;;  %v12104_v55 = vadd.f32 %v6711_v41, %v11730_v15  ;;  %v12107_v7 = vadd.f32 %v6712_v46, %v11734_v54 }
 0x876   :  { %v6726_v45 = vld [vmem:[%s12576_s0 + $0x158] sm:$0xff]  ;;  %v6727_v58 = vld [vmem:[%s12576_s0 + $0x160] sm:$0xff]  ;;  %v6728_v11 = vld [vmem:[%s12576_s0 + $0x168] sm:$0xff]  ;;  %v12110_v37 = vadd.f32 %v6713_v36, %v11738_v14  ;;  %v12113_v56 = vadd.f32 %v6714_v0, %v11742_v33  ;;  %v12125_v54 = vadd.f32 %v6715_v25, %v11746_v12  ;;  %v12128_v14 = vadd.f32 %v6716_v17, %v11750_v19 }
 0x877   :  { %v6729_v27 = vld [vmem:[%s12576_s0 + $0x170] sm:$0xff]  ;;  %v6730_v13 = vld [vmem:[%s12576_s0 + $0x178] sm:$0xff]  ;;  %v6731_v61 = vld [vmem:[%s12576_s0 + $0x180] sm:$0xff] }
 0x878   :  { %v6732_v42 = vld [vmem:[%s12576_s0 + $0x188] sm:$0xff]  ;;  %v6733_v23 = vld [vmem:[%s12576_s0 + $0x190] sm:$0xff]  ;;  %v6734_v15 = vld [vmem:[%s12576_s0 + $0x198] sm:$0xff] }
 0x879   :  { %v12901_v33 = vld [vmem:[#allocation10_spill] sm:$0xff]  ;;  %v12903_v8 = vld [vmem:[#allocation11_spill] sm:$0xff]  ;;  %v6735_v41 = vld [vmem:[%s12576_s0 + $0x1a0] sm:$0xff] }
 0x87a   :  { %v12131_v24 = vadd.f32 %v6717_v38, %v12901_v33  ;;  %v12134_v57 = vadd.f32 %v6718_v1, %v12903_v8  ;;  %v6736_v46 = vld [vmem:[%s12576_s0 + $0x1a8] sm:$0xff]  ;;  %v6737_v12 = vld [vmem:[%s12576_s0 + $0x1b0] sm:$0xff]  ;;  %v12905_v19 = vld [vmem:[#allocation12_spill] sm:$0xff] }
 0x87b   :  { %v12146_v36 = vadd.f32 %v6719_v35, %v12905_v19  ;;  %v12907_v0 = vld [vmem:[#allocation13_spill] sm:$0xff]  ;;  %v12909_v17 = vld [vmem:[#allocation14_spill] sm:$0xff]  ;;  %v12911_v1 = vld [vmem:[#allocation15_spill] sm:$0xff] }
 0x87c   :  { %12902 = vst [vmem:[#allocation10_spill] sm:$0xff] %v12131_v24  ;;  %12904 = vst [vmem:[#allocation11_spill] sm:$0xff] %v12134_v57  ;;  %v12149_v25 = vadd.f32 %v6720_v59, %v12907_v0  ;;  %v12152_v38 = vadd.f32 %v6721_v9, %v12909_v17  ;;  %v12155_v33 = vadd.f32 %v6722_v51, %v12911_v1  ;;  %v6738_v8 = vld [vmem:[%s12576_s0 + $0x1b8] sm:$0xff]  ;;  %v6739_v57 = vld [vmem:[%s12576_s0 + $0x1c0] sm:$0xff] }
 0x87d   :  { %12906 = vst [vmem:[#allocation12_spill] sm:$0xff] %v12146_v36  ;;  %v6740_v35 = vld [vmem:[%s12576_s0 + $0x1c8] sm:$0xff]  ;;  %v12913_v59 = vld [vmem:[#allocation16_spill] sm:$0xff]  ;;  %v12915_v9 = vld [vmem:[#allocation17_spill] sm:$0xff] }
 0x87e   :  { %12908 = vst [vmem:[#allocation13_spill] sm:$0xff] %v12149_v25  ;;  %12910 = vst [vmem:[#allocation14_spill] sm:$0xff] %v12152_v38  ;;  %v12167_v19 = vadd.f32 %v6723_v52, %v12913_v59  ;;  %v12170_v0 = vadd.f32 %v6724_v2, %v12915_v9  ;;  %v12917_v51 = vld [vmem:[#allocation19_spill] sm:$0xff]  ;;  %v12919_v1 = vld [vmem:[#allocation20_spill] sm:$0xff] }
 0x87f   :  { %12912 = vst [vmem:[#allocation15_spill] sm:$0xff] %v12155_v33  ;;  %v12173_v17 = vadd.f32 %v6725_v53, %v12917_v51  ;;  %v12176_v33 = vadd.f32 %v6726_v45, %v12919_v1  ;;  %v6741_v38 = vld [vmem:[%s12576_s0 + $0x1d0] sm:$0xff]  ;;  %v6742_v25 = vld [vmem:[%s12576_s0 + $0x1d8] sm:$0xff]  ;;  %v6743_v52 = vld [vmem:[%s12576_s0 + $0x1e0] sm:$0xff] }
 0x880   :  { %12914 = vst [vmem:[#allocation16_spill] sm:$0xff] %v12167_v19  ;;  %12916 = vst [vmem:[#allocation17_spill] sm:$0xff] %v12170_v0  ;;  %v12921_v2 = vld [vmem:[#allocation21_spill] sm:$0xff]  ;;  %v12923_v53 = vld [vmem:[#allocation22_spill] sm:$0xff] }
 0x881   :  { %12918 = vst [vmem:[#allocation19_spill] sm:$0xff] %v12173_v17  ;;  %12920 = vst [vmem:[#allocation20_spill] sm:$0xff] %v12176_v33  ;;  %v12188_v59 = vadd.f32 %v6727_v58, %v12921_v2  ;;  %v12191_v9 = vadd.f32 %v6728_v11, %v12923_v53  ;;  %v12925_v45 = vld [vmem:[#allocation23_spill] sm:$0xff]  ;;  %v12927_v1 = vld [vmem:[#allocation24_spill] sm:$0xff] }
 0x882   :  { %v12194_v51 = vadd.f32 %v6729_v27, %v12925_v45  ;;  %v12197_v33 = vadd.f32 %v6730_v13, %v12927_v1  ;;  %v6744_v17 = vld [vmem:[%s12576_s0 + $0x1e8] sm:$0xff]  ;;  %v6745_v0 = vld [vmem:[%s12576_s0 + $0x1f0] sm:$0xff]  ;;  %v6746_v58 = vld [vmem:[%s12576_s0 + $0x1f8] sm:$0xff] }
 0x883   :  { %12922 = vst [vmem:[#allocation21_spill] sm:$0xff] %v12188_v59  ;;  %12924 = vst [vmem:[#allocation22_spill] sm:$0xff] %v12191_v9  ;;  %v12929_v11 = vld [vmem:[#allocation25_spill] sm:$0xff]  ;;  %v12930_v27 = vld [vmem:[#allocation27_spill] sm:$0xff] }
 0x884   :  { %12926 = vst [vmem:[#allocation23_spill] sm:$0xff] %v12194_v51  ;;  %12928 = vst [vmem:[#allocation24_spill] sm:$0xff] %v12197_v33  ;;  %v12209_v2 = vadd.f32 %v6731_v61, %v12929_v11  ;;  %v12212_v53 = vadd.f32 %v6732_v42, %v12930_v27  ;;  %v12931_v13 = vld [vmem:[#allocation5_spill] sm:$0xff]  ;;  %v12932_v1 = vld [vmem:[#allocation26_spill] sm:$0xff] }
 0x885   :  { %v12215_v45 = vadd.f32 %v6733_v23, %v12931_v13  ;;  %v12218_v33 = vadd.f32 %v6734_v15, %v12932_v1  ;;  %v12933_v51 = vld [vmem:[#allocation18_spill] sm:$0xff]  ;;  %v12935_v36 = vld [vmem:[#allocation7_spill] sm:$0xff]  ;;  %v12936_v61 = vld [vmem:[#allocation8_spill] sm:$0xff] }
 0x886   :  { %v12221_v9 = vadd.f32 %v6735_v41, %v12933_v51  ;;  %v12934_v59 = vld [vmem:[#allocation6_spill] sm:$0xff]  ;;  %v12227_v24 = vadd.f32 %v6737_v12, %v12935_v36  ;;  %v12230_v11 = vadd.f32 %v6738_v8, %v12936_v61  ;;  %v12937_v42 = vld [vmem:[#allocation9_spill] sm:$0xff]  ;;  %v12938_v23 = vld [vmem:[#allocation28_spill] sm:$0xff] }
 0x887   :  { %v12224_v19 = vadd.f32 %v6736_v46, %v12934_v59  ;;  %v12233_v27 = vadd.f32 %v6739_v57, %v12937_v42  ;;  %v12236_v13 = vadd.f32 %v6740_v35, %v12938_v23  ;;  %v12939_v15 = vld [vmem:[#allocation29_spill] sm:$0xff]  ;;  %v12940_v41 = vld [vmem:[#allocation30_spill] sm:$0xff]  ;;  %v12941_v46 = vld [vmem:[#allocation31_spill] sm:$0xff]  ;;  %v6811_v35 = vmax.f32 %v11945_v40, 0.0 }
 0x888   :  { %v12239_v1 = vadd.f32 %v6741_v38, %v12939_v15  ;;  %v12242_v51 = vadd.f32 %v6742_v25, %v12940_v41  ;;  %v12245_v59 = vadd.f32 %v6743_v52, %v12941_v46  ;;  %v12942_v12 = vld [vmem:[#allocation32_spill] sm:$0xff]  ;;  %v12943_v8 = vld [vmem:[#allocation33_spill] sm:$0xff]  ;;  %v12944_v57 = vld [vmem:[#allocation34_spill] sm:$0xff]  ;;  %v6812_v38 = vmax.f32 %v11948_v16, 0.0 }
 0x889   :  { %v12248_v36 = vadd.f32 %v6744_v17, %v12942_v12  ;;  %v12251_v61 = vadd.f32 %v6745_v0, %v12943_v8  ;;  %v12254_v42 = vadd.f32 %v6746_v58, %v12944_v57  ;;  %v6813_v23 = vmax.f32 %v11951_v31, 0.0  ;;  %6875 = vst.msk [vmem:[%s12583_s7] sm:$0xff] %vm91_vm0, %v6811_v35  ;;  %v12950_v46 = vld [vmem:[#allocation15_spill] sm:$0xff]  ;;  %v12951_v8 = vld [vmem:[#allocation16_spill] sm:$0xff]  ;;  %v12952_v35 = vld [vmem:[#allocation17_spill] sm:$0xff] }
 0x88a   :  { %v6814_v25 = vmax.f32 %v11954_v34, 0.0  ;;  %v6815_v52 = vmax.f32 %v11969_v6, 0.0  ;;  %v6816_v15 = vmax.f32 %v11972_v48, 0.0  ;;  %v6817_v17 = vmax.f32 %v11975_v43, 0.0  ;;  %6876 = vst.msk [vmem:[%s12583_s7 + $0x8] sm:$0xff] %vm91_vm0, %v6812_v38 }
 0x88b   :  { %v6818_v0 = vmax.f32 %v11978_v4, 0.0  ;;  %v6819_v41 = vmax.f32 %v11993_v28, 0.0  ;;  %v6820_v58 = vmax.f32 %v11996_v10, 0.0  ;;  %v6821_v40 = vmax.f32 %v11999_v62, 0.0  ;;  %6877 = vst.msk [vmem:[%s12583_s7 + $0x10] sm:$0xff] %vm91_vm0, %v6813_v23  ;;  %v12953_v23 = vld [vmem:[#allocation19_spill] sm:$0xff] }
 0x88c   :  { %v6822_v16 = vmax.f32 %v12002_v5, 0.0  ;;  %6878 = vst.msk [vmem:[%s12583_s7 + $0x18] sm:$0xff] %vm91_vm0, %v6814_v25  ;;  %v6823_v34 = vmax.f32 %v12017_v21, 0.0  ;;  %v6824_v31 = vmax.f32 %v12020_v26, 0.0  ;;  %v6825_v6 = vmax.f32 %v12023_v50, 0.0  ;;  %6879 = vst.msk [vmem:[%s12583_s7 + $0x20] sm:$0xff] %vm91_vm0, %v6815_v52 }
 0x88d   :  { %v6826_v48 = vmax.f32 %v12026_v49, 0.0  ;;  %6880 = vst.msk [vmem:[%s12583_s7 + $0x28] sm:$0xff] %vm91_vm0, %v6816_v15  ;;  %6881 = vst.msk [vmem:[%s12583_s7 + $0x30] sm:$0xff] %vm91_vm0, %v6817_v17  ;;  %v6827_v43 = vmax.f32 %v12041_v60, 0.0  ;;  %v6828_v4 = vmax.f32 %v12044_v39, 0.0  ;;  %v6829_v28 = vmax.f32 %v12047_v47, 0.0 }
 0x88e   :  { %6882 = vst.msk [vmem:[%s12583_s7 + $0x38] sm:$0xff] %vm91_vm0, %v6818_v0  ;;  %v6830_v10 = vmax.f32 %v12050_v20, 0.0  ;;  %6883 = vst.msk [vmem:[%s12583_s7 + $0x40] sm:$0xff] %vm91_vm0, %v6819_v41  ;;  %v6831_v62 = vmax.f32 %v12062_v32, 0.0  ;;  %v6832_v5 = vmax.f32 %v12065_v30, 0.0  ;;  %v6833_v21 = vmax.f32 %v12068_v22, 0.0 }
 0x88f   :  { %6884 = vst.msk [vmem:[%s12583_s7 + $0x48] sm:$0xff] %vm91_vm0, %v6820_v58  ;;  %6885 = vst.msk [vmem:[%s12583_s7 + $0x50] sm:$0xff] %vm91_vm0, %v6821_v40  ;;  %v6834_v26 = vmax.f32 %v12071_v44, 0.0  ;;  %v6835_v50 = vmax.f32 %v12083_v63, 0.0  ;;  %v6836_v49 = vmax.f32 %v12086_v18, 0.0  ;;  %v6837_v60 = vmax.f32 %v12089_v3, 0.0 }
 0x890   :  { %6886 = vst.msk [vmem:[%s12583_s7 + $0x58] sm:$0xff] %vm91_vm0, %v6822_v16  ;;  %6887 = vst.msk [vmem:[%s12583_s7 + $0x60] sm:$0xff] %vm91_vm0, %v6823_v34  ;;  %v6838_v39 = vmax.f32 %v12092_v29, 0.0  ;;  %v6839_v47 = vmax.f32 %v12104_v55, 0.0  ;;  %v6840_v20 = vmax.f32 %v12107_v7, 0.0  ;;  %v6841_v32 = vmax.f32 %v12110_v37, 0.0 }
 0x891   :  { %6888 = vst.msk [vmem:[%s12583_s7 + $0x68] sm:$0xff] %vm91_vm0, %v6824_v31  ;;  %6889 = vst.msk [vmem:[%s12583_s7 + $0x70] sm:$0xff] %vm91_vm0, %v6825_v6  ;;  %v6842_v30 = vmax.f32 %v12113_v56, 0.0  ;;  %v6843_v22 = vmax.f32 %v12125_v54, 0.0  ;;  %v6844_v44 = vmax.f32 %v12128_v14, 0.0  ;;  %v12945_v63 = vld [vmem:[#allocation10_spill] sm:$0xff] }
 0x892   :  { %6890 = vst.msk [vmem:[%s12583_s7 + $0x78] sm:$0xff] %vm91_vm0, %v6826_v48  ;;  %6891 = vst.msk [vmem:[%s12583_s7 + $0x80] sm:$0xff] %vm91_vm0, %v6827_v43  ;;  %v6845_v18 = vmax.f32 %v12945_v63, 0.0  ;;  %v12946_v3 = vld [vmem:[#allocation11_spill] sm:$0xff]  ;;  %v12947_v55 = vld [vmem:[#allocation12_spill] sm:$0xff]  ;;  %v6850_v12 = vmax.f32 %v12950_v46, 0.0 }
 0x893   :  { %6892 = vst.msk [vmem:[%s12583_s7 + $0x88] sm:$0xff] %vm91_vm0, %v6828_v4  ;;  %6893 = vst.msk [vmem:[%s12583_s7 + $0x90] sm:$0xff] %vm91_vm0, %v6829_v28  ;;  %v6846_v29 = vmax.f32 %v12946_v3, 0.0  ;;  %v6847_v7 = vmax.f32 %v12947_v55, 0.0  ;;  %v12948_v37 = vld [vmem:[#allocation13_spill] sm:$0xff]  ;;  %v12949_v54 = vld [vmem:[#allocation14_spill] sm:$0xff] }
 0x894   :  { %6894 = vst.msk [vmem:[%s12583_s7 + $0x98] sm:$0xff] %vm91_vm0, %v6830_v10  ;;  %6895 = vst.msk [vmem:[%s12583_s7 + $0xa0] sm:$0xff] %vm91_vm0, %v6831_v62  ;;  %v6848_v56 = vmax.f32 %v12948_v37, 0.0  ;;  %v6849_v14 = vmax.f32 %v12949_v54, 0.0  ;;  %v6851_v57 = vmax.f32 %v12951_v8, 0.0  ;;  %v6852_v38 = vmax.f32 %v12952_v35, 0.0 }
 0x895   :  { %6896 = vst.msk [vmem:[%s12583_s7 + $0xa8] sm:$0xff] %vm91_vm0, %v6832_v5  ;;  %6897 = vst.msk [vmem:[%s12583_s7 + $0xb0] sm:$0xff] %vm91_vm0, %v6833_v21  ;;  %v6853_v25 = vmax.f32 %v12953_v23, 0.0  ;;  %v12954_v52 = vld [vmem:[#allocation20_spill] sm:$0xff]  ;;  %v12955_v17 = vld [vmem:[#allocation21_spill] sm:$0xff]  ;;  %v6859_v6 = vmax.f32 %v12209_v2, 0.0 }
 0x896   :  { %6898 = vst.msk [vmem:[%s12583_s7 + $0xb8] sm:$0xff] %vm91_vm0, %v6834_v26  ;;  %6899 = vst.msk [vmem:[%s12583_s7 + $0xc0] sm:$0xff] %vm91_vm0, %v6835_v50  ;;  %v6854_v15 = vmax.f32 %v12954_v52, 0.0  ;;  %v6855_v0 = vmax.f32 %v12955_v17, 0.0  ;;  %v12956_v41 = vld [vmem:[#allocation22_spill] sm:$0xff]  ;;  %v12957_v40 = vld [vmem:[#allocation23_spill] sm:$0xff] }
 0x897   :  { %6900 = vst.msk [vmem:[%s12583_s7 + $0xc8] sm:$0xff] %vm91_vm0, %v6836_v49  ;;  %6901 = vst.msk [vmem:[%s12583_s7 + $0xd0] sm:$0xff] %vm91_vm0, %v6837_v60  ;;  %v6856_v58 = vmax.f32 %v12956_v41, 0.0  ;;  %v6857_v16 = vmax.f32 %v12957_v40, 0.0  ;;  %v12958_v34 = vld [vmem:[#allocation24_spill] sm:$0xff]  ;;  %v6860_v48 = vmax.f32 %v12212_v53, 0.0 }
 0x898   :  { %6902 = vst.msk [vmem:[%s12583_s7 + $0xd8] sm:$0xff] %vm91_vm0, %v6838_v39  ;;  %6903 = vst.msk [vmem:[%s12583_s7 + $0xe0] sm:$0xff] %vm91_vm0, %v6839_v47  ;;  %v6858_v31 = vmax.f32 %v12958_v34, 0.0  ;;  %v6861_v43 = vmax.f32 %v12215_v45, 0.0  ;;  %v6862_v4 = vmax.f32 %v12218_v33, 0.0  ;;  %v6863_v33 = vmax.f32 %v12221_v9, 0.0 }
 0x899   :  { %6904 = vst.msk [vmem:[%s12583_s7 + $0xe8] sm:$0xff] %vm91_vm0, %v6840_v20  ;;  %6905 = vst.msk [vmem:[%s12583_s7 + $0xf0] sm:$0xff] %vm91_vm0, %v6841_v32  ;;  %v6864_v2 = vmax.f32 %v12224_v19, 0.0  ;;  %v6865_v53 = vmax.f32 %v12227_v24, 0.0  ;;  %v6866_v45 = vmax.f32 %v12230_v11, 0.0  ;;  %v6867_v24 = vmax.f32 %v12233_v27, 0.0 }
 0x89a   :  { %6906 = vst.msk [vmem:[%s12583_s7 + $0xf8] sm:$0xff] %vm91_vm0, %v6842_v30  ;;  %6907 = vst.msk [vmem:[%s12583_s7 + $0x100] sm:$0xff] %vm91_vm0, %v6843_v22  ;;  %v6868_v19 = vmax.f32 %v12236_v13, 0.0  ;;  %v6869_v9 = vmax.f32 %v12239_v1, 0.0  ;;  %v6870_v11 = vmax.f32 %v12242_v51, 0.0  ;;  %v6871_v27 = vmax.f32 %v12245_v59, 0.0 }
 0x89b   :  { %6908 = vst.msk [vmem:[%s12583_s7 + $0x108] sm:$0xff] %vm91_vm0, %v6844_v44  ;;  %6909 = vst.msk [vmem:[%s12583_s7 + $0x110] sm:$0xff] %vm91_vm0, %v6845_v18  ;;  %v6872_v13 = vmax.f32 %v12248_v36, 0.0  ;;  %v6873_v1 = vmax.f32 %v12251_v61, 0.0  ;;  %v6874_v51 = vmax.f32 %v12254_v42, 0.0 }
 0x89c   :  { %6910 = vst.msk [vmem:[%s12583_s7 + $0x118] sm:$0xff] %vm91_vm0, %v6846_v29  ;;  %6911 = vst.msk [vmem:[%s12583_s7 + $0x120] sm:$0xff] %vm91_vm0, %v6847_v7 }
 0x89d   :  { %6912 = vst.msk [vmem:[%s12583_s7 + $0x128] sm:$0xff] %vm91_vm0, %v6848_v56  ;;  %6913 = vst.msk [vmem:[%s12583_s7 + $0x130] sm:$0xff] %vm91_vm0, %v6849_v14 }
 0x89e   :  { %6914 = vst.msk [vmem:[%s12583_s7 + $0x138] sm:$0xff] %vm91_vm0, %v6850_v12  ;;  %6915 = vst.msk [vmem:[%s12583_s7 + $0x140] sm:$0xff] %vm91_vm0, %v6851_v57 }
 0x89f   :  { %6916 = vst.msk [vmem:[%s12583_s7 + $0x148] sm:$0xff] %vm91_vm0, %v6852_v38  ;;  %6917 = vst.msk [vmem:[%s12583_s7 + $0x150] sm:$0xff] %vm91_vm0, %v6853_v25 }
 0x8a0   :  { %6918 = vst.msk [vmem:[%s12583_s7 + $0x158] sm:$0xff] %vm91_vm0, %v6854_v15  ;;  %6919 = vst.msk [vmem:[%s12583_s7 + $0x160] sm:$0xff] %vm91_vm0, %v6855_v0 }
 0x8a1   :  { %6920 = vst.msk [vmem:[%s12583_s7 + $0x168] sm:$0xff] %vm91_vm0, %v6856_v58  ;;  %6921 = vst.msk [vmem:[%s12583_s7 + $0x170] sm:$0xff] %vm91_vm0, %v6857_v16 }
 0x8a2   :  { %6922 = vst.msk [vmem:[%s12583_s7 + $0x178] sm:$0xff] %vm91_vm0, %v6858_v31  ;;  %6923 = vst.msk [vmem:[%s12583_s7 + $0x180] sm:$0xff] %vm91_vm0, %v6859_v6 }
 0x8a3   :  { %6924 = vst.msk [vmem:[%s12583_s7 + $0x188] sm:$0xff] %vm91_vm0, %v6860_v48  ;;  %6925 = vst.msk [vmem:[%s12583_s7 + $0x190] sm:$0xff] %vm91_vm0, %v6861_v43 }
 0x8a4   :  { %6926 = vst.msk [vmem:[%s12583_s7 + $0x198] sm:$0xff] %vm91_vm0, %v6862_v4  ;;  %6927 = vst.msk [vmem:[%s12583_s7 + $0x1a0] sm:$0xff] %vm91_vm0, %v6863_v33 }
 0x8a5   :  { %6928 = vst.msk [vmem:[%s12583_s7 + $0x1a8] sm:$0xff] %vm91_vm0, %v6864_v2  ;;  %6929 = vst.msk [vmem:[%s12583_s7 + $0x1b0] sm:$0xff] %vm91_vm0, %v6865_v53 }
 0x8a6   :  { %6930 = vst.msk [vmem:[%s12583_s7 + $0x1b8] sm:$0xff] %vm91_vm0, %v6866_v45  ;;  %6931 = vst.msk [vmem:[%s12583_s7 + $0x1c0] sm:$0xff] %vm91_vm0, %v6867_v24 }
 0x8a7   :  { %6932 = vst.msk [vmem:[%s12583_s7 + $0x1c8] sm:$0xff] %vm91_vm0, %v6868_v19  ;;  %6933 = vst.msk [vmem:[%s12583_s7 + $0x1d0] sm:$0xff] %vm91_vm0, %v6869_v9 }
 0x8a8   :  { %6934 = vst.msk [vmem:[%s12583_s7 + $0x1d8] sm:$0xff] %vm91_vm0, %v6870_v11  ;;  %6935 = vst.msk [vmem:[%s12583_s7 + $0x1e0] sm:$0xff] %vm91_vm0, %v6871_v27 }
 0x8a9   :  { %6936 = vst.msk [vmem:[%s12583_s7 + $0x1e8] sm:$0xff] %vm91_vm0, %v6872_v13  ;;  %6937 = vst.msk [vmem:[%s12583_s7 + $0x1f0] sm:$0xff] %vm91_vm0, %v6873_v1 }
 0x8aa   :  { %6938 = vst.msk [vmem:[%s12583_s7 + $0x1f8] sm:$0xff] %vm91_vm0, %v6874_v51 }

</bundles_post_ra>
